<compile_context>
chip_gen: v7x
topology: tpu7x:2x2x1
jax: 0.10.0
libtpu: 0.0.40
codegen_flags: <defaults>
</compile_context>

<pallas_src>
import functools

import jax
import jax.numpy as jnp
from jax import lax
from jax.experimental import pallas as pl
from jax.experimental.pallas import tpu as pltpu


def pcmc_kernel(xr_ref, xc_ref, q_ref, out_ref, a_ref, b_ref, *, n, ep):
    # xr_ref : (1, n, Bt)  x per lane, items along sublanes ("row" layout)
    # xc_ref : (n, 1, Bt)  x per lane, items along the leading axis ("column" layout)
    # q_ref  : (n, n, 1)   shared Q parameter (constant index_map -> stays resident)
    # out_ref: (1, n, Bt)  per-lane log-probabilities (lane-dense store)
    # a_ref  : (n, n, Bt)  per-lane working matrices          (VMEM scratch)
    # b_ref  : (1, n, Bt)  per-lane b^T rows -> pi^T rows     (VMEM scratch)
    f32 = jnp.float32
    xr = xr_ref[...]                                   # (1, n, Bt)
    xc = xc_ref[...]                                   # (n, 1, Bt)

    # ---- build the per-lane PCMC rate matrices ------------------------------
    # Q_b[i, j] = max(Qp[i, j] * x_b[i] * x_b[j], ep)
    qb = jnp.maximum(q_ref[...] * xc * xr, ep)         # (n, n, Bt)
    row_sums = jnp.sum(qb, axis=1, keepdims=True)      # (n, 1, Bt)  sum over columns j
    i_idx = lax.broadcasted_iota(jnp.int32, (n, n, 1), 0)
    j_idx = lax.broadcasted_iota(jnp.int32, (n, n, 1), 1)
    # Q[i, i] -= sum_j Q[i, j]  for i < n-1 (row sums taken on the clamped Q).
    qb = jnp.where((i_idx == j_idx) & (i_idx < n - 1), qb - row_sums, qb)
    # Q[:, n-1] = x
    qb = jnp.where(j_idx == n - 1, xc, qb)
    a_ref[...] = qb

    # b^T = [ep, ..., ep, 1] per lane (batch-mode b of the reference).
    j_row = lax.broadcasted_iota(jnp.int32, (1, n, 1), 1)
    b_ref[...] = jnp.broadcast_to(
        jnp.where(j_row == n - 1, f32(1.0), f32(ep)), b_ref.shape)

    # ---- solve Q^T pi = b  <=>  pi^T = b^T Q^{-1} ---------------------------
    # Gauss-Jordan COLUMN elimination reduces Q to I; dragging b^T through the
    # same column ops leaves pi^T in b_ref.  All Bt lanes solve in lockstep.
    # TODO(synk): unpivoted elimination; relies on the PCMC Q structure (all
    # off-diagonals clamped >= ep > 0).  A sign-preserving pivot floor guards
    # against near-zero fill-in pivots (e.g. when the last alternative is
    # absent from the choice set).
    def gj_step(k, carry):
        ek = (j_row == k).astype(f32)                          # (1, n, 1) one-hot
        colk = a_ref[:, pl.ds(k, 1), :]                        # (n, 1, Bt) = A[:, k]
        rowk = a_ref[pl.ds(k, 1), :, :]                        # (1, n, Bt) = A[k, :]
        brow = b_ref[...]                                      # (1, n, Bt)
        pivot = jnp.sum(rowk * ek, axis=1, keepdims=True)      # (1, 1, Bt) = A[k, k]
        bk = jnp.sum(brow * ek, axis=1, keepdims=True)         # (1, 1, Bt) = b[k]
        tiny = f32(1e-12)
        pivot = jnp.where(jnp.abs(pivot) < tiny,
                          jnp.where(pivot < 0, -tiny, tiny), pivot)
        inv_p = f32(1.0) / pivot                               # (1, 1, Bt)
        adj = rowk - ek                                        # col j!=k: A[k,j]; col k: p-1
        # col_j -= (A[k,j]/p) * col_k   (for all j),  col_k /= p  (folded via adj)
        a_ref[...] = a_ref[...] - (colk * inv_p) * adj
        b_ref[...] = brow - (bk * inv_p) * adj
        return carry

    lax.fori_loop(0, n, gj_step, 0, unroll=True if n <= 32 else 8)

    # ---- epilogue: pi = x * pi^T + 1e-16 ; out = log(pi / sum(pi)) ----------
    pi = xr_ref[...] * b_ref[...] + f32(1e-16)                 # (1, n, Bt)
    s = jnp.sum(pi, axis=1, keepdims=True)                     # (1, 1, Bt)
    out_ref[...] = jnp.log(pi / s)                             # lane-dense store


def pcmc_forward(x, q_param, *, ep=1e-3, bt=128):
    """x: (B, n) or (n,) choice-set indicators; q_param: (n, n). Returns (B, n) log-probs."""
    x = jnp.asarray(x, jnp.float32)
    if x.ndim == 1:
        x = x[None, :]
    bsz, n = x.shape
    b_pad = ((bsz + bt - 1) // bt) * bt
    # Pad the batch with all-ones choice sets (valid & non-singular); padded
    # lanes are solved in lockstep and sliced off afterwards (layout plumbing).
    xt = jnp.pad(x.T, ((0, 0), (0, b_pad - bsz)), constant_values=1.0)  # (n, B_pad)
    xr = xt.reshape(1, n, b_pad)
    xc = xt.reshape(n, 1, b_pad)
    q3 = jnp.asarray(q_param, jnp.float32).reshape(n, n, 1)

    kernel = functools.partial(pcmc_kernel, n=n, ep=float(ep))
    # TODO(synk): for large n, budget the n*n*4*bt scratch against VMEM
    # (halve bt or raise vmem_limit_bytes on v7x's 64 MiB).
    out = pl.pallas_call(
        kernel,
        grid=(b_pad // bt,),
        in_specs=[
            pl.BlockSpec((1, n, bt), lambda i: (0, 0, i)),   # x, row layout
            pl.BlockSpec((n, 1, bt), lambda i: (0, 0, i)),   # x, column layout
            pl.BlockSpec((n, n, 1), lambda i: (0, 0, 0)),    # shared Q parameter
        ],
        out_specs=pl.BlockSpec((1, n, bt), lambda i: (0, 0, i)),
        out_shape=jax.ShapeDtypeStruct((1, n, b_pad), jnp.float32),
        scratch_shapes=[
            pltpu.VMEM((n, n, bt), jnp.float32),   # per-lane working matrices
            pltpu.VMEM((1, n, bt), jnp.float32),   # per-lane b^T / pi^T rows
        ],
        compiler_params=pltpu.CompilerParams(dimension_semantics=("parallel",)),
    )(xr, xc, q3)
    return out.reshape(n, b_pad).T[:bsz]


def pcmc_reference(x, q_param, *, ep=1e-3):
    """Pure-JAX mirror of the PyTorch forward (per-row), for validation."""
    x = jnp.asarray(x, jnp.float32)
    if x.ndim == 1:
        x = x[None, :]
    n = q_param.shape[0]
    outs = []
    for i in range(x.shape[0]):
        s = x[i]
        q = jnp.maximum(q_param * jnp.outer(s, s), ep)
        rs = jnp.sum(q, axis=1)
        d = jnp.diagonal(q)
        new_d = jnp.where(jnp.arange(n) < n - 1, d - rs, d)
        q = q + jnp.diag(new_d - d)
        q = q.at[:, n - 1].set(s)
        b = jnp.full((n,), ep, jnp.float32).at[n - 1].set(1.0)
        pi = jnp.linalg.solve(q.T, b)
        pi = s * pi + 1e-16
        outs.append(jnp.log(pi / jnp.sum(pi)))
    return jnp.stack(outs, axis=0)


if __name__ == "__main__":
    n, batch = 16, 2
    ep = 1e-3

    key = jax.random.PRNGKey(0)
    kq, kx = jax.random.split(key)
    # torch.nn.init.uniform(Tensor(n, n), 0.4, 0.6)
    q_param = jax.random.uniform(kq, (n, n), jnp.float32, 0.4, 0.6)
    # "size(S)-hot" choice-set indicators; keep each set non-empty and cover
    # both the last-alternative-present and -absent (pivot fill-in) paths.
    x = jax.random.bernoulli(kx, 0.5, (batch, n)).astype(jnp.float32)
    x = x.at[:, 0].set(1.0)
    x = x.at[0, n - 1].set(0.0).at[1, n - 1].set(1.0)

    out = jax.block_until_ready(pcmc_forward(x, q_param, ep=ep))
    ref = pcmc_reference(x, q_param, ep=ep)

    assert out.shape == (batch, n), out.shape
    assert bool(jnp.all(jnp.isfinite(out))), out
    assert jnp.allclose(out, ref, atol=1e-3, rtol=1e-3), (out, ref)
    print("KERNEL_OK")
</pallas_src>

<mosaic_0001>
module attributes {stable_mosaic.version = 11 : i64} {
  func.func @pcmc_kernel(%arg0: i32, %arg1: memref<1x16x128xf32, #tpu.memory_space<vmem>>, %arg2: memref<16x1x128xf32, #tpu.memory_space<vmem>>, %arg3: memref<16x16x1xf32, #tpu.memory_space<vmem>>, %arg4: memref<1x16x128xf32, #tpu.memory_space<vmem>>, %arg5: memref<16x16x128xf32, #tpu.memory_space<vmem>>, %arg6: memref<1x16x128xf32, #tpu.memory_space<vmem>>) attributes {dimension_semantics = [#tpu.dimension_semantics<parallel>], iteration_bounds = array<i64: 1>, scalar_prefetch = 0 : i64, scratch_operands = 2 : i64, tpu.core_type = #tpu.core_type<tc>, window_params = [{transform_indices = @transform_0, window_bounds = array<i64: 1, 16, 128>}, {transform_indices = @transform_1, window_bounds = array<i64: 16, 1, 128>}, {pipeline_mode = #tpu.pipeline_mode<synchronous>, transform_indices = @transform_2, window_bounds = array<i64: 16, 16, 1>}, {transform_indices = @transform_3, window_bounds = array<i64: 1, 16, 128>}]} {
    %c0 = arith.constant 0 : index
    %c0_0 = arith.constant 0 : index
    %c0_1 = arith.constant 0 : index
    %0 = vector.load %arg1[%c0, %c0_0, %c0_1] : memref<1x16x128xf32, #tpu.memory_space<vmem>>, vector<1x16x128xf32>
    %c0_2 = arith.constant 0 : index
    %c0_3 = arith.constant 0 : index
    %c0_4 = arith.constant 0 : index
    %1 = vector.load %arg2[%c0_2, %c0_3, %c0_4] : memref<16x1x128xf32, #tpu.memory_space<vmem>>, vector<16x1x128xf32>
    %c0_5 = arith.constant 0 : index
    %c0_6 = arith.constant 0 : index
    %c0_7 = arith.constant 0 : index
    %2 = vector.load %arg3[%c0_5, %c0_6, %c0_7] : memref<16x16x1xf32, #tpu.memory_space<vmem>>, vector<16x16x1xf32>
    %3 = vector.broadcast %2 : vector<16x16x1xf32> to vector<16x16x128xf32>
    %4 = vector.broadcast %1 : vector<16x1x128xf32> to vector<16x16x128xf32>
    %5 = arith.mulf %3, %4 : vector<16x16x128xf32>
    %6 = vector.broadcast %0 : vector<1x16x128xf32> to vector<16x16x128xf32>
    %7 = arith.mulf %5, %6 : vector<16x16x128xf32>
    %cst = arith.constant 1.000000e-03 : f32
    %8 = vector.broadcast %cst : f32 to vector<16x16x128xf32>
    %9 = arith.maximumf %7, %8 : vector<16x16x128xf32>
    %cst_8 = arith.constant dense<0.000000e+00> : vector<16x128xf32>
    %10 = vector.multi_reduction <add>, %9, %cst_8 [1] : vector<16x16x128xf32> to vector<16x128xf32>
    %11 = vector.shape_cast %10 : vector<16x128xf32> to vector<16x1x128xf32>
    %12 = tpu.iota {dimensions = array<i32: 0>} : vector<16x16x1xi32>
    %13 = tpu.iota {dimensions = array<i32: 1>} : vector<16x16x1xi32>
    %14 = arith.cmpi eq, %12, %13 : vector<16x16x1xi32>
    %c15_i32 = arith.constant 15 : i32
    %15 = vector.broadcast %c15_i32 : i32 to vector<16x16x1xi32>
    %16 = arith.cmpi slt, %12, %15 : vector<16x16x1xi32>
    %17 = arith.andi %14, %16 : vector<16x16x1xi1>
    %18 = vector.broadcast %11 : vector<16x1x128xf32> to vector<16x16x128xf32>
    %19 = arith.subf %9, %18 : vector<16x16x128xf32>
    %20 = vector.shape_cast %17 : vector<16x16x1xi1> to vector<16x16x1xi1>
    %21 = vector.broadcast %20 : vector<16x16x1xi1> to vector<16x16x128xi1>
    %22 = arith.select %21, %19, %9 : vector<16x16x128xi1>, vector<16x16x128xf32>
    %c15_i32_9 = arith.constant 15 : i32
    %23 = vector.broadcast %c15_i32_9 : i32 to vector<16x16x1xi32>
    %24 = arith.cmpi eq, %13, %23 : vector<16x16x1xi32>
    %25 = vector.shape_cast %24 : vector<16x16x1xi1> to vector<16x16x1xi1>
    %26 = vector.broadcast %25 : vector<16x16x1xi1> to vector<16x16x128xi1>
    %27 = vector.shape_cast %1 : vector<16x1x128xf32> to vector<16x1x128xf32>
    %28 = vector.broadcast %27 : vector<16x1x128xf32> to vector<16x16x128xf32>
    %29 = arith.select %26, %28, %22 : vector<16x16x128xi1>, vector<16x16x128xf32>
    %c0_10 = arith.constant 0 : index
    %c0_11 = arith.constant 0 : index
    %c0_12 = arith.constant 0 : index
    %30 = vector.load %arg5[%c0_10, %c0_11, %c0_12] : memref<16x16x128xf32, #tpu.memory_space<vmem>>, vector<16x16x128xf32>
    tpu.vector_store %arg5[%c0_10, %c0_11, %c0_12], %29 {strides = array<i32>} : memref<16x16x128xf32, #tpu.memory_space<vmem>>, vector<16x16x128xf32>,
    %31 = tpu.iota {dimensions = array<i32: 1>} : vector<1x16x1xi32>
    %c15_i32_13 = arith.constant 15 : i32
    %32 = vector.broadcast %c15_i32_13 : i32 to vector<1x16x1xi32>
    %33 = arith.cmpi eq, %31, %32 : vector<1x16x1xi32>
    %cst_14 = arith.constant 1.000000e+00 : f32
    %cst_15 = arith.constant 1.000000e-03 : f32
    %34 = vector.broadcast %cst_14 : f32 to vector<1x16x1xf32>
    %35 = vector.broadcast %cst_15 : f32 to vector<1x16x1xf32>
    %36 = arith.select %33, %34, %35 : vector<1x16x1xi1>, vector<1x16x1xf32>
    %37 = vector.shape_cast %36 : vector<1x16x1xf32> to vector<1x16x1xf32>
    %38 = vector.broadcast %37 : vector<1x16x1xf32> to vector<1x16x128xf32>
    %c0_16 = arith.constant 0 : index
    %c0_17 = arith.constant 0 : index
    %c0_18 = arith.constant 0 : index
    %39 = vector.load %arg6[%c0_16, %c0_17, %c0_18] : memref<1x16x128xf32, #tpu.memory_space<vmem>>, vector<1x16x128xf32>
    tpu.vector_store %arg6[%c0_16, %c0_17, %c0_18], %38 {strides = array<i32>} : memref<1x16x128xf32, #tpu.memory_space<vmem>>, vector<1x16x128xf32>,
    %c0_i32 = arith.constant 0 : i32
    %40 = vector.broadcast %c0_i32 : i32 to vector<1x16x1xi32>
    %41 = arith.cmpi eq, %31, %40 : vector<1x16x1xi32>
    %42 = arith.extui %41 : vector<1x16x1xi1> to vector<1x16x1xi32>
    %43 = arith.sitofp %42 : vector<1x16x1xi32> to vector<1x16x1xf32>
    %c0_19 = arith.constant 0 : index
    %44 = arith.index_cast %c0_i32 : i32 to index
    %c0_20 = arith.constant 0 : index
    %45 = vector.load %arg5[%c0_19, %44, %c0_20] : memref<16x16x128xf32, #tpu.memory_space<vmem>>, vector<16x1x128xf32>
    %46 = arith.index_cast %c0_i32 : i32 to index
    %c0_21 = arith.constant 0 : index
    %c0_22 = arith.constant 0 : index
    %47 = vector.load %arg5[%46, %c0_21, %c0_22] : memref<16x16x128xf32, #tpu.memory_space<vmem>>, vector<1x16x128xf32>
    %c0_23 = arith.constant 0 : index
    %c0_24 = arith.constant 0 : index
    %c0_25 = arith.constant 0 : index
    %48 = vector.load %arg6[%c0_23, %c0_24, %c0_25] : memref<1x16x128xf32, #tpu.memory_space<vmem>>, vector<1x16x128xf32>
    %49 = vector.broadcast %43 : vector<1x16x1xf32> to vector<1x16x128xf32>
    %50 = arith.mulf %47, %49 : vector<1x16x128xf32>
    %cst_26 = arith.constant dense<0.000000e+00> : vector<1x128xf32>
    %51 = vector.multi_reduction <add>, %50, %cst_26 [1] : vector<1x16x128xf32> to vector<1x128xf32>
    %52 = vector.shape_cast %51 : vector<1x128xf32> to vector<1x1x128xf32>
    %53 = vector.broadcast %43 : vector<1x16x1xf32> to vector<1x16x128xf32>
    %54 = arith.mulf %48, %53 : vector<1x16x128xf32>
    %cst_27 = arith.constant dense<0.000000e+00> : vector<1x128xf32>
    %55 = vector.multi_reduction <add>, %54, %cst_27 [1] : vector<1x16x128xf32> to vector<1x128xf32>
    %56 = vector.shape_cast %55 : vector<1x128xf32> to vector<1x1x128xf32>
    %57 = math.absf %52 : vector<1x1x128xf32>
    %cst_28 = arith.constant 9.99999996E-13 : f32
    %58 = vector.broadcast %cst_28 : f32 to vector<1x1x128xf32>
    %59 = arith.cmpf olt, %57, %58 : vector<1x1x128xf32>
    %cst_29 = arith.constant 0.000000e+00 : f32
    %60 = vector.broadcast %cst_29 : f32 to vector<1x1x128xf32>
    %61 = arith.cmpf olt, %52, %60 : vector<1x1x128xf32>
    %cst_30 = arith.constant 0.000000e+00 : f32
    %cst_31 = arith.constant 9.99999996E-13 : f32
    %62 = arith.subf %cst_30, %cst_31 : f32
    %cst_32 = arith.constant 9.99999996E-13 : f32
    %63 = vector.broadcast %62 : f32 to vector<1x1x128xf32>
    %64 = vector.broadcast %cst_32 : f32 to vector<1x1x128xf32>
    %65 = arith.select %61, %63, %64 : vector<1x1x128xi1>, vector<1x1x128xf32>
    %66 = arith.select %59, %65, %52 : vector<1x1x128xi1>, vector<1x1x128xf32>
    %cst_33 = arith.constant 1.000000e+00 : f32
    %67 = vector.broadcast %cst_33 : f32 to vector<1x1x128xf32>
    %68 = arith.divf %67, %66 : vector<1x1x128xf32>
    %69 = vector.broadcast %43 : vector<1x16x1xf32> to vector<1x16x128xf32>
    %70 = arith.subf %47, %69 : vector<1x16x128xf32>
    %c0_34 = arith.constant 0 : index
    %c0_35 = arith.constant 0 : index
    %c0_36 = arith.constant 0 : index
    %71 = vector.load %arg5[%c0_34, %c0_35, %c0_36] : memref<16x16x128xf32, #tpu.memory_space<vmem>>, vector<16x16x128xf32>
    %72 = vector.broadcast %68 : vector<1x1x128xf32> to vector<16x1x128xf32>
    %73 = arith.mulf %45, %72 : vector<16x1x128xf32>
    %74 = vector.broadcast %73 : vector<16x1x128xf32> to vector<16x16x128xf32>
    %75 = vector.broadcast %70 : vector<1x16x128xf32> to vector<16x16x128xf32>
    %76 = arith.mulf %74, %75 : vector<16x16x128xf32>
    %77 = arith.subf %71, %76 : vector<16x16x128xf32>
    %c0_37 = arith.constant 0 : index
    %c0_38 = arith.constant 0 : index
    %c0_39 = arith.constant 0 : index
    %78 = vector.load %arg5[%c0_37, %c0_38, %c0_39] : memref<16x16x128xf32, #tpu.memory_space<vmem>>, vector<16x16x128xf32>
    tpu.vector_store %arg5[%c0_37, %c0_38, %c0_39], %77 {strides = array<i32>} : memref<16x16x128xf32, #tpu.memory_space<vmem>>, vector<16x16x128xf32>,
    %79 = arith.mulf %56, %68 : vector<1x1x128xf32>
    %80 = vector.broadcast %79 : vector<1x1x128xf32> to vector<1x16x128xf32>
    %81 = arith.mulf %80, %70 : vector<1x16x128xf32>
    %82 = arith.subf %48, %81 : vector<1x16x128xf32>
    %c0_40 = arith.constant 0 : index
    %c0_41 = arith.constant 0 : index
    %c0_42 = arith.constant 0 : index
    %83 = vector.load %arg6[%c0_40, %c0_41, %c0_42] : memref<1x16x128xf32, #tpu.memory_space<vmem>>, vector<1x16x128xf32>
    tpu.vector_store %arg6[%c0_40, %c0_41, %c0_42], %82 {strides = array<i32>} : memref<1x16x128xf32, #tpu.memory_space<vmem>>, vector<1x16x128xf32>,
    %c1_i32 = arith.constant 1 : i32
    %84 = vector.broadcast %c1_i32 : i32 to vector<1x16x1xi32>
    %85 = arith.cmpi eq, %31, %84 : vector<1x16x1xi32>
    %86 = arith.extui %85 : vector<1x16x1xi1> to vector<1x16x1xi32>
    %87 = arith.sitofp %86 : vector<1x16x1xi32> to vector<1x16x1xf32>
    %c0_43 = arith.constant 0 : index
    %88 = arith.index_cast %c1_i32 : i32 to index
    %c0_44 = arith.constant 0 : index
    %89 = vector.load %arg5[%c0_43, %88, %c0_44] : memref<16x16x128xf32, #tpu.memory_space<vmem>>, vector<16x1x128xf32>
    %90 = arith.index_cast %c1_i32 : i32 to index
    %c0_45 = arith.constant 0 : index
    %c0_46 = arith.constant 0 : index
    %91 = vector.load %arg5[%90, %c0_45, %c0_46] : memref<16x16x128xf32, #tpu.memory_space<vmem>>, vector<1x16x128xf32>
    %c0_47 = arith.constant 0 : index
    %c0_48 = arith.constant 0 : index
    %c0_49 = arith.constant 0 : index
    %92 = vector.load %arg6[%c0_47, %c0_48, %c0_49] : memref<1x16x128xf32, #tpu.memory_space<vmem>>, vector<1x16x128xf32>
    %93 = vector.broadcast %87 : vector<1x16x1xf32> to vector<1x16x128xf32>
    %94 = arith.mulf %91, %93 : vector<1x16x128xf32>
    %cst_50 = arith.constant dense<0.000000e+00> : vector<1x128xf32>
    %95 = vector.multi_reduction <add>, %94, %cst_50 [1] : vector<1x16x128xf32> to vector<1x128xf32>
    %96 = vector.shape_cast %95 : vector<1x128xf32> to vector<1x1x128xf32>
    %97 = vector.broadcast %87 : vector<1x16x1xf32> to vector<1x16x128xf32>
    %98 = arith.mulf %92, %97 : vector<1x16x128xf32>
    %cst_51 = arith.constant dense<0.000000e+00> : vector<1x128xf32>
    %99 = vector.multi_reduction <add>, %98, %cst_51 [1] : vector<1x16x128xf32> to vector<1x128xf32>
    %100 = vector.shape_cast %99 : vector<1x128xf32> to vector<1x1x128xf32>
    %101 = math.absf %96 : vector<1x1x128xf32>
    %cst_52 = arith.constant 9.99999996E-13 : f32
    %102 = vector.broadcast %cst_52 : f32 to vector<1x1x128xf32>
    %103 = arith.cmpf olt, %101, %102 : vector<1x1x128xf32>
    %cst_53 = arith.constant 0.000000e+00 : f32
    %104 = vector.broadcast %cst_53 : f32 to vector<1x1x128xf32>
    %105 = arith.cmpf olt, %96, %104 : vector<1x1x128xf32>
    %cst_54 = arith.constant 0.000000e+00 : f32
    %cst_55 = arith.constant 9.99999996E-13 : f32
    %106 = arith.subf %cst_54, %cst_55 : f32
    %cst_56 = arith.constant 9.99999996E-13 : f32
    %107 = vector.broadcast %106 : f32 to vector<1x1x128xf32>
    %108 = vector.broadcast %cst_56 : f32 to vector<1x1x128xf32>
    %109 = arith.select %105, %107, %108 : vector<1x1x128xi1>, vector<1x1x128xf32>
    %110 = arith.select %103, %109, %96 : vector<1x1x128xi1>, vector<1x1x128xf32>
    %cst_57 = arith.constant 1.000000e+00 : f32
    %111 = vector.broadcast %cst_57 : f32 to vector<1x1x128xf32>
    %112 = arith.divf %111, %110 : vector<1x1x128xf32>
    %113 = vector.broadcast %87 : vector<1x16x1xf32> to vector<1x16x128xf32>
    %114 = arith.subf %91, %113 : vector<1x16x128xf32>
    %c0_58 = arith.constant 0 : index
    %c0_59 = arith.constant 0 : index
    %c0_60 = arith.constant 0 : index
    %115 = vector.load %arg5[%c0_58, %c0_59, %c0_60] : memref<16x16x128xf32, #tpu.memory_space<vmem>>, vector<16x16x128xf32>
    %116 = vector.broadcast %112 : vector<1x1x128xf32> to vector<16x1x128xf32>
    %117 = arith.mulf %89, %116 : vector<16x1x128xf32>
    %118 = vector.broadcast %117 : vector<16x1x128xf32> to vector<16x16x128xf32>
    %119 = vector.broadcast %114 : vector<1x16x128xf32> to vector<16x16x128xf32>
    %120 = arith.mulf %118, %119 : vector<16x16x128xf32>
    %121 = arith.subf %115, %120 : vector<16x16x128xf32>
    %c0_61 = arith.constant 0 : index
    %c0_62 = arith.constant 0 : index
    %c0_63 = arith.constant 0 : index
    %122 = vector.load %arg5[%c0_61, %c0_62, %c0_63] : memref<16x16x128xf32, #tpu.memory_space<vmem>>, vector<16x16x128xf32>
    tpu.vector_store %arg5[%c0_61, %c0_62, %c0_63], %121 {strides = array<i32>} : memref<16x16x128xf32, #tpu.memory_space<vmem>>, vector<16x16x128xf32>,
    %123 = arith.mulf %100, %112 : vector<1x1x128xf32>
    %124 = vector.broadcast %123 : vector<1x1x128xf32> to vector<1x16x128xf32>
    %125 = arith.mulf %124, %114 : vector<1x16x128xf32>
    %126 = arith.subf %92, %125 : vector<1x16x128xf32>
    %c0_64 = arith.constant 0 : index
    %c0_65 = arith.constant 0 : index
    %c0_66 = arith.constant 0 : index
    %127 = vector.load %arg6[%c0_64, %c0_65, %c0_66] : memref<1x16x128xf32, #tpu.memory_space<vmem>>, vector<1x16x128xf32>
    tpu.vector_store %arg6[%c0_64, %c0_65, %c0_66], %126 {strides = array<i32>} : memref<1x16x128xf32, #tpu.memory_space<vmem>>, vector<1x16x128xf32>,
    %c2_i32 = arith.constant 2 : i32
    %128 = vector.broadcast %c2_i32 : i32 to vector<1x16x1xi32>
    %129 = arith.cmpi eq, %31, %128 : vector<1x16x1xi32>
    %130 = arith.extui %129 : vector<1x16x1xi1> to vector<1x16x1xi32>
    %131 = arith.sitofp %130 : vector<1x16x1xi32> to vector<1x16x1xf32>
    %c0_67 = arith.constant 0 : index
    %132 = arith.index_cast %c2_i32 : i32 to index
    %c0_68 = arith.constant 0 : index
    %133 = vector.load %arg5[%c0_67, %132, %c0_68] : memref<16x16x128xf32, #tpu.memory_space<vmem>>, vector<16x1x128xf32>
    %134 = arith.index_cast %c2_i32 : i32 to index
    %c0_69 = arith.constant 0 : index
    %c0_70 = arith.constant 0 : index
    %135 = vector.load %arg5[%134, %c0_69, %c0_70] : memref<16x16x128xf32, #tpu.memory_space<vmem>>, vector<1x16x128xf32>
    %c0_71 = arith.constant 0 : index
    %c0_72 = arith.constant 0 : index
    %c0_73 = arith.constant 0 : index
    %136 = vector.load %arg6[%c0_71, %c0_72, %c0_73] : memref<1x16x128xf32, #tpu.memory_space<vmem>>, vector<1x16x128xf32>
    %137 = vector.broadcast %131 : vector<1x16x1xf32> to vector<1x16x128xf32>
    %138 = arith.mulf %135, %137 : vector<1x16x128xf32>
    %cst_74 = arith.constant dense<0.000000e+00> : vector<1x128xf32>
    %139 = vector.multi_reduction <add>, %138, %cst_74 [1] : vector<1x16x128xf32> to vector<1x128xf32>
    %140 = vector.shape_cast %139 : vector<1x128xf32> to vector<1x1x128xf32>
    %141 = vector.broadcast %131 : vector<1x16x1xf32> to vector<1x16x128xf32>
    %142 = arith.mulf %136, %141 : vector<1x16x128xf32>
    %cst_75 = arith.constant dense<0.000000e+00> : vector<1x128xf32>
    %143 = vector.multi_reduction <add>, %142, %cst_75 [1] : vector<1x16x128xf32> to vector<1x128xf32>
    %144 = vector.shape_cast %143 : vector<1x128xf32> to vector<1x1x128xf32>
    %145 = math.absf %140 : vector<1x1x128xf32>
    %cst_76 = arith.constant 9.99999996E-13 : f32
    %146 = vector.broadcast %cst_76 : f32 to vector<1x1x128xf32>
    %147 = arith.cmpf olt, %145, %146 : vector<1x1x128xf32>
    %cst_77 = arith.constant 0.000000e+00 : f32
    %148 = vector.broadcast %cst_77 : f32 to vector<1x1x128xf32>
    %149 = arith.cmpf olt, %140, %148 : vector<1x1x128xf32>
    %cst_78 = arith.constant 0.000000e+00 : f32
    %cst_79 = arith.constant 9.99999996E-13 : f32
    %150 = arith.subf %cst_78, %cst_79 : f32
    %cst_80 = arith.constant 9.99999996E-13 : f32
    %151 = vector.broadcast %150 : f32 to vector<1x1x128xf32>
    %152 = vector.broadcast %cst_80 : f32 to vector<1x1x128xf32>
    %153 = arith.select %149, %151, %152 : vector<1x1x128xi1>, vector<1x1x128xf32>
    %154 = arith.select %147, %153, %140 : vector<1x1x128xi1>, vector<1x1x128xf32>
    %cst_81 = arith.constant 1.000000e+00 : f32
    %155 = vector.broadcast %cst_81 : f32 to vector<1x1x128xf32>
    %156 = arith.divf %155, %154 : vector<1x1x128xf32>
    %157 = vector.broadcast %131 : vector<1x16x1xf32> to vector<1x16x128xf32>
    %158 = arith.subf %135, %157 : vector<1x16x128xf32>
    %c0_82 = arith.constant 0 : index
    %c0_83 = arith.constant 0 : index
    %c0_84 = arith.constant 0 : index
    %159 = vector.load %arg5[%c0_82, %c0_83, %c0_84] : memref<16x16x128xf32, #tpu.memory_space<vmem>>, vector<16x16x128xf32>
    %160 = vector.broadcast %156 : vector<1x1x128xf32> to vector<16x1x128xf32>
    %161 = arith.mulf %133, %160 : vector<16x1x128xf32>
    %162 = vector.broadcast %161 : vector<16x1x128xf32> to vector<16x16x128xf32>
    %163 = vector.broadcast %158 : vector<1x16x128xf32> to vector<16x16x128xf32>
    %164 = arith.mulf %162, %163 : vector<16x16x128xf32>
    %165 = arith.subf %159, %164 : vector<16x16x128xf32>
    %c0_85 = arith.constant 0 : index
    %c0_86 = arith.constant 0 : index
    %c0_87 = arith.constant 0 : index
    %166 = vector.load %arg5[%c0_85, %c0_86, %c0_87] : memref<16x16x128xf32, #tpu.memory_space<vmem>>, vector<16x16x128xf32>
    tpu.vector_store %arg5[%c0_85, %c0_86, %c0_87], %165 {strides = array<i32>} : memref<16x16x128xf32, #tpu.memory_space<vmem>>, vector<16x16x128xf32>,
    %167 = arith.mulf %144, %156 : vector<1x1x128xf32>
    %168 = vector.broadcast %167 : vector<1x1x128xf32> to vector<1x16x128xf32>
    %169 = arith.mulf %168, %158 : vector<1x16x128xf32>
    %170 = arith.subf %136, %169 : vector<1x16x128xf32>
    %c0_88 = arith.constant 0 : index
    %c0_89 = arith.constant 0 : index
    %c0_90 = arith.constant 0 : index
    %171 = vector.load %arg6[%c0_88, %c0_89, %c0_90] : memref<1x16x128xf32, #tpu.memory_space<vmem>>, vector<1x16x128xf32>
    tpu.vector_store %arg6[%c0_88, %c0_89, %c0_90], %170 {strides = array<i32>} : memref<1x16x128xf32, #tpu.memory_space<vmem>>, vector<1x16x128xf32>,
    %c3_i32 = arith.constant 3 : i32
    %172 = vector.broadcast %c3_i32 : i32 to vector<1x16x1xi32>
    %173 = arith.cmpi eq, %31, %172 : vector<1x16x1xi32>
    %174 = arith.extui %173 : vector<1x16x1xi1> to vector<1x16x1xi32>
    %175 = arith.sitofp %174 : vector<1x16x1xi32> to vector<1x16x1xf32>
    %c0_91 = arith.constant 0 : index
    %176 = arith.index_cast %c3_i32 : i32 to index
    %c0_92 = arith.constant 0 : index
    %177 = vector.load %arg5[%c0_91, %176, %c0_92] : memref<16x16x128xf32, #tpu.memory_space<vmem>>, vector<16x1x128xf32>
    %178 = arith.index_cast %c3_i32 : i32 to index
    %c0_93 = arith.constant 0 : index
    %c0_94 = arith.constant 0 : index
    %179 = vector.load %arg5[%178, %c0_93, %c0_94] : memref<16x16x128xf32, #tpu.memory_space<vmem>>, vector<1x16x128xf32>
    %c0_95 = arith.constant 0 : index
    %c0_96 = arith.constant 0 : index
    %c0_97 = arith.constant 0 : index
    %180 = vector.load %arg6[%c0_95, %c0_96, %c0_97] : memref<1x16x128xf32, #tpu.memory_space<vmem>>, vector<1x16x128xf32>
    %181 = vector.broadcast %175 : vector<1x16x1xf32> to vector<1x16x128xf32>
    %182 = arith.mulf %179, %181 : vector<1x16x128xf32>
    %cst_98 = arith.constant dense<0.000000e+00> : vector<1x128xf32>
    %183 = vector.multi_reduction <add>, %182, %cst_98 [1] : vector<1x16x128xf32> to vector<1x128xf32>
    %184 = vector.shape_cast %183 : vector<1x128xf32> to vector<1x1x128xf32>
    %185 = vector.broadcast %175 : vector<1x16x1xf32> to vector<1x16x128xf32>
    %186 = arith.mulf %180, %185 : vector<1x16x128xf32>
    %cst_99 = arith.constant dense<0.000000e+00> : vector<1x128xf32>
    %187 = vector.multi_reduction <add>, %186, %cst_99 [1] : vector<1x16x128xf32> to vector<1x128xf32>
    %188 = vector.shape_cast %187 : vector<1x128xf32> to vector<1x1x128xf32>
    %189 = math.absf %184 : vector<1x1x128xf32>
    %cst_100 = arith.constant 9.99999996E-13 : f32
    %190 = vector.broadcast %cst_100 : f32 to vector<1x1x128xf32>
    %191 = arith.cmpf olt, %189, %190 : vector<1x1x128xf32>
    %cst_101 = arith.constant 0.000000e+00 : f32
    %192 = vector.broadcast %cst_101 : f32 to vector<1x1x128xf32>
    %193 = arith.cmpf olt, %184, %192 : vector<1x1x128xf32>
    %cst_102 = arith.constant 0.000000e+00 : f32
    %cst_103 = arith.constant 9.99999996E-13 : f32
    %194 = arith.subf %cst_102, %cst_103 : f32
    %cst_104 = arith.constant 9.99999996E-13 : f32
    %195 = vector.broadcast %194 : f32 to vector<1x1x128xf32>
    %196 = vector.broadcast %cst_104 : f32 to vector<1x1x128xf32>
    %197 = arith.select %193, %195, %196 : vector<1x1x128xi1>, vector<1x1x128xf32>
    %198 = arith.select %191, %197, %184 : vector<1x1x128xi1>, vector<1x1x128xf32>
    %cst_105 = arith.constant 1.000000e+00 : f32
    %199 = vector.broadcast %cst_105 : f32 to vector<1x1x128xf32>
    %200 = arith.divf %199, %198 : vector<1x1x128xf32>
    %201 = vector.broadcast %175 : vector<1x16x1xf32> to vector<1x16x128xf32>
    %202 = arith.subf %179, %201 : vector<1x16x128xf32>
    %c0_106 = arith.constant 0 : index
    %c0_107 = arith.constant 0 : index
    %c0_108 = arith.constant 0 : index
    %203 = vector.load %arg5[%c0_106, %c0_107, %c0_108] : memref<16x16x128xf32, #tpu.memory_space<vmem>>, vector<16x16x128xf32>
    %204 = vector.broadcast %200 : vector<1x1x128xf32> to vector<16x1x128xf32>
    %205 = arith.mulf %177, %204 : vector<16x1x128xf32>
    %206 = vector.broadcast %205 : vector<16x1x128xf32> to vector<16x16x128xf32>
    %207 = vector.broadcast %202 : vector<1x16x128xf32> to vector<16x16x128xf32>
    %208 = arith.mulf %206, %207 : vector<16x16x128xf32>
    %209 = arith.subf %203, %208 : vector<16x16x128xf32>
    %c0_109 = arith.constant 0 : index
    %c0_110 = arith.constant 0 : index
    %c0_111 = arith.constant 0 : index
    %210 = vector.load %arg5[%c0_109, %c0_110, %c0_111] : memref<16x16x128xf32, #tpu.memory_space<vmem>>, vector<16x16x128xf32>
    tpu.vector_store %arg5[%c0_109, %c0_110, %c0_111], %209 {strides = array<i32>} : memref<16x16x128xf32, #tpu.memory_space<vmem>>, vector<16x16x128xf32>,
    %211 = arith.mulf %188, %200 : vector<1x1x128xf32>
    %212 = vector.broadcast %211 : vector<1x1x128xf32> to vector<1x16x128xf32>
    %213 = arith.mulf %212, %202 : vector<1x16x128xf32>
    %214 = arith.subf %180, %213 : vector<1x16x128xf32>
    %c0_112 = arith.constant 0 : index
    %c0_113 = arith.constant 0 : index
    %c0_114 = arith.constant 0 : index
    %215 = vector.load %arg6[%c0_112, %c0_113, %c0_114] : memref<1x16x128xf32, #tpu.memory_space<vmem>>, vector<1x16x128xf32>
    tpu.vector_store %arg6[%c0_112, %c0_113, %c0_114], %214 {strides = array<i32>} : memref<1x16x128xf32, #tpu.memory_space<vmem>>, vector<1x16x128xf32>,
    %c4_i32 = arith.constant 4 : i32
    %216 = vector.broadcast %c4_i32 : i32 to vector<1x16x1xi32>
    %217 = arith.cmpi eq, %31, %216 : vector<1x16x1xi32>
    %218 = arith.extui %217 : vector<1x16x1xi1> to vector<1x16x1xi32>
    %219 = arith.sitofp %218 : vector<1x16x1xi32> to vector<1x16x1xf32>
    %c0_115 = arith.constant 0 : index
    %220 = arith.index_cast %c4_i32 : i32 to index
    %c0_116 = arith.constant 0 : index
    %221 = vector.load %arg5[%c0_115, %220, %c0_116] : memref<16x16x128xf32, #tpu.memory_space<vmem>>, vector<16x1x128xf32>
    %222 = arith.index_cast %c4_i32 : i32 to index
    %c0_117 = arith.constant 0 : index
    %c0_118 = arith.constant 0 : index
    %223 = vector.load %arg5[%222, %c0_117, %c0_118] : memref<16x16x128xf32, #tpu.memory_space<vmem>>, vector<1x16x128xf32>
    %c0_119 = arith.constant 0 : index
    %c0_120 = arith.constant 0 : index
    %c0_121 = arith.constant 0 : index
    %224 = vector.load %arg6[%c0_119, %c0_120, %c0_121] : memref<1x16x128xf32, #tpu.memory_space<vmem>>, vector<1x16x128xf32>
    %225 = vector.broadcast %219 : vector<1x16x1xf32> to vector<1x16x128xf32>
    %226 = arith.mulf %223, %225 : vector<1x16x128xf32>
    %cst_122 = arith.constant dense<0.000000e+00> : vector<1x128xf32>
    %227 = vector.multi_reduction <add>, %226, %cst_122 [1] : vector<1x16x128xf32> to vector<1x128xf32>
    %228 = vector.shape_cast %227 : vector<1x128xf32> to vector<1x1x128xf32>
    %229 = vector.broadcast %219 : vector<1x16x1xf32> to vector<1x16x128xf32>
    %230 = arith.mulf %224, %229 : vector<1x16x128xf32>
    %cst_123 = arith.constant dense<0.000000e+00> : vector<1x128xf32>
    %231 = vector.multi_reduction <add>, %230, %cst_123 [1] : vector<1x16x128xf32> to vector<1x128xf32>
    %232 = vector.shape_cast %231 : vector<1x128xf32> to vector<1x1x128xf32>
    %233 = math.absf %228 : vector<1x1x128xf32>
    %cst_124 = arith.constant 9.99999996E-13 : f32
    %234 = vector.broadcast %cst_124 : f32 to vector<1x1x128xf32>
    %235 = arith.cmpf olt, %233, %234 : vector<1x1x128xf32>
    %cst_125 = arith.constant 0.000000e+00 : f32
    %236 = vector.broadcast %cst_125 : f32 to vector<1x1x128xf32>
    %237 = arith.cmpf olt, %228, %236 : vector<1x1x128xf32>
    %cst_126 = arith.constant 0.000000e+00 : f32
    %cst_127 = arith.constant 9.99999996E-13 : f32
    %238 = arith.subf %cst_126, %cst_127 : f32
    %cst_128 = arith.constant 9.99999996E-13 : f32
    %239 = vector.broadcast %238 : f32 to vector<1x1x128xf32>
    %240 = vector.broadcast %cst_128 : f32 to vector<1x1x128xf32>
    %241 = arith.select %237, %239, %240 : vector<1x1x128xi1>, vector<1x1x128xf32>
    %242 = arith.select %235, %241, %228 : vector<1x1x128xi1>, vector<1x1x128xf32>
    %cst_129 = arith.constant 1.000000e+00 : f32
    %243 = vector.broadcast %cst_129 : f32 to vector<1x1x128xf32>
    %244 = arith.divf %243, %242 : vector<1x1x128xf32>
    %245 = vector.broadcast %219 : vector<1x16x1xf32> to vector<1x16x128xf32>
    %246 = arith.subf %223, %245 : vector<1x16x128xf32>
    %c0_130 = arith.constant 0 : index
    %c0_131 = arith.constant 0 : index
    %c0_132 = arith.constant 0 : index
    %247 = vector.load %arg5[%c0_130, %c0_131, %c0_132] : memref<16x16x128xf32, #tpu.memory_space<vmem>>, vector<16x16x128xf32>
    %248 = vector.broadcast %244 : vector<1x1x128xf32> to vector<16x1x128xf32>
    %249 = arith.mulf %221, %248 : vector<16x1x128xf32>
    %250 = vector.broadcast %249 : vector<16x1x128xf32> to vector<16x16x128xf32>
    %251 = vector.broadcast %246 : vector<1x16x128xf32> to vector<16x16x128xf32>
    %252 = arith.mulf %250, %251 : vector<16x16x128xf32>
    %253 = arith.subf %247, %252 : vector<16x16x128xf32>
    %c0_133 = arith.constant 0 : index
    %c0_134 = arith.constant 0 : index
    %c0_135 = arith.constant 0 : index
    %254 = vector.load %arg5[%c0_133, %c0_134, %c0_135] : memref<16x16x128xf32, #tpu.memory_space<vmem>>, vector<16x16x128xf32>
    tpu.vector_store %arg5[%c0_133, %c0_134, %c0_135], %253 {strides = array<i32>} : memref<16x16x128xf32, #tpu.memory_space<vmem>>, vector<16x16x128xf32>,
    %255 = arith.mulf %232, %244 : vector<1x1x128xf32>
    %256 = vector.broadcast %255 : vector<1x1x128xf32> to vector<1x16x128xf32>
    %257 = arith.mulf %256, %246 : vector<1x16x128xf32>
    %258 = arith.subf %224, %257 : vector<1x16x128xf32>
    %c0_136 = arith.constant 0 : index
    %c0_137 = arith.constant 0 : index
    %c0_138 = arith.constant 0 : index
    %259 = vector.load %arg6[%c0_136, %c0_137, %c0_138] : memref<1x16x128xf32, #tpu.memory_space<vmem>>, vector<1x16x128xf32>
    tpu.vector_store %arg6[%c0_136, %c0_137, %c0_138], %258 {strides = array<i32>} : memref<1x16x128xf32, #tpu.memory_space<vmem>>, vector<1x16x128xf32>,
    %c5_i32 = arith.constant 5 : i32
    %260 = vector.broadcast %c5_i32 : i32 to vector<1x16x1xi32>
    %261 = arith.cmpi eq, %31, %260 : vector<1x16x1xi32>
    %262 = arith.extui %261 : vector<1x16x1xi1> to vector<1x16x1xi32>
    %263 = arith.sitofp %262 : vector<1x16x1xi32> to vector<1x16x1xf32>
    %c0_139 = arith.constant 0 : index
    %264 = arith.index_cast %c5_i32 : i32 to index
    %c0_140 = arith.constant 0 : index
    %265 = vector.load %arg5[%c0_139, %264, %c0_140] : memref<16x16x128xf32, #tpu.memory_space<vmem>>, vector<16x1x128xf32>
    %266 = arith.index_cast %c5_i32 : i32 to index
    %c0_141 = arith.constant 0 : index
    %c0_142 = arith.constant 0 : index
    %267 = vector.load %arg5[%266, %c0_141, %c0_142] : memref<16x16x128xf32, #tpu.memory_space<vmem>>, vector<1x16x128xf32>
    %c0_143 = arith.constant 0 : index
    %c0_144 = arith.constant 0 : index
    %c0_145 = arith.constant 0 : index
    %268 = vector.load %arg6[%c0_143, %c0_144, %c0_145] : memref<1x16x128xf32, #tpu.memory_space<vmem>>, vector<1x16x128xf32>
    %269 = vector.broadcast %263 : vector<1x16x1xf32> to vector<1x16x128xf32>
    %270 = arith.mulf %267, %269 : vector<1x16x128xf32>
    %cst_146 = arith.constant dense<0.000000e+00> : vector<1x128xf32>
    %271 = vector.multi_reduction <add>, %270, %cst_146 [1] : vector<1x16x128xf32> to vector<1x128xf32>
    %272 = vector.shape_cast %271 : vector<1x128xf32> to vector<1x1x128xf32>
    %273 = vector.broadcast %263 : vector<1x16x1xf32> to vector<1x16x128xf32>
    %274 = arith.mulf %268, %273 : vector<1x16x128xf32>
    %cst_147 = arith.constant dense<0.000000e+00> : vector<1x128xf32>
    %275 = vector.multi_reduction <add>, %274, %cst_147 [1] : vector<1x16x128xf32> to vector<1x128xf32>
    %276 = vector.shape_cast %275 : vector<1x128xf32> to vector<1x1x128xf32>
    %277 = math.absf %272 : vector<1x1x128xf32>
    %cst_148 = arith.constant 9.99999996E-13 : f32
    %278 = vector.broadcast %cst_148 : f32 to vector<1x1x128xf32>
    %279 = arith.cmpf olt, %277, %278 : vector<1x1x128xf32>
    %cst_149 = arith.constant 0.000000e+00 : f32
    %280 = vector.broadcast %cst_149 : f32 to vector<1x1x128xf32>
    %281 = arith.cmpf olt, %272, %280 : vector<1x1x128xf32>
    %cst_150 = arith.constant 0.000000e+00 : f32
    %cst_151 = arith.constant 9.99999996E-13 : f32
    %282 = arith.subf %cst_150, %cst_151 : f32
    %cst_152 = arith.constant 9.99999996E-13 : f32
    %283 = vector.broadcast %282 : f32 to vector<1x1x128xf32>
    %284 = vector.broadcast %cst_152 : f32 to vector<1x1x128xf32>
    %285 = arith.select %281, %283, %284 : vector<1x1x128xi1>, vector<1x1x128xf32>
    %286 = arith.select %279, %285, %272 : vector<1x1x128xi1>, vector<1x1x128xf32>
    %cst_153 = arith.constant 1.000000e+00 : f32
    %287 = vector.broadcast %cst_153 : f32 to vector<1x1x128xf32>
    %288 = arith.divf %287, %286 : vector<1x1x128xf32>
    %289 = vector.broadcast %263 : vector<1x16x1xf32> to vector<1x16x128xf32>
    %290 = arith.subf %267, %289 : vector<1x16x128xf32>
    %c0_154 = arith.constant 0 : index
    %c0_155 = arith.constant 0 : index
    %c0_156 = arith.constant 0 : index
    %291 = vector.load %arg5[%c0_154, %c0_155, %c0_156] : memref<16x16x128xf32, #tpu.memory_space<vmem>>, vector<16x16x128xf32>
    %292 = vector.broadcast %288 : vector<1x1x128xf32> to vector<16x1x128xf32>
    %293 = arith.mulf %265, %292 : vector<16x1x128xf32>
    %294 = vector.broadcast %293 : vector<16x1x128xf32> to vector<16x16x128xf32>
    %295 = vector.broadcast %290 : vector<1x16x128xf32> to vector<16x16x128xf32>
    %296 = arith.mulf %294, %295 : vector<16x16x128xf32>
    %297 = arith.subf %291, %296 : vector<16x16x128xf32>
    %c0_157 = arith.constant 0 : index
    %c0_158 = arith.constant 0 : index
    %c0_159 = arith.constant 0 : index
    %298 = vector.load %arg5[%c0_157, %c0_158, %c0_159] : memref<16x16x128xf32, #tpu.memory_space<vmem>>, vector<16x16x128xf32>
    tpu.vector_store %arg5[%c0_157, %c0_158, %c0_159], %297 {strides = array<i32>} : memref<16x16x128xf32, #tpu.memory_space<vmem>>, vector<16x16x128xf32>,
    %299 = arith.mulf %276, %288 : vector<1x1x128xf32>
    %300 = vector.broadcast %299 : vector<1x1x128xf32> to vector<1x16x128xf32>
    %301 = arith.mulf %300, %290 : vector<1x16x128xf32>
    %302 = arith.subf %268, %301 : vector<1x16x128xf32>
    %c0_160 = arith.constant 0 : index
    %c0_161 = arith.constant 0 : index
    %c0_162 = arith.constant 0 : index
    %303 = vector.load %arg6[%c0_160, %c0_161, %c0_162] : memref<1x16x128xf32, #tpu.memory_space<vmem>>, vector<1x16x128xf32>
    tpu.vector_store %arg6[%c0_160, %c0_161, %c0_162], %302 {strides = array<i32>} : memref<1x16x128xf32, #tpu.memory_space<vmem>>, vector<1x16x128xf32>,
    %c6_i32 = arith.constant 6 : i32
    %304 = vector.broadcast %c6_i32 : i32 to vector<1x16x1xi32>
    %305 = arith.cmpi eq, %31, %304 : vector<1x16x1xi32>
    %306 = arith.extui %305 : vector<1x16x1xi1> to vector<1x16x1xi32>
    %307 = arith.sitofp %306 : vector<1x16x1xi32> to vector<1x16x1xf32>
    %c0_163 = arith.constant 0 : index
    %308 = arith.index_cast %c6_i32 : i32 to index
    %c0_164 = arith.constant 0 : index
    %309 = vector.load %arg5[%c0_163, %308, %c0_164] : memref<16x16x128xf32, #tpu.memory_space<vmem>>, vector<16x1x128xf32>
    %310 = arith.index_cast %c6_i32 : i32 to index
    %c0_165 = arith.constant 0 : index
    %c0_166 = arith.constant 0 : index
    %311 = vector.load %arg5[%310, %c0_165, %c0_166] : memref<16x16x128xf32, #tpu.memory_space<vmem>>, vector<1x16x128xf32>
    %c0_167 = arith.constant 0 : index
    %c0_168 = arith.constant 0 : index
    %c0_169 = arith.constant 0 : index
    %312 = vector.load %arg6[%c0_167, %c0_168, %c0_169] : memref<1x16x128xf32, #tpu.memory_space<vmem>>, vector<1x16x128xf32>
    %313 = vector.broadcast %307 : vector<1x16x1xf32> to vector<1x16x128xf32>
    %314 = arith.mulf %311, %313 : vector<1x16x128xf32>
    %cst_170 = arith.constant dense<0.000000e+00> : vector<1x128xf32>
    %315 = vector.multi_reduction <add>, %314, %cst_170 [1] : vector<1x16x128xf32> to vector<1x128xf32>
    %316 = vector.shape_cast %315 : vector<1x128xf32> to vector<1x1x128xf32>
    %317 = vector.broadcast %307 : vector<1x16x1xf32> to vector<1x16x128xf32>
    %318 = arith.mulf %312, %317 : vector<1x16x128xf32>
    %cst_171 = arith.constant dense<0.000000e+00> : vector<1x128xf32>
    %319 = vector.multi_reduction <add>, %318, %cst_171 [1] : vector<1x16x128xf32> to vector<1x128xf32>
    %320 = vector.shape_cast %319 : vector<1x128xf32> to vector<1x1x128xf32>
    %321 = math.absf %316 : vector<1x1x128xf32>
    %cst_172 = arith.constant 9.99999996E-13 : f32
    %322 = vector.broadcast %cst_172 : f32 to vector<1x1x128xf32>
    %323 = arith.cmpf olt, %321, %322 : vector<1x1x128xf32>
    %cst_173 = arith.constant 0.000000e+00 : f32
    %324 = vector.broadcast %cst_173 : f32 to vector<1x1x128xf32>
    %325 = arith.cmpf olt, %316, %324 : vector<1x1x128xf32>
    %cst_174 = arith.constant 0.000000e+00 : f32
    %cst_175 = arith.constant 9.99999996E-13 : f32
    %326 = arith.subf %cst_174, %cst_175 : f32
    %cst_176 = arith.constant 9.99999996E-13 : f32
    %327 = vector.broadcast %326 : f32 to vector<1x1x128xf32>
    %328 = vector.broadcast %cst_176 : f32 to vector<1x1x128xf32>
    %329 = arith.select %325, %327, %328 : vector<1x1x128xi1>, vector<1x1x128xf32>
    %330 = arith.select %323, %329, %316 : vector<1x1x128xi1>, vector<1x1x128xf32>
    %cst_177 = arith.constant 1.000000e+00 : f32
    %331 = vector.broadcast %cst_177 : f32 to vector<1x1x128xf32>
    %332 = arith.divf %331, %330 : vector<1x1x128xf32>
    %333 = vector.broadcast %307 : vector<1x16x1xf32> to vector<1x16x128xf32>
    %334 = arith.subf %311, %333 : vector<1x16x128xf32>
    %c0_178 = arith.constant 0 : index
    %c0_179 = arith.constant 0 : index
    %c0_180 = arith.constant 0 : index
    %335 = vector.load %arg5[%c0_178, %c0_179, %c0_180] : memref<16x16x128xf32, #tpu.memory_space<vmem>>, vector<16x16x128xf32>
    %336 = vector.broadcast %332 : vector<1x1x128xf32> to vector<16x1x128xf32>
    %337 = arith.mulf %309, %336 : vector<16x1x128xf32>
    %338 = vector.broadcast %337 : vector<16x1x128xf32> to vector<16x16x128xf32>
    %339 = vector.broadcast %334 : vector<1x16x128xf32> to vector<16x16x128xf32>
    %340 = arith.mulf %338, %339 : vector<16x16x128xf32>
    %341 = arith.subf %335, %340 : vector<16x16x128xf32>
    %c0_181 = arith.constant 0 : index
    %c0_182 = arith.constant 0 : index
    %c0_183 = arith.constant 0 : index
    %342 = vector.load %arg5[%c0_181, %c0_182, %c0_183] : memref<16x16x128xf32, #tpu.memory_space<vmem>>, vector<16x16x128xf32>
    tpu.vector_store %arg5[%c0_181, %c0_182, %c0_183], %341 {strides = array<i32>} : memref<16x16x128xf32, #tpu.memory_space<vmem>>, vector<16x16x128xf32>,
    %343 = arith.mulf %320, %332 : vector<1x1x128xf32>
    %344 = vector.broadcast %343 : vector<1x1x128xf32> to vector<1x16x128xf32>
    %345 = arith.mulf %344, %334 : vector<1x16x128xf32>
    %346 = arith.subf %312, %345 : vector<1x16x128xf32>
    %c0_184 = arith.constant 0 : index
    %c0_185 = arith.constant 0 : index
    %c0_186 = arith.constant 0 : index
    %347 = vector.load %arg6[%c0_184, %c0_185, %c0_186] : memref<1x16x128xf32, #tpu.memory_space<vmem>>, vector<1x16x128xf32>
    tpu.vector_store %arg6[%c0_184, %c0_185, %c0_186], %346 {strides = array<i32>} : memref<1x16x128xf32, #tpu.memory_space<vmem>>, vector<1x16x128xf32>,
    %c7_i32 = arith.constant 7 : i32
    %348 = vector.broadcast %c7_i32 : i32 to vector<1x16x1xi32>
    %349 = arith.cmpi eq, %31, %348 : vector<1x16x1xi32>
    %350 = arith.extui %349 : vector<1x16x1xi1> to vector<1x16x1xi32>
    %351 = arith.sitofp %350 : vector<1x16x1xi32> to vector<1x16x1xf32>
    %c0_187 = arith.constant 0 : index
    %352 = arith.index_cast %c7_i32 : i32 to index
    %c0_188 = arith.constant 0 : index
    %353 = vector.load %arg5[%c0_187, %352, %c0_188] : memref<16x16x128xf32, #tpu.memory_space<vmem>>, vector<16x1x128xf32>
    %354 = arith.index_cast %c7_i32 : i32 to index
    %c0_189 = arith.constant 0 : index
    %c0_190 = arith.constant 0 : index
    %355 = vector.load %arg5[%354, %c0_189, %c0_190] : memref<16x16x128xf32, #tpu.memory_space<vmem>>, vector<1x16x128xf32>
    %c0_191 = arith.constant 0 : index
    %c0_192 = arith.constant 0 : index
    %c0_193 = arith.constant 0 : index
    %356 = vector.load %arg6[%c0_191, %c0_192, %c0_193] : memref<1x16x128xf32, #tpu.memory_space<vmem>>, vector<1x16x128xf32>
    %357 = vector.broadcast %351 : vector<1x16x1xf32> to vector<1x16x128xf32>
    %358 = arith.mulf %355, %357 : vector<1x16x128xf32>
    %cst_194 = arith.constant dense<0.000000e+00> : vector<1x128xf32>
    %359 = vector.multi_reduction <add>, %358, %cst_194 [1] : vector<1x16x128xf32> to vector<1x128xf32>
    %360 = vector.shape_cast %359 : vector<1x128xf32> to vector<1x1x128xf32>
    %361 = vector.broadcast %351 : vector<1x16x1xf32> to vector<1x16x128xf32>
    %362 = arith.mulf %356, %361 : vector<1x16x128xf32>
    %cst_195 = arith.constant dense<0.000000e+00> : vector<1x128xf32>
    %363 = vector.multi_reduction <add>, %362, %cst_195 [1] : vector<1x16x128xf32> to vector<1x128xf32>
    %364 = vector.shape_cast %363 : vector<1x128xf32> to vector<1x1x128xf32>
    %365 = math.absf %360 : vector<1x1x128xf32>
    %cst_196 = arith.constant 9.99999996E-13 : f32
    %366 = vector.broadcast %cst_196 : f32 to vector<1x1x128xf32>
    %367 = arith.cmpf olt, %365, %366 : vector<1x1x128xf32>
    %cst_197 = arith.constant 0.000000e+00 : f32
    %368 = vector.broadcast %cst_197 : f32 to vector<1x1x128xf32>
    %369 = arith.cmpf olt, %360, %368 : vector<1x1x128xf32>
    %cst_198 = arith.constant 0.000000e+00 : f32
    %cst_199 = arith.constant 9.99999996E-13 : f32
    %370 = arith.subf %cst_198, %cst_199 : f32
    %cst_200 = arith.constant 9.99999996E-13 : f32
    %371 = vector.broadcast %370 : f32 to vector<1x1x128xf32>
    %372 = vector.broadcast %cst_200 : f32 to vector<1x1x128xf32>
    %373 = arith.select %369, %371, %372 : vector<1x1x128xi1>, vector<1x1x128xf32>
    %374 = arith.select %367, %373, %360 : vector<1x1x128xi1>, vector<1x1x128xf32>
    %cst_201 = arith.constant 1.000000e+00 : f32
    %375 = vector.broadcast %cst_201 : f32 to vector<1x1x128xf32>
    %376 = arith.divf %375, %374 : vector<1x1x128xf32>
    %377 = vector.broadcast %351 : vector<1x16x1xf32> to vector<1x16x128xf32>
    %378 = arith.subf %355, %377 : vector<1x16x128xf32>
    %c0_202 = arith.constant 0 : index
    %c0_203 = arith.constant 0 : index
    %c0_204 = arith.constant 0 : index
    %379 = vector.load %arg5[%c0_202, %c0_203, %c0_204] : memref<16x16x128xf32, #tpu.memory_space<vmem>>, vector<16x16x128xf32>
    %380 = vector.broadcast %376 : vector<1x1x128xf32> to vector<16x1x128xf32>
    %381 = arith.mulf %353, %380 : vector<16x1x128xf32>
    %382 = vector.broadcast %381 : vector<16x1x128xf32> to vector<16x16x128xf32>
    %383 = vector.broadcast %378 : vector<1x16x128xf32> to vector<16x16x128xf32>
    %384 = arith.mulf %382, %383 : vector<16x16x128xf32>
    %385 = arith.subf %379, %384 : vector<16x16x128xf32>
    %c0_205 = arith.constant 0 : index
    %c0_206 = arith.constant 0 : index
    %c0_207 = arith.constant 0 : index
    %386 = vector.load %arg5[%c0_205, %c0_206, %c0_207] : memref<16x16x128xf32, #tpu.memory_space<vmem>>, vector<16x16x128xf32>
    tpu.vector_store %arg5[%c0_205, %c0_206, %c0_207], %385 {strides = array<i32>} : memref<16x16x128xf32, #tpu.memory_space<vmem>>, vector<16x16x128xf32>,
    %387 = arith.mulf %364, %376 : vector<1x1x128xf32>
    %388 = vector.broadcast %387 : vector<1x1x128xf32> to vector<1x16x128xf32>
    %389 = arith.mulf %388, %378 : vector<1x16x128xf32>
    %390 = arith.subf %356, %389 : vector<1x16x128xf32>
    %c0_208 = arith.constant 0 : index
    %c0_209 = arith.constant 0 : index
    %c0_210 = arith.constant 0 : index
    %391 = vector.load %arg6[%c0_208, %c0_209, %c0_210] : memref<1x16x128xf32, #tpu.memory_space<vmem>>, vector<1x16x128xf32>
    tpu.vector_store %arg6[%c0_208, %c0_209, %c0_210], %390 {strides = array<i32>} : memref<1x16x128xf32, #tpu.memory_space<vmem>>, vector<1x16x128xf32>,
    %c8_i32 = arith.constant 8 : i32
    %392 = vector.broadcast %c8_i32 : i32 to vector<1x16x1xi32>
    %393 = arith.cmpi eq, %31, %392 : vector<1x16x1xi32>
    %394 = arith.extui %393 : vector<1x16x1xi1> to vector<1x16x1xi32>
    %395 = arith.sitofp %394 : vector<1x16x1xi32> to vector<1x16x1xf32>
    %c0_211 = arith.constant 0 : index
    %396 = arith.index_cast %c8_i32 : i32 to index
    %c0_212 = arith.constant 0 : index
    %397 = vector.load %arg5[%c0_211, %396, %c0_212] : memref<16x16x128xf32, #tpu.memory_space<vmem>>, vector<16x1x128xf32>
    %398 = arith.index_cast %c8_i32 : i32 to index
    %c0_213 = arith.constant 0 : index
    %c0_214 = arith.constant 0 : index
    %399 = vector.load %arg5[%398, %c0_213, %c0_214] : memref<16x16x128xf32, #tpu.memory_space<vmem>>, vector<1x16x128xf32>
    %c0_215 = arith.constant 0 : index
    %c0_216 = arith.constant 0 : index
    %c0_217 = arith.constant 0 : index
    %400 = vector.load %arg6[%c0_215, %c0_216, %c0_217] : memref<1x16x128xf32, #tpu.memory_space<vmem>>, vector<1x16x128xf32>
    %401 = vector.broadcast %395 : vector<1x16x1xf32> to vector<1x16x128xf32>
    %402 = arith.mulf %399, %401 : vector<1x16x128xf32>
    %cst_218 = arith.constant dense<0.000000e+00> : vector<1x128xf32>
    %403 = vector.multi_reduction <add>, %402, %cst_218 [1] : vector<1x16x128xf32> to vector<1x128xf32>
    %404 = vector.shape_cast %403 : vector<1x128xf32> to vector<1x1x128xf32>
    %405 = vector.broadcast %395 : vector<1x16x1xf32> to vector<1x16x128xf32>
    %406 = arith.mulf %400, %405 : vector<1x16x128xf32>
    %cst_219 = arith.constant dense<0.000000e+00> : vector<1x128xf32>
    %407 = vector.multi_reduction <add>, %406, %cst_219 [1] : vector<1x16x128xf32> to vector<1x128xf32>
    %408 = vector.shape_cast %407 : vector<1x128xf32> to vector<1x1x128xf32>
    %409 = math.absf %404 : vector<1x1x128xf32>
    %cst_220 = arith.constant 9.99999996E-13 : f32
    %410 = vector.broadcast %cst_220 : f32 to vector<1x1x128xf32>
    %411 = arith.cmpf olt, %409, %410 : vector<1x1x128xf32>
    %cst_221 = arith.constant 0.000000e+00 : f32
    %412 = vector.broadcast %cst_221 : f32 to vector<1x1x128xf32>
    %413 = arith.cmpf olt, %404, %412 : vector<1x1x128xf32>
    %cst_222 = arith.constant 0.000000e+00 : f32
    %cst_223 = arith.constant 9.99999996E-13 : f32
    %414 = arith.subf %cst_222, %cst_223 : f32
    %cst_224 = arith.constant 9.99999996E-13 : f32
    %415 = vector.broadcast %414 : f32 to vector<1x1x128xf32>
    %416 = vector.broadcast %cst_224 : f32 to vector<1x1x128xf32>
    %417 = arith.select %413, %415, %416 : vector<1x1x128xi1>, vector<1x1x128xf32>
    %418 = arith.select %411, %417, %404 : vector<1x1x128xi1>, vector<1x1x128xf32>
    %cst_225 = arith.constant 1.000000e+00 : f32
    %419 = vector.broadcast %cst_225 : f32 to vector<1x1x128xf32>
    %420 = arith.divf %419, %418 : vector<1x1x128xf32>
    %421 = vector.broadcast %395 : vector<1x16x1xf32> to vector<1x16x128xf32>
    %422 = arith.subf %399, %421 : vector<1x16x128xf32>
    %c0_226 = arith.constant 0 : index
    %c0_227 = arith.constant 0 : index
    %c0_228 = arith.constant 0 : index
    %423 = vector.load %arg5[%c0_226, %c0_227, %c0_228] : memref<16x16x128xf32, #tpu.memory_space<vmem>>, vector<16x16x128xf32>
    %424 = vector.broadcast %420 : vector<1x1x128xf32> to vector<16x1x128xf32>
    %425 = arith.mulf %397, %424 : vector<16x1x128xf32>
    %426 = vector.broadcast %425 : vector<16x1x128xf32> to vector<16x16x128xf32>
    %427 = vector.broadcast %422 : vector<1x16x128xf32> to vector<16x16x128xf32>
    %428 = arith.mulf %426, %427 : vector<16x16x128xf32>
    %429 = arith.subf %423, %428 : vector<16x16x128xf32>
    %c0_229 = arith.constant 0 : index
    %c0_230 = arith.constant 0 : index
    %c0_231 = arith.constant 0 : index
    %430 = vector.load %arg5[%c0_229, %c0_230, %c0_231] : memref<16x16x128xf32, #tpu.memory_space<vmem>>, vector<16x16x128xf32>
    tpu.vector_store %arg5[%c0_229, %c0_230, %c0_231], %429 {strides = array<i32>} : memref<16x16x128xf32, #tpu.memory_space<vmem>>, vector<16x16x128xf32>,
    %431 = arith.mulf %408, %420 : vector<1x1x128xf32>
    %432 = vector.broadcast %431 : vector<1x1x128xf32> to vector<1x16x128xf32>
    %433 = arith.mulf %432, %422 : vector<1x16x128xf32>
    %434 = arith.subf %400, %433 : vector<1x16x128xf32>
    %c0_232 = arith.constant 0 : index
    %c0_233 = arith.constant 0 : index
    %c0_234 = arith.constant 0 : index
    %435 = vector.load %arg6[%c0_232, %c0_233, %c0_234] : memref<1x16x128xf32, #tpu.memory_space<vmem>>, vector<1x16x128xf32>
    tpu.vector_store %arg6[%c0_232, %c0_233, %c0_234], %434 {strides = array<i32>} : memref<1x16x128xf32, #tpu.memory_space<vmem>>, vector<1x16x128xf32>,
    %c9_i32 = arith.constant 9 : i32
    %436 = vector.broadcast %c9_i32 : i32 to vector<1x16x1xi32>
    %437 = arith.cmpi eq, %31, %436 : vector<1x16x1xi32>
    %438 = arith.extui %437 : vector<1x16x1xi1> to vector<1x16x1xi32>
    %439 = arith.sitofp %438 : vector<1x16x1xi32> to vector<1x16x1xf32>
    %c0_235 = arith.constant 0 : index
    %440 = arith.index_cast %c9_i32 : i32 to index
    %c0_236 = arith.constant 0 : index
    %441 = vector.load %arg5[%c0_235, %440, %c0_236] : memref<16x16x128xf32, #tpu.memory_space<vmem>>, vector<16x1x128xf32>
    %442 = arith.index_cast %c9_i32 : i32 to index
    %c0_237 = arith.constant 0 : index
    %c0_238 = arith.constant 0 : index
    %443 = vector.load %arg5[%442, %c0_237, %c0_238] : memref<16x16x128xf32, #tpu.memory_space<vmem>>, vector<1x16x128xf32>
    %c0_239 = arith.constant 0 : index
    %c0_240 = arith.constant 0 : index
    %c0_241 = arith.constant 0 : index
    %444 = vector.load %arg6[%c0_239, %c0_240, %c0_241] : memref<1x16x128xf32, #tpu.memory_space<vmem>>, vector<1x16x128xf32>
    %445 = vector.broadcast %439 : vector<1x16x1xf32> to vector<1x16x128xf32>
    %446 = arith.mulf %443, %445 : vector<1x16x128xf32>
    %cst_242 = arith.constant dense<0.000000e+00> : vector<1x128xf32>
    %447 = vector.multi_reduction <add>, %446, %cst_242 [1] : vector<1x16x128xf32> to vector<1x128xf32>
    %448 = vector.shape_cast %447 : vector<1x128xf32> to vector<1x1x128xf32>
    %449 = vector.broadcast %439 : vector<1x16x1xf32> to vector<1x16x128xf32>
    %450 = arith.mulf %444, %449 : vector<1x16x128xf32>
    %cst_243 = arith.constant dense<0.000000e+00> : vector<1x128xf32>
    %451 = vector.multi_reduction <add>, %450, %cst_243 [1] : vector<1x16x128xf32> to vector<1x128xf32>
    %452 = vector.shape_cast %451 : vector<1x128xf32> to vector<1x1x128xf32>
    %453 = math.absf %448 : vector<1x1x128xf32>
    %cst_244 = arith.constant 9.99999996E-13 : f32
    %454 = vector.broadcast %cst_244 : f32 to vector<1x1x128xf32>
    %455 = arith.cmpf olt, %453, %454 : vector<1x1x128xf32>
    %cst_245 = arith.constant 0.000000e+00 : f32
    %456 = vector.broadcast %cst_245 : f32 to vector<1x1x128xf32>
    %457 = arith.cmpf olt, %448, %456 : vector<1x1x128xf32>
    %cst_246 = arith.constant 0.000000e+00 : f32
    %cst_247 = arith.constant 9.99999996E-13 : f32
    %458 = arith.subf %cst_246, %cst_247 : f32
    %cst_248 = arith.constant 9.99999996E-13 : f32
    %459 = vector.broadcast %458 : f32 to vector<1x1x128xf32>
    %460 = vector.broadcast %cst_248 : f32 to vector<1x1x128xf32>
    %461 = arith.select %457, %459, %460 : vector<1x1x128xi1>, vector<1x1x128xf32>
    %462 = arith.select %455, %461, %448 : vector<1x1x128xi1>, vector<1x1x128xf32>
    %cst_249 = arith.constant 1.000000e+00 : f32
    %463 = vector.broadcast %cst_249 : f32 to vector<1x1x128xf32>
    %464 = arith.divf %463, %462 : vector<1x1x128xf32>
    %465 = vector.broadcast %439 : vector<1x16x1xf32> to vector<1x16x128xf32>
    %466 = arith.subf %443, %465 : vector<1x16x128xf32>
    %c0_250 = arith.constant 0 : index
    %c0_251 = arith.constant 0 : index
    %c0_252 = arith.constant 0 : index
    %467 = vector.load %arg5[%c0_250, %c0_251, %c0_252] : memref<16x16x128xf32, #tpu.memory_space<vmem>>, vector<16x16x128xf32>
    %468 = vector.broadcast %464 : vector<1x1x128xf32> to vector<16x1x128xf32>
    %469 = arith.mulf %441, %468 : vector<16x1x128xf32>
    %470 = vector.broadcast %469 : vector<16x1x128xf32> to vector<16x16x128xf32>
    %471 = vector.broadcast %466 : vector<1x16x128xf32> to vector<16x16x128xf32>
    %472 = arith.mulf %470, %471 : vector<16x16x128xf32>
    %473 = arith.subf %467, %472 : vector<16x16x128xf32>
    %c0_253 = arith.constant 0 : index
    %c0_254 = arith.constant 0 : index
    %c0_255 = arith.constant 0 : index
    %474 = vector.load %arg5[%c0_253, %c0_254, %c0_255] : memref<16x16x128xf32, #tpu.memory_space<vmem>>, vector<16x16x128xf32>
    tpu.vector_store %arg5[%c0_253, %c0_254, %c0_255], %473 {strides = array<i32>} : memref<16x16x128xf32, #tpu.memory_space<vmem>>, vector<16x16x128xf32>,
    %475 = arith.mulf %452, %464 : vector<1x1x128xf32>
    %476 = vector.broadcast %475 : vector<1x1x128xf32> to vector<1x16x128xf32>
    %477 = arith.mulf %476, %466 : vector<1x16x128xf32>
    %478 = arith.subf %444, %477 : vector<1x16x128xf32>
    %c0_256 = arith.constant 0 : index
    %c0_257 = arith.constant 0 : index
    %c0_258 = arith.constant 0 : index
    %479 = vector.load %arg6[%c0_256, %c0_257, %c0_258] : memref<1x16x128xf32, #tpu.memory_space<vmem>>, vector<1x16x128xf32>
    tpu.vector_store %arg6[%c0_256, %c0_257, %c0_258], %478 {strides = array<i32>} : memref<1x16x128xf32, #tpu.memory_space<vmem>>, vector<1x16x128xf32>,
    %c10_i32 = arith.constant 10 : i32
    %480 = vector.broadcast %c10_i32 : i32 to vector<1x16x1xi32>
    %481 = arith.cmpi eq, %31, %480 : vector<1x16x1xi32>
    %482 = arith.extui %481 : vector<1x16x1xi1> to vector<1x16x1xi32>
    %483 = arith.sitofp %482 : vector<1x16x1xi32> to vector<1x16x1xf32>
    %c0_259 = arith.constant 0 : index
    %484 = arith.index_cast %c10_i32 : i32 to index
    %c0_260 = arith.constant 0 : index
    %485 = vector.load %arg5[%c0_259, %484, %c0_260] : memref<16x16x128xf32, #tpu.memory_space<vmem>>, vector<16x1x128xf32>
    %486 = arith.index_cast %c10_i32 : i32 to index
    %c0_261 = arith.constant 0 : index
    %c0_262 = arith.constant 0 : index
    %487 = vector.load %arg5[%486, %c0_261, %c0_262] : memref<16x16x128xf32, #tpu.memory_space<vmem>>, vector<1x16x128xf32>
    %c0_263 = arith.constant 0 : index
    %c0_264 = arith.constant 0 : index
    %c0_265 = arith.constant 0 : index
    %488 = vector.load %arg6[%c0_263, %c0_264, %c0_265] : memref<1x16x128xf32, #tpu.memory_space<vmem>>, vector<1x16x128xf32>
    %489 = vector.broadcast %483 : vector<1x16x1xf32> to vector<1x16x128xf32>
    %490 = arith.mulf %487, %489 : vector<1x16x128xf32>
    %cst_266 = arith.constant dense<0.000000e+00> : vector<1x128xf32>
    %491 = vector.multi_reduction <add>, %490, %cst_266 [1] : vector<1x16x128xf32> to vector<1x128xf32>
    %492 = vector.shape_cast %491 : vector<1x128xf32> to vector<1x1x128xf32>
    %493 = vector.broadcast %483 : vector<1x16x1xf32> to vector<1x16x128xf32>
    %494 = arith.mulf %488, %493 : vector<1x16x128xf32>
    %cst_267 = arith.constant dense<0.000000e+00> : vector<1x128xf32>
    %495 = vector.multi_reduction <add>, %494, %cst_267 [1] : vector<1x16x128xf32> to vector<1x128xf32>
    %496 = vector.shape_cast %495 : vector<1x128xf32> to vector<1x1x128xf32>
    %497 = math.absf %492 : vector<1x1x128xf32>
    %cst_268 = arith.constant 9.99999996E-13 : f32
    %498 = vector.broadcast %cst_268 : f32 to vector<1x1x128xf32>
    %499 = arith.cmpf olt, %497, %498 : vector<1x1x128xf32>
    %cst_269 = arith.constant 0.000000e+00 : f32
    %500 = vector.broadcast %cst_269 : f32 to vector<1x1x128xf32>
    %501 = arith.cmpf olt, %492, %500 : vector<1x1x128xf32>
    %cst_270 = arith.constant 0.000000e+00 : f32
    %cst_271 = arith.constant 9.99999996E-13 : f32
    %502 = arith.subf %cst_270, %cst_271 : f32
    %cst_272 = arith.constant 9.99999996E-13 : f32
    %503 = vector.broadcast %502 : f32 to vector<1x1x128xf32>
    %504 = vector.broadcast %cst_272 : f32 to vector<1x1x128xf32>
    %505 = arith.select %501, %503, %504 : vector<1x1x128xi1>, vector<1x1x128xf32>
    %506 = arith.select %499, %505, %492 : vector<1x1x128xi1>, vector<1x1x128xf32>
    %cst_273 = arith.constant 1.000000e+00 : f32
    %507 = vector.broadcast %cst_273 : f32 to vector<1x1x128xf32>
    %508 = arith.divf %507, %506 : vector<1x1x128xf32>
    %509 = vector.broadcast %483 : vector<1x16x1xf32> to vector<1x16x128xf32>
    %510 = arith.subf %487, %509 : vector<1x16x128xf32>
    %c0_274 = arith.constant 0 : index
    %c0_275 = arith.constant 0 : index
    %c0_276 = arith.constant 0 : index
    %511 = vector.load %arg5[%c0_274, %c0_275, %c0_276] : memref<16x16x128xf32, #tpu.memory_space<vmem>>, vector<16x16x128xf32>
    %512 = vector.broadcast %508 : vector<1x1x128xf32> to vector<16x1x128xf32>
    %513 = arith.mulf %485, %512 : vector<16x1x128xf32>
    %514 = vector.broadcast %513 : vector<16x1x128xf32> to vector<16x16x128xf32>
    %515 = vector.broadcast %510 : vector<1x16x128xf32> to vector<16x16x128xf32>
    %516 = arith.mulf %514, %515 : vector<16x16x128xf32>
    %517 = arith.subf %511, %516 : vector<16x16x128xf32>
    %c0_277 = arith.constant 0 : index
    %c0_278 = arith.constant 0 : index
    %c0_279 = arith.constant 0 : index
    %518 = vector.load %arg5[%c0_277, %c0_278, %c0_279] : memref<16x16x128xf32, #tpu.memory_space<vmem>>, vector<16x16x128xf32>
    tpu.vector_store %arg5[%c0_277, %c0_278, %c0_279], %517 {strides = array<i32>} : memref<16x16x128xf32, #tpu.memory_space<vmem>>, vector<16x16x128xf32>,
    %519 = arith.mulf %496, %508 : vector<1x1x128xf32>
    %520 = vector.broadcast %519 : vector<1x1x128xf32> to vector<1x16x128xf32>
    %521 = arith.mulf %520, %510 : vector<1x16x128xf32>
    %522 = arith.subf %488, %521 : vector<1x16x128xf32>
    %c0_280 = arith.constant 0 : index
    %c0_281 = arith.constant 0 : index
    %c0_282 = arith.constant 0 : index
    %523 = vector.load %arg6[%c0_280, %c0_281, %c0_282] : memref<1x16x128xf32, #tpu.memory_space<vmem>>, vector<1x16x128xf32>
    tpu.vector_store %arg6[%c0_280, %c0_281, %c0_282], %522 {strides = array<i32>} : memref<1x16x128xf32, #tpu.memory_space<vmem>>, vector<1x16x128xf32>,
    %c11_i32 = arith.constant 11 : i32
    %524 = vector.broadcast %c11_i32 : i32 to vector<1x16x1xi32>
    %525 = arith.cmpi eq, %31, %524 : vector<1x16x1xi32>
    %526 = arith.extui %525 : vector<1x16x1xi1> to vector<1x16x1xi32>
    %527 = arith.sitofp %526 : vector<1x16x1xi32> to vector<1x16x1xf32>
    %c0_283 = arith.constant 0 : index
    %528 = arith.index_cast %c11_i32 : i32 to index
    %c0_284 = arith.constant 0 : index
    %529 = vector.load %arg5[%c0_283, %528, %c0_284] : memref<16x16x128xf32, #tpu.memory_space<vmem>>, vector<16x1x128xf32>
    %530 = arith.index_cast %c11_i32 : i32 to index
    %c0_285 = arith.constant 0 : index
    %c0_286 = arith.constant 0 : index
    %531 = vector.load %arg5[%530, %c0_285, %c0_286] : memref<16x16x128xf32, #tpu.memory_space<vmem>>, vector<1x16x128xf32>
    %c0_287 = arith.constant 0 : index
    %c0_288 = arith.constant 0 : index
    %c0_289 = arith.constant 0 : index
    %532 = vector.load %arg6[%c0_287, %c0_288, %c0_289] : memref<1x16x128xf32, #tpu.memory_space<vmem>>, vector<1x16x128xf32>
    %533 = vector.broadcast %527 : vector<1x16x1xf32> to vector<1x16x128xf32>
    %534 = arith.mulf %531, %533 : vector<1x16x128xf32>
    %cst_290 = arith.constant dense<0.000000e+00> : vector<1x128xf32>
    %535 = vector.multi_reduction <add>, %534, %cst_290 [1] : vector<1x16x128xf32> to vector<1x128xf32>
    %536 = vector.shape_cast %535 : vector<1x128xf32> to vector<1x1x128xf32>
    %537 = vector.broadcast %527 : vector<1x16x1xf32> to vector<1x16x128xf32>
    %538 = arith.mulf %532, %537 : vector<1x16x128xf32>
    %cst_291 = arith.constant dense<0.000000e+00> : vector<1x128xf32>
    %539 = vector.multi_reduction <add>, %538, %cst_291 [1] : vector<1x16x128xf32> to vector<1x128xf32>
    %540 = vector.shape_cast %539 : vector<1x128xf32> to vector<1x1x128xf32>
    %541 = math.absf %536 : vector<1x1x128xf32>
    %cst_292 = arith.constant 9.99999996E-13 : f32
    %542 = vector.broadcast %cst_292 : f32 to vector<1x1x128xf32>
    %543 = arith.cmpf olt, %541, %542 : vector<1x1x128xf32>
    %cst_293 = arith.constant 0.000000e+00 : f32
    %544 = vector.broadcast %cst_293 : f32 to vector<1x1x128xf32>
    %545 = arith.cmpf olt, %536, %544 : vector<1x1x128xf32>
    %cst_294 = arith.constant 0.000000e+00 : f32
    %cst_295 = arith.constant 9.99999996E-13 : f32
    %546 = arith.subf %cst_294, %cst_295 : f32
    %cst_296 = arith.constant 9.99999996E-13 : f32
    %547 = vector.broadcast %546 : f32 to vector<1x1x128xf32>
    %548 = vector.broadcast %cst_296 : f32 to vector<1x1x128xf32>
    %549 = arith.select %545, %547, %548 : vector<1x1x128xi1>, vector<1x1x128xf32>
    %550 = arith.select %543, %549, %536 : vector<1x1x128xi1>, vector<1x1x128xf32>
    %cst_297 = arith.constant 1.000000e+00 : f32
    %551 = vector.broadcast %cst_297 : f32 to vector<1x1x128xf32>
    %552 = arith.divf %551, %550 : vector<1x1x128xf32>
    %553 = vector.broadcast %527 : vector<1x16x1xf32> to vector<1x16x128xf32>
    %554 = arith.subf %531, %553 : vector<1x16x128xf32>
    %c0_298 = arith.constant 0 : index
    %c0_299 = arith.constant 0 : index
    %c0_300 = arith.constant 0 : index
    %555 = vector.load %arg5[%c0_298, %c0_299, %c0_300] : memref<16x16x128xf32, #tpu.memory_space<vmem>>, vector<16x16x128xf32>
    %556 = vector.broadcast %552 : vector<1x1x128xf32> to vector<16x1x128xf32>
    %557 = arith.mulf %529, %556 : vector<16x1x128xf32>
    %558 = vector.broadcast %557 : vector<16x1x128xf32> to vector<16x16x128xf32>
    %559 = vector.broadcast %554 : vector<1x16x128xf32> to vector<16x16x128xf32>
    %560 = arith.mulf %558, %559 : vector<16x16x128xf32>
    %561 = arith.subf %555, %560 : vector<16x16x128xf32>
    %c0_301 = arith.constant 0 : index
    %c0_302 = arith.constant 0 : index
    %c0_303 = arith.constant 0 : index
    %562 = vector.load %arg5[%c0_301, %c0_302, %c0_303] : memref<16x16x128xf32, #tpu.memory_space<vmem>>, vector<16x16x128xf32>
    tpu.vector_store %arg5[%c0_301, %c0_302, %c0_303], %561 {strides = array<i32>} : memref<16x16x128xf32, #tpu.memory_space<vmem>>, vector<16x16x128xf32>,
    %563 = arith.mulf %540, %552 : vector<1x1x128xf32>
    %564 = vector.broadcast %563 : vector<1x1x128xf32> to vector<1x16x128xf32>
    %565 = arith.mulf %564, %554 : vector<1x16x128xf32>
    %566 = arith.subf %532, %565 : vector<1x16x128xf32>
    %c0_304 = arith.constant 0 : index
    %c0_305 = arith.constant 0 : index
    %c0_306 = arith.constant 0 : index
    %567 = vector.load %arg6[%c0_304, %c0_305, %c0_306] : memref<1x16x128xf32, #tpu.memory_space<vmem>>, vector<1x16x128xf32>
    tpu.vector_store %arg6[%c0_304, %c0_305, %c0_306], %566 {strides = array<i32>} : memref<1x16x128xf32, #tpu.memory_space<vmem>>, vector<1x16x128xf32>,
    %c12_i32 = arith.constant 12 : i32
    %568 = vector.broadcast %c12_i32 : i32 to vector<1x16x1xi32>
    %569 = arith.cmpi eq, %31, %568 : vector<1x16x1xi32>
    %570 = arith.extui %569 : vector<1x16x1xi1> to vector<1x16x1xi32>
    %571 = arith.sitofp %570 : vector<1x16x1xi32> to vector<1x16x1xf32>
    %c0_307 = arith.constant 0 : index
    %572 = arith.index_cast %c12_i32 : i32 to index
    %c0_308 = arith.constant 0 : index
    %573 = vector.load %arg5[%c0_307, %572, %c0_308] : memref<16x16x128xf32, #tpu.memory_space<vmem>>, vector<16x1x128xf32>
    %574 = arith.index_cast %c12_i32 : i32 to index
    %c0_309 = arith.constant 0 : index
    %c0_310 = arith.constant 0 : index
    %575 = vector.load %arg5[%574, %c0_309, %c0_310] : memref<16x16x128xf32, #tpu.memory_space<vmem>>, vector<1x16x128xf32>
    %c0_311 = arith.constant 0 : index
    %c0_312 = arith.constant 0 : index
    %c0_313 = arith.constant 0 : index
    %576 = vector.load %arg6[%c0_311, %c0_312, %c0_313] : memref<1x16x128xf32, #tpu.memory_space<vmem>>, vector<1x16x128xf32>
    %577 = vector.broadcast %571 : vector<1x16x1xf32> to vector<1x16x128xf32>
    %578 = arith.mulf %575, %577 : vector<1x16x128xf32>
    %cst_314 = arith.constant dense<0.000000e+00> : vector<1x128xf32>
    %579 = vector.multi_reduction <add>, %578, %cst_314 [1] : vector<1x16x128xf32> to vector<1x128xf32>
    %580 = vector.shape_cast %579 : vector<1x128xf32> to vector<1x1x128xf32>
    %581 = vector.broadcast %571 : vector<1x16x1xf32> to vector<1x16x128xf32>
    %582 = arith.mulf %576, %581 : vector<1x16x128xf32>
    %cst_315 = arith.constant dense<0.000000e+00> : vector<1x128xf32>
    %583 = vector.multi_reduction <add>, %582, %cst_315 [1] : vector<1x16x128xf32> to vector<1x128xf32>
    %584 = vector.shape_cast %583 : vector<1x128xf32> to vector<1x1x128xf32>
    %585 = math.absf %580 : vector<1x1x128xf32>
    %cst_316 = arith.constant 9.99999996E-13 : f32
    %586 = vector.broadcast %cst_316 : f32 to vector<1x1x128xf32>
    %587 = arith.cmpf olt, %585, %586 : vector<1x1x128xf32>
    %cst_317 = arith.constant 0.000000e+00 : f32
    %588 = vector.broadcast %cst_317 : f32 to vector<1x1x128xf32>
    %589 = arith.cmpf olt, %580, %588 : vector<1x1x128xf32>
    %cst_318 = arith.constant 0.000000e+00 : f32
    %cst_319 = arith.constant 9.99999996E-13 : f32
    %590 = arith.subf %cst_318, %cst_319 : f32
    %cst_320 = arith.constant 9.99999996E-13 : f32
    %591 = vector.broadcast %590 : f32 to vector<1x1x128xf32>
    %592 = vector.broadcast %cst_320 : f32 to vector<1x1x128xf32>
    %593 = arith.select %589, %591, %592 : vector<1x1x128xi1>, vector<1x1x128xf32>
    %594 = arith.select %587, %593, %580 : vector<1x1x128xi1>, vector<1x1x128xf32>
    %cst_321 = arith.constant 1.000000e+00 : f32
    %595 = vector.broadcast %cst_321 : f32 to vector<1x1x128xf32>
    %596 = arith.divf %595, %594 : vector<1x1x128xf32>
    %597 = vector.broadcast %571 : vector<1x16x1xf32> to vector<1x16x128xf32>
    %598 = arith.subf %575, %597 : vector<1x16x128xf32>
    %c0_322 = arith.constant 0 : index
    %c0_323 = arith.constant 0 : index
    %c0_324 = arith.constant 0 : index
    %599 = vector.load %arg5[%c0_322, %c0_323, %c0_324] : memref<16x16x128xf32, #tpu.memory_space<vmem>>, vector<16x16x128xf32>
    %600 = vector.broadcast %596 : vector<1x1x128xf32> to vector<16x1x128xf32>
    %601 = arith.mulf %573, %600 : vector<16x1x128xf32>
    %602 = vector.broadcast %601 : vector<16x1x128xf32> to vector<16x16x128xf32>
    %603 = vector.broadcast %598 : vector<1x16x128xf32> to vector<16x16x128xf32>
    %604 = arith.mulf %602, %603 : vector<16x16x128xf32>
    %605 = arith.subf %599, %604 : vector<16x16x128xf32>
    %c0_325 = arith.constant 0 : index
    %c0_326 = arith.constant 0 : index
    %c0_327 = arith.constant 0 : index
    %606 = vector.load %arg5[%c0_325, %c0_326, %c0_327] : memref<16x16x128xf32, #tpu.memory_space<vmem>>, vector<16x16x128xf32>
    tpu.vector_store %arg5[%c0_325, %c0_326, %c0_327], %605 {strides = array<i32>} : memref<16x16x128xf32, #tpu.memory_space<vmem>>, vector<16x16x128xf32>,
    %607 = arith.mulf %584, %596 : vector<1x1x128xf32>
    %608 = vector.broadcast %607 : vector<1x1x128xf32> to vector<1x16x128xf32>
    %609 = arith.mulf %608, %598 : vector<1x16x128xf32>
    %610 = arith.subf %576, %609 : vector<1x16x128xf32>
    %c0_328 = arith.constant 0 : index
    %c0_329 = arith.constant 0 : index
    %c0_330 = arith.constant 0 : index
    %611 = vector.load %arg6[%c0_328, %c0_329, %c0_330] : memref<1x16x128xf32, #tpu.memory_space<vmem>>, vector<1x16x128xf32>
    tpu.vector_store %arg6[%c0_328, %c0_329, %c0_330], %610 {strides = array<i32>} : memref<1x16x128xf32, #tpu.memory_space<vmem>>, vector<1x16x128xf32>,
    %c13_i32 = arith.constant 13 : i32
    %612 = vector.broadcast %c13_i32 : i32 to vector<1x16x1xi32>
    %613 = arith.cmpi eq, %31, %612 : vector<1x16x1xi32>
    %614 = arith.extui %613 : vector<1x16x1xi1> to vector<1x16x1xi32>
    %615 = arith.sitofp %614 : vector<1x16x1xi32> to vector<1x16x1xf32>
    %c0_331 = arith.constant 0 : index
    %616 = arith.index_cast %c13_i32 : i32 to index
    %c0_332 = arith.constant 0 : index
    %617 = vector.load %arg5[%c0_331, %616, %c0_332] : memref<16x16x128xf32, #tpu.memory_space<vmem>>, vector<16x1x128xf32>
    %618 = arith.index_cast %c13_i32 : i32 to index
    %c0_333 = arith.constant 0 : index
    %c0_334 = arith.constant 0 : index
    %619 = vector.load %arg5[%618, %c0_333, %c0_334] : memref<16x16x128xf32, #tpu.memory_space<vmem>>, vector<1x16x128xf32>
    %c0_335 = arith.constant 0 : index
    %c0_336 = arith.constant 0 : index
    %c0_337 = arith.constant 0 : index
    %620 = vector.load %arg6[%c0_335, %c0_336, %c0_337] : memref<1x16x128xf32, #tpu.memory_space<vmem>>, vector<1x16x128xf32>
    %621 = vector.broadcast %615 : vector<1x16x1xf32> to vector<1x16x128xf32>
    %622 = arith.mulf %619, %621 : vector<1x16x128xf32>
    %cst_338 = arith.constant dense<0.000000e+00> : vector<1x128xf32>
    %623 = vector.multi_reduction <add>, %622, %cst_338 [1] : vector<1x16x128xf32> to vector<1x128xf32>
    %624 = vector.shape_cast %623 : vector<1x128xf32> to vector<1x1x128xf32>
    %625 = vector.broadcast %615 : vector<1x16x1xf32> to vector<1x16x128xf32>
    %626 = arith.mulf %620, %625 : vector<1x16x128xf32>
    %cst_339 = arith.constant dense<0.000000e+00> : vector<1x128xf32>
    %627 = vector.multi_reduction <add>, %626, %cst_339 [1] : vector<1x16x128xf32> to vector<1x128xf32>
    %628 = vector.shape_cast %627 : vector<1x128xf32> to vector<1x1x128xf32>
    %629 = math.absf %624 : vector<1x1x128xf32>
    %cst_340 = arith.constant 9.99999996E-13 : f32
    %630 = vector.broadcast %cst_340 : f32 to vector<1x1x128xf32>
    %631 = arith.cmpf olt, %629, %630 : vector<1x1x128xf32>
    %cst_341 = arith.constant 0.000000e+00 : f32
    %632 = vector.broadcast %cst_341 : f32 to vector<1x1x128xf32>
    %633 = arith.cmpf olt, %624, %632 : vector<1x1x128xf32>
    %cst_342 = arith.constant 0.000000e+00 : f32
    %cst_343 = arith.constant 9.99999996E-13 : f32
    %634 = arith.subf %cst_342, %cst_343 : f32
    %cst_344 = arith.constant 9.99999996E-13 : f32
    %635 = vector.broadcast %634 : f32 to vector<1x1x128xf32>
    %636 = vector.broadcast %cst_344 : f32 to vector<1x1x128xf32>
    %637 = arith.select %633, %635, %636 : vector<1x1x128xi1>, vector<1x1x128xf32>
    %638 = arith.select %631, %637, %624 : vector<1x1x128xi1>, vector<1x1x128xf32>
    %cst_345 = arith.constant 1.000000e+00 : f32
    %639 = vector.broadcast %cst_345 : f32 to vector<1x1x128xf32>
    %640 = arith.divf %639, %638 : vector<1x1x128xf32>
    %641 = vector.broadcast %615 : vector<1x16x1xf32> to vector<1x16x128xf32>
    %642 = arith.subf %619, %641 : vector<1x16x128xf32>
    %c0_346 = arith.constant 0 : index
    %c0_347 = arith.constant 0 : index
    %c0_348 = arith.constant 0 : index
    %643 = vector.load %arg5[%c0_346, %c0_347, %c0_348] : memref<16x16x128xf32, #tpu.memory_space<vmem>>, vector<16x16x128xf32>
    %644 = vector.broadcast %640 : vector<1x1x128xf32> to vector<16x1x128xf32>
    %645 = arith.mulf %617, %644 : vector<16x1x128xf32>
    %646 = vector.broadcast %645 : vector<16x1x128xf32> to vector<16x16x128xf32>
    %647 = vector.broadcast %642 : vector<1x16x128xf32> to vector<16x16x128xf32>
    %648 = arith.mulf %646, %647 : vector<16x16x128xf32>
    %649 = arith.subf %643, %648 : vector<16x16x128xf32>
    %c0_349 = arith.constant 0 : index
    %c0_350 = arith.constant 0 : index
    %c0_351 = arith.constant 0 : index
    %650 = vector.load %arg5[%c0_349, %c0_350, %c0_351] : memref<16x16x128xf32, #tpu.memory_space<vmem>>, vector<16x16x128xf32>
    tpu.vector_store %arg5[%c0_349, %c0_350, %c0_351], %649 {strides = array<i32>} : memref<16x16x128xf32, #tpu.memory_space<vmem>>, vector<16x16x128xf32>,
    %651 = arith.mulf %628, %640 : vector<1x1x128xf32>
    %652 = vector.broadcast %651 : vector<1x1x128xf32> to vector<1x16x128xf32>
    %653 = arith.mulf %652, %642 : vector<1x16x128xf32>
    %654 = arith.subf %620, %653 : vector<1x16x128xf32>
    %c0_352 = arith.constant 0 : index
    %c0_353 = arith.constant 0 : index
    %c0_354 = arith.constant 0 : index
    %655 = vector.load %arg6[%c0_352, %c0_353, %c0_354] : memref<1x16x128xf32, #tpu.memory_space<vmem>>, vector<1x16x128xf32>
    tpu.vector_store %arg6[%c0_352, %c0_353, %c0_354], %654 {strides = array<i32>} : memref<1x16x128xf32, #tpu.memory_space<vmem>>, vector<1x16x128xf32>,
    %c14_i32 = arith.constant 14 : i32
    %656 = vector.broadcast %c14_i32 : i32 to vector<1x16x1xi32>
    %657 = arith.cmpi eq, %31, %656 : vector<1x16x1xi32>
    %658 = arith.extui %657 : vector<1x16x1xi1> to vector<1x16x1xi32>
    %659 = arith.sitofp %658 : vector<1x16x1xi32> to vector<1x16x1xf32>
    %c0_355 = arith.constant 0 : index
    %660 = arith.index_cast %c14_i32 : i32 to index
    %c0_356 = arith.constant 0 : index
    %661 = vector.load %arg5[%c0_355, %660, %c0_356] : memref<16x16x128xf32, #tpu.memory_space<vmem>>, vector<16x1x128xf32>
    %662 = arith.index_cast %c14_i32 : i32 to index
    %c0_357 = arith.constant 0 : index
    %c0_358 = arith.constant 0 : index
    %663 = vector.load %arg5[%662, %c0_357, %c0_358] : memref<16x16x128xf32, #tpu.memory_space<vmem>>, vector<1x16x128xf32>
    %c0_359 = arith.constant 0 : index
    %c0_360 = arith.constant 0 : index
    %c0_361 = arith.constant 0 : index
    %664 = vector.load %arg6[%c0_359, %c0_360, %c0_361] : memref<1x16x128xf32, #tpu.memory_space<vmem>>, vector<1x16x128xf32>
    %665 = vector.broadcast %659 : vector<1x16x1xf32> to vector<1x16x128xf32>
    %666 = arith.mulf %663, %665 : vector<1x16x128xf32>
    %cst_362 = arith.constant dense<0.000000e+00> : vector<1x128xf32>
    %667 = vector.multi_reduction <add>, %666, %cst_362 [1] : vector<1x16x128xf32> to vector<1x128xf32>
    %668 = vector.shape_cast %667 : vector<1x128xf32> to vector<1x1x128xf32>
    %669 = vector.broadcast %659 : vector<1x16x1xf32> to vector<1x16x128xf32>
    %670 = arith.mulf %664, %669 : vector<1x16x128xf32>
    %cst_363 = arith.constant dense<0.000000e+00> : vector<1x128xf32>
    %671 = vector.multi_reduction <add>, %670, %cst_363 [1] : vector<1x16x128xf32> to vector<1x128xf32>
    %672 = vector.shape_cast %671 : vector<1x128xf32> to vector<1x1x128xf32>
    %673 = math.absf %668 : vector<1x1x128xf32>
    %cst_364 = arith.constant 9.99999996E-13 : f32
    %674 = vector.broadcast %cst_364 : f32 to vector<1x1x128xf32>
    %675 = arith.cmpf olt, %673, %674 : vector<1x1x128xf32>
    %cst_365 = arith.constant 0.000000e+00 : f32
    %676 = vector.broadcast %cst_365 : f32 to vector<1x1x128xf32>
    %677 = arith.cmpf olt, %668, %676 : vector<1x1x128xf32>
    %cst_366 = arith.constant 0.000000e+00 : f32
    %cst_367 = arith.constant 9.99999996E-13 : f32
    %678 = arith.subf %cst_366, %cst_367 : f32
    %cst_368 = arith.constant 9.99999996E-13 : f32
    %679 = vector.broadcast %678 : f32 to vector<1x1x128xf32>
    %680 = vector.broadcast %cst_368 : f32 to vector<1x1x128xf32>
    %681 = arith.select %677, %679, %680 : vector<1x1x128xi1>, vector<1x1x128xf32>
    %682 = arith.select %675, %681, %668 : vector<1x1x128xi1>, vector<1x1x128xf32>
    %cst_369 = arith.constant 1.000000e+00 : f32
    %683 = vector.broadcast %cst_369 : f32 to vector<1x1x128xf32>
    %684 = arith.divf %683, %682 : vector<1x1x128xf32>
    %685 = vector.broadcast %659 : vector<1x16x1xf32> to vector<1x16x128xf32>
    %686 = arith.subf %663, %685 : vector<1x16x128xf32>
    %c0_370 = arith.constant 0 : index
    %c0_371 = arith.constant 0 : index
    %c0_372 = arith.constant 0 : index
    %687 = vector.load %arg5[%c0_370, %c0_371, %c0_372] : memref<16x16x128xf32, #tpu.memory_space<vmem>>, vector<16x16x128xf32>
    %688 = vector.broadcast %684 : vector<1x1x128xf32> to vector<16x1x128xf32>
    %689 = arith.mulf %661, %688 : vector<16x1x128xf32>
    %690 = vector.broadcast %689 : vector<16x1x128xf32> to vector<16x16x128xf32>
    %691 = vector.broadcast %686 : vector<1x16x128xf32> to vector<16x16x128xf32>
    %692 = arith.mulf %690, %691 : vector<16x16x128xf32>
    %693 = arith.subf %687, %692 : vector<16x16x128xf32>
    %c0_373 = arith.constant 0 : index
    %c0_374 = arith.constant 0 : index
    %c0_375 = arith.constant 0 : index
    %694 = vector.load %arg5[%c0_373, %c0_374, %c0_375] : memref<16x16x128xf32, #tpu.memory_space<vmem>>, vector<16x16x128xf32>
    tpu.vector_store %arg5[%c0_373, %c0_374, %c0_375], %693 {strides = array<i32>} : memref<16x16x128xf32, #tpu.memory_space<vmem>>, vector<16x16x128xf32>,
    %695 = arith.mulf %672, %684 : vector<1x1x128xf32>
    %696 = vector.broadcast %695 : vector<1x1x128xf32> to vector<1x16x128xf32>
    %697 = arith.mulf %696, %686 : vector<1x16x128xf32>
    %698 = arith.subf %664, %697 : vector<1x16x128xf32>
    %c0_376 = arith.constant 0 : index
    %c0_377 = arith.constant 0 : index
    %c0_378 = arith.constant 0 : index
    %699 = vector.load %arg6[%c0_376, %c0_377, %c0_378] : memref<1x16x128xf32, #tpu.memory_space<vmem>>, vector<1x16x128xf32>
    tpu.vector_store %arg6[%c0_376, %c0_377, %c0_378], %698 {strides = array<i32>} : memref<1x16x128xf32, #tpu.memory_space<vmem>>, vector<1x16x128xf32>,
    %c15_i32_379 = arith.constant 15 : i32
    %700 = vector.broadcast %c15_i32_379 : i32 to vector<1x16x1xi32>
    %701 = arith.cmpi eq, %31, %700 : vector<1x16x1xi32>
    %702 = arith.extui %701 : vector<1x16x1xi1> to vector<1x16x1xi32>
    %703 = arith.sitofp %702 : vector<1x16x1xi32> to vector<1x16x1xf32>
    %c0_380 = arith.constant 0 : index
    %704 = arith.index_cast %c15_i32_379 : i32 to index
    %c0_381 = arith.constant 0 : index
    %705 = vector.load %arg5[%c0_380, %704, %c0_381] : memref<16x16x128xf32, #tpu.memory_space<vmem>>, vector<16x1x128xf32>
    %706 = arith.index_cast %c15_i32_379 : i32 to index
    %c0_382 = arith.constant 0 : index
    %c0_383 = arith.constant 0 : index
    %707 = vector.load %arg5[%706, %c0_382, %c0_383] : memref<16x16x128xf32, #tpu.memory_space<vmem>>, vector<1x16x128xf32>
    %c0_384 = arith.constant 0 : index
    %c0_385 = arith.constant 0 : index
    %c0_386 = arith.constant 0 : index
    %708 = vector.load %arg6[%c0_384, %c0_385, %c0_386] : memref<1x16x128xf32, #tpu.memory_space<vmem>>, vector<1x16x128xf32>
    %709 = vector.broadcast %703 : vector<1x16x1xf32> to vector<1x16x128xf32>
    %710 = arith.mulf %707, %709 : vector<1x16x128xf32>
    %cst_387 = arith.constant dense<0.000000e+00> : vector<1x128xf32>
    %711 = vector.multi_reduction <add>, %710, %cst_387 [1] : vector<1x16x128xf32> to vector<1x128xf32>
    %712 = vector.shape_cast %711 : vector<1x128xf32> to vector<1x1x128xf32>
    %713 = vector.broadcast %703 : vector<1x16x1xf32> to vector<1x16x128xf32>
    %714 = arith.mulf %708, %713 : vector<1x16x128xf32>
    %cst_388 = arith.constant dense<0.000000e+00> : vector<1x128xf32>
    %715 = vector.multi_reduction <add>, %714, %cst_388 [1] : vector<1x16x128xf32> to vector<1x128xf32>
    %716 = vector.shape_cast %715 : vector<1x128xf32> to vector<1x1x128xf32>
    %717 = math.absf %712 : vector<1x1x128xf32>
    %cst_389 = arith.constant 9.99999996E-13 : f32
    %718 = vector.broadcast %cst_389 : f32 to vector<1x1x128xf32>
    %719 = arith.cmpf olt, %717, %718 : vector<1x1x128xf32>
    %cst_390 = arith.constant 0.000000e+00 : f32
    %720 = vector.broadcast %cst_390 : f32 to vector<1x1x128xf32>
    %721 = arith.cmpf olt, %712, %720 : vector<1x1x128xf32>
    %cst_391 = arith.constant 0.000000e+00 : f32
    %cst_392 = arith.constant 9.99999996E-13 : f32
    %722 = arith.subf %cst_391, %cst_392 : f32
    %cst_393 = arith.constant 9.99999996E-13 : f32
    %723 = vector.broadcast %722 : f32 to vector<1x1x128xf32>
    %724 = vector.broadcast %cst_393 : f32 to vector<1x1x128xf32>
    %725 = arith.select %721, %723, %724 : vector<1x1x128xi1>, vector<1x1x128xf32>
    %726 = arith.select %719, %725, %712 : vector<1x1x128xi1>, vector<1x1x128xf32>
    %cst_394 = arith.constant 1.000000e+00 : f32
    %727 = vector.broadcast %cst_394 : f32 to vector<1x1x128xf32>
    %728 = arith.divf %727, %726 : vector<1x1x128xf32>
    %729 = vector.broadcast %703 : vector<1x16x1xf32> to vector<1x16x128xf32>
    %730 = arith.subf %707, %729 : vector<1x16x128xf32>
    %c0_395 = arith.constant 0 : index
    %c0_396 = arith.constant 0 : index
    %c0_397 = arith.constant 0 : index
    %731 = vector.load %arg5[%c0_395, %c0_396, %c0_397] : memref<16x16x128xf32, #tpu.memory_space<vmem>>, vector<16x16x128xf32>
    %732 = vector.broadcast %728 : vector<1x1x128xf32> to vector<16x1x128xf32>
    %733 = arith.mulf %705, %732 : vector<16x1x128xf32>
    %734 = vector.broadcast %733 : vector<16x1x128xf32> to vector<16x16x128xf32>
    %735 = vector.broadcast %730 : vector<1x16x128xf32> to vector<16x16x128xf32>
    %736 = arith.mulf %734, %735 : vector<16x16x128xf32>
    %737 = arith.subf %731, %736 : vector<16x16x128xf32>
    %c0_398 = arith.constant 0 : index
    %c0_399 = arith.constant 0 : index
    %c0_400 = arith.constant 0 : index
    %738 = vector.load %arg5[%c0_398, %c0_399, %c0_400] : memref<16x16x128xf32, #tpu.memory_space<vmem>>, vector<16x16x128xf32>
    tpu.vector_store %arg5[%c0_398, %c0_399, %c0_400], %737 {strides = array<i32>} : memref<16x16x128xf32, #tpu.memory_space<vmem>>, vector<16x16x128xf32>,
    %739 = arith.mulf %716, %728 : vector<1x1x128xf32>
    %740 = vector.broadcast %739 : vector<1x1x128xf32> to vector<1x16x128xf32>
    %741 = arith.mulf %740, %730 : vector<1x16x128xf32>
    %742 = arith.subf %708, %741 : vector<1x16x128xf32>
    %c0_401 = arith.constant 0 : index
    %c0_402 = arith.constant 0 : index
    %c0_403 = arith.constant 0 : index
    %743 = vector.load %arg6[%c0_401, %c0_402, %c0_403] : memref<1x16x128xf32, #tpu.memory_space<vmem>>, vector<1x16x128xf32>
    tpu.vector_store %arg6[%c0_401, %c0_402, %c0_403], %742 {strides = array<i32>} : memref<1x16x128xf32, #tpu.memory_space<vmem>>, vector<1x16x128xf32>,
    %c16_i32 = arith.constant 16 : i32
    %c0_404 = arith.constant 0 : index
    %c0_405 = arith.constant 0 : index
    %c0_406 = arith.constant 0 : index
    %744 = vector.load %arg1[%c0_404, %c0_405, %c0_406] : memref<1x16x128xf32, #tpu.memory_space<vmem>>, vector<1x16x128xf32>
    %c0_407 = arith.constant 0 : index
    %c0_408 = arith.constant 0 : index
    %c0_409 = arith.constant 0 : index
    %745 = vector.load %arg6[%c0_407, %c0_408, %c0_409] : memref<1x16x128xf32, #tpu.memory_space<vmem>>, vector<1x16x128xf32>
    %746 = arith.mulf %744, %745 : vector<1x16x128xf32>
    %cst_410 = arith.constant 1.000000e-16 : f32
    %747 = vector.broadcast %cst_410 : f32 to vector<1x16x128xf32>
    %748 = arith.addf %746, %747 : vector<1x16x128xf32>
    %cst_411 = arith.constant dense<0.000000e+00> : vector<1x128xf32>
    %749 = vector.multi_reduction <add>, %748, %cst_411 [1] : vector<1x16x128xf32> to vector<1x128xf32>
    %750 = vector.shape_cast %749 : vector<1x128xf32> to vector<1x1x128xf32>
    %751 = vector.broadcast %750 : vector<1x1x128xf32> to vector<1x16x128xf32>
    %752 = arith.divf %748, %751 : vector<1x16x128xf32>
    %753 = math.log %752 : vector<1x16x128xf32>
    %c0_412 = arith.constant 0 : index
    %c0_413 = arith.constant 0 : index
    %c0_414 = arith.constant 0 : index
    %754 = vector.load %arg4[%c0_412, %c0_413, %c0_414] : memref<1x16x128xf32, #tpu.memory_space<vmem>>, vector<1x16x128xf32>
    tpu.vector_store %arg4[%c0_412, %c0_413, %c0_414], %753 {strides = array<i32>} : memref<1x16x128xf32, #tpu.memory_space<vmem>>, vector<1x16x128xf32>,
    return
  }
  func.func @transform_0(%arg0: i32) -> (i32, i32, i32) {
    %c0_i32 = arith.constant 0 : i32
    %c0_i32_0 = arith.constant 0 : i32
    %c0_i32_1 = arith.constant 0 : i32
    return %c0_i32, %c0_i32_0, %arg0 : i32, i32, i32
  }
  func.func @transform_1(%arg0: i32) -> (i32, i32, i32) {
    %c0_i32 = arith.constant 0 : i32
    %c0_i32_0 = arith.constant 0 : i32
    %c0_i32_1 = arith.constant 0 : i32
    return %c0_i32, %c0_i32_0, %arg0 : i32, i32, i32
  }
  func.func @transform_2(%arg0: i32) -> (i32, i32, i32) {
    %c0_i32 = arith.constant 0 : i32
    %c0_i32_0 = arith.constant 0 : i32
    %c0_i32_1 = arith.constant 0 : i32
    %c0_i32_2 = arith.constant 0 : i32
    return %c0_i32, %c0_i32_0, %c0_i32_1 : i32, i32, i32
  }
  func.func @transform_3(%arg0: i32) -> (i32, i32, i32) {
    %c0_i32 = arith.constant 0 : i32
    %c0_i32_0 = arith.constant 0 : i32
    %c0_i32_1 = arith.constant 0 : i32
    return %c0_i32, %c0_i32_0, %arg0 : i32, i32, i32
  }
}

</mosaic_0001>

<bundles_post_ra>
// kernel: tpu_custom_call.1
= control target key start
LH: loop header
LB: loop body
LE: loop exit
PB: predicated region body
PF: predicated region fallthrough
CT: control target
= control target key end

     0   :  { %v5210_v2 = vmov 0   ;;  %s9350_s0 = inlined_call_operand.vmem [shape: f32[1,16,128], index: 0, kind: input, shape index: {}]   ;;  %s9351_s1 = inlined_call_operand.vmem [shape: f32[16,1,128], index: 1, kind: input, shape index: {}]   ;;  %s9352_s2 = inlined_call_operand.vmem [shape: f32[16,16,1], index: 2, kind: input, shape index: {}]   ;;  %s9353_s3 = inlined_call_operand.hbm [shape: f32[1,16,128], index: 3, kind: output, shape index: {}]  }
   0x1   :  { %v35_v0 = vld [vmem:[%s9352_s2 + $0x10] sm:$0xff]  ;;  %v33_v1 = vld [vmem:[%s9352_s2] sm:$0xff]  ;;  %5145 = vset.pattern.permute.xlu1 %v5210_v2  ;;  %5144 = vset.pattern.permute.xlu0 %v5210_v2  ;;  %v36_v3 = vld [vmem:[%s9352_s2 + $0x18] sm:$0xff] }
   0x2   :  { %77 = vperm.xlu1 %5145, %v35_v0   ;;  %67 = vperm.xlu0 %5144, %v33_v1   ;;  %v34_v4 = vld [vmem:[%s9352_s2 + $0x8] sm:$0xff]  ;;  %v37_v6 = vld [vmem:[%s9352_s2 + $0x20] sm:$0xff]  ;;  %v40_v7 = vld [vmem:[%s9352_s2 + $0x38] sm:$0xff] }
   0x3   :  { %v38_v5 = vld [vmem:[%s9352_s2 + $0x28] sm:$0xff]  ;;  %v39_v8 = vld [vmem:[%s9352_s2 + $0x30] sm:$0xff] }
   0x6   :  { %82 = vperm.xlu1 %5145, %v36_v3   ;;  %72 = vperm.xlu0 %5144, %v34_v4  }
   0xa   :  { %92 = vperm.xlu1 %5145, %v38_v5   ;;  %87 = vperm.xlu0 %5144, %v37_v6  }
   0xb   :  { %8 = vsyncpa [#allocation5], 0  ;;  %v42_v9 = vld [vmem:[%s9352_s2 + $0x48] sm:$0xff]  ;;  %v41_v10 = vld [vmem:[%s9352_s2 + $0x40] sm:$0xff]  ;;  %v529_v33 = vlaneseq  ;;  %v5211_v36 = vmov 0.001  }
   0xc   :  { %v44_v11 = vld [vmem:[%s9352_s2 + $0x58] sm:$0xff]  ;;  %v43_v12 = vld [vmem:[%s9352_s2 + $0x50] sm:$0xff]  ;;  %v46_v13 = vld [vmem:[%s9352_s2 + $0x68] sm:$0xff]  ;;  %v9354_v38 = vmov 0.0  }
   0xd   :  { %v45_v14 = vld [vmem:[%s9352_s2 + $0x60] sm:$0xff]  ;;  %v48_v15 = vld [vmem:[%s9352_s2 + $0x78] sm:$0xff]  ;;  %v47_v16 = vld [vmem:[%s9352_s2 + $0x70] sm:$0xff]  ;;  %v5333_v34 = vshrl.u32 %v529_v33, 7 }
   0xe   :  { %102 = vperm.xlu1 %5145, %v40_v7   ;;  %97 = vperm.xlu0 %5144, %v39_v8   ;;  %v50_v17 = vld [vmem:[%s9352_s2 + $0x88] sm:$0xff]  ;;  %v49_v18 = vld [vmem:[%s9352_s2 + $0x80] sm:$0xff]  ;;  %v52_v19 = vld [vmem:[%s9352_s2 + $0x98] sm:$0xff] }
   0xf   :  { %v51_v20 = vld [vmem:[%s9352_s2 + $0x90] sm:$0xff]  ;;  %v54_v21 = vld [vmem:[%s9352_s2 + $0xa8] sm:$0xff]  ;;  %v53_v22 = vld [vmem:[%s9352_s2 + $0xa0] sm:$0xff]  ;;  %9548 = vst [vmem:[#allocation7_spill] sm:$0xff] %v5333_v34  ;;  %v5336_v35 = vadd.s32 8, %v5333_v34  ;;  %vm532_vm1 = vcmp.eq.s32.totalorder %v5333_v34, 0 }
  0x10   :  { %v56_v23 = vld [vmem:[%s9352_s2 + $0xb8] sm:$0xff]  ;;  %v55_v24 = vld [vmem:[%s9352_s2 + $0xb0] sm:$0xff]  ;;  %v58_v25 = vld [vmem:[%s9352_s2 + $0xc8] sm:$0xff]  ;;  %v5347_v39 = vsel %vm532_vm1, 1.0, %v9354_v38  ;;  %vm534_vm2 = vcmp.eq.s32.totalorder %v5333_v34, 1  ;;  %vm536_vm3 = vcmp.eq.s32.totalorder %v5333_v34, 2 }
  0x11   :  { %v57_v26 = vld [vmem:[%s9352_s2 + $0xc0] sm:$0xff]  ;;  %v60_v27 = vld [vmem:[%s9352_s2 + $0xd8] sm:$0xff]  ;;  %v59_v28 = vld [vmem:[%s9352_s2 + $0xd0] sm:$0xff]  ;;  %9549 = vst [vmem:[#allocation8_spill] sm:$0xff] %v5336_v35  ;;  %vm563_vm0 = vcmp.eq.s32.totalorder %v5336_v35, 15  ;;  %vm538_vm4 = vcmp.eq.s32.totalorder %v5333_v34, 3 }
  0x12   :  { %112 = vperm.xlu1 %5145, %v42_v9   ;;  %107 = vperm.xlu0 %5144, %v41_v10   ;;  %v62_v29 = vld [vmem:[%s9352_s2 + $0xe8] sm:$0xff]  ;;  %v61_v30 = vld [vmem:[%s9352_s2 + $0xe0] sm:$0xff]  ;;  %v64_v31 = vld [vmem:[%s9352_s2 + $0xf8] sm:$0xff]  ;;  %v5342_v37 = vsel %vm563_vm0, 1.0, %v5211_v36  ;;  %v829_v40 = vmul.f32 0.001, %v5347_v39 }
  0x13   :  { %v63_v32 = vld [vmem:[%s9352_s2 + $0xf0] sm:$0xff]  ;;  %v830_v41 = vmul.f32 0.0, %v5342_v37  ;;  %v5354_v42 = vld [vmem:[%s9351_s1 + $0x1] ss:$0 sm:$0xff]  ;;  %v5359_v43 = vld [vmem:[%s9351_s1] ss:$0 sm:$0xff] }
  0x14   :  { %v5364_v47 = vld [vmem:[%s9350_s0] sm:$0xff]  ;;  %v5373_v54 = vld [vmem:[%s9350_s0 + $0x8] sm:$0xff]  ;;  %vm540_vm5 = vcmp.eq.s32.totalorder %v5333_v34, 4  ;;  %vm542_vm6 = vcmp.eq.s32.totalorder %v5333_v34, 5  ;;  %vm544_vm7 = vcmp.eq.s32.totalorder %v5333_v34, 6  ;;  %vm546_vm10 = vcmp.eq.s32.totalorder %v5333_v34, 7 }
  0x15   :  { %v831_v44 = vadd.f32 %v830_v41, %v829_v40  ;;  %v5107_v58 = vld [vmem:[%s9351_s1 + $0x2] ss:$0 sm:$0xff]  ;;  %v5108_v7 = vld [vmem:[%s9351_s1 + $0x3] ss:$0 sm:$0xff]  ;;  %vm549_vm11 = vcmp.eq.s32.totalorder %v5336_v35, 8  ;;  %vm551_vm12 = vcmp.eq.s32.totalorder %v5336_v35, 9 }
  0x16   :  { %122 = vperm.xlu1 %5145, %v44_v11   ;;  %117 = vperm.xlu0 %5144, %v43_v12   ;;  %vm553_vm13 = vcmp.eq.s32.totalorder %v5336_v35, 10 }
  0x17   :  { %v832_v50 = vrot.slane %v831_v44, 4 }
  0x19   :  { %v833_v59 = vadd.f32 %v832_v50, %v831_v44 }
  0x1a   :  { %132 = vperm.xlu1 %5145, %v46_v13   ;;  %127 = vperm.xlu0 %5144, %v45_v14  }
  0x1b   :  { %v834_v6 = vrot.slane %v833_v59, 2 }
  0x1e   :  { %142 = vperm.xlu1 %5145, %v48_v15   ;;  %137 = vperm.xlu0 %5144, %v47_v16  }
  0x22   :  { %152 = vperm.xlu1 %5145, %v50_v17   ;;  %147 = vperm.xlu0 %5144, %v49_v18  }
  0x26   :  { %162 = vperm.xlu1 %5145, %v52_v19   ;;  %157 = vperm.xlu0 %5144, %v51_v20   ;;  %v5398_v19 = vadd.f32 %v834_v6, %v833_v59 }
  0x28   :  { %v836_v36 = vrot.slane %v5398_v19, 1 }
  0x2a   :  { %172 = vperm.xlu1 %5145, %v54_v21   ;;  %167 = vperm.xlu0 %5144, %v53_v22  }
  0x2e   :  { %182 = vperm.xlu1 %5145, %v56_v23   ;;  %177 = vperm.xlu0 %5144, %v55_v24  }
  0x32   :  { %192 = vperm.xlu1 %5145, %v58_v25   ;;  %187 = vperm.xlu0 %5144, %v57_v26   ;;  %v5109_v25 = vld [vmem:[%s9351_s1 + $0x4] ss:$0 sm:$0xff] }
  0x36   :  { %202 = vperm.xlu1 %5145, %v60_v27   ;;  %197 = vperm.xlu0 %5144, %v59_v28  }
  0x3a   :  { %212 = vperm.xlu1 %5145, %v62_v29   ;;  %207 = vperm.xlu0 %5144, %v61_v30  }
  0x3e   :  { %222 = vperm.xlu1 %5145, %v64_v31   ;;  %217 = vperm.xlu0 %5144, %v63_v32  }
  0x81   :  { %v78_v45 = vpop.permute.xlu1 %77  ;;  %v68_v46 = vpop.permute.xlu0 %67 }
  0x82   :  { %v323_v48 = vmul.f32 %v5354_v42, %v78_v45  ;;  %v321_v49 = vmul.f32 %v5359_v43, %v68_v46  ;;  %v5110_v45 = vld [vmem:[%s9351_s1 + $0x5] ss:$0 sm:$0xff] }
  0x84   :  { %v355_v51 = vmul.f32 %v323_v48, %v5364_v47  ;;  %v353_v52 = vmul.f32 %v321_v49, %v5364_v47 }
  0x85   :  { %v83_v53 = vpop.permute.xlu1 %82  ;;  %v73_v55 = vpop.permute.xlu0 %72 }
  0x86   :  { %v324_v56 = vmul.f32 %v5354_v42, %v83_v53  ;;  %v322_v57 = vmul.f32 %v5359_v43, %v73_v55  ;;  %v5380_v60 = vmax.f32 %v355_v51, 0.001  ;;  %v5386_v63 = vmax.f32 %v353_v52, 0.001 }
  0x88   :  { %v5383_v61 = vmul.f32 %v324_v56, %v5373_v54  ;;  %v354_v62 = vmul.f32 %v322_v57, %v5373_v54 }
  0x89   :  { %v93_v0 = vpop.permute.xlu1 %92  ;;  %v88_v1 = vpop.permute.xlu0 %87 }
  0x8a   :  { %v388_v2 = vmax.f32 %v5383_v61, 0.001  ;;  %v386_v3 = vmax.f32 %v354_v62, 0.001  ;;  %v326_v4 = vmul.f32 %v5107_v58, %v93_v0  ;;  %v325_v5 = vmul.f32 %v5107_v58, %v88_v1 }
  0x8c   :  { %v424_v8 = vadd.f32 %v388_v2, %v5380_v60  ;;  %v417_v9 = vadd.f32 %v386_v3, %v5386_v63  ;;  %v358_v10 = vmul.f32 %v326_v4, %v5373_v54  ;;  %v357_v11 = vmul.f32 %v325_v5, %v5364_v47 }
  0x8d   :  { %v103_v12 = vpop.permute.xlu1 %102  ;;  %v98_v13 = vpop.permute.xlu0 %97  ;;  %v5427_v51 = vsel %vm563_vm0, %v5359_v43, %v386_v3 }
  0x8e   :  { %v425_v14 = vrot.slane %v424_v8, 4  ;;  %v418_v15 = vrot.slane %v417_v9, 4  ;;  %v328_v16 = vmul.f32 %v5108_v7, %v103_v12  ;;  %v327_v17 = vmul.f32 %v5108_v7, %v98_v13 }
  0x8f   :  { %v390_v18 = vmax.f32 %v358_v10, 0.001  ;;  %v5400_v20 = vmax.f32 %v357_v11, 0.001 }
  0x90   :  { %v426_v21 = vadd.f32 %v425_v14, %v424_v8  ;;  %v419_v22 = vadd.f32 %v418_v15, %v417_v9  ;;  %v360_v23 = vmul.f32 %v328_v16, %v5373_v54  ;;  %v359_v24 = vmul.f32 %v327_v17, %v5364_v47  ;;  %v5111_v9 = vld [vmem:[%s9351_s1 + $0x6] ss:$0 sm:$0xff] }
  0x91   :  { %v5410_v26 = vsel %vm563_vm0, %v5107_v58, %v390_v18  ;;  %v431_v27 = vadd.f32 %v390_v18, %v5400_v20  ;;  %v113_v28 = vpop.permute.xlu1 %112  ;;  %v108_v29 = vpop.permute.xlu0 %107 }
  0x92   :  { %v427_v30 = vrot.slane %v426_v21, 2  ;;  %v420_v31 = vrot.slane %v419_v22, 2  ;;  %v392_v32 = vmax.f32 %v360_v23, 0.001  ;;  %v5413_v33 = vmax.f32 %v359_v24, 0.001 }
  0x93   :  { %v432_v40 = vrot.slane %v431_v27, 4  ;;  %v330_v41 = vmul.f32 %v5109_v25, %v113_v28  ;;  %v329_v44 = vmul.f32 %v5109_v25, %v108_v29 }
  0x94   :  { %v428_v46 = vadd.f32 %v427_v30, %v426_v21  ;;  %v421_v48 = vadd.f32 %v420_v31, %v419_v22  ;;  %v5421_v49 = vsel %vm563_vm0, %v5108_v7, %v392_v32  ;;  %v438_v50 = vadd.f32 %v392_v32, %v5413_v33  ;;  %v5112_v31 = vld [vmem:[%s9351_s1 + $0x7] ss:$0 sm:$0xff] }
  0x95   :  { %9550 = vst [vmem:[#allocation9_spill] sm:$0xff] %v5421_v49  ;;  %v433_v52 = vadd.f32 %v432_v40, %v431_v27  ;;  %v362_v53 = vmul.f32 %v330_v41, %v5373_v54  ;;  %v361_v55 = vmul.f32 %v329_v44, %v5364_v47  ;;  %v123_v56 = vpop.permute.xlu1 %122  ;;  %v118_v57 = vpop.permute.xlu0 %117  ;;  %v821_v32 = vmul.f32 0.0, %v5427_v51 }
  0x96   :  { %v429_v58 = vrot.slane %v428_v46, 1  ;;  %v422_v59 = vrot.slane %v421_v48, 1  ;;  %v439_v62 = vrot.slane %v438_v50, 4  ;;  %v332_v0 = vmul.f32 %v5110_v45, %v123_v56 }
  0x97   :  { %v434_v1 = vrot.slane %v433_v52, 2  ;;  %v394_v4 = vmax.f32 %v362_v53, 0.001  ;;  %v5432_v5 = vmax.f32 %v361_v55, 0.001  ;;  %v331_v6 = vmul.f32 %v5110_v45, %v118_v57 }
  0x98   :  { %v430_v43 = vadd.f32 %v429_v58, %v428_v46  ;;  %v423_v3 = vadd.f32 %v422_v59, %v421_v48  ;;  %v440_v7 = vadd.f32 %v439_v62, %v438_v50  ;;  %v364_v8 = vmul.f32 %v332_v0, %v5373_v54 }
  0x99   :  { %v435_v10 = vadd.f32 %v434_v1, %v433_v52  ;;  %v5441_v11 = vsel %vm563_vm0, %v5109_v25, %v394_v4  ;;  %v445_v12 = vadd.f32 %v394_v4, %v5432_v5  ;;  %v363_v13 = vmul.f32 %v331_v6, %v5364_v47  ;;  %v133_v14 = vpop.permute.xlu1 %132  ;;  %v128_v15 = vpop.permute.xlu0 %127 }
  0x9a   :  { %v598_v16 = vsub.f32 %v5380_v60, %v430_v43  ;;  %v596_v17 = vsub.f32 %v5386_v63, %v423_v3  ;;  %v441_v18 = vrot.slane %v440_v7, 2  ;;  %v396_v21 = vmax.f32 %v364_v8, 0.001  ;;  %v5485_v3 = vld [vmem:[%s9351_s1 + $0x8] ss:$0 sm:$0xff] }
  0x9b   :  { %v436_v22 = vrot.slane %v435_v10, 1  ;;  %v446_v23 = vrot.slane %v445_v12, 4  ;;  %v5447_v24 = vmax.f32 %v363_v13, 0.001  ;;  %v334_v27 = vmul.f32 %v5111_v9, %v133_v14 }
  0x9c   :  { %v5452_v25 = vsel %vm534_vm2, %v598_v16, %v5380_v60  ;;  %v5457_v28 = vsel %vm532_vm1, %v596_v17, %v5386_v63  ;;  %v442_v29 = vadd.f32 %v441_v18, %v440_v7  ;;  %v5461_v30 = vsel %vm563_vm0, %v5110_v45, %v396_v21 }
  0x9d   :  { %762 = vst [vmem:[#allocation2 + $0x10] sm:$0xff] %v5452_v25  ;;  %760 = vst [vmem:[#allocation2] sm:$0xff] %v5457_v28  ;;  %v820_v60 = vmul.f32 %v5347_v39, %v5457_v28  ;;  %v437_v63 = vadd.f32 %v436_v22, %v435_v10  ;;  %v447_v40 = vadd.f32 %v446_v23, %v445_v12  ;;  %v143_v41 = vpop.permute.xlu1 %142  ;;  %v138_v44 = vpop.permute.xlu0 %137  ;;  %vm555_vm1 = vcmp.eq.s32.totalorder %v5336_v35, 11 }
  0x9e   :  { %v443_v46 = vrot.slane %v442_v29, 1  ;;  %v452_v45 = vadd.f32 %v396_v21, %v5447_v24  ;;  %v366_v48 = vmul.f32 %v334_v27, %v5373_v54  ;;  %v333_v50 = vmul.f32 %v5111_v9, %v128_v15 }
  0x9f   :  { %v822_v52 = vadd.f32 %v821_v32, %v820_v60  ;;  %v600_v53 = vsub.f32 %v5400_v20, %v437_v63  ;;  %v448_v55 = vrot.slane %v447_v40, 2  ;;  %v336_v56 = vmul.f32 %v5112_v31, %v143_v41 }
  0xa0   :  { %v444_v57 = vadd.f32 %v443_v46, %v442_v29  ;;  %v453_v58 = vrot.slane %v452_v45, 4  ;;  %v398_v59 = vmax.f32 %v366_v48, 0.001  ;;  %v365_v62 = vmul.f32 %v333_v50, %v5364_v47 }
  0xa1   :  { %v823_v0 = vrot.slane %v822_v52, 4  ;;  %v5479_v1 = vsel %vm536_vm3, %v600_v53, %v5400_v20  ;;  %v449_v4 = vadd.f32 %v448_v55, %v447_v40  ;;  %v368_v6 = vmul.f32 %v336_v56, %v5373_v54  ;;  %v153_v43 = vpop.permute.xlu1 %152  ;;  %v148_v7 = vpop.permute.xlu0 %147  ;;  %v5526_v56 = vld [vmem:[%s9351_s1 + $0xa] ss:$0 sm:$0xff] }
  0xa2   :  { %764 = vst [vmem:[#allocation2 + $0x20] sm:$0xff] %v5479_v1  ;;  %v602_v8 = vsub.f32 %v5413_v33, %v444_v57  ;;  %v454_v10 = vadd.f32 %v453_v58, %v452_v45  ;;  %v5491_v12 = vsel %vm563_vm0, %v5111_v9, %v398_v59  ;;  %v5493_v20 = vmax.f32 %v365_v62, 0.001  ;;  %v5506_v9 = vld [vmem:[%s9351_s1 + $0x9] ss:$0 sm:$0xff] }
  0xa3   :  { %v824_v13 = vadd.f32 %v823_v0, %v822_v52  ;;  %v450_v14 = vrot.slane %v449_v4, 1  ;;  %v400_v15 = vmax.f32 %v368_v6, 0.001  ;;  %v335_v16 = vmul.f32 %v5112_v31, %v138_v44 }
  0xa4   :  { %v5499_v17 = vsel %vm538_vm4, %v602_v8, %v5413_v33  ;;  %v455_v18 = vrot.slane %v454_v10, 2  ;;  %v459_v21 = vadd.f32 %v398_v59, %v5493_v20  ;;  %v338_v22 = vmul.f32 %v5485_v3, %v153_v43 }
  0xa5   :  { %v825_v23 = vrot.slane %v824_v13, 2  ;;  %766 = vst [vmem:[#allocation2 + $0x30] sm:$0xff] %v5499_v17  ;;  %v451_v27 = vadd.f32 %v450_v14, %v449_v4  ;;  %v5511_v29 = vsel %vm563_vm0, %v5112_v31, %v400_v15  ;;  %v367_v33 = vmul.f32 %v335_v16, %v5364_v47  ;;  %v163_v60 = vpop.permute.xlu1 %162  ;;  %v158_v32 = vpop.permute.xlu0 %157 }
  0xa6   :  { %v456_v63 = vadd.f32 %v455_v18, %v454_v10  ;;  %v460_v40 = vrot.slane %v459_v21, 4  ;;  %v370_v41 = vmul.f32 %v338_v22, %v5373_v54  ;;  %v337_v44 = vmul.f32 %v5485_v3, %v148_v7 }
  0xa7   :  { %v826_v46 = vadd.f32 %v825_v23, %v824_v13  ;;  %v604_v45 = vsub.f32 %v5432_v5, %v451_v27  ;;  %v5517_v48 = vmax.f32 %v367_v33, 0.001  ;;  %v340_v50 = vmul.f32 %v5506_v9, %v163_v60 }
  0xa8   :  { %v457_v52 = vrot.slane %v456_v63, 1  ;;  %v461_v31 = vadd.f32 %v460_v40, %v459_v21  ;;  %v5520_v53 = vmax.f32 %v370_v41, 0.001  ;;  %v369_v55 = vmul.f32 %v337_v44, %v5364_v47 }
  0xa9   :  { %v827_v57 = vrot.slane %v826_v46, 1  ;;  %v5531_v58 = vsel %vm540_vm5, %v604_v45, %v5432_v5  ;;  %v466_v59 = vadd.f32 %v400_v15, %v5517_v48  ;;  %v372_v62 = vmul.f32 %v340_v50, %v5373_v54  ;;  %v173_v0 = vpop.permute.xlu1 %172  ;;  %v168_v4 = vpop.permute.xlu0 %167 }
  0xaa   :  { %768 = vst [vmem:[#allocation2 + $0x40] sm:$0xff] %v5531_v58  ;;  %v458_v6 = vadd.f32 %v457_v52, %v456_v63  ;;  %v462_v43 = vrot.slane %v461_v31, 2  ;;  %v5537_v7 = vmax.f32 %v369_v55, 0.001  ;;  %v339_v8 = vmul.f32 %v5506_v9, %v158_v32 }
  0xab   :  { %v828_v10 = vadd.f32 %v827_v57, %v826_v46  ;;  %v467_v13 = vrot.slane %v466_v59, 4  ;;  %v5540_v5 = vmax.f32 %v372_v62, 0.001  ;;  %v342_v14 = vmul.f32 %v5526_v56, %v173_v0  ;;  %v5558_v46 = vld [vmem:[%s9351_s1 + $0xb] ss:$0 sm:$0xff] }
  0xac   :  { %v606_v15 = vsub.f32 %v5447_v24, %v458_v6  ;;  %v463_v16 = vadd.f32 %v462_v43, %v461_v31  ;;  %v473_v18 = vadd.f32 %v5520_v53, %v5537_v7  ;;  %776 = vst [vmem:[#allocation2 + $0x80] sm:$0xff] %v5537_v7  ;;  %v371_v21 = vmul.f32 %v339_v8, %v5364_v47 }
  0xad   :  { %v838_v22 = vand.u32 2147483647, %v828_v10  ;;  %vm840_vm8 = vcmp.lt.f32.partialorder %v828_v10, 0.0  ;;  %v468_v23 = vadd.f32 %v467_v13, %v466_v59  ;;  %v374_v27 = vmul.f32 %v342_v14, %v5373_v54  ;;  %v178_v33 = vpop.permute.xlu0 %177  ;;  %v183_v44 = vpop.permute.xlu1 %182 }
  0xae   :  { %v9356_v60 = vmov 1e-12   ;;  %v5553_v63 = vsel %vm542_vm6, %v606_v15, %v5447_v24  ;;  %v464_v40 = vrot.slane %v463_v16, 1  ;;  %v474_v41 = vrot.slane %v473_v18, 4  ;;  %v5578_v15 = vld [vmem:[%s9351_s1 + $0xc] ss:$0 sm:$0xff] }
  0xaf   :  { %v841_v32 = vsel %vm840_vm8, -1e-12, %v9356_v60  ;;  %vm839_vm9 = vcmp.lt.f32.partialorder %v838_v22, 1e-12  ;;  %770 = vst [vmem:[#allocation2 + $0x50] sm:$0xff] %v5553_v63  ;;  %v469_v45 = vrot.slane %v468_v23, 2  ;;  %v341_v52 = vmul.f32 %v5526_v56, %v168_v4 }
  0xb0   :  { %v5561_v50 = vmax.f32 %v371_v21, 0.001  ;;  %v842_v31 = vsel %vm839_vm9, %v841_v32, %v828_v10  ;;  %v465_v55 = vadd.f32 %v464_v40, %v463_v16  ;;  %v475_v24 = vadd.f32 %v474_v41, %v473_v18  ;;  %9551 = vst [vmem:[#allocation10_spill] sm:$0xff] %v5578_v15 }
  0xb1   :  { %v5564_v57 = vmax.f32 %v374_v27, 0.001  ;;  %5146 = vrcp.f32 %v842_v31  ;;  %v470_v59 = vadd.f32 %v469_v45, %v468_v23  ;;  %v373_v0 = vmul.f32 %v341_v52, %v5364_v47  ;;  %v188_v16 = vpop.permute.xlu0 %187  ;;  %v193_v27 = vpop.permute.xlu1 %192 }
  0xb2   :  { %v480_v62 = vadd.f32 %v5540_v5, %v5561_v50  ;;  %778 = vst [vmem:[#allocation2 + $0x90] sm:$0xff] %v5561_v50  ;;  %v608_v6 = vsub.f32 %v5493_v20, %v465_v55  ;;  %v476_v43 = vrot.slane %v475_v24, 2  ;;  %v344_v8 = vmul.f32 %v5558_v46, %v183_v44 }
  0xb3   :  { %v343_v4 = vmul.f32 %v5558_v46, %v178_v33  ;;  %v471_v10 = vrot.slane %v470_v59, 1  ;;  %v5573_v14 = vmax.f32 %v373_v0, 0.001  ;;  %v345_v41 = vmul.f32 %v5578_v15, %v188_v16 }
  0xb4   :  { %v481_v13 = vrot.slane %v480_v62, 4  ;;  %v5583_v18 = vsel %vm544_vm7, %v608_v6, %v5493_v20  ;;  %v477_v21 = vadd.f32 %v476_v43, %v475_v24  ;;  %v376_v22 = vmul.f32 %v344_v8, %v5373_v54  ;;  %v801_v6 = vld [vmem:[#allocation2 + $0x10] sm:$0x1] }
  0xb5   :  { %v375_v23 = vmul.f32 %v343_v4, %v5364_v47  ;;  %772 = vst [vmem:[#allocation2 + $0x60] sm:$0xff] %v5583_v18  ;;  %v472_v33 = vadd.f32 %v471_v10, %v470_v59  ;;  %v5590_v32 = vadd.f32 %v5564_v57, %v5573_v14  ;;  %780 = vst [vmem:[#allocation2 + $0xa0] sm:$0xff] %v5573_v14  ;;  %v5618_v43 = vsub.s32 0, %v5333_v34  ;;  %v800_v4 = vld [vmem:[#allocation2] sm:$0x1]  ;;  %v203_v49 = vpop.permute.xlu1 %202 }
  0xb6   :  { %v478_v40 = vrot.slane %v477_v21, 1  ;;  %v5594_v20 = vmax.f32 %v376_v22, 0.001  ;;  %v482_v45 = vadd.f32 %v481_v13, %v480_v62  ;;  %v346_v31 = vmul.f32 %v5578_v15, %v193_v27  ;;  %v802_v13 = vld [vmem:[#allocation2 + $0x20] sm:$0x1] }
  0xb7   :  { %v610_v44 = vsub.f32 %v5517_v48, %v472_v33  ;;  %v5598_v52 = vmax.f32 %v375_v23, 0.001  ;;  %v837_v55 = vadd.f32 %v836_v36, %v5398_v19  ;;  %v377_v59 = vmul.f32 %v345_v41, %v5364_v47  ;;  %9552 = vst [vmem:[#allocation11_spill] sm:$0xff] %v5618_v43  ;;  %v804_v41 = vld [vmem:[#allocation2 + $0x40] sm:$0x1] }
  0xb8   :  { %v5604_v24 = vadd.f32 %v478_v40, %v477_v21  ;;  %v5634_v10 = vsub.f32 %v5457_v28, %v5347_v39  ;;  %v483_v16 = vrot.slane %v482_v45, 2  ;;  %v378_v21 = vmul.f32 %v346_v31, %v5373_v54  ;;  %v803_v40 = vld [vmem:[#allocation2 + $0x30] sm:$0x1] }
  0xb9   :  { %v5610_v0 = vsel %vm546_vm10, %v610_v44, %v5517_v48  ;;  %v5614_v62 = vadd.f32 %v5594_v20, %v5598_v52  ;;  %782 = vst [vmem:[#allocation2 + $0xb0] sm:$0xff] %v5598_v52  ;;  %v5623_v36 = vmax.f32 %v377_v59, 0.001  ;;  %v5630_v48 = vsel %vm534_vm2, 1.0, %v9354_v38  ;;  %v805_v44 = vld [vmem:[#allocation2 + $0x50] sm:$0x1] }
  0xba   :  { %774 = vst [vmem:[#allocation2 + $0x70] sm:$0xff] %v5610_v0  ;;  %9553 = vst [vmem:[#allocation12_spill] sm:$0xff] %v5634_v10  ;;  %v731_v39 = vsel %vm563_vm0, %v5354_v42, %v388_v2  ;;  %v484_v2 = vadd.f32 %v483_v16, %v482_v45  ;;  %vm557_vm2 = vcmp.eq.s32.totalorder %v5336_v35, 12  ;;  %vm559_vm9 = vcmp.eq.s32.totalorder %v5336_v35, 13 }
  0xbb   :  { %v5625_v8 = vpop.eup %5146  ;;  %784 = vst [vmem:[#allocation2 + $0xc0] sm:$0xff] %v5623_v36 }
  0xbc   :  { %v879_v22 = vmul.f32 %v5625_v8, %v800_v4  ;;  %v880_v23 = vmul.f32 %v5625_v8, %v801_v6  ;;  %v881_v27 = vmul.f32 %v5625_v8, %v802_v13  ;;  %v1055_v33 = vmul.f32 %v5625_v8, %v837_v55 }
  0xbd   :  { %v882_v31 = vmul.f32 %v5625_v8, %v803_v40  ;;  %v883_v59 = vmul.f32 %v5625_v8, %v804_v41  ;;  %v884_v6 = vmul.f32 %v5625_v8, %v805_v44  ;;  %v488_v40 = vrot.slane %v5590_v32, 4 }
  0xbe   :  { %v5651_v4 = vrot.slane %v879_v22, %v5618_v43  ;;  %v902_v55 = vrot.slane %v880_v23, %v5618_v43  ;;  %v5655_v13 = vrot.slane %v881_v27, %v5618_v43  ;;  %v5658_v61 = vmul.f32 %v1055_v33, %v5634_v10 }
  0xbf   :  { %v1057_v42 = vmul.f32 %v1055_v33, %v5427_v51  ;;  %v5663_v41 = vmax.f32 %v378_v21, 0.001  ;;  %v910_v44 = vrot.slane %v882_v31, %v5618_v43  ;;  %v914_v16 = vrot.slane %v883_v59, %v5618_v43 }
  0xc0   :  { %v959_v22 = vmul.f32 %v5651_v4, %v5634_v10  ;;  %v961_v23 = vmul.f32 %v902_v55, %v5634_v10  ;;  %v962_v27 = vmul.f32 %v902_v55, %v5427_v51  ;;  %v963_v38 = vmul.f32 %v5655_v13, %v5634_v10  ;;  %v806_v55 = vld [vmem:[#allocation2 + $0x60] sm:$0x1] }
  0xc1   :  { %v5674_v45 = vsub.f32 %v5342_v37, %v1057_v42  ;;  %v918_v31 = vrot.slane %v884_v6, %v5618_v43  ;;  %v885_v60 = vmul.f32 %v5625_v8, %v806_v55  ;;  %v485_v37 = vrot.slane %v484_v2, 1 }
  0xc2   :  { %v5678_v21 = vsub.f32 %v5457_v28, %v959_v22  ;;  %v5681_v33 = vsub.f32 %v5452_v25, %v961_v23  ;;  %v5683_v19 = vsub.f32 %v731_v39, %v962_v27  ;;  %v5687_v15 = vsub.f32 %v5479_v1, %v963_v38 }
  0xc3   :  { %v5691_v42 = vadd.f32 %v488_v40, %v5590_v32  ;;  %v9556_v39 = vsub.f32 0.001, %v5658_v61  ;;  %v965_v1 = vmul.f32 %v910_v44, %v5634_v10  ;;  %v1097_v32 = vmul.f32 0.0, %v5674_v45 }
  0xc4   :  { %9554 = vst [vmem:[#allocation13_spill] sm:$0xff] %v5683_v19  ;;  %9555 = vst [vmem:[#allocation14_spill] sm:$0xff] %v5687_v15  ;;  %v1087_v25 = vmul.f32 %v5630_v48, %v5681_v33  ;;  %v1088_v28 = vmul.f32 0.0, %v5683_v19  ;;  %v5705_v59 = vmul.f32 %v910_v44, %v5427_v51  ;;  %v967_v6 = vmul.f32 %v914_v16, %v5634_v10  ;;  %v808_v44 = vld [vmem:[#allocation2 + $0x80] sm:$0x1] }
  0xc5   :  { %1023 = vst [vmem:[#allocation2] sm:$0xff] %v5678_v21  ;;  %1025 = vst [vmem:[#allocation2 + $0x10] sm:$0xff] %v5681_v33  ;;  %v1096_v38 = vmul.f32 %v5630_v48, %v9556_v39  ;;  %v5709_v40 = vmul.f32 %v914_v16, %v5427_v51  ;;  %v5713_v23 = vsub.f32 %v5499_v17, %v965_v1  ;;  %v807_v39 = vld [vmem:[#allocation2 + $0x70] sm:$0x1] }
  0xc6   :  { %1027 = vst [vmem:[#allocation2 + $0x20] sm:$0xff] %v5687_v15  ;;  %9557 = vst [vmem:[#allocation15_spill] sm:$0xff] %v5705_v59  ;;  %v1089_v22 = vadd.f32 %v1088_v28, %v1087_v25  ;;  %v969_v27 = vmul.f32 %v918_v31, %v5634_v10  ;;  %v5717_v55 = vmul.f32 %v918_v31, %v5427_v51  ;;  %v490_v25 = vrot.slane %v5691_v42, 2 }
  0xc7   :  { %v5722_v15 = vsub.f32 %v5531_v58, %v967_v6  ;;  %1029 = vst [vmem:[#allocation2 + $0x30] sm:$0xff] %v5713_v23  ;;  %v922_v1 = vrot.slane %v885_v60, %v5618_v43  ;;  %v1098_v59 = vadd.f32 %v1097_v32, %v1096_v38  ;;  %v886_v58 = vmul.f32 %v5625_v8, %v807_v39 }
  0xc8   :  { %v1090_v28 = vrot.slane %v1089_v22, 4  ;;  %v5729_v17 = vsub.f32 %v5553_v63, %v969_v27  ;;  %v9558_v6 = vsub.f32 %v5520_v53, %v5604_v24  ;;  %v887_v63 = vmul.f32 %v5625_v8, %v808_v44 }
  0xc9   :  { %1031 = vst [vmem:[#allocation2 + $0x40] sm:$0xff] %v5722_v15  ;;  %v971_v60 = vmul.f32 %v922_v1, %v5634_v10  ;;  %v5746_v38 = vmul.f32 %v922_v1, %v5427_v51  ;;  %v926_v24 = vrot.slane %v886_v58, %v5618_v43 }
  0xca   :  { %v709_v16 = vsel %vm549_vm11, %v9558_v6, %v5520_v53  ;;  %v1091_v27 = vadd.f32 %v1090_v28, %v1089_v22  ;;  %1033 = vst [vmem:[#allocation2 + $0x50] sm:$0xff] %v5729_v17  ;;  %v930_v39 = vrot.slane %v887_v63, %v5618_v43  ;;  %v486_v53 = vadd.f32 %v485_v37, %v484_v2  ;;  %v809_v6 = vld [vmem:[#allocation2 + $0x90] sm:$0x1] }
  0xcb   :  { %9559 = vst [vmem:[#allocation16_spill] sm:$0xff] %v5746_v38  ;;  %v5751_v32 = vsel %vm563_vm0, %v5485_v3, %v709_v16  ;;  %v495_v22 = vrot.slane %v5614_v62, 4  ;;  %v5757_v28 = vsub.f32 %v5583_v18, %v971_v60  ;;  %v888_v31 = vmul.f32 %v5625_v8, %v809_v6  ;;  %v5765_v3 = vld [vmem:[%s9351_s1 + $0xd] ss:$0 sm:$0xff] }
  0xcc   :  { %9560 = vst [vmem:[#allocation17_spill] sm:$0xff] %v5751_v32  ;;  %v1092_v44 = vrot.slane %v1091_v27, 2  ;;  %9561 = vst [vmem:[#allocation18_spill] sm:$0xff] %v5765_v3  ;;  %v1099_v16 = vrot.slane %v1098_v59, 4  ;;  %v973_v2 = vmul.f32 %v926_v24, %v5634_v10  ;;  %v5769_v37 = vmul.f32 %v926_v24, %v5427_v51 }
  0xcd   :  { %v975_v18 = vmul.f32 %v930_v39, %v5634_v10  ;;  %1035 = vst [vmem:[#allocation2 + $0x60] sm:$0xff] %v5757_v28  ;;  %v5774_v63 = vmul.f32 %v930_v39, %v5427_v51  ;;  %v615_v60 = vsub.f32 %v5540_v5, %v486_v53  ;;  %v934_v6 = vrot.slane %v888_v31, %v5618_v43  ;;  %v810_v39 = vld [vmem:[#allocation2 + $0xa0] sm:$0x1] }
  0xce   :  { %v1093_v58 = vadd.f32 %v1092_v44, %v1091_v27  ;;  %v5780_v1 = vsub.f32 %v5610_v0, %v973_v2  ;;  %v348_v27 = vmul.f32 %v5765_v3, %v203_v49  ;;  %v811_v0 = vld [vmem:[#allocation2 + $0xb0] sm:$0x1]  ;;  %v1100_v2 = vadd.f32 %v1099_v16, %v1098_v59 }
  0xcf   :  { %9562 = vst [vmem:[#allocation19_spill] sm:$0xff] %v5774_v63  ;;  %v5785_v38 = vsub.f32 %v5537_v7, %v975_v18  ;;  %v711_v31 = vsel %vm551_vm12, %v615_v60, %v5540_v5  ;;  %v977_v53 = vmul.f32 %v934_v6, %v5634_v10  ;;  %v5802_v7 = vmul.f32 %v934_v6, %v5427_v51 }
  0xd0   :  { %v1094_v44 = vrot.slane %v1093_v58, 1  ;;  %1037 = vst [vmem:[#allocation2 + $0x70] sm:$0xff] %v5780_v1  ;;  %v5799_v49 = vsel %vm563_vm0, %v5506_v9, %v711_v31  ;;  %v491_v18 = vadd.f32 %v490_v25, %v5691_v42  ;;  %v889_v59 = vmul.f32 %v5625_v8, %v810_v39  ;;  %v198_v31 = vpop.permute.xlu0 %197 }
  0xd1   :  { %1039 = vst [vmem:[#allocation2 + $0x80] sm:$0xff] %v5785_v38  ;;  %9563 = vst [vmem:[#allocation20_spill] sm:$0xff] %v5799_v49  ;;  %v5806_v60 = vsub.f32 %v5561_v50, %v977_v53  ;;  %v496_v16 = vadd.f32 %v495_v22, %v5614_v62  ;;  %v890_v9 = vmul.f32 %v5625_v8, %v811_v0  ;;  %v1101_v62 = vrot.slane %v1100_v2, 2 }
  0xd2   :  { %9564 = vst [vmem:[#allocation21_spill] sm:$0xff] %v5802_v7  ;;  %v1095_v5 = vadd.f32 %v1094_v44, %v1093_v58  ;;  %v492_v63 = vrot.slane %v491_v18, 1  ;;  %v501_v6 = vadd.f32 %v5663_v41, %v5623_v36  ;;  %v938_v50 = vrot.slane %v889_v59, %v5618_v43  ;;  %v812_v7 = vld [vmem:[#allocation2 + $0xc0] sm:$0x1] }
  0xd3   :  { %9565 = vst [vmem:[#allocation22_spill] sm:$0xff] %v5806_v60  ;;  %1041 = vst [vmem:[#allocation2 + $0x90] sm:$0xff] %v5806_v60  ;;  %v497_v25 = vrot.slane %v496_v16, 2  ;;  %v9566_v58 = vmov 1e-12   ;;  %v942_v39 = vrot.slane %v890_v9, %v5618_v43 }
  0xd4   :  { %v1105_v42 = vand.u32 2147483647, %v1095_v5  ;;  %vm1107_vm14 = vcmp.lt.f32.partialorder %v1095_v5, 0.0  ;;  %v493_v22 = vadd.f32 %v492_v63, %v491_v18  ;;  %v979_v53 = vmul.f32 %v938_v50, %v5634_v10 }
  0xd5   :  { %v1108_v44 = vsel %vm1107_vm14, -1e-12, %v9566_v58  ;;  %v498_v0 = vadd.f32 %v497_v25, %v496_v16  ;;  %v502_v24 = vrot.slane %v501_v6, 4  ;;  %v5822_v60 = vmul.f32 %v938_v50, %v5427_v51 }
  0xd6   :  { %vm1106_vm15 = vcmp.lt.f32.partialorder %v1105_v42, 1e-12  ;;  %v617_v32 = vsub.f32 %v5564_v57, %v493_v22  ;;  %v981_v59 = vmul.f32 %v942_v39, %v5634_v10  ;;  %v5826_v58 = vsub.f32 %v5573_v14, %v979_v53  ;;  %v5838_v42 = vld [vmem:[%s9351_s1 + $0xe] ss:$0 sm:$0xff]  ;;  %v213_v53 = vpop.permute.xlu1 %212 }
  0xd7   :  { %v1109_v49 = vsel %vm1106_vm15, %v1108_v44, %v1095_v5  ;;  %v499_v63 = vrot.slane %v498_v0, 1  ;;  %v1102_v18 = vadd.f32 %v1101_v62, %v1100_v2  ;;  %v891_v5 = vmul.f32 %v5625_v8, %v812_v7  ;;  %9567 = vst [vmem:[#allocation23_spill] sm:$0xff] %v5838_v42 }
  0xd8   :  { %5148 = vrcp.f32 %v1109_v49  ;;  %v713_v16 = vsel %vm553_vm13, %v617_v32, %v5564_v57  ;;  %v5832_v9 = vsub.f32 %v5598_v52, %v981_v59  ;;  %v208_v49 = vpop.permute.xlu0 %207  ;;  %1043 = vst [vmem:[#allocation2 + $0xa0] sm:$0xff] %v5826_v58  ;;  %v503_v57 = vadd.f32 %v502_v24, %v501_v6 }
  0xd9   :  { %v5843_v14 = vsel %vm563_vm0, %v5526_v56, %v713_v16  ;;  %v500_v2 = vadd.f32 %v499_v63, %v498_v0  ;;  %v347_v52 = vmul.f32 %v5765_v3, %v198_v31  ;;  %v946_v7 = vrot.slane %v891_v5, %v5618_v43  ;;  %v1070_v63 = vld [vmem:[#allocation2 + $0x41] sm:$0x1]  ;;  %v9572_v3 = vld [vmem:[#allocation14_spill] sm:$0xff] }
  0xda   :  { %1045 = vst [vmem:[#allocation2 + $0xb0] sm:$0xff] %v5832_v9  ;;  %v380_v50 = vmul.f32 %v348_v27, %v5373_v54  ;;  %v960_v56 = vmul.f32 %v5651_v4, %v5427_v51  ;;  %v349_v6 = vmul.f32 %v5838_v42, %v208_v49  ;;  %v964_v31 = vmul.f32 %v5655_v13, %v5427_v51 }
  0xdb   :  { %v619_v25 = vsub.f32 %v5594_v20, %v500_v2  ;;  %v379_v24 = vmul.f32 %v347_v52, %v5364_v47  ;;  %v1103_v44 = vrot.slane %v1102_v18, 1  ;;  %v5861_v62 = vmul.f32 %v942_v39, %v5427_v51  ;;  %v1067_v52 = vld [vmem:[#allocation2 + $0x11] sm:$0x1] }
  0xdc   :  { %v983_v22 = vmul.f32 %v946_v7, %v5634_v10  ;;  %v504_v27 = vrot.slane %v503_v57, 2  ;;  %v381_v59 = vmul.f32 %v349_v6, %v5364_v47  ;;  %v992_v5 = vsub.f32 %v5427_v51, %v960_v56  ;;  %v1066_v47 = vld [vmem:[#allocation2 + $0x1] sm:$0x1] }
  0xdd   :  { %v715_v4 = vsel %vm555_vm1, %v619_v25, %v5594_v20  ;;  %v5867_v0 = vmax.f32 %v379_v24, 0.001  ;;  %v350_v20 = vmul.f32 %v5838_v42, %v213_v53  ;;  %v9568_v49 = vmov 0.0   ;;  %v1068_v6 = vld [vmem:[#allocation2 + $0x21] sm:$0x1] }
  0xde   :  { %v5873_v13 = vsel %vm563_vm0, %v5558_v46, %v715_v4  ;;  %v5876_v39 = vsub.f32 %v5623_v36, %v983_v22  ;;  %v5882_v16 = vmax.f32 %v381_v59, 0.001  ;;  %v5888_v46 = vsel %vm536_vm3, 1.0, %v9568_v49  ;;  %v1069_v59 = vld [vmem:[#allocation2 + $0x31] sm:$0x1] }
  0xdf   :  { %786 = vst [vmem:[#allocation2 + $0xd0] sm:$0xff] %v5867_v0  ;;  %v1104_v2 = vadd.f32 %v1103_v44, %v1102_v18  ;;  %v5895_v25 = vsub.f32 %v5681_v33, %v5630_v48  ;;  %v996_v24 = vsub.f32 %v5410_v26, %v964_v31  ;;  %v505_v56 = vadd.f32 %v504_v27, %v503_v57  ;;  %v1072_v42 = vld [vmem:[#allocation2 + $0x61] sm:$0x1] }
  0xe0   :  { %1047 = vst [vmem:[#allocation2 + $0xc0] sm:$0xff] %v5876_v39  ;;  %v5898_v22 = vmax.f32 %v380_v50, 0.001  ;;  %788 = vst [vmem:[#allocation2 + $0xe0] sm:$0xff] %v5882_v16  ;;  %v5908_v57 = vmul.f32 %v946_v7, %v5427_v51  ;;  %v382_v50 = vmul.f32 %v350_v20, %v5373_v54 }
  0xe2   :  { %v5891_v36 = vpop.eup %5148 }
  0xe3   :  { %v1146_v53 = vmul.f32 %v5891_v36, %v1066_v47  ;;  %v1147_v18 = vmul.f32 %v5891_v36, %v1067_v52  ;;  %v1148_v44 = vmul.f32 %v5891_v36, %v1068_v6  ;;  %v1322_v4 = vmul.f32 %v5891_v36, %v1104_v2  ;;  %v1071_v52 = vld [vmem:[#allocation2 + $0x51] sm:$0x1] }
  0xe4   :  { %v1149_v48 = vmul.f32 %v5891_v36, %v1069_v59  ;;  %v1150_v26 = vmul.f32 %v5891_v36, %v1070_v63  ;;  %v1151_v7 = vmul.f32 %v5891_v36, %v1071_v52  ;;  %v506_v63 = vrot.slane %v505_v56, 1 }
  0xe5   :  { %v1165_v31 = vrot.slane %v1146_v53, %v5618_v43  ;;  %v5913_v27 = vrot.slane %v1147_v18, %v5618_v43  ;;  %v1173_v47 = vrot.slane %v1148_v44, %v5618_v43  ;;  %v1323_v2 = vmul.f32 %v1322_v4, %v5895_v25 }
  0xe6   :  { %v1324_v6 = vmul.f32 %v1322_v4, %v5683_v19  ;;  %v5919_v59 = vrot.slane %v1149_v48, %v5618_v43  ;;  %v1181_v18 = vrot.slane %v1150_v26, %v5618_v43  ;;  %v9569_v4 = vsub.f32 0.001, %v5658_v61 }
  0xe7   :  { %v1226_v54 = vmul.f32 %v1165_v31, %v5895_v25  ;;  %v1227_v20 = vmul.f32 %v1165_v31, %v5683_v19  ;;  %v1228_v53 = vmul.f32 %v5913_v27, %v5895_v25  ;;  %v1230_v44 = vmul.f32 %v1173_v47, %v5895_v25 }
  0xe8   :  { %v1231_v32 = vmul.f32 %v1173_v47, %v5683_v19  ;;  %v5931_v48 = vsub.f32 %v9569_v4, %v1323_v2  ;;  %v5934_v52 = vsub.f32 %v5674_v45, %v1324_v6  ;;  %v1152_v26 = vmul.f32 %v5891_v36, %v1072_v42 }
  0xe9   :  { %v5937_v34 = vsub.f32 %v5678_v21, %v1226_v54  ;;  %v5939_v31 = vsub.f32 %v992_v5, %v1227_v20  ;;  %v5942_v49 = vsub.f32 %v5681_v33, %v1228_v53  ;;  %v5946_v47 = vsub.f32 %v9572_v3, %v1230_v44  ;;  %v218_v5 = vpop.permute.xlu0 %217 }
  0xea   :  { %9570 = vst [vmem:[#allocation24_spill] sm:$0xff] %v5931_v48  ;;  %9571 = vst [vmem:[#allocation25_spill] sm:$0xff] %v5934_v52  ;;  %v5948_v61 = vsub.f32 %v996_v24, %v1231_v32  ;;  %v1363_v45 = vmul.f32 %v5888_v46, %v5931_v48  ;;  %v1364_v2 = vmul.f32 0.0, %v5934_v52  ;;  %v1232_v21 = vmul.f32 %v5919_v59, %v5895_v25  ;;  %v5964_v32 = vld [vmem:[%s9351_s1 + $0xf] ss:$0 sm:$0xff] }
  0xeb   :  { %1290 = vst [vmem:[#allocation2] sm:$0xff] %v5937_v34  ;;  %1292 = vst [vmem:[#allocation2 + $0x10] sm:$0xff] %v5942_v49  ;;  %v1234_v33 = vmul.f32 %v1181_v18, %v5895_v25  ;;  %v1235_v42 = vmul.f32 %v1181_v18, %v5683_v19  ;;  %v5959_v3 = vadd.f32 %v506_v63, %v505_v56  ;;  %v5970_v20 = vmax.f32 %v382_v50, 0.001 }
  0xec   :  { %9573 = vst [vmem:[#allocation14_spill] sm:$0xff] %v5948_v61  ;;  %9574 = vst [vmem:[#allocation26_spill] sm:$0xff] %v5964_v32  ;;  %v1354_v24 = vmul.f32 %v5888_v46, %v5946_v47  ;;  %v1355_v6 = vmul.f32 0.0, %v5948_v61  ;;  %v1365_v54 = vadd.f32 %v1364_v2, %v1363_v45  ;;  %v5973_v53 = vsub.f32 %v5713_v23, %v1232_v21  ;;  %v1073_v45 = vld [vmem:[#allocation2 + $0x71] sm:$0x1] }
  0xed   :  { %1294 = vst [vmem:[#allocation2 + $0x20] sm:$0xff] %v5946_v47  ;;  %v5976_v56 = vsub.f32 %v5722_v15, %v1234_v33  ;;  %v9576_v63 = vsub.f32 %v5441_v11, %v5709_v40  ;;  %v5986_v44 = vadd.f32 %v5898_v22, %v5867_v0  ;;  %v1185_v50 = vrot.slane %v1151_v7, %v5618_v43  ;;  %v1074_v2 = vld [vmem:[#allocation2 + $0x81] sm:$0x1]  ;;  %v1075_v15 = vld [vmem:[#allocation2 + $0x91] sm:$0x1] }
  0xee   :  { %v1356_v4 = vadd.f32 %v1355_v6, %v1354_v24  ;;  %v1189_v23 = vrot.slane %v1152_v26, %v5618_v43  ;;  %v5991_v21 = vmul.f32 %v5964_v32, %v218_v5  ;;  %1296 = vst [vmem:[#allocation2 + $0x30] sm:$0xff] %v5973_v53  ;;  %v1153_v11 = vmul.f32 %v5891_v36, %v1073_v45 }
  0xef   :  { %9575 = vst [vmem:[#allocation27_spill] sm:$0xff] %v5976_v56  ;;  %v5981_v18 = vsub.f32 %v9576_v63, %v1235_v42  ;;  %1298 = vst [vmem:[#allocation2 + $0x40] sm:$0xff] %v5976_v56  ;;  %v1154_v40 = vmul.f32 %v5891_v36, %v1074_v2  ;;  %v1155_v33 = vmul.f32 %v5891_v36, %v1075_v15  ;;  %v1076_v42 = vld [vmem:[#allocation2 + $0xa1] sm:$0x1]  ;;  %v1366_v56 = vrot.slane %v1365_v54, 4 }
  0xf0   :  { %v621_v7 = vsub.f32 %v5663_v41, %v5959_v3  ;;  %v1357_v26 = vrot.slane %v1356_v4, 4  ;;  %v1236_v24 = vmul.f32 %v1185_v50, %v5895_v25  ;;  %v1237_v5 = vmul.f32 %v1185_v50, %v5683_v19 }
  0xf1   :  { %9577 = vst [vmem:[#allocation28_spill] sm:$0xff] %v5981_v18  ;;  %v1156_v6 = vmul.f32 %v5891_v36, %v1076_v42  ;;  %v1238_v63 = vmul.f32 %v1189_v23, %v5895_v25  ;;  %v1239_v18 = vmul.f32 %v1189_v23, %v5683_v19  ;;  %v1193_v45 = vrot.slane %v1153_v11, %v5618_v43  ;;  %v9580_v42 = vld [vmem:[#allocation16_spill] sm:$0xff] }
  0xf2   :  { %v1197_v2 = vrot.slane %v1154_v40, %v5618_v43  ;;  %v1358_v15 = vadd.f32 %v1357_v26, %v1356_v4  ;;  %v6008_v52 = vsub.f32 %v5729_v17, %v1236_v24  ;;  %v9578_v3 = vsub.f32 %v5461_v30, %v5717_v55 }
  0xf3   :  { %v6016_v50 = vsub.f32 %v5757_v28, %v1238_v63  ;;  %v9581_v23 = vsub.f32 %v5491_v12, %v9580_v42  ;;  %v1240_v11 = vmul.f32 %v1193_v45, %v5895_v25  ;;  %v1241_v4 = vmul.f32 %v1193_v45, %v5683_v19 }
  0xf4   :  { %v6013_v48 = vsub.f32 %v9578_v3, %v1237_v5  ;;  %v1359_v40 = vrot.slane %v1358_v15, 2  ;;  %1300 = vst [vmem:[#allocation2 + $0x50] sm:$0xff] %v6008_v52  ;;  %v1242_v17 = vmul.f32 %v1197_v2, %v5895_v25  ;;  %v1243_v30 = vmul.f32 %v1197_v2, %v5683_v19  ;;  %v9583_v2 = vld [vmem:[#allocation17_spill] sm:$0xff]  ;;  %v9584_v3 = vld [vmem:[#allocation19_spill] sm:$0xff] }
  0xf5   :  { %v6021_v32 = vsub.f32 %v9581_v23, %v1239_v18  ;;  %v509_v55 = vrot.slane %v5986_v44, 4  ;;  %1302 = vst [vmem:[#allocation2 + $0x60] sm:$0xff] %v6016_v50  ;;  %v6031_v28 = vsub.f32 %v5780_v1, %v1240_v11  ;;  %v9582_v12 = vsub.f32 %v5511_v29, %v5769_v37 }
  0xf6   :  { %9579 = vst [vmem:[#allocation29_spill] sm:$0xff] %v6013_v48  ;;  %v1201_v26 = vrot.slane %v1155_v33, %v5618_v43  ;;  %v1205_v24 = vrot.slane %v1156_v6, %v5618_v43  ;;  %v1360_v5 = vadd.f32 %v1359_v40, %v1358_v15  ;;  %v1367_v63 = vadd.f32 %v1366_v56, %v1365_v54  ;;  %v1077_v6 = vld [vmem:[#allocation2 + $0xb1] sm:$0x1]  ;;  %v813_v15 = vld [vmem:[#allocation2 + $0xd0] sm:$0x1] }
  0xf7   :  { %v6036_v18 = vsub.f32 %v9582_v12, %v1241_v4  ;;  %v6041_v45 = vsub.f32 %v5785_v38, %v1242_v17  ;;  %v9585_v42 = vsub.f32 %v9583_v2, %v9584_v3  ;;  %1304 = vst [vmem:[#allocation2 + $0x70] sm:$0xff] %v6031_v28  ;;  %v1157_v38 = vmul.f32 %v5891_v36, %v1077_v6  ;;  %v9586_v4 = vld [vmem:[#allocation22_spill] sm:$0xff]  ;;  %v9587_v17 = vld [vmem:[#allocation20_spill] sm:$0xff] }
  0xf8   :  { %v1244_v29 = vmul.f32 %v1201_v26, %v5895_v25  ;;  %v1245_v1 = vmul.f32 %v1201_v26, %v5683_v19  ;;  %v1246_v37 = vmul.f32 %v1205_v24, %v5895_v25  ;;  %v1247_v33 = vmul.f32 %v1205_v24, %v5683_v19  ;;  %v9591_v6 = vld [vmem:[#allocation10_spill] sm:$0xff] }
  0xf9   :  { %v6046_v23 = vsub.f32 %v9585_v42, %v1243_v30  ;;  %v1361_v54 = vrot.slane %v1360_v5, 1  ;;  %1306 = vst [vmem:[#allocation2 + $0x80] sm:$0xff] %v6041_v45  ;;  %v717_v56 = vsel %vm557_vm2, %v621_v7, %v5663_v41  ;;  %v515_v11 = vadd.f32 %v5970_v20, %v5882_v16  ;;  %v9588_v30 = vld [vmem:[#allocation21_spill] sm:$0xff] }
  0xfa   :  { %v6061_v40 = vsub.f32 %v9586_v4, %v1244_v29  ;;  %v9589_v12 = vsub.f32 %v9587_v17, %v9588_v30  ;;  %v6069_v24 = vsub.f32 %v5826_v58, %v1246_v37  ;;  %v9590_v2 = vsub.f32 %v5843_v14, %v5822_v60  ;;  %v1078_v41 = vld [vmem:[#allocation2 + $0xc1] sm:$0x1] }
  0xfb   :  { %v1362_v7 = vadd.f32 %v1361_v54, %v1360_v5  ;;  %v1209_v42 = vrot.slane %v1157_v38, %v5618_v43  ;;  %v753_v29 = vsel %vm563_vm0, %v9591_v6, %v717_v56  ;;  %v1158_v4 = vmul.f32 %v5891_v36, %v1078_v41 }
  0xfc   :  { %v6066_v26 = vsub.f32 %v9589_v12, %v1245_v1  ;;  %v6074_v3 = vsub.f32 %v9590_v2, %v1247_v33  ;;  %v1368_v1 = vrot.slane %v1367_v63, 2  ;;  %1308 = vst [vmem:[#allocation2 + $0x90] sm:$0xff] %v6061_v40  ;;  %1310 = vst [vmem:[#allocation2 + $0xa0] sm:$0xff] %v6069_v24  ;;  %v1016_v58 = vsub.f32 %v753_v29, %v5908_v57  ;;  %v814_v12 = vld [vmem:[#allocation2 + $0xe0] sm:$0x1] }
  0xfd   :  { %v510_v60 = vadd.f32 %v509_v55, %v5986_v44  ;;  %v892_v14 = vmul.f32 %v5625_v8, %v813_v15  ;;  %v1372_v5 = vand.u32 2147483647, %v1362_v7  ;;  %vm1374_vm3 = vcmp.lt.f32.partialorder %v1362_v7, 0.0 }
  0xfe   :  { %v1248_v37 = vmul.f32 %v1209_v42, %v5895_v25  ;;  %v1249_v33 = vmul.f32 %v1209_v42, %v5683_v19  ;;  %v9592_v54 = vmov 1e-12   ;;  %v1213_v56 = vrot.slane %v1158_v4, %v5618_v43 }
  0xff   :  { %v1375_v38 = vsel %vm1374_vm3, -1e-12, %v9592_v54  ;;  %v511_v17 = vrot.slane %v510_v60, 2  ;;  %v950_v30 = vrot.slane %v892_v14, %v5618_v43  ;;  %vm1373_vm8 = vcmp.lt.f32.partialorder %v1372_v5, 1e-12 }
 0x100   :  { %v6092_v57 = vsub.f32 %v5832_v9, %v1248_v37  ;;  %v9593_v44 = vsub.f32 %v5873_v13, %v5861_v62  ;;  %v516_v15 = vrot.slane %v515_v11, 4  ;;  %v1376_v2 = vsel %vm1373_vm8, %v1375_v38, %v1362_v7 }
 0x101   :  { %v1250_v41 = vmul.f32 %v1213_v56, %v5895_v25  ;;  %v1251_v42 = vmul.f32 %v1213_v56, %v5683_v19  ;;  %v512_v6 = vadd.f32 %v511_v17, %v510_v60  ;;  %5150 = vrcp.f32 %v1376_v2  ;;  %v5184_v60 = vld [vmem:[%s9350_s0] sm:$0xff] }
 0x102   :  { %v6097_v55 = vsub.f32 %v9593_v44, %v1249_v33  ;;  %1312 = vst [vmem:[#allocation2 + $0xb0] sm:$0xff] %v6092_v57  ;;  %v985_v29 = vmul.f32 %v950_v30, %v5634_v10  ;;  %v893_v13 = vmul.f32 %v5625_v8, %v814_v12  ;;  %v1369_v14 = vadd.f32 %v1368_v1, %v1367_v63  ;;  %v1333_v12 = vld [vmem:[#allocation2 + $0x2] sm:$0x1] }
 0x103   :  { %v6104_v9 = vsub.f32 %v5876_v39, %v1250_v41  ;;  %v6106_v4 = vsub.f32 %v1016_v58, %v1251_v42  ;;  %v513_v62 = vrot.slane %v512_v6, 1  ;;  %v517_v5 = vadd.f32 %v516_v15, %v515_v11  ;;  %v9595_v15 = vld [vmem:[#allocation18_spill] sm:$0xff] }
 0x104   :  { %v6110_v7 = vsub.f32 %v5867_v0, %v985_v29  ;;  %v6116_v37 = vmul.f32 %v5184_v60, %v5991_v21  ;;  %v6120_v58 = vrot.slane %v893_v13, %v5618_v43  ;;  %v1229_v21 = vmul.f32 %v5913_v27, %v5683_v19 }
 0x105   :  { %1314 = vst [vmem:[#allocation2 + $0xc0] sm:$0xff] %v6104_v9  ;;  %v514_v39 = vadd.f32 %v513_v62, %v512_v6  ;;  %v1370_v1 = vrot.slane %v1369_v14, 1  ;;  %v518_v33 = vrot.slane %v517_v5, 2  ;;  %v6136_v56 = vmul.f32 %v950_v30, %v5427_v51  ;;  %v1334_v30 = vld [vmem:[#allocation2 + $0x12] sm:$0x1] }
 0x106   :  { %9594 = vst [vmem:[#allocation16_spill] sm:$0xff] %v6116_v37  ;;  %1049 = vst [vmem:[#allocation2 + $0xd0] sm:$0xff] %v6110_v7  ;;  %v9377_v0 = vmax.f32 %v6116_v37, 0.001  ;;  %v987_v11 = vmul.f32 %v6120_v58, %v5634_v10  ;;  %v1233_v44 = vmul.f32 %v5919_v59, %v5683_v19  ;;  %v9596_v2 = vmov 0.0   ;;  %v9605_v10 = vld [vmem:[#allocation26_spill] sm:$0xff] }
 0x107   :  { %v623_v63 = vsub.f32 %v5898_v22, %v514_v39  ;;  %v6151_v42 = vsel %vm538_vm4, 1.0, %v9596_v2  ;;  %v1261_v59 = vsub.f32 %v5683_v19, %v1229_v21  ;;  %v1335_v6 = vld [vmem:[#allocation2 + $0x22] sm:$0x1]  ;;  %v6161_v29 = vsub.f32 %v5946_v47, %v5888_v46  ;;  %v1336_v62 = vld [vmem:[#allocation2 + $0x32] sm:$0x1] }
 0x108   :  { %790 = vst [vmem:[#allocation2 + $0xf0] sm:$0xff] %v9377_v0  ;;  %v6139_v17 = vsub.f32 %v5882_v16, %v987_v11  ;;  %v1371_v13 = vadd.f32 %v1370_v1, %v1369_v14  ;;  %v519_v60 = vadd.f32 %v518_v33, %v517_v5  ;;  %v1338_v0 = vld [vmem:[#allocation2 + $0x52] sm:$0x1]  ;;  %v9599_v21 = vld [vmem:[#allocation9_spill] sm:$0xff]  ;;  %vm561_vm4 = vcmp.eq.s32.totalorder %v5336_v35, 14 }
 0x109   :  { %v719_v38 = vsel %vm559_vm9, %v623_v63, %v5898_v22  ;;  %9598 = vst [vmem:[#allocation17_spill] sm:$0xff] %v6161_v29  ;;  %v9600_v22 = vld [vmem:[#allocation15_spill] sm:$0xff] }
 0x10a   :  { %v6146_v27 = vsel %vm563_vm0, %v9595_v15, %v719_v38  ;;  %1051 = vst [vmem:[#allocation2 + $0xe0] sm:$0xff] %v6139_v17  ;;  %v1337_v15 = vld [vmem:[#allocation2 + $0x42] sm:$0x1]  ;;  %v9601_v41 = vsub.f32 %v9599_v21, %v9600_v22  ;;  %v1340_v21 = vld [vmem:[#allocation2 + $0x72] sm:$0x1] }
 0x10b   :  { %v6156_v16 = vpop.eup %5150 }
 0x10c   :  { %v1413_v39 = vmul.f32 %v6156_v16, %v1333_v12  ;;  %v1414_v63 = vmul.f32 %v6156_v16, %v1334_v30  ;;  %v1415_v11 = vmul.f32 %v6156_v16, %v1335_v6  ;;  %v1416_v38 = vmul.f32 %v6156_v16, %v1336_v62 }
 0x10d   :  { %v1265_v2 = vsub.f32 %v9601_v41, %v1233_v44  ;;  %v1589_v46 = vmul.f32 %v6156_v16, %v1371_v13  ;;  %v1417_v37 = vmul.f32 %v6156_v16, %v1337_v15  ;;  %v1418_v14 = vmul.f32 %v6156_v16, %v1338_v0 }
 0x10e   :  { %v1432_v5 = vrot.slane %v1413_v39, %v5618_v43  ;;  %v1436_v1 = vrot.slane %v1414_v63, %v5618_v43  ;;  %v6176_v33 = vrot.slane %v1415_v11, %v5618_v43  ;;  %v1444_v12 = vrot.slane %v1416_v38, %v5618_v43  ;;  %v223_v39 = vpop.permute.xlu1 %222 }
 0x10f   :  { %v1590_v30 = vmul.f32 %v1589_v46, %v6161_v29  ;;  %v1591_v22 = vmul.f32 %v1589_v46, %v5948_v61  ;;  %v6182_v44 = vrot.slane %v1417_v37, %v5618_v43  ;;  %v520_v41 = vrot.slane %v519_v60, 1 }
 0x110   :  { %9602 = vst [vmem:[#allocation19_spill] sm:$0xff] %v6176_v33  ;;  %v1493_v6 = vmul.f32 %v1432_v5, %v6161_v29  ;;  %v6186_v0 = vmul.f32 %v1432_v5, %v5948_v61  ;;  %v1495_v62 = vmul.f32 %v1436_v1, %v6161_v29  ;;  %v1496_v13 = vmul.f32 %v1436_v1, %v5948_v61 }
 0x111   :  { %v1497_v63 = vmul.f32 %v6176_v33, %v6161_v29  ;;  %v1499_v11 = vmul.f32 %v1444_v12, %v6161_v29  ;;  %v1500_v38 = vmul.f32 %v1444_v12, %v5948_v61  ;;  %v1452_v37 = vrot.slane %v1418_v14, %v5618_v43  ;;  %v1339_v14 = vld [vmem:[#allocation2 + $0x62] sm:$0x1] }
 0x112   :  { %v6196_v15 = vsub.f32 %v5937_v34, %v1493_v6  ;;  %v6201_v46 = vsub.f32 %v5942_v49, %v1495_v62  ;;  %v6203_v5 = vsub.f32 %v1261_v59, %v1496_v13  ;;  %v352_v34 = vmul.f32 %v9605_v10, %v223_v39  ;;  %v9606_v6 = vld [vmem:[#allocation24_spill] sm:$0xff]  ;;  %v9608_v59 = vld [vmem:[#allocation25_spill] sm:$0xff] }
 0x113   :  { %v6206_v1 = vsub.f32 %v5946_v47, %v1497_v63  ;;  %v6209_v33 = vsub.f32 %v5973_v53, %v1499_v11  ;;  %v6211_v12 = vsub.f32 %v1265_v2, %v1500_v38  ;;  %v6217_v49 = vsub.f32 %v9606_v6, %v1590_v30  ;;  %v9610_v63 = vld [vmem:[#allocation27_spill] sm:$0xff] }
 0x114   :  { %9603 = vst [vmem:[#allocation22_spill] sm:$0xff] %v6203_v5  ;;  %1557 = vst [vmem:[#allocation2] sm:$0xff] %v6196_v15  ;;  %v6220_v62 = vsub.f32 %v9608_v59, %v1591_v22  ;;  %v1501_v47 = vmul.f32 %v6182_v44, %v6161_v29  ;;  %v1419_v53 = vmul.f32 %v6156_v16, %v1339_v14  ;;  %v5185_v5 = vld [vmem:[%s9350_s0 + $0x8] sm:$0xff] }
 0x115   :  { %9604 = vst [vmem:[#allocation20_spill] sm:$0xff] %v6206_v1  ;;  %1559 = vst [vmem:[#allocation2 + $0x10] sm:$0xff] %v6201_v46  ;;  %v1621_v2 = vmul.f32 %v6151_v42, %v6209_v33  ;;  %v1622_v13 = vmul.f32 0.0, %v6211_v12  ;;  %v1503_v30 = vmul.f32 %v1452_v37, %v6161_v29  ;;  %v1630_v22 = vmul.f32 %v6151_v42, %v6217_v49 }
 0x116   :  { %9607 = vst [vmem:[#allocation21_spill] sm:$0xff] %v6217_v49  ;;  %9609 = vst [vmem:[#allocation10_spill] sm:$0xff] %v6220_v62  ;;  %v1631_v39 = vmul.f32 0.0, %v6220_v62  ;;  %v6236_v11 = vsub.f32 %v9610_v63, %v1501_v47  ;;  %v521_v38 = vadd.f32 %v520_v41, %v519_v60  ;;  %v6239_v6 = vmul.f32 %v1452_v37, %v5948_v61  ;;  %v1342_v47 = vld [vmem:[#allocation2 + $0x92] sm:$0x1] }
 0x117   :  { %1561 = vst [vmem:[#allocation2 + $0x20] sm:$0xff] %v6206_v1  ;;  %1563 = vst [vmem:[#allocation2 + $0x30] sm:$0xff] %v6209_v33  ;;  %v1623_v14 = vadd.f32 %v1622_v13, %v1621_v2  ;;  %v6242_v59 = vsub.f32 %v6008_v52, %v1503_v30  ;;  %v1341_v1 = vld [vmem:[#allocation2 + $0x82] sm:$0x1]  ;;  %v6247_v49 = vmul.f32 %v5185_v5, %v352_v34 }
 0x118   :  { %9611 = vst [vmem:[#allocation18_spill] sm:$0xff] %v6239_v6  ;;  %v1632_v62 = vadd.f32 %v1631_v39, %v1630_v22  ;;  %1565 = vst [vmem:[#allocation2 + $0x40] sm:$0xff] %v6236_v11  ;;  %v1456_v60 = vrot.slane %v1419_v53, %v5618_v43  ;;  %v1420_v41 = vmul.f32 %v6156_v16, %v1340_v21  ;;  %v1343_v52 = vld [vmem:[#allocation2 + $0xa2] sm:$0x1] }
 0x119   :  { %v1421_v37 = vmul.f32 %v6156_v16, %v1341_v1  ;;  %v1624_v2 = vrot.slane %v1623_v14, 4  ;;  %1567 = vst [vmem:[#allocation2 + $0x50] sm:$0xff] %v6242_v59  ;;  %v1422_v5 = vmul.f32 %v6156_v16, %v1342_v47  ;;  %v1423_v34 = vmul.f32 %v6156_v16, %v1343_v52 }
 0x11a   :  { %v1505_v30 = vmul.f32 %v1456_v60, %v6161_v29  ;;  %v6260_v53 = vmul.f32 %v1456_v60, %v5948_v61  ;;  %v1460_v21 = vrot.slane %v1420_v41, %v5618_v43  ;;  %v625_v1 = vsub.f32 %v5970_v20, %v521_v38 }
 0x11b   :  { %v1625_v22 = vadd.f32 %v1624_v2, %v1623_v14  ;;  %v1633_v39 = vrot.slane %v1632_v62, 4  ;;  %v1464_v63 = vrot.slane %v1421_v37, %v5618_v43  ;;  %v1468_v13 = vrot.slane %v1422_v5, %v5618_v43 }
 0x11c   :  { %v6267_v6 = vsub.f32 %v6016_v50, %v1505_v30  ;;  %v1507_v52 = vmul.f32 %v1460_v21, %v6161_v29  ;;  %v1472_v60 = vrot.slane %v1423_v34, %v5618_v43  ;;  %v6274_v41 = vmul.f32 %v1460_v21, %v5948_v61 }
 0x11d   :  { %v1626_v48 = vrot.slane %v1625_v22, 2  ;;  %v1509_v38 = vmul.f32 %v1464_v63, %v6161_v29  ;;  %v6278_v14 = vmul.f32 %v1464_v63, %v5948_v61  ;;  %v1511_v37 = vmul.f32 %v1468_v13, %v6161_v29 }
 0x11e   :  { %1569 = vst [vmem:[#allocation2 + $0x60] sm:$0xff] %v6267_v6  ;;  %v6282_v50 = vsub.f32 %v6031_v28, %v1507_v52  ;;  %v6286_v2 = vmul.f32 %v1468_v13, %v5948_v61  ;;  %v721_v5 = vsel %vm561_vm4, %v625_v1, %v5970_v20  ;;  %v1634_v63 = vadd.f32 %v1633_v39, %v1632_v62  ;;  %v1344_v20 = vld [vmem:[#allocation2 + $0xb2] sm:$0x1]  ;;  %v1345_v1 = vld [vmem:[#allocation2 + $0xc2] sm:$0x1] }
 0x11f   :  { %v1627_v34 = vadd.f32 %v1626_v48, %v1625_v22  ;;  %v6294_v21 = vsub.f32 %v6041_v45, %v1509_v38  ;;  %v6300_v13 = vsub.f32 %v6061_v40, %v1511_v37  ;;  %v1513_v48 = vmul.f32 %v1472_v60, %v6161_v29  ;;  %v1079_v38 = vld [vmem:[#allocation2 + $0xd1] sm:$0x1] }
 0x120   :  { %9612 = vst [vmem:[#allocation9_spill] sm:$0xff] %v6286_v2  ;;  %1571 = vst [vmem:[#allocation2 + $0x70] sm:$0xff] %v6282_v50  ;;  %v6307_v45 = vmul.f32 %v1472_v60, %v5948_v61  ;;  %v1424_v62 = vmul.f32 %v6156_v16, %v1344_v20  ;;  %v1425_v39 = vmul.f32 %v6156_v16, %v1345_v1  ;;  %v9613_v52 = vld [vmem:[#allocation23_spill] sm:$0xff]  ;;  %v1080_v2 = vld [vmem:[#allocation2 + $0xe1] sm:$0x1] }
 0x121   :  { %v1628_v22 = vrot.slane %v1627_v34, 1  ;;  %1573 = vst [vmem:[#allocation2 + $0x80] sm:$0xff] %v6294_v21  ;;  %1575 = vst [vmem:[#allocation2 + $0x90] sm:$0xff] %v6300_v13  ;;  %v6313_v40 = vsub.f32 %v6069_v24, %v1513_v48  ;;  %v1159_v37 = vmul.f32 %v5891_v36, %v1079_v38  ;;  %v757_v28 = vsel %vm563_vm0, %v9613_v52, %v721_v5 }
 0x122   :  { %v988_v60 = vmul.f32 %v6120_v58, %v5427_v51  ;;  %v1476_v1 = vrot.slane %v1424_v62, %v5618_v43  ;;  %v1480_v47 = vrot.slane %v1425_v39, %v5618_v43  ;;  %v1635_v24 = vrot.slane %v1634_v63, 2 }
 0x123   :  { %v1629_v30 = vadd.f32 %v1628_v22, %v1627_v34  ;;  %1577 = vst [vmem:[#allocation2 + $0xa0] sm:$0xff] %v6313_v40  ;;  %v1217_v48 = vrot.slane %v1159_v37, %v5618_v43  ;;  %v1160_v5 = vmul.f32 %v5891_v36, %v1080_v2  ;;  %v815_v37 = vld [vmem:[#allocation2 + $0xf0] sm:$0x1] }
 0x124   :  { %v1020_v38 = vsub.f32 %v757_v28, %v988_v60  ;;  %v1515_v58 = vmul.f32 %v1476_v1, %v6161_v29  ;;  %v6330_v34 = vmul.f32 %v1476_v1, %v5948_v61  ;;  %v1517_v62 = vmul.f32 %v1480_v47, %v6161_v29  ;;  %v1605_v28 = vld [vmem:[#allocation2 + $0x53] sm:$0x1] }
 0x125   :  { %v1639_v52 = vand.u32 2147483647, %v1629_v30  ;;  %vm1641_vm14 = vcmp.lt.f32.partialorder %v1629_v30, 0.0  ;;  %v6335_v39 = vmul.f32 %v1480_v47, %v5948_v61  ;;  %v1252_v20 = vmul.f32 %v1217_v48, %v5895_v25  ;;  %v1604_v47 = vld [vmem:[#allocation2 + $0x43] sm:$0x1] }
 0x126   :  { %v1642_v22 = vsel %vm1641_vm14, -1e-12, %v9592_v54  ;;  %v6339_v2 = vsub.f32 %v6092_v57, %v1515_v58  ;;  %v1253_v60 = vmul.f32 %v1217_v48, %v5683_v19  ;;  %v6345_v54 = vsub.f32 %v6104_v9, %v1517_v62 }
 0x127   :  { %vm1640_vm15 = vcmp.lt.f32.partialorder %v1639_v52, 1e-12  ;;  %v6350_v29 = vsub.f32 %v6110_v7, %v1252_v20  ;;  %v9614_v57 = vsub.f32 %v6146_v27, %v6136_v56  ;;  %v1221_v48 = vrot.slane %v1160_v5, %v5618_v43  ;;  %v9615_v5 = vld [vmem:[#allocation12_spill] sm:$0xff] }
 0x128   :  { %v1643_v1 = vsel %vm1640_vm15, %v1642_v22, %v1629_v30  ;;  %1579 = vst [vmem:[#allocation2 + $0xb0] sm:$0xff] %v6339_v2  ;;  %v894_v30 = vmul.f32 %v5625_v8, %v815_v37  ;;  %1581 = vst [vmem:[#allocation2 + $0xc0] sm:$0xff] %v6345_v54  ;;  %v416_v9 = vmax.f32 %v6247_v49, 0.001  ;;  %v1636_v7 = vadd.f32 %v1635_v24, %v1634_v63  ;;  %v9618_v63 = vld [vmem:[#allocation19_spill] sm:$0xff] }
 0x129   :  { %5152 = vrcp.f32 %v1643_v1  ;;  %v6356_v52 = vsub.f32 %v9614_v57, %v1253_v60  ;;  %1316 = vst [vmem:[#allocation2 + $0xd0] sm:$0xff] %v6350_v29  ;;  %v1254_v20 = vmul.f32 %v1221_v48, %v5895_v25  ;;  %v1255_v58 = vmul.f32 %v1221_v48, %v5683_v19 }
 0x12a   :  { %v958_v22 = vrot.slane %v894_v30, %v5618_v43  ;;  %v6378_v49 = vsel %vm563_vm0, %v9605_v10, %v416_v9  ;;  %v1498_v24 = vmul.f32 %v9618_v63, %v5948_v61  ;;  %v1637_v37 = vrot.slane %v1636_v7, 1 }
 0x12b   :  { %v6367_v56 = vsub.f32 %v6139_v17, %v1254_v20  ;;  %v6369_v27 = vsub.f32 %v1020_v38, %v1255_v58  ;;  %9617 = vst [vmem:[#allocation26_spill] sm:$0xff] %v6378_v49  ;;  %v9619_v17 = vld [vmem:[#allocation16_spill] sm:$0xff]  ;;  %v9622_v57 = vmov 0.0   ;;  %v1601_v20 = vld [vmem:[#allocation2 + $0x13] sm:$0x1]  ;;  %v9626_v49 = vld [vmem:[#allocation22_spill] sm:$0xff] }
 0x12c   :  { %v989_v8 = vmul.f32 %v958_v22, %v9615_v5  ;;  %v6373_v62 = vmul.f32 %v958_v22, %v5427_v51  ;;  %v9620_v60 = vmax.f32 %v9619_v17, 0.001  ;;  %v1600_v51 = vld [vmem:[#allocation2 + $0x3] sm:$0x1]  ;;  %v6393_v10 = vsel %vm540_vm5, 1.0, %v9622_v57 }
 0x12d   :  { %1318 = vst [vmem:[#allocation2 + $0xe0] sm:$0xff] %v6367_v56  ;;  %v1530_v9 = vsub.f32 %v5948_v61, %v1498_v24  ;;  %v1602_v58 = vld [vmem:[#allocation2 + $0x23] sm:$0x1]  ;;  %v1603_v22 = vld [vmem:[#allocation2 + $0x33] sm:$0x1]  ;;  %v1502_v5 = vmul.f32 %v6182_v44, %v5948_v61  ;;  %v6406_v24 = vsub.f32 %v6209_v33, %v6151_v42 }
 0x12e   :  { %9616 = vst [vmem:[#allocation15_spill] sm:$0xff] %v6373_v62  ;;  %v6385_v38 = vsub.f32 %v9620_v60, %v989_v8  ;;  %v1638_v8 = vadd.f32 %v1637_v37, %v1636_v7 }
 0x130   :  { %9621 = vst [vmem:[#allocation24_spill] sm:$0xff] %v6385_v38  ;;  %1053 = vst [vmem:[#allocation2 + $0xf0] sm:$0xff] %v6385_v38  ;;  %v9627_v38 = vld [vmem:[#allocation20_spill] sm:$0xff] }
 0x133   :  { %v6395_v30 = vpop.eup %5152 }
 0x134   :  { %v1680_v63 = vmul.f32 %v6395_v30, %v1600_v51  ;;  %v1681_v17 = vmul.f32 %v6395_v30, %v1601_v20  ;;  %v1682_v60 = vmul.f32 %v6395_v30, %v1602_v58  ;;  %v1683_v1 = vmul.f32 %v6395_v30, %v1603_v22  ;;  %v1606_v58 = vld [vmem:[#allocation2 + $0x63] sm:$0x1] }
 0x135   :  { %v1684_v35 = vmul.f32 %v6395_v30, %v1604_v47  ;;  %v1856_v48 = vmul.f32 %v6395_v30, %v1638_v8  ;;  %v1685_v44 = vmul.f32 %v6395_v30, %v1605_v28  ;;  %v1686_v8 = vmul.f32 %v6395_v30, %v1606_v58 }
 0x136   :  { %v1699_v7 = vrot.slane %v1680_v63, %v5618_v43  ;;  %v1703_v37 = vrot.slane %v1681_v17, %v5618_v43  ;;  %v1707_v51 = vrot.slane %v1682_v60, %v5618_v43  ;;  %v6415_v20 = vrot.slane %v1683_v1, %v5618_v43 }
 0x137   :  { %v1715_v22 = vrot.slane %v1684_v35, %v5618_v43  ;;  %v1857_v42 = vmul.f32 %v1856_v48, %v6406_v24  ;;  %v1858_v47 = vmul.f32 %v1856_v48, %v6211_v12  ;;  %v6432_v48 = vrot.slane %v1685_v44, %v5618_v43 }
 0x138   :  { %9624 = vst [vmem:[#allocation25_spill] sm:$0xff] %v6415_v20  ;;  %v1760_v28 = vmul.f32 %v1699_v7, %v6406_v24  ;;  %v1761_v63 = vmul.f32 %v1699_v7, %v6211_v12  ;;  %v1762_v17 = vmul.f32 %v1703_v37, %v6406_v24  ;;  %v6425_v60 = vmul.f32 %v1703_v37, %v6211_v12 }
 0x139   :  { %v1764_v1 = vmul.f32 %v1707_v51, %v6406_v24  ;;  %v1765_v57 = vmul.f32 %v1707_v51, %v6211_v12  ;;  %v1766_v35 = vmul.f32 %v6415_v20, %v6406_v24  ;;  %v9625_v7 = vsub.f32 %v5939_v31, %v6186_v0 }
 0x13a   :  { %v6435_v58 = vsub.f32 %v6196_v15, %v1760_v28  ;;  %v6443_v37 = vsub.f32 %v6201_v46, %v1762_v17  ;;  %v9628_v15 = vld [vmem:[#allocation28_spill] sm:$0xff]  ;;  %v1768_v31 = vmul.f32 %v1715_v22, %v6406_v24  ;;  %v1769_v0 = vmul.f32 %v1715_v22, %v6211_v12  ;;  %v9629_v46 = vld [vmem:[#allocation21_spill] sm:$0xff] }
 0x13b   :  { %v6440_v62 = vsub.f32 %v9625_v7, %v1761_v63  ;;  %v6448_v19 = vsub.f32 %v9627_v38, %v1764_v1  ;;  %v6450_v20 = vsub.f32 %v1530_v9, %v1765_v57  ;;  %v6453_v44 = vsub.f32 %v6209_v33, %v1766_v35  ;;  %v9630_v38 = vld [vmem:[#allocation10_spill] sm:$0xff]  ;;  %v1607_v57 = vld [vmem:[#allocation2 + $0x73] sm:$0x1] }
 0x13c   :  { %v1534_v28 = vsub.f32 %v9628_v15, %v1502_v5  ;;  %1824 = vst [vmem:[#allocation2] sm:$0xff] %v6435_v58  ;;  %1826 = vst [vmem:[#allocation2 + $0x10] sm:$0xff] %v6443_v37  ;;  %v6461_v63 = vsub.f32 %v9629_v46, %v1857_v42  ;;  %v6464_v17 = vsub.f32 %v9630_v38, %v1858_v47  ;;  %v1608_v38 = vld [vmem:[#allocation2 + $0x83] sm:$0x1] }
 0x13d   :  { %1828 = vst [vmem:[#allocation2 + $0x20] sm:$0xff] %v6448_v19  ;;  %1830 = vst [vmem:[#allocation2 + $0x30] sm:$0xff] %v6453_v44  ;;  %v1770_v33 = vmul.f32 %v6432_v48, %v6406_v24  ;;  %v1723_v9 = vrot.slane %v1686_v8, %v5618_v43  ;;  %v1687_v5 = vmul.f32 %v6395_v30, %v1607_v57  ;;  %v1609_v57 = vld [vmem:[#allocation2 + $0x93] sm:$0x1] }
 0x13e   :  { %v6473_v22 = vsub.f32 %v6236_v11, %v1768_v31  ;;  %v6475_v42 = vsub.f32 %v1534_v28, %v1769_v0  ;;  %v1897_v47 = vmul.f32 %v6393_v10, %v6461_v63  ;;  %v1898_v1 = vmul.f32 0.0, %v6464_v17 }
 0x13f   :  { %v6481_v35 = vsub.f32 %v6242_v59, %v1770_v33  ;;  %v1772_v7 = vmul.f32 %v1723_v9, %v6406_v24  ;;  %v1773_v15 = vmul.f32 %v1723_v9, %v6211_v12  ;;  %v9633_v59 = vsub.f32 %v6021_v32, %v6260_v53 }
 0x140   :  { %9631 = vst [vmem:[#allocation27_spill] sm:$0xff] %v6475_v42  ;;  %1832 = vst [vmem:[#allocation2 + $0x40] sm:$0xff] %v6473_v22  ;;  %v1888_v11 = vmul.f32 %v6393_v10, %v6473_v22  ;;  %v1889_v8 = vmul.f32 0.0, %v6475_v42  ;;  %v1899_v28 = vadd.f32 %v1898_v1, %v1897_v47  ;;  %v1727_v46 = vrot.slane %v1687_v5, %v5618_v43  ;;  %v1610_v47 = vld [vmem:[#allocation2 + $0xa3] sm:$0x1] }
 0x141   :  { %1834 = vst [vmem:[#allocation2 + $0x50] sm:$0xff] %v6481_v35  ;;  %v6491_v31 = vsub.f32 %v6267_v6, %v1772_v7  ;;  %v6496_v0 = vsub.f32 %v9633_v59, %v1773_v15  ;;  %v1688_v9 = vmul.f32 %v6395_v30, %v1608_v38  ;;  %v1689_v51 = vmul.f32 %v6395_v30, %v1609_v57  ;;  %v1611_v1 = vld [vmem:[#allocation2 + $0xb3] sm:$0x1]  ;;  %v1346_v5 = vld [vmem:[#allocation2 + $0xd2] sm:$0x1] }
 0x142   :  { %v1890_v33 = vadd.f32 %v1889_v8, %v1888_v11  ;;  %v1774_v6 = vmul.f32 %v1727_v46, %v6406_v24  ;;  %v1775_v7 = vmul.f32 %v1727_v46, %v6211_v12  ;;  %v1690_v32 = vmul.f32 %v6395_v30, %v1610_v47 }
 0x143   :  { %9632 = vst [vmem:[#allocation23_spill] sm:$0xff] %v6491_v31  ;;  %9634 = vst [vmem:[#allocation12_spill] sm:$0xff] %v6496_v0  ;;  %v1691_v53 = vmul.f32 %v6395_v30, %v1611_v1  ;;  %v1731_v11 = vrot.slane %v1688_v9, %v5618_v43  ;;  %v1735_v8 = vrot.slane %v1689_v51, %v5618_v43  ;;  %v1900_v38 = vrot.slane %v1899_v28, 4 }
 0x144   :  { %1836 = vst [vmem:[#allocation2 + $0x60] sm:$0xff] %v6491_v31  ;;  %v1891_v15 = vrot.slane %v1890_v33, 4  ;;  %v1426_v59 = vmul.f32 %v6156_v16, %v1346_v5  ;;  %v6510_v57 = vsub.f32 %v6282_v50, %v1774_v6  ;;  %v9635_v0 = vsub.f32 %v6036_v18, %v6274_v41 }
 0x145   :  { %v1739_v47 = vrot.slane %v1690_v32, %v5618_v43  ;;  %v1776_v31 = vmul.f32 %v1731_v11, %v6406_v24  ;;  %v1777_v9 = vmul.f32 %v1731_v11, %v6211_v12  ;;  %v1743_v51 = vrot.slane %v1691_v53, %v5618_v43  ;;  %v9638_v53 = vld [vmem:[#allocation9_spill] sm:$0xff] }
 0x146   :  { %v6515_v46 = vsub.f32 %v9635_v0, %v1775_v7  ;;  %v1892_v1 = vadd.f32 %v1891_v15, %v1890_v33  ;;  %1838 = vst [vmem:[#allocation2 + $0x70] sm:$0xff] %v6510_v57  ;;  %v1778_v5 = vmul.f32 %v1735_v8, %v6406_v24  ;;  %v1779_v50 = vmul.f32 %v1735_v8, %v6211_v12 }
 0x147   :  { %v1780_v6 = vmul.f32 %v1739_v47, %v6406_v24  ;;  %v1781_v18 = vmul.f32 %v1739_v47, %v6211_v12  ;;  %v6527_v0 = vsub.f32 %v6294_v21, %v1776_v31  ;;  %v9637_v33 = vsub.f32 %v6046_v23, %v6278_v14 }
 0x148   :  { %9636 = vst [vmem:[#allocation19_spill] sm:$0xff] %v6515_v46  ;;  %v1893_v41 = vrot.slane %v1892_v1, 2  ;;  %v6535_v32 = vsub.f32 %v6300_v13, %v1778_v5  ;;  %v9639_v15 = vsub.f32 %v6066_v26, %v9638_v53  ;;  %v9640_v21 = vsub.f32 %v6074_v3, %v6307_v45  ;;  %v1347_v26 = vld [vmem:[#allocation2 + $0xe2] sm:$0x1]  ;;  %v1081_v5 = vld [vmem:[#allocation2 + $0xf1] sm:$0x1] }
 0x149   :  { %v6532_v7 = vsub.f32 %v9637_v33, %v1777_v9  ;;  %v6543_v8 = vsub.f32 %v6313_v40, %v1780_v6  ;;  %v1901_v23 = vadd.f32 %v1900_v38, %v1899_v28  ;;  %1840 = vst [vmem:[#allocation2 + $0x80] sm:$0xff] %v6527_v0  ;;  %v1782_v14 = vmul.f32 %v1743_v51, %v6406_v24  ;;  %v1612_v9 = vld [vmem:[#allocation2 + $0xc3] sm:$0x1] }
 0x14a   :  { %v6540_v11 = vsub.f32 %v9639_v15, %v1779_v50  ;;  %v6548_v31 = vsub.f32 %v9640_v21, %v1781_v18  ;;  %v1894_v47 = vadd.f32 %v1893_v41, %v1892_v1  ;;  %v1783_v13 = vmul.f32 %v1743_v51, %v6211_v12  ;;  %1842 = vst [vmem:[#allocation2 + $0x90] sm:$0xff] %v6535_v32  ;;  %v9642_v18 = vld [vmem:[#allocation17_spill] sm:$0xff] }
 0x14b   :  { %1844 = vst [vmem:[#allocation2 + $0xa0] sm:$0xff] %v6543_v8  ;;  %v1692_v40 = vmul.f32 %v6395_v30, %v1612_v9  ;;  %v1484_v3 = vrot.slane %v1426_v59, %v5618_v43  ;;  %v1427_v45 = vmul.f32 %v6156_v16, %v1347_v26  ;;  %v1161_v28 = vmul.f32 %v5891_v36, %v1081_v5 }
 0x14c   :  { %v1895_v38 = vrot.slane %v1894_v47, 1  ;;  %v6560_v1 = vsub.f32 %v6339_v2, %v1782_v14  ;;  %v9641_v51 = vsub.f32 %v6097_v55, %v6330_v34  ;;  %v1902_v36 = vrot.slane %v1901_v23, 2 }
 0x14d   :  { %v1747_v6 = vrot.slane %v1692_v40, %v5618_v43  ;;  %v1519_v41 = vmul.f32 %v1484_v3, %v9642_v18  ;;  %v6570_v33 = vmul.f32 %v1484_v3, %v5948_v61  ;;  %v1488_v59 = vrot.slane %v1427_v45, %v5618_v43 }
 0x14e   :  { %v6565_v50 = vsub.f32 %v9641_v51, %v1783_v13  ;;  %v1896_v53 = vadd.f32 %v1895_v38, %v1894_v47  ;;  %1846 = vst [vmem:[#allocation2 + $0xb0] sm:$0xff] %v6560_v1  ;;  %v1225_v2 = vrot.slane %v1161_v28, %v5618_v43  ;;  %v9643_v9 = vmov 1e-12   ;;  %v9645_v38 = vld [vmem:[#allocation13_spill] sm:$0xff]  ;;  %v1872_v28 = vld [vmem:[#allocation2 + $0x54] sm:$0x1] }
 0x14f   :  { %v1784_v15 = vmul.f32 %v1747_v6, %v6406_v24  ;;  %v1785_v55 = vmul.f32 %v1747_v6, %v6211_v12  ;;  %v6578_v34 = vsub.f32 %v6350_v29, %v1519_v41  ;;  %v1521_v13 = vmul.f32 %v1488_v59, %v9642_v18  ;;  %v9646_v6 = vld [vmem:[#allocation24_spill] sm:$0xff] }
 0x150   :  { %v1906_v14 = vand.u32 2147483647, %v1896_v53  ;;  %vm1908_vm5 = vcmp.lt.f32.partialorder %v1896_v53, 0.0  ;;  %v6584_v47 = vmul.f32 %v1488_v59, %v5948_v61  ;;  %v9644_v40 = vsub.f32 %v6106_v4, %v6335_v39  ;;  %v9648_v39 = vld [vmem:[#allocation26_spill] sm:$0xff] }
 0x151   :  { %v1909_v26 = vsel %vm1908_vm5, -1e-12, %v9643_v9  ;;  %v6588_v5 = vsub.f32 %v6345_v54, %v1784_v15  ;;  %1583 = vst [vmem:[#allocation2 + $0xd0] sm:$0xff] %v6578_v34  ;;  %v1256_v3 = vmul.f32 %v1225_v2, %v5895_v25  ;;  %v6598_v45 = vsub.f32 %v6367_v56, %v1521_v13  ;;  %v9649_v25 = vld [vmem:[#allocation15_spill] sm:$0xff]  ;;  %v9652_v15 = vld [vmem:[#allocation25_spill] sm:$0xff] }
 0x152   :  { %v6593_v29 = vsub.f32 %v9644_v40, %v1785_v55  ;;  %vm1907_vm3 = vcmp.lt.f32.partialorder %v1906_v14, 1e-12  ;;  %v1257_v51 = vmul.f32 %v1225_v2, %v9645_v38  ;;  %v9650_v41 = vsub.f32 %v9648_v39, %v9649_v25  ;;  %v1867_v55 = vld [vmem:[#allocation2 + $0x4] sm:$0x1]  ;;  %v1868_v38 = vld [vmem:[#allocation2 + $0x14] sm:$0x1] }
 0x153   :  { %v1910_v54 = vsel %vm1907_vm3, %v1909_v26, %v1896_v53  ;;  %1848 = vst [vmem:[#allocation2 + $0xc0] sm:$0xff] %v6588_v5  ;;  %v6605_v4 = vsub.f32 %v9646_v6, %v1256_v3  ;;  %1585 = vst [vmem:[#allocation2 + $0xe0] sm:$0xff] %v6598_v45  ;;  %v1903_v56 = vadd.f32 %v1902_v36, %v1901_v23  ;;  %v9653_v14 = vmov 0.0   ;;  %v1871_v39 = vld [vmem:[#allocation2 + $0x44] sm:$0x1] }
 0x154   :  { %5154 = vrcp.f32 %v1910_v54  ;;  %v6611_v59 = vsub.f32 %v9650_v41, %v1257_v51  ;;  %v1767_v2 = vmul.f32 %v9652_v15, %v6211_v12  ;;  %v6619_v26 = vsel %vm542_vm6, 1.0, %v9653_v14  ;;  %v1870_v51 = vld [vmem:[#allocation2 + $0x34] sm:$0x1]  ;;  %v1869_v54 = vld [vmem:[#allocation2 + $0x24] sm:$0x1] }
 0x155   :  { %9647 = vst [vmem:[#allocation16_spill] sm:$0xff] %v6605_v4  ;;  %1320 = vst [vmem:[#allocation2 + $0xf0] sm:$0xff] %v6605_v4  ;;  %v1904_v53 = vrot.slane %v1903_v56, 1  ;;  %v6626_v23 = vsub.f32 %v6473_v22, %v6393_v10  ;;  %v1771_v36 = vmul.f32 %v6432_v48, %v6211_v12 }
 0x156   :  { %9651 = vst [vmem:[#allocation22_spill] sm:$0xff] %v6611_v59  ;;  %v1799_v3 = vsub.f32 %v6211_v12, %v1767_v2  ;;  %v1873_v59 = vld [vmem:[#allocation2 + $0x64] sm:$0x1] }
 0x157   :  { %9656 = vst [vmem:[#allocation28_spill] sm:$0xff] %v6626_v23  ;;  %v1905_v6 = vadd.f32 %v1904_v53, %v1903_v56 }
 0x158   :  { %v1613_v21 = vld [vmem:[#allocation2 + $0xd3] sm:$0x1] }
 0x159   :  { %v1693_v48 = vmul.f32 %v6395_v30, %v1613_v21 }
 0x15e   :  { %v6621_v40 = vpop.eup %5154 }
 0x15f   :  { %9655 = vst [vmem:[#allocation20_spill] sm:$0xff] %v6621_v40  ;;  %v1947_v25 = vmul.f32 %v6621_v40, %v1867_v55  ;;  %v1948_v41 = vmul.f32 %v6621_v40, %v1868_v38  ;;  %v1949_v15 = vmul.f32 %v6621_v40, %v1869_v54  ;;  %v1950_v2 = vmul.f32 %v6621_v40, %v1870_v51 }
 0x160   :  { %v1951_v13 = vmul.f32 %v6621_v40, %v1871_v39  ;;  %v1952_v10 = vmul.f32 %v6621_v40, %v1872_v28  ;;  %v2123_v14 = vmul.f32 %v6621_v40, %v1905_v6 }
 0x161   :  { %v1966_v56 = vrot.slane %v1947_v25, %v5618_v43  ;;  %v1970_v53 = vrot.slane %v1948_v41, %v5618_v43  ;;  %v1974_v55 = vrot.slane %v1949_v15, %v5618_v43  ;;  %v1978_v38 = vrot.slane %v1950_v2, %v5618_v43 }
 0x162   :  { %v6643_v51 = vrot.slane %v1951_v13, %v5618_v43  ;;  %v1986_v54 = vrot.slane %v1952_v10, %v5618_v43  ;;  %v2124_v39 = vmul.f32 %v2123_v14, %v6626_v23  ;;  %v2125_v28 = vmul.f32 %v2123_v14, %v6475_v42 }
 0x163   :  { %v2027_v6 = vmul.f32 %v1966_v56, %v6626_v23  ;;  %v6650_v21 = vmul.f32 %v1966_v56, %v6475_v42  ;;  %v2029_v25 = vmul.f32 %v1970_v53, %v6626_v23  ;;  %v2030_v41 = vmul.f32 %v1970_v53, %v6475_v42 }
 0x164   :  { %v2031_v15 = vmul.f32 %v1974_v55, %v6626_v23  ;;  %v6656_v13 = vmul.f32 %v1974_v55, %v6475_v42  ;;  %v2033_v2 = vmul.f32 %v1978_v38, %v6626_v23  ;;  %v2034_v10 = vmul.f32 %v1978_v38, %v6475_v42 }
 0x165   :  { %v2035_v14 = vmul.f32 %v6643_v51, %v6626_v23  ;;  %v6663_v56 = vsub.f32 %v6435_v58, %v2027_v6  ;;  %v1953_v53 = vmul.f32 %v6621_v40, %v1873_v59  ;;  %v6669_v61 = vsub.f32 %v6443_v37, %v2029_v25  ;;  %v9658_v37 = vld [vmem:[#allocation29_spill] sm:$0xff] }
 0x166   :  { %v9657_v55 = vsub.f32 %v9626_v49, %v6425_v60  ;;  %v6677_v38 = vsub.f32 %v6448_v19, %v2031_v15  ;;  %v6682_v6 = vsub.f32 %v6453_v44, %v2033_v2  ;;  %v6684_v4 = vsub.f32 %v1799_v3, %v2034_v10  ;;  %v9659_v49 = vld [vmem:[#allocation18_spill] sm:$0xff]  ;;  %v1875_v15 = vld [vmem:[#allocation2 + $0x84] sm:$0x1] }
 0x167   :  { %v6687_v59 = vsub.f32 %v6473_v22, %v2035_v14  ;;  %2091 = vst [vmem:[#allocation2] sm:$0xff] %v6663_v56  ;;  %v9660_v60 = vsub.f32 %v9658_v37, %v9659_v49  ;;  %2093 = vst [vmem:[#allocation2 + $0x10] sm:$0xff] %v6669_v61  ;;  %v2037_v19 = vmul.f32 %v1986_v54, %v6626_v23  ;;  %v1876_v14 = vld [vmem:[#allocation2 + $0x94] sm:$0x1]  ;;  %v1614_v49 = vld [vmem:[#allocation2 + $0xe3] sm:$0x1] }
 0x168   :  { %v6674_v9 = vsub.f32 %v9657_v55, %v2030_v41  ;;  %2095 = vst [vmem:[#allocation2 + $0x20] sm:$0xff] %v6677_v38  ;;  %v2038_v44 = vmul.f32 %v1986_v54, %v6475_v42  ;;  %v6698_v3 = vsub.f32 %v6461_v63, %v2124_v39  ;;  %v6701_v22 = vsub.f32 %v6464_v17, %v2125_v28  ;;  %v1874_v41 = vld [vmem:[#allocation2 + $0x74] sm:$0x1] }
 0x169   :  { %v1803_v25 = vsub.f32 %v9660_v60, %v1771_v36  ;;  %2097 = vst [vmem:[#allocation2 + $0x30] sm:$0xff] %v6682_v6  ;;  %2099 = vst [vmem:[#allocation2 + $0x40] sm:$0xff] %v6687_v59  ;;  %v6706_v36 = vrot.slane %v1953_v53, %v5618_v43  ;;  %v1954_v2 = vmul.f32 %v6621_v40, %v1874_v41 }
 0x16a   :  { %9661 = vst [vmem:[#allocation21_spill] sm:$0xff] %v6698_v3  ;;  %9662 = vst [vmem:[#allocation10_spill] sm:$0xff] %v6701_v22  ;;  %v1955_v10 = vmul.f32 %v6621_v40, %v1875_v15  ;;  %v1751_v54 = vrot.slane %v1693_v48, %v5618_v43  ;;  %v6712_v63 = vsub.f32 %v6481_v35, %v2037_v19  ;;  %v2165_v28 = vmul.f32 0.0, %v6701_v22 }
 0x16b   :  { %v6714_v17 = vsub.f32 %v1803_v25, %v2038_v44  ;;  %v2164_v39 = vmul.f32 %v6619_v26, %v6698_v3  ;;  %v2039_v53 = vmul.f32 %v6706_v36, %v6626_v23  ;;  %v1994_v55 = vrot.slane %v1954_v2, %v5618_v43  ;;  %v9664_v44 = vld [vmem:[#allocation23_spill] sm:$0xff]  ;;  %v1877_v3 = vld [vmem:[#allocation2 + $0xa4] sm:$0x1] }
 0x16c   :  { %v1998_v37 = vrot.slane %v1955_v10, %v5618_v43  ;;  %v1956_v48 = vmul.f32 %v6621_v40, %v1876_v14  ;;  %2101 = vst [vmem:[#allocation2 + $0x50] sm:$0xff] %v6712_v63  ;;  %v2155_v35 = vmul.f32 %v6619_v26, %v6712_v63  ;;  %v1694_v19 = vmul.f32 %v6395_v30, %v1614_v49 }
 0x16d   :  { %9663 = vst [vmem:[#allocation9_spill] sm:$0xff] %v6714_v17  ;;  %v2156_v60 = vmul.f32 0.0, %v6714_v17  ;;  %v2166_v25 = vadd.f32 %v2165_v28, %v2164_v39  ;;  %v6730_v41 = vsub.f32 %v9664_v44, %v2039_v53  ;;  %v2041_v15 = vmul.f32 %v1994_v55, %v6626_v23  ;;  %v1879_v53 = vld [vmem:[#allocation2 + $0xc4] sm:$0x1] }
 0x16e   :  { %v6734_v2 = vmul.f32 %v1994_v55, %v6475_v42  ;;  %v1786_v10 = vmul.f32 %v1751_v54, %v6406_v24  ;;  %v2043_v58 = vmul.f32 %v1998_v37, %v6626_v23  ;;  %v6739_v22 = vmul.f32 %v1998_v37, %v6475_v42 }
 0x16f   :  { %v2157_v14 = vadd.f32 %v2156_v60, %v2155_v35  ;;  %v1787_v39 = vmul.f32 %v1751_v54, %v6211_v12  ;;  %2103 = vst [vmem:[#allocation2 + $0x60] sm:$0xff] %v6730_v41  ;;  %v6744_v28 = vsub.f32 %v6510_v57, %v2041_v15  ;;  %v2002_v55 = vrot.slane %v1956_v48, %v5618_v43  ;;  %v1878_v54 = vld [vmem:[#allocation2 + $0xb4] sm:$0x1] }
 0x170   :  { %9665 = vst [vmem:[#allocation17_spill] sm:$0xff] %v6734_v2  ;;  %v1957_v49 = vmul.f32 %v6621_v40, %v1877_v3  ;;  %v6751_v60 = vsub.f32 %v6527_v0, %v2043_v58  ;;  %v1755_v44 = vrot.slane %v1694_v19, %v5618_v43  ;;  %v1958_v3 = vmul.f32 %v6621_v40, %v1878_v54  ;;  %v1348_v54 = vld [vmem:[#allocation2 + $0xf2] sm:$0x1] }
 0x171   :  { %v2158_v35 = vrot.slane %v2157_v14, 4  ;;  %2105 = vst [vmem:[#allocation2 + $0x70] sm:$0xff] %v6744_v28  ;;  %v2045_v57 = vmul.f32 %v2002_v55, %v6626_v23  ;;  %v6759_v15 = vmul.f32 %v2002_v55, %v6475_v42  ;;  %v1959_v58 = vmul.f32 %v6621_v40, %v1879_v53 }
 0x172   :  { %v2006_v48 = vrot.slane %v1957_v49, %v5618_v43  ;;  %2107 = vst [vmem:[#allocation2 + $0x80] sm:$0xff] %v6751_v60  ;;  %v1818_v37 = vsub.f32 %v6578_v34, %v1786_v10  ;;  %v1428_v34 = vmul.f32 %v6156_v16, %v1348_v54  ;;  %v9666_v53 = vsub.f32 %v6356_v52, %v6570_v33 }
 0x173   :  { %v2159_v0 = vadd.f32 %v2158_v35, %v2157_v14  ;;  %v6767_v19 = vsub.f32 %v6535_v32, %v2045_v57  ;;  %v2010_v14 = vrot.slane %v1958_v3, %v5618_v43  ;;  %v2014_v35 = vrot.slane %v1959_v58, %v5618_v43 }
 0x174   :  { %v2047_v55 = vmul.f32 %v2006_v48, %v6626_v23  ;;  %v6773_v49 = vmul.f32 %v2006_v48, %v6475_v42  ;;  %1850 = vst [vmem:[#allocation2 + $0xd0] sm:$0xff] %v1818_v37  ;;  %v6787_v57 = vsub.f32 %v9666_v53, %v1787_v39  ;;  %v1788_v48 = vmul.f32 %v1755_v44, %v6406_v24 }
 0x175   :  { %v2160_v46 = vrot.slane %v2159_v0, 2  ;;  %2109 = vst [vmem:[#allocation2 + $0x90] sm:$0xff] %v6767_v19  ;;  %v2167_v58 = vrot.slane %v2166_v25, 4  ;;  %v2049_v2 = vmul.f32 %v2010_v14, %v6626_v23  ;;  %v6792_v16 = vmul.f32 %v2010_v14, %v6475_v42 }
 0x176   :  { %v6780_v32 = vsub.f32 %v6543_v8, %v2047_v55  ;;  %v2051_v8 = vmul.f32 %v2014_v35, %v6626_v23  ;;  %v6797_v55 = vmul.f32 %v2014_v35, %v6475_v42  ;;  %v1789_v52 = vmul.f32 %v1755_v44, %v6211_v12 }
 0x177   :  { %v2161_v3 = vadd.f32 %v2160_v46, %v2159_v0  ;;  %v6801_v39 = vsub.f32 %v6560_v1, %v2049_v2  ;;  %v1820_v14 = vsub.f32 %v6598_v45, %v1788_v48  ;;  %v9667_v35 = vsub.f32 %v6369_v27, %v6584_v47  ;;  %v9670_v47 = vld [vmem:[#allocation14_spill] sm:$0xff]  ;;  %v2136_v46 = vld [vmem:[#allocation2 + $0x25] sm:$0x1] }
 0x178   :  { %2111 = vst [vmem:[#allocation2 + $0xa0] sm:$0xff] %v6780_v32  ;;  %v6806_v0 = vsub.f32 %v6588_v5, %v2051_v8  ;;  %v2168_v10 = vadd.f32 %v2167_v58, %v2166_v25  ;;  %v1492_v1 = vrot.slane %v1428_v34, %v5618_v43  ;;  %v9669_v48 = vmov 1e-12   ;;  %v9672_v34 = vld [vmem:[#allocation16_spill] sm:$0xff] }
 0x179   :  { %v2162_v33 = vrot.slane %v2161_v3, 1  ;;  %v6814_v53 = vsub.f32 %v9667_v35, %v1789_v52  ;;  %2113 = vst [vmem:[#allocation2 + $0xb0] sm:$0xff] %v6801_v39  ;;  %1852 = vst [vmem:[#allocation2 + $0xe0] sm:$0xff] %v1820_v14 }
 0x17a   :  { %2115 = vst [vmem:[#allocation2 + $0xc0] sm:$0xff] %v6806_v0  ;;  %v1523_v45 = vmul.f32 %v1492_v1, %v9642_v18  ;;  %v6823_v52 = vmul.f32 %v1492_v1, %v9670_v47  ;;  %v2169_v25 = vrot.slane %v2168_v10, 2 }
 0x17b   :  { %9668 = vst [vmem:[#allocation13_spill] sm:$0xff] %v6814_v53  ;;  %v2163_v44 = vadd.f32 %v2162_v33, %v2161_v3  ;;  %v1880_v5 = vld [vmem:[#allocation2 + $0xd4] sm:$0x1] }
 0x17c   :  { %v1960_v8 = vmul.f32 %v6621_v40, %v1880_v5  ;;  %9671 = vst [vmem:[#allocation24_spill] sm:$0xff] %v6823_v52  ;;  %v6827_v58 = vsub.f32 %v9672_v34, %v1523_v45  ;;  %v2170_v1 = vadd.f32 %v2169_v25, %v2168_v10  ;;  %v9676_v25 = vmov 0.0   ;;  %v2140_v52 = vld [vmem:[#allocation2 + $0x65] sm:$0x1] }
 0x17d   :  { %v2173_v2 = vand.u32 2147483647, %v2163_v44  ;;  %vm2175_vm6 = vcmp.lt.f32.partialorder %v2163_v44, 0.0 }
 0x17e   :  { %v2176_v27 = vsel %vm2175_vm6, -1e-12, %v9669_v48  ;;  %v2018_v3 = vrot.slane %v1960_v8, %v5618_v43  ;;  %9673 = vst [vmem:[#allocation26_spill] sm:$0xff] %v6827_v58  ;;  %1587 = vst [vmem:[#allocation2 + $0xf0] sm:$0xff] %v6827_v58 }
 0x17f   :  { %vm2174_vm8 = vcmp.lt.f32.partialorder %v2173_v2, 1e-12  ;;  %v2135_v2 = vld [vmem:[#allocation2 + $0x15] sm:$0x1] }
 0x180   :  { %v2177_v33 = vsel %vm2174_vm8, %v2176_v27, %v2163_v44  ;;  %v2053_v5 = vmul.f32 %v2018_v3, %v6626_v23  ;;  %v6833_v18 = vmul.f32 %v2018_v3, %v6475_v42  ;;  %v1881_v8 = vld [vmem:[#allocation2 + $0xe4] sm:$0x1]  ;;  %v2036_v27 = vmul.f32 %v6643_v51, %v6475_v42 }
 0x181   :  { %5156 = vrcp.f32 %v2177_v33  ;;  %v1961_v44 = vmul.f32 %v6621_v40, %v1881_v8  ;;  %v2171_v3 = vrot.slane %v2170_v1, 1  ;;  %v2138_v33 = vld [vmem:[#allocation2 + $0x45] sm:$0x1] }
 0x182   :  { %v6836_v47 = vsub.f32 %v1818_v37, %v2053_v5  ;;  %v2134_v37 = vld [vmem:[#allocation2 + $0x5] sm:$0x1]  ;;  %v6852_v5 = vsel %vm544_vm7, 1.0, %v9676_v25  ;;  %v2068_v51 = vsub.f32 %v6475_v42, %v2036_v27  ;;  %v2139_v25 = vld [vmem:[#allocation2 + $0x55] sm:$0x1] }
 0x183   :  { %v2022_v45 = vrot.slane %v1961_v44, %v5618_v43  ;;  %v2172_v40 = vadd.f32 %v2171_v3, %v2170_v1 }
 0x184   :  { %2117 = vst [vmem:[#allocation2 + $0xd0] sm:$0xff] %v6836_v47 }
 0x185   :  { %v2055_v34 = vmul.f32 %v2022_v45, %v6626_v23  ;;  %v6847_v10 = vmul.f32 %v2022_v45, %v6475_v42  ;;  %v2137_v23 = vld [vmem:[#allocation2 + $0x35] sm:$0x1]  ;;  %v6863_v45 = vsub.f32 %v6712_v63, %v6619_v26 }
 0x187   :  { %9675 = vst [vmem:[#allocation15_spill] sm:$0xff] %v6847_v10  ;;  %v6854_v8 = vsub.f32 %v1820_v14, %v2055_v34 }
 0x189   :  { %9678 = vst [vmem:[#allocation25_spill] sm:$0xff] %v6854_v8  ;;  %2119 = vst [vmem:[#allocation2 + $0xe0] sm:$0xff] %v6854_v8 }
 0x18b   :  { %v6858_v54 = vpop.eup %5156 }
 0x18c   :  { %v2214_v14 = vmul.f32 %v6858_v54, %v2134_v37  ;;  %v2215_v34 = vmul.f32 %v6858_v54, %v2135_v2  ;;  %v2216_v44 = vmul.f32 %v6858_v54, %v2136_v46  ;;  %v2217_v48 = vmul.f32 %v6858_v54, %v2137_v23 }
 0x18d   :  { %v2218_v27 = vmul.f32 %v6858_v54, %v2138_v33  ;;  %v2219_v35 = vmul.f32 %v6858_v54, %v2139_v25  ;;  %v2220_v26 = vmul.f32 %v6858_v54, %v2140_v52  ;;  %v2390_v1 = vmul.f32 %v6858_v54, %v2172_v40 }
 0x18e   :  { %v2233_v3 = vrot.slane %v2214_v14, %v5618_v43  ;;  %v2237_v37 = vrot.slane %v2215_v34, %v5618_v43  ;;  %v2241_v2 = vrot.slane %v2216_v44, %v5618_v43  ;;  %v2245_v46 = vrot.slane %v2217_v48, %v5618_v43 }
 0x18f   :  { %v2249_v23 = vrot.slane %v2218_v27, %v5618_v43  ;;  %v6880_v58 = vrot.slane %v2219_v35, %v5618_v43  ;;  %v2040_v25 = vmul.f32 %v6706_v36, %v6475_v42  ;;  %v2257_v52 = vrot.slane %v2220_v26, %v5618_v43 }
 0x190   :  { %v2294_v40 = vmul.f32 %v2233_v3, %v6863_v45  ;;  %v2295_v33 = vmul.f32 %v2233_v3, %v6714_v17  ;;  %v2296_v14 = vmul.f32 %v2237_v37, %v6863_v45  ;;  %v6889_v44 = vmul.f32 %v2237_v37, %v6714_v17 }
 0x191   :  { %9679 = vst [vmem:[#allocation29_spill] sm:$0xff] %v6880_v58  ;;  %v2298_v48 = vmul.f32 %v2241_v2, %v6863_v45  ;;  %v2299_v34 = vmul.f32 %v2241_v2, %v6714_v17  ;;  %v2300_v35 = vmul.f32 %v2245_v46, %v6863_v45  ;;  %v6895_v27 = vmul.f32 %v2245_v46, %v6714_v17 }
 0x192   :  { %v2302_v36 = vmul.f32 %v2249_v23, %v6863_v45  ;;  %v2303_v26 = vmul.f32 %v2249_v23, %v6714_v17  ;;  %v2304_v3 = vmul.f32 %v6880_v58, %v6863_v45  ;;  %v2391_v42 = vmul.f32 %v2390_v1, %v6863_v45 }
 0x193   :  { %v6903_v37 = vsub.f32 %v6663_v56, %v2294_v40  ;;  %v9680_v2 = vsub.f32 %v6440_v62, %v6650_v21  ;;  %v6911_v46 = vsub.f32 %v6669_v61, %v2296_v14  ;;  %v6916_v23 = vsub.f32 %v6677_v38, %v2298_v48  ;;  %v2141_v38 = vld [vmem:[#allocation2 + $0x75] sm:$0x1]  ;;  %v2144_v48 = vld [vmem:[#allocation2 + $0xa5] sm:$0x1] }
 0x194   :  { %v9681_v58 = vsub.f32 %v6450_v20, %v6656_v13  ;;  %v6924_v56 = vsub.f32 %v6682_v6, %v2300_v35  ;;  %v6929_v61 = vsub.f32 %v6687_v59, %v2302_v36  ;;  %v6931_v21 = vsub.f32 %v2068_v51, %v2303_v26  ;;  %v9682_v20 = vld [vmem:[#allocation12_spill] sm:$0xff]  ;;  %v9683_v51 = vld [vmem:[#allocation21_spill] sm:$0xff]  ;;  %v2143_v14 = vld [vmem:[#allocation2 + $0x95] sm:$0x1] }
 0x195   :  { %v6908_v10 = vsub.f32 %v9680_v2, %v2295_v33  ;;  %v6934_v40 = vsub.f32 %v6712_v63, %v2304_v3  ;;  %2358 = vst [vmem:[#allocation2] sm:$0xff] %v6903_v37  ;;  %2360 = vst [vmem:[#allocation2 + $0x10] sm:$0xff] %v6911_v46  ;;  %v2072_v13 = vsub.f32 %v9682_v20, %v2040_v25  ;;  %v2142_v33 = vld [vmem:[#allocation2 + $0x85] sm:$0x1]  ;;  %v9684_v36 = vld [vmem:[#allocation10_spill] sm:$0xff] }
 0x196   :  { %v6921_v8 = vsub.f32 %v9681_v58, %v2299_v34  ;;  %2362 = vst [vmem:[#allocation2 + $0x20] sm:$0xff] %v6916_v23  ;;  %2364 = vst [vmem:[#allocation2 + $0x30] sm:$0xff] %v6924_v56  ;;  %v2306_v6 = vmul.f32 %v2257_v52, %v6863_v45  ;;  %v2307_v59 = vmul.f32 %v2257_v52, %v6714_v17 }
 0x197   :  { %v2392_v58 = vmul.f32 %v2390_v1, %v6714_v17  ;;  %v6945_v63 = vsub.f32 %v9683_v51, %v2391_v42  ;;  %2366 = vst [vmem:[#allocation2 + $0x40] sm:$0xff] %v6929_v61  ;;  %2368 = vst [vmem:[#allocation2 + $0x50] sm:$0xff] %v6934_v40  ;;  %v2221_v25 = vmul.f32 %v6858_v54, %v2141_v38 }
 0x198   :  { %v2222_v34 = vmul.f32 %v6858_v54, %v2142_v33  ;;  %v2223_v35 = vmul.f32 %v6858_v54, %v2143_v14  ;;  %v2224_v52 = vmul.f32 %v6858_v54, %v2144_v48  ;;  %v6954_v1 = vsub.f32 %v6730_v41, %v2306_v6 }
 0x199   :  { %v6956_v42 = vsub.f32 %v2072_v13, %v2307_v59  ;;  %v6959_v26 = vsub.f32 %v9684_v36, %v2392_v58  ;;  %v2431_v3 = vmul.f32 %v6852_v5, %v6945_v63  ;;  %v6964_v2 = vrot.slane %v2221_v25, %v5618_v43 }
 0x19a   :  { %v2265_v20 = vrot.slane %v2222_v34, %v5618_v43  ;;  %v2269_v38 = vrot.slane %v2223_v35, %v5618_v43  ;;  %2370 = vst [vmem:[#allocation2 + $0x60] sm:$0xff] %v6954_v1  ;;  %v2422_v41 = vmul.f32 %v6852_v5, %v6954_v1  ;;  %v2273_v33 = vrot.slane %v2224_v52, %v5618_v43 }
 0x19b   :  { %v2423_v13 = vmul.f32 0.0, %v6956_v42  ;;  %v2432_v6 = vmul.f32 0.0, %v6959_v26  ;;  %v2308_v59 = vmul.f32 %v6964_v2, %v6863_v45  ;;  %v9685_v62 = vsub.f32 %v6532_v7, %v6739_v22 }
 0x19c   :  { %v2310_v58 = vmul.f32 %v2265_v20, %v6863_v45  ;;  %v2311_v51 = vmul.f32 %v2265_v20, %v6714_v17  ;;  %v2312_v25 = vmul.f32 %v2269_v38, %v6863_v45  ;;  %v2313_v34 = vmul.f32 %v2269_v38, %v6714_v17  ;;  %v1615_v20 = vld [vmem:[#allocation2 + $0xf3] sm:$0x1] }
 0x19d   :  { %v2424_v14 = vadd.f32 %v2423_v13, %v2422_v41  ;;  %v6978_v48 = vadd.f32 %v2432_v6, %v2431_v3  ;;  %v6983_v35 = vsub.f32 %v6744_v28, %v2308_v59  ;;  %v9686_v41 = vsub.f32 %v6540_v11, %v6759_v15  ;;  %v2145_v28 = vld [vmem:[#allocation2 + $0xb5] sm:$0x1]  ;;  %v2146_v13 = vld [vmem:[#allocation2 + $0xc5] sm:$0x1] }
 0x19e   :  { %v6986_v36 = vsub.f32 %v6751_v60, %v2310_v58  ;;  %v6991_v53 = vsub.f32 %v9685_v62, %v2311_v51  ;;  %v6994_v3 = vsub.f32 %v6767_v19, %v2312_v25  ;;  %v1695_v60 = vmul.f32 %v6395_v30, %v1615_v20  ;;  %v2147_v6 = vld [vmem:[#allocation2 + $0xd5] sm:$0x1]  ;;  %v2148_v11 = vld [vmem:[#allocation2 + $0xe5] sm:$0x1] }
 0x19f   :  { %v2425_v52 = vrot.slane %v2424_v14, 4  ;;  %v6999_v38 = vsub.f32 %v9686_v41, %v2313_v34  ;;  %2372 = vst [vmem:[#allocation2 + $0x70] sm:$0xff] %v6983_v35  ;;  %v2314_v7 = vmul.f32 %v2273_v33, %v6863_v45  ;;  %v2315_v22 = vmul.f32 %v2273_v33, %v6714_v17 }
 0x1a0   :  { %2374 = vst [vmem:[#allocation2 + $0x80] sm:$0xff] %v6986_v36  ;;  %v2225_v19 = vmul.f32 %v6858_v54, %v2145_v28  ;;  %v2226_v62 = vmul.f32 %v6858_v54, %v2146_v13  ;;  %2376 = vst [vmem:[#allocation2 + $0x90] sm:$0xff] %v6994_v3  ;;  %v2227_v59 = vmul.f32 %v6858_v54, %v2147_v6 }
 0x1a1   :  { %v2426_v15 = vadd.f32 %v2425_v52, %v2424_v14  ;;  %v2228_v30 = vmul.f32 %v6858_v54, %v2148_v11  ;;  %v7012_v58 = vsub.f32 %v6780_v32, %v2314_v7  ;;  %v9687_v51 = vsub.f32 %v6548_v31, %v6773_v49 }
 0x1a2   :  { %v2277_v25 = vrot.slane %v2225_v19, %v5618_v43  ;;  %v2281_v34 = vrot.slane %v2226_v62, %v5618_v43  ;;  %v2285_v14 = vrot.slane %v2227_v59, %v5618_v43  ;;  %v1759_v41 = vrot.slane %v1695_v60, %v5618_v43 }
 0x1a3   :  { %v7017_v33 = vsub.f32 %v9687_v51, %v2315_v22  ;;  %v2427_v20 = vrot.slane %v2426_v15, 2  ;;  %v2289_v52 = vrot.slane %v2228_v30, %v5618_v43  ;;  %2378 = vst [vmem:[#allocation2 + $0xa0] sm:$0xff] %v7012_v58  ;;  %v9688_v60 = vsub.f32 %v6565_v50, %v6792_v16 }
 0x1a4   :  { %v2316_v32 = vmul.f32 %v2277_v25, %v6863_v45  ;;  %v2317_v28 = vmul.f32 %v2277_v25, %v6714_v17  ;;  %v2318_v31 = vmul.f32 %v2281_v34, %v6863_v45  ;;  %v2319_v49 = vmul.f32 %v2281_v34, %v6714_v17 }
 0x1a5   :  { %v2428_v13 = vadd.f32 %v2427_v20, %v2426_v15  ;;  %v2320_v7 = vmul.f32 %v2285_v14, %v6863_v45  ;;  %v2321_v22 = vmul.f32 %v2285_v14, %v6714_v17  ;;  %v9689_v11 = vsub.f32 %v6593_v29, %v6797_v55  ;;  %v9698_v14 = vld [vmem:[#allocation26_spill] sm:$0xff] }
 0x1a6   :  { %v7032_v19 = vsub.f32 %v6801_v39, %v2316_v32  ;;  %v7037_v62 = vsub.f32 %v9688_v60, %v2317_v28  ;;  %v7040_v6 = vsub.f32 %v6806_v0, %v2318_v31  ;;  %v9691_v39 = vsub.f32 %v6787_v57, %v6833_v18  ;;  %v9694_v57 = vld [vmem:[#allocation13_spill] sm:$0xff]  ;;  %v9695_v18 = vld [vmem:[#allocation15_spill] sm:$0xff] }
 0x1a7   :  { %v7045_v59 = vsub.f32 %v9689_v11, %v2319_v49  ;;  %v2429_v15 = vrot.slane %v2428_v13, 1  ;;  %v7048_v30 = vsub.f32 %v6836_v47, %v2320_v7  ;;  %v2322_v50 = vmul.f32 %v2289_v52, %v6863_v45  ;;  %v9693_v47 = vld [vmem:[#allocation25_spill] sm:$0xff] }
 0x1a8   :  { %v7053_v51 = vsub.f32 %v9691_v39, %v2321_v22  ;;  %2380 = vst [vmem:[#allocation2 + $0xb0] sm:$0xff] %v7032_v19  ;;  %2382 = vst [vmem:[#allocation2 + $0xc0] sm:$0xff] %v7040_v6  ;;  %v2323_v16 = vmul.f32 %v2289_v52, %v6714_v17  ;;  %v1790_v29 = vmul.f32 %v1759_v41, %v6406_v24  ;;  %v9699_v52 = vld [vmem:[#allocation22_spill] sm:$0xff]  ;;  %v9700_v24 = vld [vmem:[#allocation24_spill] sm:$0xff]  ;;  %v2434_v7 = vrot.slane %v6978_v48, 4 }
 0x1a9   :  { %9690 = vst [vmem:[#allocation18_spill] sm:$0xff] %v7045_v59  ;;  %v2430_v55 = vadd.f32 %v2429_v15, %v2428_v13  ;;  %2384 = vst [vmem:[#allocation2 + $0xd0] sm:$0xff] %v7048_v30  ;;  %v1791_v0 = vmul.f32 %v1759_v41, %v6211_v12  ;;  %v7063_v25 = vsub.f32 %v9693_v47, %v2322_v50  ;;  %v9703_v13 = vmov 1e-12   ;;  %v2401_v11 = vld [vmem:[#allocation2 + $0x6] sm:$0x1] }
 0x1aa   :  { %9692 = vst [vmem:[#allocation23_spill] sm:$0xff] %v7053_v51  ;;  %v9696_v34 = vsub.f32 %v9694_v57, %v9695_v18  ;;  %v7071_v32 = vsub.f32 %v9698_v14, %v1790_v29  ;;  %v9701_v31 = vsub.f32 %v9699_v52, %v9700_v24  ;;  %v2435_v22 = vadd.f32 %v2434_v7, %v6978_v48  ;;  %v2402_v39 = vld [vmem:[#allocation2 + $0x16] sm:$0x1]  ;;  %v2403_v50 = vld [vmem:[#allocation2 + $0x26] sm:$0x1] }
 0x1ab   :  { %v2440_v28 = vand.u32 2147483647, %v2430_v55  ;;  %vm2442_vm7 = vcmp.lt.f32.partialorder %v2430_v55, 0.0  ;;  %2386 = vst [vmem:[#allocation2 + $0xe0] sm:$0xff] %v7063_v25  ;;  %v7087_v29 = vsub.f32 %v6954_v1, %v6852_v5  ;;  %v2405_v47 = vld [vmem:[#allocation2 + $0x46] sm:$0x1] }
 0x1ac   :  { %v7068_v20 = vsub.f32 %v9696_v34, %v2323_v16  ;;  %v7076_v49 = vsub.f32 %v9701_v31, %v1791_v0  ;;  %v2443_v12 = vsel %vm2442_vm7, -1e-12, %v9703_v13  ;;  %1854 = vst [vmem:[#allocation2 + $0xf0] sm:$0xff] %v7071_v32  ;;  %v2436_v60 = vrot.slane %v2435_v22, 2  ;;  %v2404_v16 = vld [vmem:[#allocation2 + $0x36] sm:$0x1] }
 0x1ad   :  { %vm2441_vm14 = vcmp.lt.f32.partialorder %v2440_v28, 1e-12  ;;  %9704 = vst [vmem:[#allocation12_spill] sm:$0xff] %v7087_v29  ;;  %v2406_v0 = vld [vmem:[#allocation2 + $0x56] sm:$0x1] }
 0x1ae   :  { %9697 = vst [vmem:[#allocation14_spill] sm:$0xff] %v7068_v20  ;;  %9702 = vst [vmem:[#allocation16_spill] sm:$0xff] %v7076_v49  ;;  %v2444_v41 = vsel %vm2441_vm14, %v2443_v12, %v2430_v55  ;;  %v2407_v57 = vld [vmem:[#allocation2 + $0x66] sm:$0x1]  ;;  %v2437_v14 = vadd.f32 %v2436_v60, %v2435_v22  ;;  %v2408_v7 = vld [vmem:[#allocation2 + $0x76] sm:$0x1] }
 0x1af   :  { %5158 = vrcp.f32 %v2444_v41 }
 0x1b3   :  { %v1882_v59 = vld [vmem:[#allocation2 + $0xf4] sm:$0x1] }
 0x1b9   :  { %v7083_v15 = vpop.eup %5158 }
 0x1ba   :  { %v2481_v55 = vmul.f32 %v7083_v15, %v2401_v11  ;;  %v2482_v18 = vmul.f32 %v7083_v15, %v2402_v39  ;;  %v2483_v48 = vmul.f32 %v7083_v15, %v2403_v50  ;;  %v2484_v34 = vmul.f32 %v7083_v15, %v2404_v16 }
 0x1bb   :  { %v2485_v28 = vmul.f32 %v7083_v15, %v2405_v47  ;;  %v2486_v52 = vmul.f32 %v7083_v15, %v2406_v0  ;;  %v2487_v24 = vmul.f32 %v7083_v15, %v2407_v57  ;;  %v2488_v39 = vmul.f32 %v7083_v15, %v2408_v7 }
 0x1bc   :  { %v7097_v5 = vrot.slane %v2481_v55, %v5618_v43  ;;  %v7100_v31 = vrot.slane %v2482_v18, %v5618_v43  ;;  %v7103_v12 = vrot.slane %v2483_v48, %v5618_v43  ;;  %v7106_v41 = vrot.slane %v2484_v34, %v5618_v43 }
 0x1bd   :  { %v7109_v22 = vrot.slane %v2485_v28, %v5618_v43  ;;  %v7112_v60 = vrot.slane %v2486_v52, %v5618_v43  ;;  %v7115_v11 = vrot.slane %v2487_v24, %v5618_v43  ;;  %v2438_v0 = vrot.slane %v2437_v14, 1 }
 0x1be   :  { %v2561_v50 = vmul.f32 %v7097_v5, %v7087_v29  ;;  %v2563_v16 = vmul.f32 %v7100_v31, %v7087_v29  ;;  %v2565_v47 = vmul.f32 %v7103_v12, %v7087_v29  ;;  %v2567_v57 = vmul.f32 %v7106_v41, %v7087_v29 }
 0x1bf   :  { %v2569_v55 = vmul.f32 %v7109_v22, %v7087_v29  ;;  %v2571_v18 = vmul.f32 %v7112_v60, %v7087_v29  ;;  %v2309_v48 = vmul.f32 %v6964_v2, %v6714_v17  ;;  %v2573_v34 = vmul.f32 %v7115_v11, %v7087_v29 }
 0x1c0   :  { %v7135_v28 = vsub.f32 %v6903_v37, %v2561_v50  ;;  %v2528_v52 = vrot.slane %v2488_v39, %v5618_v43  ;;  %v7139_v24 = vsub.f32 %v6911_v46, %v2563_v16  ;;  %v7142_v7 = vsub.f32 %v6916_v23, %v2565_v47  ;;  %v9710_v46 = vld [vmem:[#allocation19_spill] sm:$0xff]  ;;  %v9711_v23 = vld [vmem:[#allocation17_spill] sm:$0xff]  ;;  %v9713_v16 = vld [vmem:[#allocation20_spill] sm:$0xff] }
 0x1c1   :  { %v7145_v20 = vsub.f32 %v6924_v56, %v2567_v57  ;;  %v7148_v51 = vsub.f32 %v6929_v61, %v2569_v55  ;;  %v2439_v2 = vadd.f32 %v2438_v0, %v2437_v14  ;;  %v7152_v37 = vsub.f32 %v6934_v40, %v2571_v18  ;;  %v2409_v61 = vld [vmem:[#allocation2 + $0x86] sm:$0x1]  ;;  %v2410_v57 = vld [vmem:[#allocation2 + $0x96] sm:$0x1] }
 0x1c2   :  { %9705 = vst [vmem:[#allocation21_spill] sm:$0xff] %v7142_v7  ;;  %2625 = vst [vmem:[#allocation2] sm:$0xff] %v7135_v28  ;;  %v7155_v39 = vsub.f32 %v6954_v1, %v2573_v34  ;;  %v9712_v56 = vsub.f32 %v9710_v46, %v9711_v23  ;;  %v1962_v47 = vmul.f32 %v9713_v16, %v1882_v59  ;;  %v2411_v55 = vld [vmem:[#allocation2 + $0xa6] sm:$0x1]  ;;  %v2412_v18 = vld [vmem:[#allocation2 + $0xb6] sm:$0x1] }
 0x1c3   :  { %9706 = vst [vmem:[#allocation10_spill] sm:$0xff] %v7145_v20  ;;  %9707 = vst [vmem:[#allocation25_spill] sm:$0xff] %v7148_v51  ;;  %v2575_v40 = vmul.f32 %v2528_v52, %v7087_v29  ;;  %v2576_v1 = vmul.f32 %v2528_v52, %v6956_v42  ;;  %v2657_v14 = vmul.f32 %v7083_v15, %v2439_v2  ;;  %v9714_v59 = vmov 0.0  }
 0x1c4   :  { %9708 = vst [vmem:[#allocation13_spill] sm:$0xff] %v7152_v37  ;;  %9709 = vst [vmem:[#allocation15_spill] sm:$0xff] %v7155_v39  ;;  %v2341_v50 = vsub.f32 %v9712_v56, %v2309_v48  ;;  %v2489_v0 = vmul.f32 %v7083_v15, %v2409_v61  ;;  %v7174_v34 = vsel %vm546_vm10, 1.0, %v9714_v59  ;;  %v2490_v46 = vmul.f32 %v7083_v15, %v2410_v57 }
 0x1c5   :  { %2627 = vst [vmem:[#allocation2 + $0x10] sm:$0xff] %v7139_v24  ;;  %2629 = vst [vmem:[#allocation2 + $0x20] sm:$0xff] %v7142_v7  ;;  %v2491_v52 = vmul.f32 %v7083_v15, %v2411_v55  ;;  %v2492_v2 = vmul.f32 %v7083_v15, %v2412_v18  ;;  %v7180_v23 = vsub.f32 %v6983_v35, %v2575_v40 }
 0x1c6   :  { %2631 = vst [vmem:[#allocation2 + $0x30] sm:$0xff] %v7145_v20  ;;  %2633 = vst [vmem:[#allocation2 + $0x40] sm:$0xff] %v7148_v51  ;;  %v7182_v56 = vsub.f32 %v2341_v50, %v2576_v1  ;;  %v2658_v61 = vmul.f32 %v2657_v14, %v7087_v29  ;;  %v2659_v16 = vmul.f32 %v2657_v14, %v6956_v42  ;;  %v2413_v14 = vld [vmem:[#allocation2 + $0xc6] sm:$0x1]  ;;  %v9718_v20 = vld [vmem:[#allocation28_spill] sm:$0xff] }
 0x1c7   :  { %2637 = vst [vmem:[#allocation2 + $0x60] sm:$0xff] %v7155_v39  ;;  %2635 = vst [vmem:[#allocation2 + $0x50] sm:$0xff] %v7152_v37  ;;  %v7187_v39 = vrot.slane %v2489_v0, %v5618_v43  ;;  %v7190_v48 = vrot.slane %v2490_v46, %v5618_v43  ;;  %v7193_v57 = vrot.slane %v2491_v52, %v5618_v43 }
 0x1c8   :  { %9716 = vst [vmem:[#allocation26_spill] sm:$0xff] %v7180_v23  ;;  %v2026_v55 = vrot.slane %v1962_v47, %v5618_v43  ;;  %2639 = vst [vmem:[#allocation2 + $0x70] sm:$0xff] %v7180_v23  ;;  %v7198_v35 = vsub.f32 %v6945_v63, %v2658_v61  ;;  %v7201_v50 = vsub.f32 %v6959_v26, %v2659_v16  ;;  %v2690_v1 = vmul.f32 0.0, %v7182_v56 }
 0x1c9   :  { %v2689_v40 = vmul.f32 %v7174_v34, %v7180_v23  ;;  %v2577_v0 = vmul.f32 %v7187_v39, %v7087_v29  ;;  %v2579_v47 = vmul.f32 %v7190_v48, %v7087_v29  ;;  %v7211_v18 = vrot.slane %v2492_v2, %v5618_v43 }
 0x1ca   :  { %v2493_v63 = vmul.f32 %v7083_v15, %v2413_v14  ;;  %v2698_v26 = vmul.f32 %v7174_v34, %v7198_v35  ;;  %v2699_v52 = vmul.f32 0.0, %v7201_v50  ;;  %v2581_v37 = vmul.f32 %v7193_v57, %v7087_v29  ;;  %v9719_v14 = vld [vmem:[#allocation27_spill] sm:$0xff] }
 0x1cb   :  { %v2691_v46 = vadd.f32 %v2690_v1, %v2689_v40  ;;  %v7218_v61 = vsub.f32 %v6986_v36, %v2577_v0  ;;  %v7221_v16 = vsub.f32 %v6994_v3, %v2579_v47  ;;  %v2057_v7 = vmul.f32 %v2026_v55, %v9718_v20  ;;  %v2414_v1 = vld [vmem:[#allocation2 + $0xd6] sm:$0x1] }
 0x1cc   :  { %v2700_v2 = vadd.f32 %v2699_v52, %v2698_v26  ;;  %v7229_v40 = vsub.f32 %v7012_v58, %v2581_v37  ;;  %v2583_v36 = vmul.f32 %v7211_v18, %v7087_v29  ;;  %v7234_v3 = vrot.slane %v2493_v63, %v5618_v43  ;;  %v2415_v37 = vld [vmem:[#allocation2 + $0xe6] sm:$0x1] }
 0x1cd   :  { %9717 = vst [vmem:[#allocation22_spill] sm:$0xff] %v7221_v16  ;;  %v2692_v51 = vrot.slane %v2691_v46, 4  ;;  %2641 = vst [vmem:[#allocation2 + $0x80] sm:$0xff] %v7218_v61  ;;  %v7237_v0 = vmul.f32 %v2026_v55, %v9719_v14  ;;  %v2494_v20 = vmul.f32 %v7083_v15, %v2414_v1  ;;  %v2089_v55 = vsub.f32 %v7071_v32, %v2057_v7 }
 0x1ce   :  { %2643 = vst [vmem:[#allocation2 + $0x90] sm:$0xff] %v7221_v16  ;;  %2645 = vst [vmem:[#allocation2 + $0xa0] sm:$0xff] %v7229_v40  ;;  %v7242_v26 = vsub.f32 %v7032_v19, %v2583_v36  ;;  %v2585_v58 = vmul.f32 %v7234_v3, %v7087_v29  ;;  %v2495_v16 = vmul.f32 %v7083_v15, %v2415_v37  ;;  %v2701_v36 = vrot.slane %v2700_v2, 4 }
 0x1cf   :  { %9720 = vst [vmem:[#allocation24_spill] sm:$0xff] %v7237_v0  ;;  %v2693_v47 = vadd.f32 %v2692_v51, %v2691_v46  ;;  %v7247_v63 = vrot.slane %v2494_v20, %v5618_v43  ;;  %2121 = vst [vmem:[#allocation2 + $0xf0] sm:$0xff] %v2089_v55 }
 0x1d0   :  { %2647 = vst [vmem:[#allocation2 + $0xb0] sm:$0xff] %v7242_v26  ;;  %v7252_v51 = vsub.f32 %v7040_v6, %v2585_v58  ;;  %v7261_v14 = vrot.slane %v2495_v16, %v5618_v43  ;;  %v2702_v58 = vadd.f32 %v2701_v36, %v2700_v2 }
 0x1d1   :  { %v2694_v52 = vrot.slane %v2693_v47, 2  ;;  %v2587_v1 = vmul.f32 %v7247_v63, %v7087_v29 }
 0x1d2   :  { %9721 = vst [vmem:[#allocation19_spill] sm:$0xff] %v7252_v51  ;;  %2649 = vst [vmem:[#allocation2 + $0xc0] sm:$0xff] %v7252_v51  ;;  %v2589_v32 = vmul.f32 %v7261_v14, %v7087_v29 }
 0x1d3   :  { %v2695_v46 = vadd.f32 %v2694_v52, %v2693_v47  ;;  %v7264_v6 = vsub.f32 %v7048_v30, %v2587_v1  ;;  %v2703_v52 = vrot.slane %v2702_v58, 2 }
 0x1d4   :  { %v7270_v47 = vsub.f32 %v7063_v25, %v2589_v32  ;;  %v2564_v32 = vmul.f32 %v7100_v31, %v6956_v42  ;;  %v7302_v31 = vmul.f32 %v7115_v11, %v6956_v42  ;;  %v7321_v11 = vmul.f32 %v7211_v18, %v6956_v42 }
 0x1d5   :  { %v2696_v20 = vrot.slane %v2695_v46, 1  ;;  %9722 = vst [vmem:[#allocation17_spill] sm:$0xff] %v7264_v6  ;;  %2651 = vst [vmem:[#allocation2 + $0xd0] sm:$0xff] %v7264_v6  ;;  %v2704_v36 = vadd.f32 %v2703_v52, %v2702_v58  ;;  %v7296_v58 = vmul.f32 %v7109_v22, %v6956_v42  ;;  %v7331_v52 = vsel %vm549_vm11, 1.0, %v9714_v59 }
 0x1d6   :  { %9723 = vst [vmem:[#allocation20_spill] sm:$0xff] %v7270_v47  ;;  %2653 = vst [vmem:[#allocation2 + $0xe0] sm:$0xff] %v7270_v47  ;;  %v2149_v30 = vld [vmem:[#allocation2 + $0xf5] sm:$0x1]  ;;  %v9729_v18 = vsub.f32 %v6684_v4, %v6895_v27  ;;  %v9758_v47 = vld [vmem:[#allocation16_spill] sm:$0xff] }
 0x1d7   :  { %v2697_v7 = vadd.f32 %v2696_v20, %v2695_v46  ;;  %v2229_v19 = vmul.f32 %v6858_v54, %v2149_v30  ;;  %v9725_v46 = vld [vmem:[#allocation29_spill] sm:$0xff]  ;;  %v7282_v20 = vmul.f32 %v7097_v5, %v6956_v42  ;;  %v7290_v54 = vmul.f32 %v7103_v12, %v6956_v42 }
 0x1d8   :  { %v2305_v25 = vmul.f32 %v9725_v46, %v6714_v17  ;;  %v2572_v5 = vmul.f32 %v7112_v60, %v6956_v42  ;;  %v7310_v12 = vmul.f32 %v7190_v48, %v6956_v42  ;;  %v7317_v60 = vmul.f32 %v7193_v57, %v6956_v42  ;;  %v2669_v46 = vld [vmem:[#allocation2 + $0x17] sm:$0x1] }
 0x1d9   :  { %v2707_v37 = vand.u32 2147483647, %v2697_v7  ;;  %vm2709_vm10 = vcmp.lt.f32.partialorder %v2697_v7, 0.0  ;;  %v7276_v2 = vrot.slane %v2229_v19, %v5618_v43  ;;  %v2568_v19 = vmul.f32 %v7106_v41, %v6956_v42 }
 0x1da   :  { %v2710_v16 = vsel %vm2709_vm10, -1e-12, %v9703_v13  ;;  %v2337_v22 = vsub.f32 %v6714_v17, %v2305_v25  ;;  %v9727_v48 = vsub.f32 %v6674_v9, %v6889_v44  ;;  %v2598_v57 = vsub.f32 %v6921_v8, %v7290_v54  ;;  %v2668_v44 = vld [vmem:[#allocation2 + $0x7] sm:$0x1] }
 0x1db   :  { %vm2708_vm15 = vcmp.lt.f32.partialorder %v2707_v37, 1e-12  ;;  %9724 = vst [vmem:[#allocation7_spill] sm:$0xff] %v7276_v2  ;;  %v2705_v37 = vrot.slane %v2704_v36, 1  ;;  %v2600_v30 = vsub.f32 %v9729_v18, %v2568_v19  ;;  %v7345_v25 = vsub.f32 %v7180_v23, %v7174_v34 }
 0x1dc   :  { %v2711_v1 = vsel %vm2708_vm15, %v2710_v16, %v2697_v7  ;;  %v2324_v7 = vmul.f32 %v7276_v2, %v6863_v45  ;;  %v7306_v45 = vmul.f32 %v7187_v39, %v6956_v42  ;;  %v2594_v39 = vsub.f32 %v6908_v10, %v7282_v20  ;;  %v2670_v20 = vld [vmem:[#allocation2 + $0x27] sm:$0x1] }
 0x1dd   :  { %5160 = vrcp.f32 %v2711_v1  ;;  %v2596_v16 = vsub.f32 %v9727_v48, %v2564_v32  ;;  %v2602_v10 = vsub.f32 %v6931_v21, %v7296_v58  ;;  %v2604_v1 = vsub.f32 %v2337_v22, %v2572_v5  ;;  %v2671_v21 = vld [vmem:[#allocation2 + $0x37] sm:$0x1]  ;;  %v2672_v32 = vld [vmem:[#allocation2 + $0x47] sm:$0x1] }
 0x1de   :  { %v7312_v41 = vsub.f32 %v2089_v55, %v2324_v7  ;;  %v7353_v7 = vadd.f32 %v2705_v37, %v2704_v36  ;;  %v7361_v19 = vmul.f32 %v7234_v3, %v6956_v42  ;;  %v2674_v58 = vld [vmem:[#allocation2 + $0x67] sm:$0x1]  ;;  %v2673_v5 = vld [vmem:[#allocation2 + $0x57] sm:$0x1] }
 0x1df   :  { %v2675_v22 = vld [vmem:[#allocation2 + $0x77] sm:$0x1] }
 0x1e0   :  { %9726 = vst [vmem:[#allocation28_spill] sm:$0xff] %v7312_v41  ;;  %2388 = vst [vmem:[#allocation2 + $0xf0] sm:$0xff] %v7312_v41  ;;  %v9739_v41 = vld [vmem:[#allocation18_spill] sm:$0xff] }
 0x1e1   :  { %v2618_v17 = vsub.f32 %v9739_v41, %v7361_v19  ;;  %v2588_v41 = vmul.f32 %v7247_v63, %v6956_v42 }
 0x1e7   :  { %v7351_v27 = vpop.eup %5160 }
 0x1e8   :  { %v2748_v48 = vmul.f32 %v7351_v27, %v2668_v44  ;;  %v2749_v18 = vmul.f32 %v7351_v27, %v2669_v46  ;;  %v2750_v36 = vmul.f32 %v7351_v27, %v2670_v20  ;;  %v2751_v37 = vmul.f32 %v7351_v27, %v2671_v21 }
 0x1e9   :  { %v2752_v54 = vmul.f32 %v7351_v27, %v2672_v32  ;;  %v2753_v4 = vmul.f32 %v7351_v27, %v2673_v5  ;;  %v2754_v34 = vmul.f32 %v7351_v27, %v2674_v58  ;;  %v2755_v3 = vmul.f32 %v7351_v27, %v2675_v22 }
 0x1ea   :  { %v2767_v8 = vrot.slane %v2748_v48, %v5618_v43  ;;  %v2771_v9 = vrot.slane %v2749_v18, %v5618_v43  ;;  %v2775_v44 = vrot.slane %v2750_v36, %v5618_v43  ;;  %v2779_v46 = vrot.slane %v2751_v37, %v5618_v43 }
 0x1eb   :  { %v2783_v20 = vrot.slane %v2752_v54, %v5618_v43  ;;  %v2787_v21 = vrot.slane %v2753_v4, %v5618_v43  ;;  %v2791_v32 = vrot.slane %v2754_v34, %v5618_v43  ;;  %v2795_v5 = vrot.slane %v2755_v3, %v5618_v43 }
 0x1ec   :  { %v7380_v58 = vmul.f32 %v2767_v8, %v7345_v25  ;;  %v2829_v22 = vmul.f32 %v2767_v8, %v7182_v56  ;;  %v7384_v48 = vmul.f32 %v2771_v9, %v7345_v25  ;;  %v2831_v18 = vmul.f32 %v2771_v9, %v7182_v56 }
 0x1ed   :  { %v7388_v36 = vmul.f32 %v2775_v44, %v7345_v25  ;;  %v2833_v54 = vmul.f32 %v2775_v44, %v7182_v56  ;;  %v7392_v4 = vmul.f32 %v2779_v46, %v7345_v25  ;;  %v2835_v34 = vmul.f32 %v2779_v46, %v7182_v56 }
 0x1ee   :  { %v7396_v37 = vmul.f32 %v2783_v20, %v7345_v25  ;;  %v2837_v8 = vmul.f32 %v2783_v20, %v7182_v56  ;;  %v7400_v3 = vmul.f32 %v2787_v21, %v7345_v25  ;;  %v2839_v9 = vmul.f32 %v2787_v21, %v7182_v56  ;;  %v9731_v21 = vld [vmem:[#allocation21_spill] sm:$0xff]  ;;  %v2681_v20 = vld [vmem:[#allocation2 + $0xd7] sm:$0x1] }
 0x1ef   :  { %v7404_v55 = vmul.f32 %v2791_v32, %v7345_v25  ;;  %v2841_v44 = vmul.f32 %v2791_v32, %v7182_v56  ;;  %v7408_v59 = vmul.f32 %v2795_v5, %v7345_v25  ;;  %v2843_v46 = vmul.f32 %v2795_v5, %v7182_v56  ;;  %v9732_v32 = vld [vmem:[#allocation10_spill] sm:$0xff]  ;;  %v9733_v5 = vld [vmem:[#allocation25_spill] sm:$0xff] }
 0x1f0   :  { %v7413_v49 = vsub.f32 %v2594_v39, %v2829_v22  ;;  %v7417_v2 = vsub.f32 %v2596_v16, %v2831_v18  ;;  %v7421_v13 = vsub.f32 %v2598_v57, %v2833_v54  ;;  %v7425_v29 = vsub.f32 %v2600_v30, %v2835_v34  ;;  %v9734_v22 = vld [vmem:[#allocation13_spill] sm:$0xff]  ;;  %v9735_v57 = vld [vmem:[#allocation15_spill] sm:$0xff] }
 0x1f1   :  { %9730 = vst [vmem:[#allocation27_spill] sm:$0xff] %v7408_v59  ;;  %v7429_v39 = vsub.f32 %v2602_v10, %v2837_v8  ;;  %v7433_v16 = vsub.f32 %v2604_v1, %v2839_v9  ;;  %v9736_v30 = vsub.f32 %v6956_v42, %v7302_v31  ;;  %v7447_v34 = vsub.f32 %v7182_v56, %v2843_v46  ;;  %v2676_v1 = vld [vmem:[#allocation2 + $0x87] sm:$0x1]  ;;  %v2677_v8 = vld [vmem:[#allocation2 + $0x97] sm:$0x1] }
 0x1f2   :  { %2893 = vst [vmem:[#allocation2 + $0x8] sm:$0xff] %v7413_v49  ;;  %2895 = vst [vmem:[#allocation2 + $0x18] sm:$0xff] %v7417_v2  ;;  %v2678_v9 = vld [vmem:[#allocation2 + $0xa7] sm:$0x1]  ;;  %v2924_v31 = vmul.f32 %v7351_v27, %v7353_v7  ;;  %v2679_v10 = vld [vmem:[#allocation2 + $0xb7] sm:$0x1]  ;;  %v9768_v51 = vsub.f32 %v9731_v21, %v7388_v36 }
 0x1f3   :  { %v7442_v54 = vsub.f32 %v9736_v30, %v2841_v44  ;;  %9738 = vst [vmem:[#allocation21_spill] sm:$0xff] %v7447_v34  ;;  %2897 = vst [vmem:[#allocation2 + $0x28] sm:$0xff] %v7421_v13  ;;  %v2756_v44 = vmul.f32 %v7351_v27, %v2676_v1  ;;  %v2757_v30 = vmul.f32 %v7351_v27, %v2677_v8  ;;  %v2680_v18 = vld [vmem:[#allocation2 + $0xc7] sm:$0x1] }
 0x1f4   :  { %2899 = vst [vmem:[#allocation2 + $0x38] sm:$0xff] %v7425_v29  ;;  %2901 = vst [vmem:[#allocation2 + $0x48] sm:$0xff] %v7429_v39  ;;  %v2758_v46 = vmul.f32 %v7351_v27, %v2678_v9  ;;  %v2759_v0 = vmul.f32 %v7351_v27, %v2679_v10  ;;  %v2760_v7 = vmul.f32 %v7351_v27, %v2680_v18 }
 0x1f5   :  { %9737 = vst [vmem:[#allocation29_spill] sm:$0xff] %v7442_v54  ;;  %2903 = vst [vmem:[#allocation2 + $0x58] sm:$0xff] %v7433_v16  ;;  %v2761_v1 = vmul.f32 %v7351_v27, %v2681_v20  ;;  %v2925_v8 = vmul.f32 %v2924_v31, %v7345_v25  ;;  %v2926_v9 = vmul.f32 %v2924_v31, %v7182_v56 }
 0x1f6   :  { %2905 = vst [vmem:[#allocation2 + $0x68] sm:$0xff] %v7442_v54  ;;  %2907 = vst [vmem:[#allocation2 + $0x78] sm:$0xff] %v7447_v34  ;;  %v2799_v59 = vrot.slane %v2756_v44, %v5618_v43  ;;  %v7469_v23 = vrot.slane %v2757_v30, %v5618_v43  ;;  %v2807_v34 = vrot.slane %v2758_v46, %v5618_v43 }
 0x1f7   :  { %v2811_v10 = vrot.slane %v2759_v0, %v5618_v43  ;;  %v2815_v54 = vrot.slane %v2760_v7, %v5618_v43  ;;  %v7477_v19 = vsub.f32 %v7198_v35, %v2925_v8  ;;  %v7480_v20 = vsub.f32 %v7201_v50, %v2926_v9 }
 0x1f8   :  { %v2844_v18 = vmul.f32 %v2799_v59, %v7345_v25  ;;  %v2845_v31 = vmul.f32 %v2799_v59, %v7182_v56  ;;  %v2847_v44 = vmul.f32 %v7469_v23, %v7182_v56  ;;  %v7487_v0 = vmul.f32 %v2807_v34, %v7345_v25 }
 0x1f9   :  { %v2849_v30 = vmul.f32 %v2807_v34, %v7182_v56  ;;  %v2819_v63 = vrot.slane %v2761_v1, %v5618_v43  ;;  %v2965_v35 = vmul.f32 0.0, %v7477_v19  ;;  %v9740_v50 = vsub.f32 %v6991_v53, %v7306_v45  ;;  %v2682_v45 = vld [vmem:[#allocation2 + $0xe7] sm:$0x1] }
 0x1fa   :  { %v7493_v46 = vsub.f32 %v7218_v61, %v2844_v18  ;;  %v2966_v59 = vmul.f32 %v7331_v52, %v7480_v20  ;;  %v9741_v8 = vsub.f32 %v6999_v38, %v7310_v12  ;;  %v9742_v61 = vsub.f32 %v7017_v33, %v7317_v60  ;;  %v9743_v18 = vld [vmem:[#allocation23_spill] sm:$0xff] }
 0x1fb   :  { %v7498_v7 = vsub.f32 %v9740_v50, %v2845_v31  ;;  %v2620_v53 = vsub.f32 %v9743_v18, %v2588_v41  ;;  %v7523_v33 = vmul.f32 %v2811_v10, %v7345_v25  ;;  %v2851_v60 = vmul.f32 %v2811_v10, %v7182_v56 }
 0x1fc   :  { %v7505_v9 = vsub.f32 %v9741_v8, %v2847_v44  ;;  %v7512_v1 = vsub.f32 %v9742_v61, %v2849_v30  ;;  %v2956_v31 = vmul.f32 0.0, %v7493_v46  ;;  %v2967_v12 = vadd.f32 %v2966_v59, %v2965_v35  ;;  %v9773_v21 = vld [vmem:[#allocation29_spill] sm:$0xff] }
 0x1fd   :  { %2909 = vst [vmem:[#allocation2 + $0x88] sm:$0xff] %v7498_v7  ;;  %v2957_v38 = vmul.f32 %v7331_v52, %v7498_v7  ;;  %v2762_v44 = vmul.f32 %v7351_v27, %v2682_v45  ;;  %v7527_v41 = vmul.f32 %v2815_v54, %v7345_v25  ;;  %v2853_v30 = vmul.f32 %v2815_v54, %v7182_v56 }
 0x1fe   :  { %2911 = vst [vmem:[#allocation2 + $0x98] sm:$0xff] %v7505_v9  ;;  %2913 = vst [vmem:[#allocation2 + $0xa8] sm:$0xff] %v7512_v1  ;;  %v7531_v8 = vmul.f32 %v2819_v63, %v7345_v25  ;;  %v2855_v35 = vmul.f32 %v2819_v63, %v7182_v56  ;;  %v2590_v59 = vmul.f32 %v7261_v14, %v6956_v42  ;;  %v2416_v14 = vld [vmem:[#allocation2 + $0xf6] sm:$0x1] }
 0x1ff   :  { %9744 = vst [vmem:[#allocation10_spill] sm:$0xff] %v7527_v41  ;;  %v2958_v50 = vadd.f32 %v2957_v38, %v2956_v31  ;;  %v9746_v10 = vsub.f32 %v7037_v62, %v7321_v11  ;;  %v7545_v45 = vsub.f32 %v2618_v17, %v2853_v30  ;;  %v2823_v62 = vrot.slane %v2762_v44, %v5618_v43  ;;  %v9749_v17 = vld [vmem:[#allocation14_spill] sm:$0xff]  ;;  %v9752_v44 = vld [vmem:[#allocation12_spill] sm:$0xff] }
 0x200   :  { %9745 = vst [vmem:[#allocation25_spill] sm:$0xff] %v7531_v8  ;;  %v7549_v38 = vsub.f32 %v2620_v53, %v2855_v35  ;;  %v2496_v11 = vmul.f32 %v7083_v15, %v2416_v14  ;;  %v2622_v30 = vsub.f32 %v9749_v17, %v2590_v59  ;;  %v9753_v59 = vld [vmem:[#allocation28_spill] sm:$0xff] }
 0x201   :  { %v7541_v18 = vsub.f32 %v9746_v10, %v2851_v60  ;;  %9747 = vst [vmem:[#allocation13_spill] sm:$0xff] %v7545_v45  ;;  %v2959_v31 = vrot.slane %v2958_v50, 4  ;;  %2917 = vst [vmem:[#allocation2 + $0xc8] sm:$0xff] %v7545_v45  ;;  %v7558_v10 = vmul.f32 %v2823_v62, %v7345_v25  ;;  %v2857_v53 = vmul.f32 %v2823_v62, %v7182_v56 }
 0x202   :  { %9748 = vst [vmem:[#allocation15_spill] sm:$0xff] %v7549_v38  ;;  %2919 = vst [vmem:[#allocation2 + $0xd8] sm:$0xff] %v7549_v38  ;;  %v2560_v35 = vrot.slane %v2496_v11, %v5618_v43  ;;  %v9755_v38 = vmov 1e-12  }
 0x203   :  { %2915 = vst [vmem:[#allocation2 + $0xb8] sm:$0xff] %v7541_v18  ;;  %v2960_v60 = vadd.f32 %v2959_v31, %v2958_v50  ;;  %9750 = vst [vmem:[#allocation18_spill] sm:$0xff] %v7558_v10  ;;  %v7564_v61 = vsub.f32 %v2622_v30, %v2857_v53  ;;  %v2968_v31 = vrot.slane %v2967_v12, 4 }
 0x204   :  { %v2591_v15 = vmul.f32 %v2560_v35, %v9752_v44  ;;  %v9756_v44 = vld [vmem:[#allocation9_spill] sm:$0xff] }
 0x205   :  { %v2961_v63 = vrot.slane %v2960_v60, 2  ;;  %9751 = vst [vmem:[#allocation23_spill] sm:$0xff] %v7564_v61  ;;  %2921 = vst [vmem:[#allocation2 + $0xe8] sm:$0xff] %v7564_v61  ;;  %v2969_v11 = vadd.f32 %v2968_v31, %v2967_v12 }
 0x206   :  { %v7569_v14 = vsub.f32 %v9753_v59, %v2591_v15  ;;  %v2592_v15 = vmul.f32 %v2560_v35, %v6956_v42  ;;  %v9763_v35 = vmov 0.0  }
 0x207   :  { %v2962_v50 = vadd.f32 %v2961_v63, %v2960_v60  ;;  %v2970_v30 = vrot.slane %v2969_v11, 2  ;;  %v9757_v63 = vld [vmem:[#allocation7_spill] sm:$0xff] }
 0x208   :  { %9754 = vst [vmem:[#allocation14_spill] sm:$0xff] %v7569_v14  ;;  %2655 = vst [vmem:[#allocation2 + $0xf0] sm:$0xff] %v7569_v14  ;;  %v2325_v60 = vmul.f32 %v9757_v63, %v9756_v44  ;;  %v2937_v44 = vld [vmem:[#allocation2 + $0x28] sm:$0x1]  ;;  %v2938_v63 = vld [vmem:[#allocation2 + $0x38] sm:$0x1] }
 0x209   :  { %v2963_v17 = vrot.slane %v2962_v50, 1  ;;  %v2971_v10 = vadd.f32 %v2970_v30, %v2969_v11  ;;  %v7596_v30 = vsel %vm551_vm12, 1.0, %v9763_v35  ;;  %v2943_v11 = vld [vmem:[#allocation2 + $0x88] sm:$0x1] }
 0x20b   :  { %v2964_v62 = vadd.f32 %v2963_v17, %v2962_v50  ;;  %v9759_v50 = vld [vmem:[#allocation24_spill] sm:$0xff] }
 0x20c   :  { %v9760_v12 = vsub.f32 %v9758_v47, %v9759_v50  ;;  %v2935_v47 = vld [vmem:[#allocation2 + $0x8] sm:$0x1]  ;;  %v2940_v50 = vld [vmem:[#allocation2 + $0x58] sm:$0x1] }
 0x20d   :  { %v2974_v34 = vand.u32 2147483647, %v2964_v62  ;;  %vm2976_vm11 = vcmp.lt.f32.partialorder %v2964_v62, 0.0 }
 0x20e   :  { %v2977_v54 = vsel %vm2976_vm11, -1e-12, %v9755_v38  ;;  %v2357_v31 = vsub.f32 %v9760_v12, %v2325_v60  ;;  %v2941_v12 = vld [vmem:[#allocation2 + $0x68] sm:$0x1] }
 0x20f   :  { %vm2975_vm5 = vcmp.lt.f32.partialorder %v2974_v34, 1e-12  ;;  %v2683_v61 = vld [vmem:[#allocation2 + $0xf7] sm:$0x1] }
 0x210   :  { %v2978_v53 = vsel %vm2975_vm5, %v2977_v54, %v2964_v62  ;;  %v2763_v59 = vmul.f32 %v7351_v27, %v2683_v61  ;;  %v2624_v38 = vsub.f32 %v2357_v31, %v2592_v15  ;;  %v2972_v62 = vrot.slane %v2971_v10, 1  ;;  %v2936_v61 = vld [vmem:[#allocation2 + $0x18] sm:$0x1] }
 0x211   :  { %5162 = vrcp.f32 %v2978_v53  ;;  %v7587_v53 = vmul.f32 %v7469_v23, %v7345_v25  ;;  %v2939_v23 = vld [vmem:[#allocation2 + $0x48] sm:$0x1] }
 0x212   :  { %v2827_v17 = vrot.slane %v2763_v59, %v5618_v43  ;;  %v7607_v15 = vadd.f32 %v2972_v62, %v2971_v10  ;;  %v2942_v59 = vld [vmem:[#allocation2 + $0x78] sm:$0x1] }
 0x214   :  { %v7582_v34 = vmul.f32 %v2827_v17, %v7345_v25  ;;  %v2859_v54 = vmul.f32 %v2827_v17, %v7182_v56  ;;  %v7603_v25 = vsub.f32 %v7498_v7, %v7331_v52 }
 0x216   :  { %9761 = vst [vmem:[#allocation12_spill] sm:$0xff] %v7582_v34  ;;  %v7591_v27 = vsub.f32 %v2624_v38, %v2859_v54  ;;  %v9765_v38 = vld [vmem:[#allocation22_spill] sm:$0xff] }
 0x218   :  { %9762 = vst [vmem:[#allocation28_spill] sm:$0xff] %v7591_v27  ;;  %2923 = vst [vmem:[#allocation2 + $0xf8] sm:$0xff] %v7591_v27 }
 0x21b   :  { %v7599_v56 = vpop.eup %5162 }
 0x21c   :  { %v3015_v31 = vmul.f32 %v7599_v56, %v2935_v47  ;;  %v3016_v17 = vmul.f32 %v7599_v56, %v2936_v61  ;;  %v3017_v54 = vmul.f32 %v7599_v56, %v2937_v44  ;;  %v3018_v42 = vmul.f32 %v7599_v56, %v2938_v63 }
 0x21d   :  { %v3019_v52 = vmul.f32 %v7599_v56, %v2939_v23  ;;  %v3020_v35 = vmul.f32 %v7599_v56, %v2940_v50  ;;  %v3021_v60 = vmul.f32 %v7599_v56, %v2941_v12  ;;  %v3022_v10 = vmul.f32 %v7599_v56, %v2942_v59 }
 0x21e   :  { %v3023_v62 = vmul.f32 %v7599_v56, %v2943_v11  ;;  %v3034_v27 = vrot.slane %v3015_v31, %v5618_v43  ;;  %v3038_v47 = vrot.slane %v3016_v17, %v5618_v43  ;;  %v3042_v61 = vrot.slane %v3017_v54, %v5618_v43 }
 0x21f   :  { %v3046_v44 = vrot.slane %v3018_v42, %v5618_v43  ;;  %v3050_v63 = vrot.slane %v3019_v52, %v5618_v43  ;;  %v3054_v23 = vrot.slane %v3020_v35, %v5618_v43  ;;  %v3058_v50 = vrot.slane %v3021_v60, %v5618_v43 }
 0x220   :  { %v3062_v12 = vrot.slane %v3022_v10, %v5618_v43  ;;  %v3066_v59 = vrot.slane %v3023_v62, %v5618_v43  ;;  %v3095_v11 = vmul.f32 %v3034_v27, %v7493_v46  ;;  %v3096_v31 = vmul.f32 %v3034_v27, %v7603_v25 }
 0x221   :  { %v3097_v17 = vmul.f32 %v3038_v47, %v7493_v46  ;;  %v3098_v54 = vmul.f32 %v3038_v47, %v7603_v25  ;;  %v3099_v42 = vmul.f32 %v3042_v61, %v7493_v46  ;;  %v3100_v52 = vmul.f32 %v3042_v61, %v7603_v25 }
 0x222   :  { %v3101_v35 = vmul.f32 %v3046_v44, %v7493_v46  ;;  %v3102_v60 = vmul.f32 %v3046_v44, %v7603_v25  ;;  %v3103_v10 = vmul.f32 %v3050_v63, %v7493_v46  ;;  %v3104_v62 = vmul.f32 %v3050_v63, %v7603_v25 }
 0x223   :  { %v3105_v34 = vmul.f32 %v3054_v23, %v7493_v46  ;;  %v3106_v27 = vmul.f32 %v3054_v23, %v7603_v25  ;;  %v3107_v14 = vmul.f32 %v3058_v50, %v7493_v46  ;;  %v3108_v47 = vmul.f32 %v3058_v50, %v7603_v25 }
 0x224   :  { %v3109_v8 = vmul.f32 %v3062_v12, %v7493_v46  ;;  %v3110_v61 = vmul.f32 %v3062_v12, %v7603_v25  ;;  %v7644_v6 = vmul.f32 %v3066_v59, %v7493_v46  ;;  %v3112_v44 = vmul.f32 %v3066_v59, %v7603_v25 }
 0x225   :  { %v9766_v63 = vsub.f32 %v7135_v28, %v7380_v58  ;;  %v7653_v23 = vsub.f32 %v7413_v49, %v3096_v31  ;;  %v9767_v50 = vsub.f32 %v7139_v24, %v7384_v48  ;;  %v7661_v12 = vsub.f32 %v7417_v2, %v3098_v54  ;;  %v2945_v31 = vld [vmem:[#allocation2 + $0xa8] sm:$0x1] }
 0x226   :  { %v7666_v59 = vsub.f32 %v9768_v51, %v3099_v42  ;;  %v7669_v28 = vsub.f32 %v7421_v13, %v3100_v52  ;;  %v9769_v49 = vsub.f32 %v9732_v32, %v7392_v4  ;;  %v7677_v24 = vsub.f32 %v7425_v29, %v3102_v60  ;;  %v2947_v54 = vld [vmem:[#allocation2 + $0xc8] sm:$0x1]  ;;  %v2948_v42 = vld [vmem:[#allocation2 + $0xd8] sm:$0x1] }
 0x227   :  { %v7650_v45 = vsub.f32 %v9766_v63, %v3095_v11  ;;  %v7658_v41 = vsub.f32 %v9767_v50, %v3097_v17  ;;  %v9770_v2 = vsub.f32 %v9733_v5, %v7396_v37  ;;  %v7685_v36 = vsub.f32 %v7429_v39, %v3104_v62  ;;  %3160 = vst [vmem:[#allocation2 + $0x8] sm:$0xff] %v7653_v23  ;;  %v9774_v5 = vld [vmem:[#allocation26_spill] sm:$0xff]  ;;  %v9775_v39 = vld [vmem:[#allocation27_spill] sm:$0xff]  ;;  %v2944_v11 = vld [vmem:[#allocation2 + $0x98] sm:$0x1] }
 0x228   :  { %v7674_v58 = vsub.f32 %v9769_v49, %v3101_v35  ;;  %v9771_v13 = vsub.f32 %v9734_v22, %v7400_v3  ;;  %v7693_v4 = vsub.f32 %v7433_v16, %v3106_v27  ;;  %3162 = vst [vmem:[#allocation2 + $0x18] sm:$0xff] %v7661_v12  ;;  %v9772_v29 = vsub.f32 %v9735_v57, %v7404_v55  ;;  %v2946_v17 = vld [vmem:[#allocation2 + $0xb8] sm:$0x1] }
 0x229   :  { %v7682_v48 = vsub.f32 %v9770_v2, %v3103_v10  ;;  %v7703_v32 = vsub.f32 %v9773_v21, %v3108_v47  ;;  %v9776_v3 = vsub.f32 %v9774_v5, %v9775_v39  ;;  %3164 = vst [vmem:[#allocation2 + $0x28] sm:$0xff] %v7669_v28  ;;  %3166 = vst [vmem:[#allocation2 + $0x38] sm:$0xff] %v7677_v24  ;;  %v2949_v10 = vld [vmem:[#allocation2 + $0xe8] sm:$0x1] }
 0x22a   :  { %v7690_v51 = vsub.f32 %v9771_v13, %v3105_v34  ;;  %v7700_v37 = vsub.f32 %v9772_v29, %v3107_v14  ;;  %v9777_v34 = vld [vmem:[#allocation21_spill] sm:$0xff]  ;;  %v7718_v57 = vsub.f32 %v7498_v7, %v3112_v44  ;;  %3168 = vst [vmem:[#allocation2 + $0x48] sm:$0xff] %v7685_v36  ;;  %3170 = vst [vmem:[#allocation2 + $0x58] sm:$0xff] %v7693_v4 }
 0x22b   :  { %v7708_v22 = vsub.f32 %v9776_v3, %v3109_v8  ;;  %v7711_v16 = vsub.f32 %v9777_v34, %v3110_v61  ;;  %v3024_v8 = vmul.f32 %v7599_v56, %v2944_v11  ;;  %v3191_v14 = vmul.f32 %v7599_v56, %v7607_v15  ;;  %3172 = vst [vmem:[#allocation2 + $0x68] sm:$0xff] %v7703_v32 }
 0x22c   :  { %v3025_v52 = vmul.f32 %v7599_v56, %v2945_v31  ;;  %v3026_v7 = vmul.f32 %v7599_v56, %v2946_v17  ;;  %v3027_v35 = vmul.f32 %v7599_v56, %v2947_v54  ;;  %v3028_v60 = vmul.f32 %v7599_v56, %v2948_v42  ;;  %3176 = vst [vmem:[#allocation2 + $0x88] sm:$0xff] %v7718_v57  ;;  %v2950_v42 = vld [vmem:[#allocation2 + $0xf8] sm:$0x1] }
 0x22d   :  { %3174 = vst [vmem:[#allocation2 + $0x78] sm:$0xff] %v7711_v16  ;;  %v3070_v15 = vrot.slane %v3024_v8, %v5618_v43  ;;  %v3192_v62 = vmul.f32 %v3191_v14, %v7493_v46  ;;  %v3193_v27 = vmul.f32 %v3191_v14, %v7603_v25  ;;  %v3029_v47 = vmul.f32 %v7599_v56, %v2949_v10  ;;  %v9783_v10 = vld [vmem:[#allocation10_spill] sm:$0xff] }
 0x22e   :  { %v3074_v61 = vrot.slane %v3025_v52, %v5618_v43  ;;  %v3078_v44 = vrot.slane %v3026_v7, %v5618_v43  ;;  %v3082_v63 = vrot.slane %v3027_v35, %v5618_v43  ;;  %v3086_v50 = vrot.slane %v3028_v60, %v5618_v43  ;;  %v9782_v60 = vld [vmem:[#allocation19_spill] sm:$0xff] }
 0x22f   :  { %v3113_v49 = vmul.f32 %v3070_v15, %v7493_v46  ;;  %v3114_v2 = vmul.f32 %v3070_v15, %v7603_v25  ;;  %v7743_v13 = vsub.f32 %v7477_v19, %v3192_v62  ;;  %v7746_v29 = vsub.f32 %v7480_v20, %v3193_v27  ;;  %v9786_v27 = vld [vmem:[#allocation13_spill] sm:$0xff] }
 0x230   :  { %v3115_v21 = vmul.f32 %v3074_v61, %v7493_v46  ;;  %v3116_v5 = vmul.f32 %v3074_v61, %v7603_v25  ;;  %v3117_v39 = vmul.f32 %v3078_v44, %v7493_v46  ;;  %v3118_v3 = vmul.f32 %v3078_v44, %v7603_v25  ;;  %v9787_v44 = vld [vmem:[#allocation17_spill] sm:$0xff] }
 0x231   :  { %v9778_v34 = vsub.f32 %v9765_v38, %v7587_v53  ;;  %v7758_v31 = vsub.f32 %v7505_v9, %v3114_v2  ;;  %v3232_v19 = vmul.f32 0.0, %v7743_v13  ;;  %v3233_v20 = vmul.f32 %v7596_v30, %v7746_v29 }
 0x232   :  { %v9779_v8 = vsub.f32 %v7229_v40, %v7487_v0  ;;  %v7769_v17 = vsub.f32 %v7512_v1, %v3116_v5  ;;  %v9780_v53 = vsub.f32 %v7242_v26, %v7523_v33  ;;  %v7777_v9 = vsub.f32 %v7541_v18, %v3118_v3 }
 0x233   :  { %v7755_v11 = vsub.f32 %v9778_v34, %v3113_v49  ;;  %3178 = vst [vmem:[#allocation2 + $0x98] sm:$0xff] %v7758_v31  ;;  %v3224_v40 = vmul.f32 %v7596_v30, %v7758_v31  ;;  %v3234_v0 = vadd.f32 %v3233_v20, %v3232_v19  ;;  %v3119_v1 = vmul.f32 %v3082_v63, %v7493_v46  ;;  %v9792_v34 = vld [vmem:[#allocation20_spill] sm:$0xff]  ;;  %v9793_v19 = vld [vmem:[#allocation18_spill] sm:$0xff] }
 0x234   :  { %v7766_v14 = vsub.f32 %v9779_v8, %v3115_v21  ;;  %v7774_v38 = vsub.f32 %v9780_v53, %v3117_v39  ;;  %3180 = vst [vmem:[#allocation2 + $0xa8] sm:$0xff] %v7769_v17  ;;  %3182 = vst [vmem:[#allocation2 + $0xb8] sm:$0xff] %v7777_v9  ;;  %v3120_v26 = vmul.f32 %v3082_v63, %v7603_v25  ;;  %v9788_v63 = vld [vmem:[#allocation25_spill] sm:$0xff]  ;;  %v9796_v53 = vld [vmem:[#allocation23_spill] sm:$0xff] }
 0x235   :  { %v3223_v54 = vmul.f32 0.0, %v7755_v11  ;;  %v3121_v33 = vmul.f32 %v3086_v50, %v7493_v46  ;;  %v3122_v18 = vmul.f32 %v3086_v50, %v7603_v25  ;;  %v3090_v7 = vrot.slane %v3029_v47, %v5618_v43  ;;  %v9791_v50 = vld [vmem:[#allocation15_spill] sm:$0xff] }
 0x236   :  { %9781 = vst [vmem:[#allocation9_spill] sm:$0xff] %v7774_v38  ;;  %v3030_v35 = vmul.f32 %v7599_v56, %v2950_v42  ;;  %v9784_v15 = vsub.f32 %v9782_v60, %v9783_v10  ;;  %v7797_v61 = vsub.f32 %v9786_v27, %v3120_v26  ;;  %v9789_v49 = vsub.f32 %v9787_v44, %v9788_v63 }
 0x237   :  { %v3225_v52 = vadd.f32 %v3224_v40, %v3223_v54  ;;  %v7805_v21 = vsub.f32 %v9791_v50, %v3122_v18  ;;  %v3123_v47 = vmul.f32 %v3090_v7, %v7493_v46  ;;  %v3124_v56 = vmul.f32 %v3090_v7, %v7603_v25  ;;  %v9798_v18 = vld [vmem:[#allocation12_spill] sm:$0xff] }
 0x238   :  { %v7794_v62 = vsub.f32 %v9784_v15, %v3119_v1  ;;  %v7802_v2 = vsub.f32 %v9789_v49, %v3121_v33  ;;  %3184 = vst [vmem:[#allocation2 + $0xc8] sm:$0xff] %v7797_v61  ;;  %v3094_v39 = vrot.slane %v3030_v35, %v5618_v43  ;;  %v9794_v20 = vsub.f32 %v9792_v34, %v9793_v19  ;;  %v9797_v33 = vld [vmem:[#allocation14_spill] sm:$0xff]  ;;  %v3203_v34 = vld [vmem:[#allocation2 + $0x19] sm:$0x1] }
 0x239   :  { %v3226_v5 = vrot.slane %v3225_v52, 4  ;;  %3186 = vst [vmem:[#allocation2 + $0xd8] sm:$0xff] %v7805_v21  ;;  %v7818_v54 = vsub.f32 %v9796_v53, %v3124_v56  ;;  %v9799_v42 = vsub.f32 %v9797_v33, %v9798_v18  ;;  %v3235_v10 = vrot.slane %v3234_v0, 4  ;;  %v3206_v53 = vld [vmem:[#allocation2 + $0x49] sm:$0x1] }
 0x23a   :  { %9785 = vst [vmem:[#allocation7_spill] sm:$0xff] %v7794_v62  ;;  %9790 = vst [vmem:[#allocation16_spill] sm:$0xff] %v7802_v2  ;;  %v7815_v8 = vsub.f32 %v9794_v20, %v3123_v47  ;;  %v3125_v40 = vmul.f32 %v3094_v39, %v7493_v46  ;;  %v3126_v1 = vmul.f32 %v3094_v39, %v7603_v25  ;;  %v9803_v25 = vmov 1e-12   ;;  %v3202_v39 = vld [vmem:[#allocation2 + $0x9] sm:$0x1] }
 0x23b   :  { %v3227_v3 = vadd.f32 %v3226_v5, %v3225_v52  ;;  %3188 = vst [vmem:[#allocation2 + $0xe8] sm:$0xff] %v7818_v54  ;;  %v9801_v52 = vld [vmem:[#allocation28_spill] sm:$0xff]  ;;  %v3236_v44 = vadd.f32 %v3235_v10, %v3234_v0  ;;  %v7837_v0 = vsub.f32 %v7758_v31, %v7596_v30  ;;  %v3210_v10 = vld [vmem:[#allocation2 + $0x89] sm:$0x1] }
 0x23c   :  { %9795 = vst [vmem:[#allocation24_spill] sm:$0xff] %v7815_v8  ;;  %v7826_v7 = vsub.f32 %v9799_v42, %v3125_v40  ;;  %v7829_v35 = vsub.f32 %v9801_v52, %v3126_v1  ;;  %v3205_v20 = vld [vmem:[#allocation2 + $0x39] sm:$0x1] }
 0x23d   :  { %v3228_v26 = vrot.slane %v3227_v3, 2  ;;  %v3237_v50 = vrot.slane %v3236_v44, 2  ;;  %v3207_v1 = vld [vmem:[#allocation2 + $0x59] sm:$0x1] }
 0x23e   :  { %9800 = vst [vmem:[#allocation22_spill] sm:$0xff] %v7826_v7  ;;  %9802 = vst [vmem:[#allocation29_spill] sm:$0xff] %v7829_v35  ;;  %v3209_v33 = vld [vmem:[#allocation2 + $0x79] sm:$0x1] }
 0x23f   :  { %v3229_v60 = vadd.f32 %v3228_v26, %v3227_v3  ;;  %3190 = vst [vmem:[#allocation2 + $0xf8] sm:$0xff] %v7829_v35  ;;  %v3238_v47 = vadd.f32 %v3237_v50, %v3236_v44  ;;  %v3204_v3 = vld [vmem:[#allocation2 + $0x29] sm:$0x1] }
 0x240   :  { %v3208_v26 = vld [vmem:[#allocation2 + $0x69] sm:$0x1] }
 0x241   :  { %v3230_v15 = vrot.slane %v3229_v60, 1  ;;  %v3239_v56 = vrot.slane %v3238_v47, 1 }
 0x243   :  { %v3231_v27 = vadd.f32 %v3230_v15, %v3229_v60  ;;  %v7839_v40 = vadd.f32 %v3239_v56, %v3238_v47  ;;  %v3211_v15 = vld [vmem:[#allocation2 + $0x99] sm:$0x1] }
 0x245   :  { %v3241_v63 = vand.u32 2147483647, %v3231_v27  ;;  %vm3243_vm12 = vcmp.lt.f32.partialorder %v3231_v27, 0.0 }
 0x246   :  { %v3244_v49 = vsel %vm3243_vm12, -1e-12, %v9803_v25 }
 0x247   :  { %vm3242_vm3 = vcmp.lt.f32.partialorder %v3241_v63, 1e-12 }
 0x248   :  { %v3245_v5 = vsel %vm3242_vm3, %v3244_v49, %v3231_v27 }
 0x249   :  { %5164 = vrcp.f32 %v3245_v5 }
 0x253   :  { %v7833_v19 = vpop.eup %5164 }
 0x254   :  { %v3282_v18 = vmul.f32 %v7833_v19, %v3202_v39  ;;  %v3283_v42 = vmul.f32 %v7833_v19, %v3203_v34  ;;  %v3284_v52 = vmul.f32 %v7833_v19, %v3204_v3  ;;  %v3285_v60 = vmul.f32 %v7833_v19, %v3205_v20 }
 0x255   :  { %v3286_v27 = vmul.f32 %v7833_v19, %v3206_v53  ;;  %v3287_v30 = vmul.f32 %v7833_v19, %v3207_v1  ;;  %v3288_v44 = vmul.f32 %v7833_v19, %v3208_v26  ;;  %v3289_v63 = vmul.f32 %v7833_v19, %v3209_v33 }
 0x256   :  { %v3290_v49 = vmul.f32 %v7833_v19, %v3210_v10  ;;  %v3291_v50 = vmul.f32 %v7833_v19, %v3211_v15  ;;  %v3301_v5 = vrot.slane %v3282_v18, %v5618_v43  ;;  %v3305_v47 = vrot.slane %v3283_v42, %v5618_v43 }
 0x257   :  { %v3309_v56 = vrot.slane %v3284_v52, %v5618_v43  ;;  %v3313_v39 = vrot.slane %v3285_v60, %v5618_v43  ;;  %v3317_v34 = vrot.slane %v3286_v27, %v5618_v43  ;;  %v3321_v3 = vrot.slane %v3287_v30, %v5618_v43 }
 0x258   :  { %v3325_v20 = vrot.slane %v3288_v44, %v5618_v43  ;;  %v3329_v53 = vrot.slane %v3289_v63, %v5618_v43  ;;  %v3333_v1 = vrot.slane %v3290_v49, %v5618_v43  ;;  %v3337_v26 = vrot.slane %v3291_v50, %v5618_v43 }
 0x259   :  { %v7862_v33 = vmul.f32 %v3301_v5, %v7755_v11  ;;  %v3363_v18 = vmul.f32 %v3301_v5, %v7837_v0  ;;  %v7866_v42 = vmul.f32 %v3305_v47, %v7755_v11  ;;  %v3365_v52 = vmul.f32 %v3305_v47, %v7837_v0 }
 0x25a   :  { %v7870_v60 = vmul.f32 %v3309_v56, %v7755_v11  ;;  %v3367_v10 = vmul.f32 %v3309_v56, %v7837_v0  ;;  %v7874_v15 = vmul.f32 %v3313_v39, %v7755_v11  ;;  %v3369_v27 = vmul.f32 %v3313_v39, %v7837_v0 }
 0x25b   :  { %v7878_v30 = vmul.f32 %v3317_v34, %v7755_v11  ;;  %v3371_v44 = vmul.f32 %v3317_v34, %v7837_v0  ;;  %v7882_v63 = vmul.f32 %v3321_v3, %v7755_v11  ;;  %v3373_v49 = vmul.f32 %v3321_v3, %v7837_v0 }
 0x25c   :  { %v7886_v50 = vmul.f32 %v3325_v20, %v7755_v11  ;;  %v3375_v5 = vmul.f32 %v3325_v20, %v7837_v0  ;;  %v7890_v47 = vmul.f32 %v3329_v53, %v7755_v11  ;;  %v3377_v56 = vmul.f32 %v3329_v53, %v7837_v0 }
 0x25d   :  { %v3378_v39 = vmul.f32 %v3333_v1, %v7755_v11  ;;  %v3379_v55 = vmul.f32 %v3333_v1, %v7837_v0  ;;  %v7896_v34 = vmul.f32 %v3337_v26, %v7755_v11  ;;  %v3381_v25 = vmul.f32 %v3337_v26, %v7837_v0 }
 0x25e   :  { %v7902_v35 = vsub.f32 %v7653_v23, %v3363_v18  ;;  %v7907_v53 = vsub.f32 %v7661_v12, %v3365_v52  ;;  %v7912_v7 = vsub.f32 %v7669_v28, %v3367_v10  ;;  %v7917_v3 = vsub.f32 %v7677_v24, %v3369_v27 }
 0x25f   :  { %v7922_v18 = vsub.f32 %v7685_v36, %v3371_v44  ;;  %v7927_v52 = vsub.f32 %v7693_v4, %v3373_v49  ;;  %v7934_v24 = vsub.f32 %v7703_v32, %v3375_v5  ;;  %v7939_v10 = vsub.f32 %v7711_v16, %v3377_v56  ;;  %v3212_v16 = vld [vmem:[#allocation2 + $0xa9] sm:$0x1]  ;;  %v3213_v5 = vld [vmem:[#allocation2 + $0xb9] sm:$0x1] }
 0x260   :  { %3427 = vst [vmem:[#allocation2 + $0x8] sm:$0xff] %v7902_v35  ;;  %3429 = vst [vmem:[#allocation2 + $0x18] sm:$0xff] %v7907_v53  ;;  %v9804_v4 = vsub.f32 %v7493_v46, %v7644_v6  ;;  %v7949_v44 = vsub.f32 %v7718_v57, %v3379_v55  ;;  %v7954_v49 = vsub.f32 %v7758_v31, %v3381_v25  ;;  %v3214_v56 = vld [vmem:[#allocation2 + $0xc9] sm:$0x1]  ;;  %v3215_v31 = vld [vmem:[#allocation2 + $0xd9] sm:$0x1] }
 0x261   :  { %3431 = vst [vmem:[#allocation2 + $0x28] sm:$0xff] %v7912_v7  ;;  %3433 = vst [vmem:[#allocation2 + $0x38] sm:$0xff] %v7917_v3  ;;  %v3292_v6 = vmul.f32 %v7833_v19, %v3212_v16  ;;  %v3458_v46 = vmul.f32 %v7833_v19, %v7839_v40  ;;  %v3293_v55 = vmul.f32 %v7833_v19, %v3213_v5  ;;  %v3216_v25 = vld [vmem:[#allocation2 + $0xe9] sm:$0x1] }
 0x262   :  { %v7946_v27 = vsub.f32 %v9804_v4, %v3378_v39  ;;  %3435 = vst [vmem:[#allocation2 + $0x48] sm:$0xff] %v7922_v18  ;;  %3437 = vst [vmem:[#allocation2 + $0x58] sm:$0xff] %v7927_v52  ;;  %v3294_v57 = vmul.f32 %v7833_v19, %v3214_v56  ;;  %v3217_v39 = vld [vmem:[#allocation2 + $0xf9] sm:$0x1]  ;;  %v9805_v4 = vmov 0.0   ;;  %v3295_v16 = vmul.f32 %v7833_v19, %v3215_v31 }
 0x263   :  { %3439 = vst [vmem:[#allocation2 + $0x68] sm:$0xff] %v7934_v24  ;;  %3441 = vst [vmem:[#allocation2 + $0x78] sm:$0xff] %v7939_v10  ;;  %v7970_v36 = vsel %vm553_vm13, 1.0, %v9805_v4  ;;  %v3296_v40 = vmul.f32 %v7833_v19, %v3216_v25  ;;  %v3297_v5 = vmul.f32 %v7833_v19, %v3217_v39  ;;  %v3341_v56 = vrot.slane %v3292_v6, %v5618_v43 }
 0x264   :  { %3443 = vst [vmem:[#allocation2 + $0x88] sm:$0xff] %v7949_v44  ;;  %3445 = vst [vmem:[#allocation2 + $0x98] sm:$0xff] %v7954_v49  ;;  %v3459_v28 = vmul.f32 %v3458_v46, %v7755_v11  ;;  %v3460_v12 = vmul.f32 %v3458_v46, %v7837_v0  ;;  %v3345_v23 = vrot.slane %v3293_v55, %v5618_v43 }
 0x265   :  { %v3349_v26 = vrot.slane %v3294_v57, %v5618_v43  ;;  %v3353_v1 = vrot.slane %v3295_v16, %v5618_v43  ;;  %v3357_v20 = vrot.slane %v3296_v40, %v5618_v43  ;;  %v3361_v31 = vrot.slane %v3297_v5, %v5618_v43 }
 0x266   :  { %v3382_v25 = vmul.f32 %v3341_v56, %v7755_v11  ;;  %v3383_v19 = vmul.f32 %v3341_v56, %v7837_v0  ;;  %v7986_v6 = vsub.f32 %v7743_v13, %v3459_v28  ;;  %v7989_v39 = vsub.f32 %v7746_v29, %v3460_v12 }
 0x267   :  { %v7992_v46 = vmul.f32 %v3345_v23, %v7755_v11  ;;  %v3385_v55 = vmul.f32 %v3345_v23, %v7837_v0  ;;  %v7996_v57 = vmul.f32 %v3349_v26, %v7755_v11  ;;  %v3387_v16 = vmul.f32 %v3349_v26, %v7837_v0 }
 0x268   :  { %9807 = vst [vmem:[#allocation26_spill] sm:$0xff] %v7986_v6  ;;  %9808 = vst [vmem:[#allocation27_spill] sm:$0xff] %v7989_v39  ;;  %v8000_v40 = vsub.f32 %v7766_v14, %v3382_v25  ;;  %v8003_v5 = vsub.f32 %v7769_v17, %v3383_v19  ;;  %v3499_v13 = vmul.f32 0.0, %v7986_v6  ;;  %v3500_v29 = vmul.f32 %v7970_v36, %v7989_v39 }
 0x269   :  { %9809 = vst [vmem:[#allocation21_spill] sm:$0xff] %v7992_v46  ;;  %9810 = vst [vmem:[#allocation19_spill] sm:$0xff] %v7996_v57  ;;  %v8011_v23 = vsub.f32 %v7777_v9, %v3385_v55  ;;  %v8016_v14 = vsub.f32 %v7797_v61, %v3387_v16  ;;  %v8025_v9 = vmul.f32 %v3353_v1, %v7755_v11 }
 0x26a   :  { %3447 = vst [vmem:[#allocation2 + $0xa8] sm:$0xff] %v8003_v5  ;;  %v3490_v17 = vmul.f32 0.0, %v8000_v40  ;;  %v3491_v28 = vmul.f32 %v7970_v36, %v8003_v5  ;;  %v3501_v56 = vadd.f32 %v3500_v29, %v3499_v13  ;;  %v3389_v25 = vmul.f32 %v3353_v1, %v7837_v0 }
 0x26b   :  { %9811 = vst [vmem:[#allocation10_spill] sm:$0xff] %v8011_v23  ;;  %9812 = vst [vmem:[#allocation13_spill] sm:$0xff] %v8016_v14  ;;  %v8029_v61 = vmul.f32 %v3357_v20, %v7755_v11  ;;  %v3391_v19 = vmul.f32 %v3357_v20, %v7837_v0  ;;  %v8033_v16 = vmul.f32 %v3361_v31, %v7755_v11 }
 0x26c   :  { %3449 = vst [vmem:[#allocation2 + $0xb8] sm:$0xff] %v8011_v23  ;;  %3451 = vst [vmem:[#allocation2 + $0xc8] sm:$0xff] %v8016_v14  ;;  %v3492_v55 = vadd.f32 %v3491_v28, %v3490_v17  ;;  %v3393_v13 = vmul.f32 %v3361_v31, %v7837_v0  ;;  %v8039_v26 = vsub.f32 %v7805_v21, %v3389_v25  ;;  %v9819_v28 = vld [vmem:[#allocation29_spill] sm:$0xff]  ;;  %v3502_v25 = vrot.slane %v3501_v56, 4 }
 0x26d   :  { %9813 = vst [vmem:[#allocation17_spill] sm:$0xff] %v8025_v9  ;;  %9814 = vst [vmem:[#allocation25_spill] sm:$0xff] %v8029_v61  ;;  %v8044_v12 = vsub.f32 %v7818_v54, %v3391_v19  ;;  %v9821_v61 = vmov 1e-12   ;;  %v9824_v4 = vsub.f32 %v7666_v59, %v7870_v60 }
 0x26e   :  { %9815 = vst [vmem:[#allocation15_spill] sm:$0xff] %v8033_v16  ;;  %9816 = vst [vmem:[#allocation20_spill] sm:$0xff] %v8039_v26  ;;  %v3493_v14 = vrot.slane %v3492_v55, 4  ;;  %v8049_v57 = vsub.f32 %v9819_v28, %v3393_v13  ;;  %v3503_v19 = vadd.f32 %v3502_v25, %v3501_v56  ;;  %v8059_v56 = vsub.f32 %v8003_v5, %v7970_v36  ;;  %v3475_v25 = vld [vmem:[#allocation2 + $0x6a] sm:$0x1] }
 0x26f   :  { %9817 = vst [vmem:[#allocation18_spill] sm:$0xff] %v8044_v12  ;;  %3453 = vst [vmem:[#allocation2 + $0xd8] sm:$0xff] %v8039_v26 }
 0x270   :  { %9820 = vst [vmem:[#allocation23_spill] sm:$0xff] %v8049_v57  ;;  %3455 = vst [vmem:[#allocation2 + $0xe8] sm:$0xff] %v8044_v12  ;;  %v3494_v0 = vadd.f32 %v3493_v14, %v3492_v55  ;;  %v3504_v16 = vrot.slane %v3503_v19, 2  ;;  %v3469_v12 = vld [vmem:[#allocation2 + $0xa] sm:$0x1] }
 0x271   :  { %3457 = vst [vmem:[#allocation2 + $0xf8] sm:$0xff] %v8049_v57  ;;  %v3470_v14 = vld [vmem:[#allocation2 + $0x1a] sm:$0x1]  ;;  %v3471_v57 = vld [vmem:[#allocation2 + $0x2a] sm:$0x1] }
 0x272   :  { %v3495_v21 = vrot.slane %v3494_v0, 2  ;;  %v3505_v28 = vadd.f32 %v3504_v16, %v3503_v19  ;;  %v3479_v8 = vld [vmem:[#allocation2 + $0xaa] sm:$0x1] }
 0x274   :  { %v3496_v31 = vadd.f32 %v3495_v21, %v3494_v0  ;;  %v3506_v20 = vrot.slane %v3505_v28, 1  ;;  %v3472_v0 = vld [vmem:[#allocation2 + $0x3a] sm:$0x1]  ;;  %v3473_v21 = vld [vmem:[#allocation2 + $0x4a] sm:$0x1] }
 0x276   :  { %v3497_v1 = vrot.slane %v3496_v31, 1 }
 0x278   :  { %v3498_v54 = vadd.f32 %v3497_v1, %v3496_v31  ;;  %v8061_v1 = vadd.f32 %v3506_v20, %v3505_v28  ;;  %v3474_v31 = vld [vmem:[#allocation2 + $0x5a] sm:$0x1] }
 0x27a   :  { %v3508_v29 = vand.u32 2147483647, %v3498_v54  ;;  %vm3510_vm13 = vcmp.lt.f32.partialorder %v3498_v54, 0.0 }
 0x27b   :  { %v3511_v17 = vsel %vm3510_vm13, -1e-12, %v9821_v61  ;;  %v3477_v61 = vld [vmem:[#allocation2 + $0x8a] sm:$0x1] }
 0x27c   :  { %vm3509_vm6 = vcmp.lt.f32.partialorder %v3508_v29, 1e-12  ;;  %v3476_v29 = vld [vmem:[#allocation2 + $0x7a] sm:$0x1] }
 0x27d   :  { %v3512_v13 = vsel %vm3509_vm6, %v3511_v17, %v3498_v54 }
 0x27e   :  { %5166 = vrcp.f32 %v3512_v13  ;;  %v3478_v13 = vld [vmem:[#allocation2 + $0x9a] sm:$0x1] }
 0x288   :  { %v8055_v55 = vpop.eup %5166 }
 0x289   :  { %v3549_v17 = vmul.f32 %v8055_v55, %v3469_v12  ;;  %v3550_v16 = vmul.f32 %v8055_v55, %v3470_v14  ;;  %v3551_v54 = vmul.f32 %v8055_v55, %v3471_v57  ;;  %v3552_v19 = vmul.f32 %v8055_v55, %v3472_v0 }
 0x28a   :  { %v3553_v26 = vmul.f32 %v8055_v55, %v3473_v21  ;;  %v3554_v36 = vmul.f32 %v8055_v55, %v3474_v31  ;;  %v3555_v20 = vmul.f32 %v8055_v55, %v3475_v25  ;;  %v3556_v28 = vmul.f32 %v8055_v55, %v3476_v29 }
 0x28b   :  { %v3557_v9 = vmul.f32 %v8055_v55, %v3477_v61  ;;  %v3558_v12 = vmul.f32 %v8055_v55, %v3478_v13  ;;  %v3559_v14 = vmul.f32 %v8055_v55, %v3479_v8  ;;  %v3568_v57 = vrot.slane %v3549_v17, %v5618_v43 }
 0x28c   :  { %v3572_v0 = vrot.slane %v3550_v16, %v5618_v43  ;;  %v3576_v2 = vrot.slane %v3551_v54, %v5618_v43  ;;  %v3580_v21 = vrot.slane %v3552_v19, %v5618_v43  ;;  %v3584_v31 = vrot.slane %v3553_v26, %v5618_v43 }
 0x28d   :  { %v3588_v25 = vrot.slane %v3554_v36, %v5618_v43  ;;  %v3592_v29 = vrot.slane %v3555_v20, %v5618_v43  ;;  %v3596_v61 = vrot.slane %v3556_v28, %v5618_v43  ;;  %v3600_v13 = vrot.slane %v3557_v9, %v5618_v43 }
 0x28e   :  { %v3604_v8 = vrot.slane %v3558_v12, %v5618_v43  ;;  %v3608_v17 = vrot.slane %v3559_v14, %v5618_v43  ;;  %v3629_v16 = vmul.f32 %v3568_v57, %v8000_v40  ;;  %v3630_v54 = vmul.f32 %v3568_v57, %v8059_v56 }
 0x28f   :  { %v3631_v19 = vmul.f32 %v3572_v0, %v8000_v40  ;;  %v3632_v26 = vmul.f32 %v3572_v0, %v8059_v56  ;;  %v3633_v36 = vmul.f32 %v3576_v2, %v8000_v40  ;;  %v3634_v20 = vmul.f32 %v3576_v2, %v8059_v56 }
 0x290   :  { %v3635_v28 = vmul.f32 %v3580_v21, %v8000_v40  ;;  %v3636_v9 = vmul.f32 %v3580_v21, %v8059_v56  ;;  %v3637_v12 = vmul.f32 %v3584_v31, %v8000_v40  ;;  %v3638_v14 = vmul.f32 %v3584_v31, %v8059_v56 }
 0x291   :  { %v3639_v62 = vmul.f32 %v3588_v25, %v8000_v40  ;;  %v3640_v57 = vmul.f32 %v3588_v25, %v8059_v56  ;;  %v3641_v23 = vmul.f32 %v3592_v29, %v8000_v40  ;;  %v3642_v0 = vmul.f32 %v3592_v29, %v8059_v56 }
 0x292   :  { %v3643_v46 = vmul.f32 %v3596_v61, %v8000_v40  ;;  %v3644_v2 = vmul.f32 %v3596_v61, %v8059_v56  ;;  %v8102_v38 = vmul.f32 %v3600_v13, %v8000_v40  ;;  %v3646_v21 = vmul.f32 %v3600_v13, %v8059_v56 }
 0x293   :  { %v3647_v39 = vmul.f32 %v3604_v8, %v8000_v40  ;;  %v3648_v31 = vmul.f32 %v3604_v8, %v8059_v56  ;;  %v8108_v6 = vmul.f32 %v3608_v17, %v8000_v40  ;;  %v3650_v25 = vmul.f32 %v3608_v17, %v8059_v56 }
 0x294   :  { %v9822_v29 = vsub.f32 %v7650_v45, %v7862_v33  ;;  %v8117_v61 = vsub.f32 %v7902_v35, %v3630_v54  ;;  %v9823_v13 = vsub.f32 %v7658_v41, %v7866_v42  ;;  %v8125_v8 = vsub.f32 %v7907_v53, %v3632_v26 }
 0x295   :  { %v8130_v17 = vsub.f32 %v9824_v4, %v3633_v36  ;;  %v8133_v45 = vsub.f32 %v7912_v7, %v3634_v20  ;;  %v9825_v35 = vsub.f32 %v7674_v58, %v7874_v15  ;;  %v8141_v41 = vsub.f32 %v7917_v3, %v3636_v9  ;;  %v3484_v36 = vld [vmem:[#allocation2 + $0xfa] sm:$0x1] }
 0x296   :  { %v8114_v43 = vsub.f32 %v9822_v29, %v3629_v16  ;;  %v8122_v32 = vsub.f32 %v9823_v13, %v3631_v19  ;;  %v9826_v42 = vsub.f32 %v7682_v48, %v7878_v30  ;;  %v8149_v59 = vsub.f32 %v7922_v18, %v3638_v14  ;;  %3694 = vst [vmem:[#allocation2 + $0x8] sm:$0xff] %v8117_v61 }
 0x297   :  { %v8138_v33 = vsub.f32 %v9825_v35, %v3635_v28  ;;  %v9827_v7 = vsub.f32 %v7690_v51, %v7882_v63  ;;  %v8157_v58 = vsub.f32 %v7927_v52, %v3640_v57  ;;  %3696 = vst [vmem:[#allocation2 + $0x18] sm:$0xff] %v8125_v8  ;;  %v9828_v48 = vsub.f32 %v7700_v37, %v7886_v50 }
 0x298   :  { %v8146_v53 = vsub.f32 %v9826_v42, %v3637_v12  ;;  %v8167_v30 = vsub.f32 %v7934_v24, %v3642_v0  ;;  %v9829_v51 = vsub.f32 %v7708_v22, %v7890_v47  ;;  %v8175_v63 = vsub.f32 %v7939_v10, %v3644_v2  ;;  %3698 = vst [vmem:[#allocation2 + $0x28] sm:$0xff] %v8133_v45  ;;  %v3480_v47 = vld [vmem:[#allocation2 + $0xba] sm:$0x1]  ;;  %v3481_v10 = vld [vmem:[#allocation2 + $0xca] sm:$0x1]  ;;  %v9837_v42 = vld [vmem:[#allocation9_spill] sm:$0xff] }
 0x299   :  { %v8154_v60 = vsub.f32 %v9827_v7, %v3639_v62  ;;  %v8164_v15 = vsub.f32 %v9828_v48, %v3641_v23  ;;  %3700 = vst [vmem:[#allocation2 + $0x38] sm:$0xff] %v8141_v41  ;;  %v8182_v50 = vsub.f32 %v7949_v44, %v3646_v21  ;;  %v9830_v3 = vsub.f32 %v7755_v11, %v7896_v34  ;;  %v3482_v44 = vld [vmem:[#allocation2 + $0xda] sm:$0x1]  ;;  %v9834_v0 = vld [vmem:[#allocation26_spill] sm:$0xff]  ;;  %v9836_v21 = vld [vmem:[#allocation27_spill] sm:$0xff] }
 0x29a   :  { %v8172_v62 = vsub.f32 %v9829_v51, %v3643_v46  ;;  %v8190_v22 = vsub.f32 %v7954_v49, %v3648_v31  ;;  %3702 = vst [vmem:[#allocation2 + $0x48] sm:$0xff] %v8149_v59  ;;  %3704 = vst [vmem:[#allocation2 + $0x58] sm:$0xff] %v8157_v58  ;;  %v8197_v24 = vsub.f32 %v8003_v5, %v3650_v25  ;;  %v3483_v49 = vld [vmem:[#allocation2 + $0xea] sm:$0x1]  ;;  %v9831_v5 = vmov 0.0  }
 0x29b   :  { %v8187_v18 = vsub.f32 %v9830_v3, %v3647_v39  ;;  %3706 = vst [vmem:[#allocation2 + $0x68] sm:$0xff] %v8167_v30  ;;  %3708 = vst [vmem:[#allocation2 + $0x78] sm:$0xff] %v8175_v63  ;;  %v3560_v11 = vmul.f32 %v8055_v55, %v3480_v47  ;;  %v3725_v34 = vmul.f32 %v8055_v55, %v8061_v1  ;;  %v8213_v16 = vsel %vm555_vm1, 1.0, %v9831_v5  ;;  %v9833_v1 = vld [vmem:[#allocation11_spill] sm:$0xff]  ;;  %v9841_v51 = vld [vmem:[#allocation10_spill] sm:$0xff] }
 0x29c   :  { %3710 = vst [vmem:[#allocation2 + $0x88] sm:$0xff] %v8182_v50  ;;  %3712 = vst [vmem:[#allocation2 + $0x98] sm:$0xff] %v8190_v22  ;;  %v3561_v4 = vmul.f32 %v8055_v55, %v3481_v10  ;;  %v3562_v39 = vmul.f32 %v8055_v55, %v3482_v44  ;;  %v3563_v46 = vmul.f32 %v8055_v55, %v3483_v49  ;;  %v9843_v10 = vld [vmem:[#allocation19_spill] sm:$0xff] }
 0x29d   :  { %3714 = vst [vmem:[#allocation2 + $0xa8] sm:$0xff] %v8197_v24  ;;  %v3612_v54 = vrot.slane %v3560_v11, %v9833_v1  ;;  %v3726_v19 = vmul.f32 %v3725_v34, %v8000_v40  ;;  %v3727_v26 = vmul.f32 %v3725_v34, %v8059_v56  ;;  %v3564_v12 = vmul.f32 %v8055_v55, %v3484_v36  ;;  %v9838_v55 = vld [vmem:[#allocation21_spill] sm:$0xff]  ;;  %v9842_v34 = vld [vmem:[#allocation7_spill] sm:$0xff]  ;;  %v9852_v36 = vld [vmem:[#allocation20_spill] sm:$0xff] }
 0x29e   :  { %v3616_v20 = vrot.slane %v3561_v4, %v9833_v1  ;;  %v3620_v28 = vrot.slane %v3562_v39, %v9833_v1  ;;  %v3624_v9 = vrot.slane %v3563_v46, %v9833_v1  ;;  %v9839_v7 = vsub.f32 %v9837_v42, %v9838_v55  ;;  %v9846_v4 = vld [vmem:[#allocation13_spill] sm:$0xff]  ;;  %v9848_v46 = vld [vmem:[#allocation16_spill] sm:$0xff] }
 0x29f   :  { %v3651_v14 = vmul.f32 %v3612_v54, %v8000_v40  ;;  %v3652_v57 = vmul.f32 %v3612_v54, %v8059_v56  ;;  %v8225_v2 = vsub.f32 %v9834_v0, %v3726_v19  ;;  %v8228_v31 = vsub.f32 %v9836_v21, %v3727_v26  ;;  %v9849_v54 = vld [vmem:[#allocation17_spill] sm:$0xff] }
 0x2a0   :  { %v3653_v25 = vmul.f32 %v3616_v20, %v8000_v40  ;;  %v3654_v29 = vmul.f32 %v3616_v20, %v8059_v56  ;;  %v3655_v13 = vmul.f32 %v3620_v28, %v8000_v40  ;;  %v3656_v35 = vmul.f32 %v3620_v28, %v8059_v56 }
 0x2a1   :  { %9835 = vst [vmem:[#allocation14_spill] sm:$0xff] %v8225_v2  ;;  %v8237_v48 = vsub.f32 %v9839_v7, %v3651_v14  ;;  %v8240_v3 = vsub.f32 %v9841_v51, %v3652_v57  ;;  %v3766_v47 = vmul.f32 0.0, %v8225_v2  ;;  %v3767_v11 = vmul.f32 %v8213_v16, %v8228_v31  ;;  %v9858_v7 = vld [vmem:[#allocation18_spill] sm:$0xff] }
 0x2a2   :  { %v9844_v44 = vsub.f32 %v9842_v34, %v9843_v10  ;;  %v8251_v39 = vsub.f32 %v9846_v4, %v3654_v29  ;;  %v9850_v19 = vsub.f32 %v9848_v46, %v9849_v54  ;;  %v8259_v20 = vsub.f32 %v9852_v36, %v3656_v35  ;;  %v9855_v35 = vld [vmem:[#allocation25_spill] sm:$0xff]  ;;  %v9860_v10 = vld [vmem:[#allocation22_spill] sm:$0xff]  ;;  %v9864_v4 = vld [vmem:[#allocation23_spill] sm:$0xff] }
 0x2a3   :  { %9840 = vst [vmem:[#allocation12_spill] sm:$0xff] %v8237_v48  ;;  %3716 = vst [vmem:[#allocation2 + $0xb8] sm:$0xff] %v8240_v3  ;;  %v3757_v28 = vmul.f32 0.0, %v8237_v48  ;;  %v3758_v14 = vmul.f32 %v8213_v16, %v8240_v3  ;;  %v3768_v57 = vadd.f32 %v3767_v11, %v3766_v47  ;;  %v3657_v0 = vmul.f32 %v3624_v9, %v8000_v40 }
 0x2a4   :  { %v8248_v49 = vsub.f32 %v9844_v44, %v3653_v25  ;;  %9847 = vst [vmem:[#allocation29_spill] sm:$0xff] %v8251_v39  ;;  %v8256_v26 = vsub.f32 %v9850_v19, %v3655_v13  ;;  %9853 = vst [vmem:[#allocation27_spill] sm:$0xff] %v8259_v20  ;;  %v3658_v21 = vmul.f32 %v3624_v9, %v8059_v56  ;;  %v9854_v13 = vld [vmem:[#allocation24_spill] sm:$0xff]  ;;  %v9861_v9 = vld [vmem:[#allocation15_spill] sm:$0xff] }
 0x2a5   :  { %3718 = vst [vmem:[#allocation2 + $0xc8] sm:$0xff] %v8251_v39  ;;  %3720 = vst [vmem:[#allocation2 + $0xd8] sm:$0xff] %v8259_v20  ;;  %v3628_v25 = vrot.slane %v3564_v12, %v9833_v1  ;;  %v3759_v29 = vadd.f32 %v3758_v14, %v3757_v28  ;;  %v9856_v42 = vsub.f32 %v9854_v13, %v9855_v35  ;;  %v3769_v28 = vrot.slane %v3768_v57, 4 }
 0x2a6   :  { %9845 = vst [vmem:[#allocation28_spill] sm:$0xff] %v8248_v49  ;;  %9851 = vst [vmem:[#allocation26_spill] sm:$0xff] %v8256_v26  ;;  %v8276_v51 = vsub.f32 %v9858_v7, %v3658_v21  ;;  %v9862_v44 = vsub.f32 %v9860_v10, %v9861_v9  ;;  %v3739_v9 = vld [vmem:[#allocation2 + $0x3b] sm:$0x1] }
 0x2a7   :  { %v8273_v55 = vsub.f32 %v9856_v42, %v3657_v0  ;;  %v3659_v47 = vmul.f32 %v3628_v25, %v8000_v40  ;;  %v3660_v11 = vmul.f32 %v3628_v25, %v8059_v56  ;;  %v3760_v34 = vrot.slane %v3759_v29, 4 }
 0x2a8   :  { %9859 = vst [vmem:[#allocation21_spill] sm:$0xff] %v8276_v51  ;;  %3722 = vst [vmem:[#allocation2 + $0xe8] sm:$0xff] %v8276_v51  ;;  %v3770_v56 = vadd.f32 %v3769_v28, %v3768_v57  ;;  %v9866_v25 = vmov 1e-12   ;;  %v8295_v57 = vsub.f32 %v8240_v3, %v8213_v16  ;;  %v3744_v28 = vld [vmem:[#allocation2 + $0x8b] sm:$0x1] }
 0x2a9   :  { %9857 = vst [vmem:[#allocation9_spill] sm:$0xff] %v8273_v55  ;;  %v8284_v12 = vsub.f32 %v9862_v44, %v3659_v47  ;;  %v8287_v46 = vsub.f32 %v9864_v4, %v3660_v11  ;;  %v3761_v54 = vadd.f32 %v3760_v34, %v3759_v29  ;;  %v3736_v11 = vld [vmem:[#allocation2 + $0xb] sm:$0x1]  ;;  %v3737_v29 = vld [vmem:[#allocation2 + $0x1b] sm:$0x1] }
 0x2aa   :  { %v3771_v35 = vrot.slane %v3770_v56, 2  ;;  %v3738_v34 = vld [vmem:[#allocation2 + $0x2b] sm:$0x1]  ;;  %v3741_v4 = vld [vmem:[#allocation2 + $0x5b] sm:$0x1] }
 0x2ab   :  { %9863 = vst [vmem:[#allocation10_spill] sm:$0xff] %v8284_v12  ;;  %9865 = vst [vmem:[#allocation7_spill] sm:$0xff] %v8287_v46  ;;  %v3762_v19 = vrot.slane %v3761_v54, 2  ;;  %v3740_v44 = vld [vmem:[#allocation2 + $0x4b] sm:$0x1] }
 0x2ac   :  { %3724 = vst [vmem:[#allocation2 + $0xf8] sm:$0xff] %v8287_v46  ;;  %v3772_v7 = vadd.f32 %v3771_v35, %v3770_v56  ;;  %v3745_v35 = vld [vmem:[#allocation2 + $0x9b] sm:$0x1] }
 0x2ad   :  { %v3763_v36 = vadd.f32 %v3762_v19, %v3761_v54  ;;  %v3742_v19 = vld [vmem:[#allocation2 + $0x6b] sm:$0x1] }
 0x2ae   :  { %v3773_v47 = vrot.slane %v3772_v7, 1 }
 0x2af   :  { %v3764_v14 = vrot.slane %v3763_v36, 1 }
 0x2b0   :  { %v8297_v54 = vadd.f32 %v3773_v47, %v3772_v7 }
 0x2b1   :  { %v3765_v0 = vadd.f32 %v3764_v14, %v3763_v36  ;;  %v3743_v36 = vld [vmem:[#allocation2 + $0x7b] sm:$0x1] }
 0x2b3   :  { %v3775_v21 = vand.u32 2147483647, %v3765_v0  ;;  %vm3777_vm1 = vcmp.lt.f32.partialorder %v3765_v0, 0.0 }
 0x2b4   :  { %v3778_v13 = vsel %vm3777_vm1, -1e-12, %v9866_v25 }
 0x2b5   :  { %vm3776_vm8 = vcmp.lt.f32.partialorder %v3775_v21, 1e-12 }
 0x2b6   :  { %v3779_v42 = vsel %vm3776_vm8, %v3778_v13, %v3765_v0  ;;  %v3746_v13 = vld [vmem:[#allocation2 + $0xab] sm:$0x1] }
 0x2b7   :  { %5168 = vrcp.f32 %v3779_v42  ;;  %v3747_v42 = vld [vmem:[#allocation2 + $0xbb] sm:$0x1] }
 0x2c1   :  { %v8291_v10 = vpop.eup %5168 }
 0x2c2   :  { %v3816_v14 = vmul.f32 %v8291_v10, %v3736_v11  ;;  %v3817_v0 = vmul.f32 %v8291_v10, %v3737_v29  ;;  %v3818_v56 = vmul.f32 %v8291_v10, %v3738_v34  ;;  %v3819_v21 = vmul.f32 %v8291_v10, %v3739_v9 }
 0x2c3   :  { %v3820_v52 = vmul.f32 %v8291_v10, %v3740_v44  ;;  %v3821_v16 = vmul.f32 %v8291_v10, %v3741_v4  ;;  %v3822_v7 = vmul.f32 %v8291_v10, %v3742_v19  ;;  %v3823_v47 = vmul.f32 %v8291_v10, %v3743_v36 }
 0x2c4   :  { %v3824_v37 = vmul.f32 %v8291_v10, %v3744_v28  ;;  %v3825_v11 = vmul.f32 %v8291_v10, %v3745_v35  ;;  %v3826_v29 = vmul.f32 %v8291_v10, %v3746_v13  ;;  %v3827_v34 = vmul.f32 %v8291_v10, %v3747_v42 }
 0x2c5   :  { %v3835_v9 = vrot.slane %v3816_v14, %v9833_v1  ;;  %v3839_v25 = vrot.slane %v3817_v0, %v9833_v1  ;;  %v3843_v44 = vrot.slane %v3818_v56, %v9833_v1  ;;  %v3847_v4 = vrot.slane %v3819_v21, %v9833_v1 }
 0x2c6   :  { %v3851_v19 = vrot.slane %v3820_v52, %v9833_v1  ;;  %v3855_v36 = vrot.slane %v3821_v16, %v9833_v1  ;;  %v3859_v28 = vrot.slane %v3822_v7, %v9833_v1  ;;  %v3863_v35 = vrot.slane %v3823_v47, %v9833_v1 }
 0x2c7   :  { %v3867_v13 = vrot.slane %v3824_v37, %v9833_v1  ;;  %v3871_v42 = vrot.slane %v3825_v11, %v9833_v1  ;;  %v3875_v14 = vrot.slane %v3826_v29, %v9833_v1  ;;  %v3879_v0 = vrot.slane %v3827_v34, %v9833_v1 }
 0x2c8   :  { %v8324_v56 = vmul.f32 %v3835_v9, %v8237_v48  ;;  %v3897_v21 = vmul.f32 %v3835_v9, %v8295_v57  ;;  %v8328_v52 = vmul.f32 %v3839_v25, %v8237_v48  ;;  %v3899_v16 = vmul.f32 %v3839_v25, %v8295_v57 }
 0x2c9   :  { %v8332_v7 = vmul.f32 %v3843_v44, %v8237_v48  ;;  %v3901_v37 = vmul.f32 %v3843_v44, %v8295_v57  ;;  %v8336_v47 = vmul.f32 %v3847_v4, %v8237_v48  ;;  %v3903_v11 = vmul.f32 %v3847_v4, %v8295_v57 }
 0x2ca   :  { %v8340_v29 = vmul.f32 %v3851_v19, %v8237_v48  ;;  %v3905_v34 = vmul.f32 %v3851_v19, %v8295_v57  ;;  %v8344_v9 = vmul.f32 %v3855_v36, %v8237_v48  ;;  %v3907_v25 = vmul.f32 %v3855_v36, %v8295_v57 }
 0x2cb   :  { %v8348_v2 = vmul.f32 %v3859_v28, %v8237_v48  ;;  %v3909_v44 = vmul.f32 %v3859_v28, %v8295_v57  ;;  %v8352_v46 = vmul.f32 %v3863_v35, %v8237_v48  ;;  %v3911_v4 = vmul.f32 %v3863_v35, %v8295_v57 }
 0x2cc   :  { %v3912_v12 = vmul.f32 %v3867_v13, %v8237_v48  ;;  %v3913_v51 = vmul.f32 %v3867_v13, %v8295_v57  ;;  %v8358_v19 = vmul.f32 %v3871_v42, %v8237_v48  ;;  %v3915_v55 = vmul.f32 %v3871_v42, %v8295_v57 }
 0x2cd   :  { %v3916_v36 = vmul.f32 %v3875_v14, %v8237_v48  ;;  %v3917_v20 = vmul.f32 %v3875_v14, %v8295_v57  ;;  %v8364_v28 = vmul.f32 %v3879_v0, %v8237_v48  ;;  %v3919_v26 = vmul.f32 %v3879_v0, %v8295_v57 }
 0x2ce   :  { %v8370_v39 = vsub.f32 %v8117_v61, %v3897_v21  ;;  %v8375_v42 = vsub.f32 %v8125_v8, %v3899_v16  ;;  %v8380_v49 = vsub.f32 %v8133_v45, %v3901_v37  ;;  %v8385_v35 = vsub.f32 %v8141_v41, %v3903_v11  ;;  %v9885_v61 = vld [vmem:[#allocation21_spill] sm:$0xff] }
 0x2cf   :  { %9867 = vst [vmem:[#allocation19_spill] sm:$0xff] %v8364_v28  ;;  %v8390_v21 = vsub.f32 %v8149_v59, %v3905_v34  ;;  %v8395_v16 = vsub.f32 %v8157_v58, %v3907_v25  ;;  %v8402_v41 = vsub.f32 %v8167_v30, %v3909_v44  ;;  %v8407_v37 = vsub.f32 %v8175_v63, %v3911_v4 }
 0x2d0   :  { %3961 = vst [vmem:[#allocation2 + $0x8] sm:$0xff] %v8370_v39  ;;  %3963 = vst [vmem:[#allocation2 + $0x18] sm:$0xff] %v8375_v42  ;;  %v9868_v58 = vsub.f32 %v7946_v27, %v8102_v38  ;;  %v8417_v34 = vsub.f32 %v8182_v50, %v3913_v51  ;;  %v8422_v25 = vsub.f32 %v8190_v22, %v3915_v55  ;;  %v3748_v22 = vld [vmem:[#allocation2 + $0xcb] sm:$0x1]  ;;  %v3749_v55 = vld [vmem:[#allocation2 + $0xdb] sm:$0x1] }
 0x2d1   :  { %3965 = vst [vmem:[#allocation2 + $0x28] sm:$0xff] %v8380_v49  ;;  %3967 = vst [vmem:[#allocation2 + $0x38] sm:$0xff] %v8385_v35  ;;  %v9869_v63 = vsub.f32 %v8000_v40, %v8108_v6  ;;  %v8432_v38 = vsub.f32 %v8197_v24, %v3917_v20  ;;  %v8437_v50 = vsub.f32 %v8240_v3, %v3919_v26  ;;  %v3750_v20 = vld [vmem:[#allocation2 + $0xeb] sm:$0x1]  ;;  %v3751_v3 = vld [vmem:[#allocation2 + $0xfb] sm:$0x1] }
 0x2d2   :  { %v8414_v11 = vsub.f32 %v9868_v58, %v3912_v12  ;;  %3969 = vst [vmem:[#allocation2 + $0x48] sm:$0xff] %v8390_v21  ;;  %3971 = vst [vmem:[#allocation2 + $0x58] sm:$0xff] %v8395_v16  ;;  %v3828_v6 = vmul.f32 %v8291_v10, %v3748_v22  ;;  %v3992_v40 = vmul.f32 %v8291_v10, %v8297_v54  ;;  %v5133_v58 = vsel %vm557_vm2, 1.0, %v9831_v5 }
 0x2d3   :  { %v8429_v44 = vsub.f32 %v9869_v63, %v3916_v36  ;;  %9871 = vst [vmem:[#allocation16_spill] sm:$0xff] %v8432_v38  ;;  %9872 = vst [vmem:[#allocation17_spill] sm:$0xff] %v8437_v50  ;;  %v3829_v24 = vmul.f32 %v8291_v10, %v3749_v55  ;;  %v3830_v26 = vmul.f32 %v8291_v10, %v3750_v20 }
 0x2d4   :  { %3973 = vst [vmem:[#allocation2 + $0x68] sm:$0xff] %v8402_v41  ;;  %3975 = vst [vmem:[#allocation2 + $0x78] sm:$0xff] %v8407_v37  ;;  %v3831_v51 = vmul.f32 %v8291_v10, %v3751_v3  ;;  %v3883_v12 = vrot.slane %v3828_v6, %v9833_v1  ;;  %v3994_v4 = vmul.f32 %v3992_v40, %v8295_v57 }
 0x2d5   :  { %9870 = vst [vmem:[#allocation13_spill] sm:$0xff] %v8429_v44  ;;  %3977 = vst [vmem:[#allocation2 + $0x88] sm:$0xff] %v8417_v34  ;;  %v3887_v36 = vrot.slane %v3829_v24, %v9833_v1  ;;  %v3993_v54 = vmul.f32 %v3992_v40, %v8237_v48  ;;  %v3891_v63 = vrot.slane %v3830_v26, %v9833_v1 }
 0x2d6   :  { %3979 = vst [vmem:[#allocation2 + $0x98] sm:$0xff] %v8422_v25  ;;  %3981 = vst [vmem:[#allocation2 + $0xa8] sm:$0xff] %v8432_v38  ;;  %v3895_v22 = vrot.slane %v3831_v51, %v9833_v1  ;;  %v3920_v55 = vmul.f32 %v3883_v12, %v8237_v48  ;;  %v3921_v10 = vmul.f32 %v3883_v12, %v8295_v57  ;;  %v9877_v51 = vld [vmem:[#allocation28_spill] sm:$0xff]  ;;  %v9879_v12 = vld [vmem:[#allocation29_spill] sm:$0xff] }
 0x2d7   :  { %3983 = vst [vmem:[#allocation2 + $0xb8] sm:$0xff] %v8437_v50  ;;  %v8463_v6 = vsub.f32 %v8228_v31, %v3994_v4  ;;  %v8466_v20 = vmul.f32 %v3887_v36, %v8237_v48  ;;  %v3923_v40 = vmul.f32 %v3887_v36, %v8295_v57  ;;  %v8470_v24 = vmul.f32 %v3891_v63, %v8237_v48  ;;  %v9882_v36 = vld [vmem:[#allocation27_spill] sm:$0xff] }
 0x2d8   :  { %v3925_v3 = vmul.f32 %v3891_v63, %v8295_v57  ;;  %v8474_v26 = vmul.f32 %v3895_v22, %v8237_v48  ;;  %v8477_v27 = vsub.f32 %v9877_v51, %v3920_v55  ;;  %v8480_v30 = vsub.f32 %v9879_v12, %v3921_v10 }
 0x2d9   :  { %9873 = vst [vmem:[#allocation20_spill] sm:$0xff] %v8463_v6  ;;  %9874 = vst [vmem:[#allocation24_spill] sm:$0xff] %v8466_v20  ;;  %v4034_v31 = vmul.f32 %v5133_v58, %v8463_v6  ;;  %v8486_v45 = vsub.f32 %v9882_v36, %v3923_v40  ;;  %v3927_v55 = vmul.f32 %v3895_v22, %v8295_v57  ;;  %v9888_v40 = vld [vmem:[#allocation7_spill] sm:$0xff]  ;;  %v4004_v20 = vld [vmem:[#allocation2 + $0x1c] sm:$0x1] }
 0x2da   :  { %9875 = vst [vmem:[#allocation25_spill] sm:$0xff] %v8470_v24  ;;  %9876 = vst [vmem:[#allocation18_spill] sm:$0xff] %v8474_v26  ;;  %v8491_v0 = vsub.f32 %v9885_v61, %v3925_v3  ;;  %v4024_v10 = vmul.f32 0.0, %v8477_v27  ;;  %v4025_v51 = vmul.f32 %v5133_v58, %v8480_v30  ;;  %v9890_v61 = vld [vmem:[#allocation14_spill] sm:$0xff] }
 0x2db   :  { %9878 = vst [vmem:[#allocation22_spill] sm:$0xff] %v8477_v27  ;;  %9880 = vst [vmem:[#allocation15_spill] sm:$0xff] %v8480_v30  ;;  %v8502_v36 = vsub.f32 %v9888_v40, %v3927_v55  ;;  %v8505_v3 = vsub.f32 %v9890_v61, %v3993_v54  ;;  %v9892_v55 = vmov 1e-12  }
 0x2dc   :  { %9883 = vst [vmem:[#allocation23_spill] sm:$0xff] %v8486_v45  ;;  %9886 = vst [vmem:[#allocation28_spill] sm:$0xff] %v8491_v0  ;;  %v4026_v57 = vadd.f32 %v4025_v51, %v4024_v10 }
 0x2dd   :  { %3985 = vst [vmem:[#allocation2 + $0xc8] sm:$0xff] %v8480_v30  ;;  %3987 = vst [vmem:[#allocation2 + $0xd8] sm:$0xff] %v8486_v45  ;;  %v4033_v22 = vmul.f32 0.0, %v8505_v3 }
 0x2de   :  { %3989 = vst [vmem:[#allocation2 + $0xe8] sm:$0xff] %v8491_v0  ;;  %9889 = vst [vmem:[#allocation29_spill] sm:$0xff] %v8502_v36  ;;  %v4027_v63 = vrot.slane %v4026_v57, 4 }
 0x2df   :  { %9891 = vst [vmem:[#allocation27_spill] sm:$0xff] %v8505_v3  ;;  %3991 = vst [vmem:[#allocation2 + $0xf8] sm:$0xff] %v8502_v36  ;;  %v4035_v14 = vadd.f32 %v4034_v31, %v4033_v22  ;;  %v4003_v36 = vld [vmem:[#allocation2 + $0xc] sm:$0x1] }
 0x2e0   :  { %v4028_v13 = vadd.f32 %v4027_v63, %v4026_v57  ;;  %v4005_v31 = vld [vmem:[#allocation2 + $0x2c] sm:$0x1]  ;;  %v4008_v57 = vld [vmem:[#allocation2 + $0x5c] sm:$0x1] }
 0x2e1   :  { %v4036_v26 = vrot.slane %v4035_v14, 4 }
 0x2e2   :  { %v4029_v24 = vrot.slane %v4028_v13, 2 }
 0x2e3   :  { %v4037_v0 = vadd.f32 %v4036_v26, %v4035_v14  ;;  %v8513_v14 = vsub.f32 %v8480_v30, %v5133_v58  ;;  %v4009_v26 = vld [vmem:[#allocation2 + $0x6c] sm:$0x1] }
 0x2e4   :  { %v4030_v59 = vadd.f32 %v4029_v24, %v4028_v13  ;;  %v4006_v13 = vld [vmem:[#allocation2 + $0x3c] sm:$0x1]  ;;  %v4007_v24 = vld [vmem:[#allocation2 + $0x4c] sm:$0x1] }
 0x2e5   :  { %v4038_v54 = vrot.slane %v4037_v0, 2  ;;  %v4015_v6 = vld [vmem:[#allocation2 + $0xcc] sm:$0x1] }
 0x2e6   :  { %v4031_v12 = vrot.slane %v4030_v59, 1 }
 0x2e7   :  { %v4039_v51 = vadd.f32 %v4038_v54, %v4037_v0  ;;  %v4014_v54 = vld [vmem:[#allocation2 + $0xbc] sm:$0x1] }
 0x2e8   :  { %v4032_v8 = vadd.f32 %v4031_v12, %v4030_v59  ;;  %v4011_v12 = vld [vmem:[#allocation2 + $0x8c] sm:$0x1] }
 0x2e9   :  { %v4040_v61 = vrot.slane %v4039_v51, 1 }
 0x2ea   :  { %v4042_v45 = vand.u32 2147483647, %v4032_v8  ;;  %vm4044_vm2 = vcmp.lt.f32.partialorder %v4032_v8, 0.0 }
 0x2eb   :  { %v4045_v40 = vsel %vm4044_vm2, -1e-12, %v9892_v55  ;;  %v8515_v59 = vadd.f32 %v4040_v61, %v4039_v51  ;;  %v4013_v55 = vld [vmem:[#allocation2 + $0xac] sm:$0x1] }
 0x2ec   :  { %vm4043_vm7 = vcmp.lt.f32.partialorder %v4042_v45, 1e-12  ;;  %v4010_v45 = vld [vmem:[#allocation2 + $0x7c] sm:$0x1] }
 0x2ed   :  { %v4046_v10 = vsel %vm4043_vm7, %v4045_v40, %v4032_v8  ;;  %9894 = vst [vmem:[#allocation7_spill] sm:$0xff] %v8515_v59 }
 0x2ee   :  { %5170 = vrcp.f32 %v4046_v10  ;;  %v4012_v10 = vld [vmem:[#allocation2 + $0x9c] sm:$0x1] }
 0x2f8   :  { %v8510_v63 = vpop.eup %5170 }
 0x2f9   :  { %9893 = vst [vmem:[#allocation21_spill] sm:$0xff] %v8510_v63  ;;  %v4083_v8 = vmul.f32 %v8510_v63, %v4003_v36  ;;  %v4084_v0 = vmul.f32 %v8510_v63, %v4004_v20  ;;  %v4085_v22 = vmul.f32 %v8510_v63, %v4005_v31  ;;  %v4086_v40 = vmul.f32 %v8510_v63, %v4006_v13 }
 0x2fa   :  { %v4087_v4 = vmul.f32 %v8510_v63, %v4007_v24  ;;  %v4088_v58 = vmul.f32 %v8510_v63, %v4008_v57  ;;  %v4089_v51 = vmul.f32 %v8510_v63, %v4009_v26  ;;  %v4090_v61 = vmul.f32 %v8510_v63, %v4010_v45 }
 0x2fb   :  { %v4091_v36 = vmul.f32 %v8510_v63, %v4011_v12  ;;  %v4092_v20 = vmul.f32 %v8510_v63, %v4012_v10  ;;  %v4093_v31 = vmul.f32 %v8510_v63, %v4013_v55  ;;  %v4094_v13 = vmul.f32 %v8510_v63, %v4014_v54 }
 0x2fc   :  { %v4095_v3 = vmul.f32 %v8510_v63, %v4015_v6  ;;  %v4102_v23 = vrot.slane %v4083_v8, %v9833_v1  ;;  %v4106_v24 = vrot.slane %v4084_v0, %v9833_v1  ;;  %v4110_v57 = vrot.slane %v4085_v22, %v9833_v1 }
 0x2fd   :  { %v4114_v26 = vrot.slane %v4086_v40, %v9833_v1  ;;  %v4118_v45 = vrot.slane %v4087_v4, %v9833_v1  ;;  %v4122_v12 = vrot.slane %v4088_v58, %v9833_v1  ;;  %v4126_v10 = vrot.slane %v4089_v51, %v9833_v1 }
 0x2fe   :  { %v4130_v55 = vrot.slane %v4090_v61, %v9833_v1  ;;  %v4134_v54 = vrot.slane %v4091_v36, %v9833_v1  ;;  %v4138_v6 = vrot.slane %v4092_v20, %v9833_v1  ;;  %v4142_v8 = vrot.slane %v4093_v31, %v9833_v1 }
 0x2ff   :  { %v4146_v0 = vrot.slane %v4094_v13, %v9833_v1  ;;  %v4150_v22 = vrot.slane %v4095_v3, %v9833_v1  ;;  %v4163_v40 = vmul.f32 %v4102_v23, %v8477_v27  ;;  %v4164_v4 = vmul.f32 %v4102_v23, %v8513_v14 }
 0x300   :  { %v4165_v58 = vmul.f32 %v4106_v24, %v8477_v27  ;;  %v4166_v51 = vmul.f32 %v4106_v24, %v8513_v14  ;;  %v4167_v61 = vmul.f32 %v4110_v57, %v8477_v27  ;;  %v4168_v36 = vmul.f32 %v4110_v57, %v8513_v14 }
 0x301   :  { %v4169_v20 = vmul.f32 %v4114_v26, %v8477_v27  ;;  %v4170_v31 = vmul.f32 %v4114_v26, %v8513_v14  ;;  %v4171_v13 = vmul.f32 %v4118_v45, %v8477_v27  ;;  %v4172_v3 = vmul.f32 %v4118_v45, %v8513_v14 }
 0x302   :  { %v4173_v5 = vmul.f32 %v4122_v12, %v8477_v27  ;;  %v4174_v23 = vmul.f32 %v4122_v12, %v8513_v14  ;;  %v4175_v1 = vmul.f32 %v4126_v10, %v8477_v27  ;;  %v4176_v24 = vmul.f32 %v4126_v10, %v8513_v14 }
 0x303   :  { %v4177_v59 = vmul.f32 %v4130_v55, %v8477_v27  ;;  %v4178_v57 = vmul.f32 %v4130_v55, %v8513_v14  ;;  %v8560_v63 = vmul.f32 %v4134_v54, %v8477_v27  ;;  %v4180_v26 = vmul.f32 %v4134_v54, %v8513_v14 }
 0x304   :  { %v4181_v30 = vmul.f32 %v4138_v6, %v8477_v27  ;;  %v4182_v45 = vmul.f32 %v4138_v6, %v8513_v14  ;;  %v8566_v50 = vmul.f32 %v4142_v8, %v8477_v27  ;;  %v4184_v12 = vmul.f32 %v4142_v8, %v8513_v14 }
 0x305   :  { %v4185_v10 = vmul.f32 %v4146_v0, %v8477_v27  ;;  %v4186_v28 = vmul.f32 %v4146_v0, %v8513_v14  ;;  %v8572_v55 = vmul.f32 %v4150_v22, %v8477_v27  ;;  %v4188_v48 = vmul.f32 %v4150_v22, %v8513_v14 }
 0x306   :  { %v9895_v54 = vsub.f32 %v8114_v43, %v8324_v56  ;;  %v8581_v6 = vsub.f32 %v8370_v39, %v4164_v4  ;;  %v9896_v8 = vsub.f32 %v8122_v32, %v8328_v52  ;;  %v8589_v0 = vsub.f32 %v8375_v42, %v4166_v51 }
 0x307   :  { %v9897_v27 = vsub.f32 %v8130_v17, %v8332_v7  ;;  %v8597_v43 = vsub.f32 %v8380_v49, %v4168_v36  ;;  %v9898_v39 = vsub.f32 %v8138_v33, %v8336_v47  ;;  %v8605_v32 = vsub.f32 %v8385_v35, %v4170_v31 }
 0x308   :  { %v8578_v38 = vsub.f32 %v9895_v54, %v4163_v40  ;;  %v8586_v44 = vsub.f32 %v9896_v8, %v4165_v58  ;;  %v9899_v52 = vsub.f32 %v8146_v53, %v8340_v29  ;;  %v8613_v17 = vsub.f32 %v8390_v21, %v4172_v3  ;;  %4228 = vst [vmem:[#allocation2 + $0x8] sm:$0xff] %v8581_v6  ;;  %v9911_v40 = vld [vmem:[#allocation22_spill] sm:$0xff]  ;;  %v9912_v58 = vld [vmem:[#allocation15_spill] sm:$0xff] }
 0x309   :  { %v8594_v22 = vsub.f32 %v9897_v27, %v4167_v61  ;;  %v8602_v56 = vsub.f32 %v9898_v39, %v4169_v20  ;;  %v9900_v49 = vsub.f32 %v8154_v60, %v8344_v9  ;;  %v8621_v33 = vsub.f32 %v8395_v16, %v4174_v23  ;;  %4230 = vst [vmem:[#allocation2 + $0x18] sm:$0xff] %v8589_v0  ;;  %v9905_v16 = vld [vmem:[#allocation16_spill] sm:$0xff]  ;;  %v9914_v61 = vld [vmem:[#allocation21_spill] sm:$0xff] }
 0x30a   :  { %v8610_v42 = vsub.f32 %v9899_v52, %v4171_v13  ;;  %v9901_v53 = vsub.f32 %v8164_v15, %v8348_v2  ;;  %v8631_v29 = vsub.f32 %v8402_v41, %v4176_v24  ;;  %v9902_v60 = vsub.f32 %v8172_v62, %v8352_v46  ;;  %4232 = vst [vmem:[#allocation2 + $0x28] sm:$0xff] %v8597_v43  ;;  %v9904_v46 = vld [vmem:[#allocation13_spill] sm:$0xff]  ;;  %v4018_v20 = vld [vmem:[#allocation2 + $0xfc] sm:$0x1]  ;;  %v9915_v13 = vld [vmem:[#allocation7_spill] sm:$0xff] }
 0x30b   :  { %v8618_v7 = vsub.f32 %v9900_v49, %v4173_v5  ;;  %v8639_v9 = vsub.f32 %v8407_v37, %v4178_v57  ;;  %4234 = vst [vmem:[#allocation2 + $0x38] sm:$0xff] %v8605_v32  ;;  %v9903_v2 = vsub.f32 %v8187_v18, %v8358_v19  ;;  %v8654_v62 = vsub.f32 %v8422_v25, %v4182_v45  ;;  %v9906_v37 = vld [vmem:[#allocation12_spill] sm:$0xff]  ;;  %v9910_v18 = vld [vmem:[#allocation17_spill] sm:$0xff]  ;;  %v4017_v25 = vld [vmem:[#allocation2 + $0xec] sm:$0x1] }
 0x30c   :  { %v8628_v47 = vsub.f32 %v9901_v53, %v4175_v1  ;;  %v8636_v5 = vsub.f32 %v9902_v60, %v4177_v59  ;;  %v8646_v1 = vsub.f32 %v8417_v34, %v4180_v26  ;;  %4236 = vst [vmem:[#allocation2 + $0x48] sm:$0xff] %v8613_v17  ;;  %4238 = vst [vmem:[#allocation2 + $0x58] sm:$0xff] %v8621_v33  ;;  %v9907_v34 = vld [vmem:[#allocation19_spill] sm:$0xff]  ;;  %v9917_v57 = vmov 0.0  }
 0x30d   :  { %v8651_v35 = vsub.f32 %v9903_v2, %v4181_v30  ;;  %v8661_v41 = vsub.f32 %v9905_v16, %v4184_v12  ;;  %v9908_v27 = vsub.f32 %v9906_v37, %v9907_v34  ;;  %v8669_v19 = vsub.f32 %v9910_v18, %v4186_v28  ;;  %4240 = vst [vmem:[#allocation2 + $0x68] sm:$0xff] %v8631_v29  ;;  %v4016_v30 = vld [vmem:[#allocation2 + $0xdc] sm:$0x1]  ;;  %v9919_v2 = vld [vmem:[#allocation27_spill] sm:$0xff] }
 0x30e   :  { %4242 = vst [vmem:[#allocation2 + $0x78] sm:$0xff] %v8639_v9  ;;  %v8676_v51 = vsub.f32 %v9912_v58, %v4188_v48  ;;  %4244 = vst [vmem:[#allocation2 + $0x88] sm:$0xff] %v8646_v1  ;;  %v4096_v36 = vmul.f32 %v9914_v61, %v4016_v30  ;;  %v4097_v28 = vmul.f32 %v9914_v61, %v4017_v25  ;;  %v9916_v48 = vld [vmem:[#allocation11_spill] sm:$0xff]  ;;  %v5134_v45 = vsel %vm559_vm9, 1.0, %v9917_v57  ;;  %v9921_v37 = vld [vmem:[#allocation20_spill] sm:$0xff] }
 0x30f   :  { %v8666_v59 = vsub.f32 %v9908_v27, %v4185_v10  ;;  %4246 = vst [vmem:[#allocation2 + $0x98] sm:$0xff] %v8654_v62  ;;  %4248 = vst [vmem:[#allocation2 + $0xa8] sm:$0xff] %v8661_v41  ;;  %v4098_v31 = vmul.f32 %v9914_v61, %v4018_v20  ;;  %v4259_v3 = vmul.f32 %v9914_v61, %v9915_v13  ;;  %v9923_v27 = vld [vmem:[#allocation26_spill] sm:$0xff]  ;;  %v9924_v18 = vld [vmem:[#allocation24_spill] sm:$0xff] }
 0x310   :  { %9913 = vst [vmem:[#allocation13_spill] sm:$0xff] %v8676_v51  ;;  %4250 = vst [vmem:[#allocation2 + $0xb8] sm:$0xff] %v8669_v19  ;;  %v4154_v23 = vrot.slane %v4096_v36, %v9916_v48  ;;  %v4158_v24 = vrot.slane %v4097_v28, %v9916_v48  ;;  %v9925_v30 = vsub.f32 %v9923_v27, %v9924_v18  ;;  %v9927_v58 = vld [vmem:[#allocation23_spill] sm:$0xff]  ;;  %v9929_v36 = vld [vmem:[#allocation9_spill] sm:$0xff] }
 0x311   :  { %9909 = vst [vmem:[#allocation14_spill] sm:$0xff] %v8666_v59  ;;  %4252 = vst [vmem:[#allocation2 + $0xc8] sm:$0xff] %v8676_v51  ;;  %v4162_v12 = vrot.slane %v4098_v31, %v9916_v48  ;;  %v4260_v10 = vmul.f32 %v4259_v3, %v9911_v40  ;;  %v4261_v54 = vmul.f32 %v4259_v3, %v8513_v14  ;;  %v9930_v28 = vld [vmem:[#allocation25_spill] sm:$0xff]  ;;  %v9935_v3 = vld [vmem:[#allocation10_spill] sm:$0xff] }
 0x312   :  { %v4189_v8 = vmul.f32 %v4154_v23, %v9911_v40  ;;  %v4190_v39 = vmul.f32 %v4154_v23, %v8513_v14  ;;  %v4191_v52 = vmul.f32 %v4158_v24, %v9911_v40  ;;  %v4192_v49 = vmul.f32 %v4158_v24, %v8513_v14  ;;  %v9936_v23 = vld [vmem:[#allocation18_spill] sm:$0xff] }
 0x313   :  { %v4193_v53 = vmul.f32 %v4162_v12, %v9911_v40  ;;  %v4194_v60 = vmul.f32 %v4162_v12, %v8513_v14  ;;  %v8703_v16 = vsub.f32 %v9919_v2, %v4260_v10  ;;  %v8706_v34 = vsub.f32 %v9921_v37, %v4261_v54  ;;  %v9933_v14 = vld [vmem:[#allocation28_spill] sm:$0xff]  ;;  %v9939_v10 = vld [vmem:[#allocation29_spill] sm:$0xff] }
 0x314   :  { %v8711_v25 = vsub.f32 %v9925_v30, %v4189_v8  ;;  %v8714_v61 = vsub.f32 %v9927_v58, %v4190_v39  ;;  %v9931_v20 = vsub.f32 %v9929_v36, %v9930_v28  ;;  %v8722_v13 = vsub.f32 %v9933_v14, %v4192_v49 }
 0x315   :  { %9920 = vst [vmem:[#allocation16_spill] sm:$0xff] %v8703_v16  ;;  %9922 = vst [vmem:[#allocation12_spill] sm:$0xff] %v8706_v34  ;;  %v9937_v24 = vsub.f32 %v9935_v3, %v9936_v23  ;;  %v8730_v54 = vsub.f32 %v9939_v10, %v4194_v60  ;;  %v4300_v8 = vmul.f32 0.0, %v8703_v16  ;;  %v4301_v39 = vmul.f32 %v5134_v45, %v8706_v34 }
 0x316   :  { %9926 = vst [vmem:[#allocation19_spill] sm:$0xff] %v8711_v25  ;;  %9928 = vst [vmem:[#allocation17_spill] sm:$0xff] %v8714_v61  ;;  %v8719_v31 = vsub.f32 %v9931_v20, %v4191_v52  ;;  %v4291_v52 = vmul.f32 0.0, %v8711_v25  ;;  %v4292_v2 = vmul.f32 %v5134_v45, %v8714_v61  ;;  %v9941_v14 = vmov 1e-12  }
 0x317   :  { %9934 = vst [vmem:[#allocation15_spill] sm:$0xff] %v8722_v13  ;;  %v8727_v12 = vsub.f32 %v9937_v24, %v4193_v53  ;;  %9940 = vst [vmem:[#allocation7_spill] sm:$0xff] %v8730_v54  ;;  %v4302_v49 = vadd.f32 %v4301_v39, %v4300_v8  ;;  %v4270_v8 = vld [vmem:[#allocation2 + $0xd] sm:$0x1]  ;;  %v4271_v39 = vld [vmem:[#allocation2 + $0x1d] sm:$0x1] }
 0x318   :  { %9932 = vst [vmem:[#allocation22_spill] sm:$0xff] %v8719_v31  ;;  %4254 = vst [vmem:[#allocation2 + $0xd8] sm:$0xff] %v8714_v61  ;;  %v4293_v53 = vadd.f32 %v4292_v2, %v4291_v52  ;;  %v4272_v52 = vld [vmem:[#allocation2 + $0x2d] sm:$0x1]  ;;  %v4281_v21 = vld [vmem:[#allocation2 + $0xbd] sm:$0x1] }
 0x319   :  { %9938 = vst [vmem:[#allocation21_spill] sm:$0xff] %v8727_v12  ;;  %4256 = vst [vmem:[#allocation2 + $0xe8] sm:$0xff] %v8722_v13  ;;  %v4303_v30 = vrot.slane %v4302_v49, 4 }
 0x31a   :  { %4258 = vst [vmem:[#allocation2 + $0xf8] sm:$0xff] %v8730_v54  ;;  %v4294_v37 = vrot.slane %v4293_v53, 4 }
 0x31b   :  { %v4304_v28 = vadd.f32 %v4303_v30, %v4302_v49  ;;  %v8743_v49 = vsub.f32 %v8714_v61, %v5134_v45  ;;  %v4277_v30 = vld [vmem:[#allocation2 + $0x7d] sm:$0x1] }
 0x31c   :  { %v4295_v27 = vadd.f32 %v4294_v37, %v4293_v53  ;;  %v4273_v53 = vld [vmem:[#allocation2 + $0x3d] sm:$0x1]  ;;  %v4274_v37 = vld [vmem:[#allocation2 + $0x4d] sm:$0x1] }
 0x31d   :  { %v4305_v23 = vrot.slane %v4304_v28, 2 }
 0x31e   :  { %v4296_v60 = vrot.slane %v4295_v27, 2 }
 0x31f   :  { %v4306_v10 = vadd.f32 %v4305_v23, %v4304_v28  ;;  %v4279_v23 = vld [vmem:[#allocation2 + $0x9d] sm:$0x1] }
 0x320   :  { %v4297_v18 = vadd.f32 %v4296_v60, %v4295_v27  ;;  %v4275_v27 = vld [vmem:[#allocation2 + $0x5d] sm:$0x1] }
 0x321   :  { %v4307_v4 = vrot.slane %v4306_v10, 1  ;;  %v4283_v12 = vld [vmem:[#allocation2 + $0xdd] sm:$0x1] }
 0x322   :  { %v4298_v58 = vrot.slane %v4297_v18, 1 }
 0x323   :  { %v8745_v60 = vadd.f32 %v4307_v4, %v4306_v10 }
 0x324   :  { %v4299_v36 = vadd.f32 %v4298_v58, %v4297_v18  ;;  %v4276_v18 = vld [vmem:[#allocation2 + $0x6d] sm:$0x1] }
 0x325   :  { %9943 = vst [vmem:[#allocation20_spill] sm:$0xff] %v8745_v60  ;;  %v4278_v58 = vld [vmem:[#allocation2 + $0x8d] sm:$0x1] }
 0x326   :  { %v4309_v20 = vand.u32 2147483647, %v4299_v36  ;;  %vm4311_vm9 = vcmp.lt.f32.partialorder %v4299_v36, 0.0 }
 0x327   :  { %v4312_v3 = vsel %vm4311_vm9, -1e-12, %v9941_v14  ;;  %v4282_v14 = vld [vmem:[#allocation2 + $0xcd] sm:$0x1] }
 0x328   :  { %vm4310_vm14 = vcmp.lt.f32.partialorder %v4309_v20, 1e-12 }
 0x329   :  { %v4313_v24 = vsel %vm4310_vm14, %v4312_v3, %v4299_v36 }
 0x32a   :  { %5172 = vrcp.f32 %v4313_v24  ;;  %v4280_v24 = vld [vmem:[#allocation2 + $0xad] sm:$0x1] }
 0x334   :  { %v8740_v2 = vpop.eup %5172 }
 0x335   :  { %9942 = vst [vmem:[#allocation27_spill] sm:$0xff] %v8740_v2  ;;  %v4350_v36 = vmul.f32 %v8740_v2, %v4270_v8  ;;  %v4351_v28 = vmul.f32 %v8740_v2, %v4271_v39  ;;  %v4352_v20 = vmul.f32 %v8740_v2, %v4272_v52  ;;  %v4353_v3 = vmul.f32 %v8740_v2, %v4273_v53 }
 0x336   :  { %v4354_v15 = vmul.f32 %v8740_v2, %v4274_v37  ;;  %v4355_v45 = vmul.f32 %v8740_v2, %v4275_v27  ;;  %v4356_v4 = vmul.f32 %v8740_v2, %v4276_v18  ;;  %v4357_v10 = vmul.f32 %v8740_v2, %v4277_v30 }
 0x337   :  { %v4358_v8 = vmul.f32 %v8740_v2, %v4278_v58  ;;  %v4359_v39 = vmul.f32 %v8740_v2, %v4279_v23  ;;  %v4360_v52 = vmul.f32 %v8740_v2, %v4280_v24  ;;  %v4361_v53 = vmul.f32 %v8740_v2, %v4281_v21 }
 0x338   :  { %v4362_v54 = vmul.f32 %v8740_v2, %v4282_v14  ;;  %v4363_v37 = vmul.f32 %v8740_v2, %v4283_v12  ;;  %v4369_v27 = vrot.slane %v4350_v36, %v9916_v48  ;;  %v4373_v18 = vrot.slane %v4351_v28, %v9916_v48 }
 0x339   :  { %v4377_v30 = vrot.slane %v4352_v20, %v9916_v48  ;;  %v4381_v13 = vrot.slane %v4353_v3, %v9916_v48  ;;  %v4385_v58 = vrot.slane %v4354_v15, %v9916_v48  ;;  %v4389_v23 = vrot.slane %v4355_v45, %v9916_v48 }
 0x33a   :  { %v4393_v24 = vrot.slane %v4356_v4, %v9916_v48  ;;  %v4397_v21 = vrot.slane %v4357_v10, %v9916_v48  ;;  %v4401_v14 = vrot.slane %v4358_v8, %v9916_v48  ;;  %v4405_v12 = vrot.slane %v4359_v39, %v9916_v48 }
 0x33b   :  { %v4409_v36 = vrot.slane %v4360_v52, %v9916_v48  ;;  %v4413_v28 = vrot.slane %v4361_v53, %v9916_v48  ;;  %v4417_v20 = vrot.slane %v4362_v54, %v9916_v48  ;;  %v4421_v3 = vrot.slane %v4363_v37, %v9916_v48 }
 0x33c   :  { %v8776_v15 = vmul.f32 %v4369_v27, %v8711_v25  ;;  %v4431_v45 = vmul.f32 %v4369_v27, %v8743_v49  ;;  %v8780_v4 = vmul.f32 %v4373_v18, %v8711_v25  ;;  %v4433_v10 = vmul.f32 %v4373_v18, %v8743_v49 }
 0x33d   :  { %v8784_v8 = vmul.f32 %v4377_v30, %v8711_v25  ;;  %v4435_v39 = vmul.f32 %v4377_v30, %v8743_v49  ;;  %v8788_v52 = vmul.f32 %v4381_v13, %v8711_v25  ;;  %v4437_v54 = vmul.f32 %v4381_v13, %v8743_v49 }
 0x33e   :  { %v8792_v53 = vmul.f32 %v4385_v58, %v8711_v25  ;;  %v4439_v37 = vmul.f32 %v4385_v58, %v8743_v49  ;;  %v8796_v27 = vmul.f32 %v4389_v23, %v8711_v25  ;;  %v4441_v18 = vmul.f32 %v4389_v23, %v8743_v49 }
 0x33f   :  { %v8800_v31 = vmul.f32 %v4393_v24, %v8711_v25  ;;  %v4443_v30 = vmul.f32 %v4393_v24, %v8743_v49  ;;  %v8804_v34 = vmul.f32 %v4397_v21, %v8711_v25  ;;  %v4445_v13 = vmul.f32 %v4397_v21, %v8743_v49 }
 0x340   :  { %v4446_v16 = vmul.f32 %v4401_v14, %v8711_v25  ;;  %v4447_v26 = vmul.f32 %v4401_v14, %v8743_v49  ;;  %v8810_v58 = vmul.f32 %v4405_v12, %v8711_v25  ;;  %v4449_v57 = vmul.f32 %v4405_v12, %v8743_v49 }
 0x341   :  { %v4450_v23 = vmul.f32 %v4409_v36, %v8711_v25  ;;  %v4451_v48 = vmul.f32 %v4409_v36, %v8743_v49  ;;  %v8816_v24 = vmul.f32 %v4413_v28, %v8711_v25  ;;  %v4453_v60 = vmul.f32 %v4413_v28, %v8743_v49 }
 0x342   :  { %9944 = vst [vmem:[#allocation26_spill] sm:$0xff] %v8810_v58  ;;  %v4454_v21 = vmul.f32 %v4417_v20, %v8711_v25  ;;  %v4455_v2 = vmul.f32 %v4417_v20, %v8743_v49  ;;  %v8822_v14 = vmul.f32 %v4421_v3, %v8711_v25  ;;  %v4457_v61 = vmul.f32 %v4421_v3, %v8743_v49 }
 0x343   :  { %9945 = vst [vmem:[#allocation24_spill] sm:$0xff] %v8816_v24  ;;  %v8828_v51 = vsub.f32 %v8581_v6, %v4431_v45  ;;  %v8833_v28 = vsub.f32 %v8589_v0, %v4433_v10  ;;  %v8838_v25 = vsub.f32 %v8597_v43, %v4435_v39  ;;  %v8843_v12 = vsub.f32 %v8605_v32, %v4437_v54  ;;  %v9972_v43 = vld [vmem:[#allocation15_spill] sm:$0xff] }
 0x344   :  { %9946 = vst [vmem:[#allocation23_spill] sm:$0xff] %v8822_v14  ;;  %v8848_v45 = vsub.f32 %v8613_v17, %v4439_v37  ;;  %v8853_v10 = vsub.f32 %v8621_v33, %v4441_v18  ;;  %v8860_v32 = vsub.f32 %v8631_v29, %v4443_v30  ;;  %v8865_v39 = vsub.f32 %v8639_v9, %v4445_v13  ;;  %v9961_v13 = vld [vmem:[#allocation20_spill] sm:$0xff]  ;;  %v9974_v6 = vld [vmem:[#allocation7_spill] sm:$0xff] }
 0x345   :  { %4495 = vst [vmem:[#allocation2 + $0x8] sm:$0xff] %v8828_v51  ;;  %4497 = vst [vmem:[#allocation2 + $0x18] sm:$0xff] %v8833_v28  ;;  %v9947_v33 = vsub.f32 %v8414_v11, %v8560_v63  ;;  %v8875_v37 = vsub.f32 %v8646_v1, %v4447_v26  ;;  %v8880_v18 = vsub.f32 %v8654_v62, %v4449_v57  ;;  %v9958_v26 = vld [vmem:[#allocation17_spill] sm:$0xff] }
 0x346   :  { %4499 = vst [vmem:[#allocation2 + $0x28] sm:$0xff] %v8838_v25  ;;  %4501 = vst [vmem:[#allocation2 + $0x38] sm:$0xff] %v8843_v12  ;;  %v9949_v9 = vsub.f32 %v9904_v46, %v8566_v50  ;;  %v8890_v11 = vsub.f32 %v8661_v41, %v4451_v48  ;;  %v8895_v1 = vsub.f32 %v8669_v19, %v4453_v60  ;;  %v9955_v50 = vld [vmem:[#allocation13_spill] sm:$0xff]  ;;  %v9957_v41 = vld [vmem:[#allocation19_spill] sm:$0xff] }
 0x347   :  { %v8872_v54 = vsub.f32 %v9947_v33, %v4446_v16  ;;  %9948 = vst [vmem:[#allocation9_spill] sm:$0xff] %v8880_v18  ;;  %4503 = vst [vmem:[#allocation2 + $0x48] sm:$0xff] %v8848_v45  ;;  %v9953_v62 = vsub.f32 %v9911_v40, %v8572_v55  ;;  %v8905_v46 = vsub.f32 %v9955_v50, %v4455_v2  ;;  %v4284_v19 = vld [vmem:[#allocation2 + $0xed] sm:$0x1]  ;;  %v4285_v60 = vld [vmem:[#allocation2 + $0xfd] sm:$0x1] }
 0x348   :  { %4505 = vst [vmem:[#allocation2 + $0x58] sm:$0xff] %v8853_v10  ;;  %v8887_v30 = vsub.f32 %v9949_v9, %v4450_v23  ;;  %9951 = vst [vmem:[#allocation28_spill] sm:$0xff] %v8890_v11  ;;  %v8910_v16 = vsub.f32 %v9958_v26, %v4457_v61  ;;  %v9960_v55 = vld [vmem:[#allocation27_spill] sm:$0xff]  ;;  %v9963_v50 = vmov 0.0  }
 0x349   :  { %9952 = vst [vmem:[#allocation10_spill] sm:$0xff] %v8895_v1  ;;  %4507 = vst [vmem:[#allocation2 + $0x68] sm:$0xff] %v8860_v32  ;;  %v8902_v57 = vsub.f32 %v9953_v62, %v4454_v21  ;;  %v4364_v40 = vmul.f32 %v9960_v55, %v4284_v19  ;;  %v4365_v2 = vmul.f32 %v9960_v55, %v4285_v60  ;;  %v9962_v61 = vld [vmem:[#allocation11_spill] sm:$0xff]  ;;  %v5135_v19 = vsel %vm561_vm4, 1.0, %v9963_v50 }
 0x34a   :  { %9950 = vst [vmem:[#allocation25_spill] sm:$0xff] %v8887_v30  ;;  %4509 = vst [vmem:[#allocation2 + $0x78] sm:$0xff] %v8865_v39  ;;  %v4526_v23 = vmul.f32 %v9960_v55, %v9961_v13 }
 0x34b   :  { %9954 = vst [vmem:[#allocation18_spill] sm:$0xff] %v8902_v57  ;;  %9956 = vst [vmem:[#allocation29_spill] sm:$0xff] %v8905_v46  ;;  %v4425_v21 = vrot.slane %v4364_v40, %v9962_v61  ;;  %v4429_v33 = vrot.slane %v4365_v2, %v9962_v61  ;;  %v9966_v40 = vld [vmem:[#allocation16_spill] sm:$0xff] }
 0x34c   :  { %9959 = vst [vmem:[#allocation13_spill] sm:$0xff] %v8910_v16  ;;  %4511 = vst [vmem:[#allocation2 + $0x88] sm:$0xff] %v8875_v37  ;;  %v4527_v9 = vmul.f32 %v4526_v23, %v9957_v41  ;;  %v4528_v62 = vmul.f32 %v4526_v23, %v8743_v49  ;;  %v9968_v2 = vld [vmem:[#allocation12_spill] sm:$0xff]  ;;  %v9970_v23 = vld [vmem:[#allocation22_spill] sm:$0xff] }
 0x34d   :  { %4513 = vst [vmem:[#allocation2 + $0x98] sm:$0xff] %v8880_v18  ;;  %4515 = vst [vmem:[#allocation2 + $0xa8] sm:$0xff] %v8890_v11  ;;  %v4458_v60 = vmul.f32 %v4425_v21, %v9957_v41  ;;  %v4459_v55 = vmul.f32 %v4425_v21, %v8743_v49  ;;  %v4461_v13 = vmul.f32 %v4429_v33, %v8743_v49  ;;  %v9977_v49 = vmov 1e-12  }
 0x34e   :  { %4517 = vst [vmem:[#allocation2 + $0xb8] sm:$0xff] %v8895_v1  ;;  %4519 = vst [vmem:[#allocation2 + $0xc8] sm:$0xff] %v8905_v46  ;;  %v8933_v48 = vmul.f32 %v4429_v33, %v9957_v41  ;;  %v8936_v63 = vsub.f32 %v9966_v40, %v4527_v9  ;;  %v8939_v29 = vsub.f32 %v9968_v2, %v4528_v62 }
 0x34f   :  { %4521 = vst [vmem:[#allocation2 + $0xd8] sm:$0xff] %v8910_v16  ;;  %v8942_v17 = vsub.f32 %v9970_v23, %v4458_v60  ;;  %v8945_v0 = vsub.f32 %v9972_v43, %v4459_v55  ;;  %v8948_v3 = vsub.f32 %v9974_v6, %v4461_v13 }
 0x350   :  { %9965 = vst [vmem:[#allocation17_spill] sm:$0xff] %v8933_v48  ;;  %9967 = vst [vmem:[#allocation27_spill] sm:$0xff] %v8936_v63  ;;  %v4567_v33 = vmul.f32 0.0, %v8936_v63  ;;  %v4568_v9 = vmul.f32 %v5135_v19, %v8939_v29 }
 0x351   :  { %9969 = vst [vmem:[#allocation20_spill] sm:$0xff] %v8939_v29  ;;  %9971 = vst [vmem:[#allocation16_spill] sm:$0xff] %v8942_v17  ;;  %v4558_v62 = vmul.f32 0.0, %v8942_v17  ;;  %v4559_v60 = vmul.f32 %v5135_v19, %v8945_v0 }
 0x352   :  { %9973 = vst [vmem:[#allocation12_spill] sm:$0xff] %v8945_v0  ;;  %9975 = vst [vmem:[#allocation22_spill] sm:$0xff] %v8948_v3  ;;  %v4569_v43 = vadd.f32 %v4568_v9, %v4567_v33  ;;  %v4537_v33 = vld [vmem:[#allocation2 + $0xe] sm:$0x1]  ;;  %v4538_v9 = vld [vmem:[#allocation2 + $0x1e] sm:$0x1] }
 0x353   :  { %4523 = vst [vmem:[#allocation2 + $0xe8] sm:$0xff] %v8945_v0  ;;  %4525 = vst [vmem:[#allocation2 + $0xf8] sm:$0xff] %v8948_v3  ;;  %v4560_v55 = vadd.f32 %v4559_v60, %v4558_v62  ;;  %v4539_v62 = vld [vmem:[#allocation2 + $0x2e] sm:$0x1] }
 0x354   :  { %v4570_v23 = vrot.slane %v4569_v43, 4 }
 0x355   :  { %v4561_v40 = vrot.slane %v4560_v55, 4 }
 0x356   :  { %v4571_v36 = vadd.f32 %v4570_v23, %v4569_v43  ;;  %v4547_v23 = vld [vmem:[#allocation2 + $0xae] sm:$0x1] }
 0x357   :  { %v4562_v6 = vadd.f32 %v4561_v40, %v4560_v55  ;;  %v4540_v55 = vld [vmem:[#allocation2 + $0x3e] sm:$0x1]  ;;  %v4541_v40 = vld [vmem:[#allocation2 + $0x4e] sm:$0x1] }
 0x358   :  { %v4572_v63 = vrot.slane %v4571_v36, 2 }
 0x359   :  { %v4563_v13 = vrot.slane %v4562_v6, 2 }
 0x35a   :  { %v4573_v50 = vadd.f32 %v4572_v63, %v4571_v36 }
 0x35b   :  { %v4564_v2 = vadd.f32 %v4563_v13, %v4562_v6  ;;  %v4542_v6 = vld [vmem:[#allocation2 + $0x5e] sm:$0x1]  ;;  %v4543_v13 = vld [vmem:[#allocation2 + $0x6e] sm:$0x1] }
 0x35c   :  { %v4574_v3 = vrot.slane %v4573_v50, 1 }
 0x35d   :  { %v4565_v21 = vrot.slane %v4564_v2, 1 }
 0x35e   :  { %v8964_v43 = vadd.f32 %v4574_v3, %v4573_v50 }
 0x35f   :  { %v4566_v20 = vadd.f32 %v4565_v21, %v4564_v2  ;;  %v8962_v21 = vsub.f32 %v8945_v0, %v5135_v19  ;;  %v4545_v2 = vld [vmem:[#allocation2 + $0x8e] sm:$0x1] }
 0x360   :  { %9979 = vst [vmem:[#allocation7_spill] sm:$0xff] %v8964_v43  ;;  %v4550_v43 = vld [vmem:[#allocation2 + $0xde] sm:$0x1]  ;;  %v4549_v0 = vld [vmem:[#allocation2 + $0xce] sm:$0x1] }
 0x361   :  { %v4576_v48 = vand.u32 2147483647, %v4566_v20  ;;  %vm4578_vm4 = vcmp.lt.f32.partialorder %v4566_v20, 0.0 }
 0x362   :  { %v4579_v29 = vsel %vm4578_vm4, -1e-12, %v9977_v49  ;;  %v4548_v49 = vld [vmem:[#allocation2 + $0xbe] sm:$0x1] }
 0x363   :  { %vm4577_vm10 = vcmp.lt.f32.partialorder %v4576_v48, 1e-12  ;;  %v4544_v48 = vld [vmem:[#allocation2 + $0x7e] sm:$0x1] }
 0x364   :  { %v4580_v26 = vsel %vm4577_vm10, %v4579_v29, %v4566_v20 }
 0x365   :  { %5174 = vrcp.f32 %v4580_v26  ;;  %v4546_v26 = vld [vmem:[#allocation2 + $0x9e] sm:$0x1] }
 0x36f   :  { %v8959_v60 = vpop.eup %5174 }
 0x370   :  { %9978 = vst [vmem:[#allocation15_spill] sm:$0xff] %v8959_v60  ;;  %v4617_v20 = vmul.f32 %v8959_v60, %v4537_v33  ;;  %v4618_v36 = vmul.f32 %v8959_v60, %v4538_v9  ;;  %v4619_v29 = vmul.f32 %v8959_v60, %v4539_v62  ;;  %v4620_v63 = vmul.f32 %v8959_v60, %v4540_v55  ;;  %v4551_v33 = vld [vmem:[#allocation2 + $0xee] sm:$0x1] }
 0x371   :  { %v4621_v16 = vmul.f32 %v8959_v60, %v4541_v40  ;;  %v4622_v19 = vmul.f32 %v8959_v60, %v4542_v6  ;;  %v4623_v3 = vmul.f32 %v8959_v60, %v4543_v13  ;;  %v4624_v50 = vmul.f32 %v8959_v60, %v4544_v48 }
 0x372   :  { %v4625_v9 = vmul.f32 %v8959_v60, %v4545_v2  ;;  %v4626_v62 = vmul.f32 %v8959_v60, %v4546_v26  ;;  %v4627_v55 = vmul.f32 %v8959_v60, %v4547_v23  ;;  %v4628_v14 = vmul.f32 %v8959_v60, %v4548_v49 }
 0x373   :  { %v4629_v41 = vmul.f32 %v8959_v60, %v4549_v0  ;;  %v4630_v40 = vmul.f32 %v8959_v60, %v4550_v43  ;;  %v4631_v6 = vmul.f32 %v8959_v60, %v4551_v33  ;;  %v4636_v13 = vrot.slane %v4617_v20, %v9962_v61 }
 0x374   :  { %v4640_v48 = vrot.slane %v4618_v36, %v9962_v61  ;;  %v4644_v46 = vrot.slane %v4619_v29, %v9962_v61  ;;  %v4648_v2 = vrot.slane %v4620_v63, %v9962_v61  ;;  %v4652_v26 = vrot.slane %v4621_v16, %v9962_v61 }
 0x375   :  { %v4656_v23 = vrot.slane %v4622_v19, %v9962_v61  ;;  %v4660_v49 = vrot.slane %v4623_v3, %v9962_v61  ;;  %v4664_v0 = vrot.slane %v4624_v50, %v9962_v61  ;;  %v4668_v43 = vrot.slane %v4625_v9, %v9962_v61 }
 0x376   :  { %v4672_v33 = vrot.slane %v4626_v62, %v9962_v61  ;;  %v4676_v20 = vrot.slane %v4627_v55, %v9962_v61  ;;  %v4680_v36 = vrot.slane %v4628_v14, %v9962_v61  ;;  %v4684_v29 = vrot.slane %v4629_v41, %v9962_v61 }
 0x377   :  { %v4688_v63 = vrot.slane %v4630_v40, %v9962_v61  ;;  %v4692_v16 = vrot.slane %v4631_v6, %v9962_v61  ;;  %v4697_v19 = vmul.f32 %v4636_v13, %v8942_v17  ;;  %v4698_v3 = vmul.f32 %v4636_v13, %v8962_v21 }
 0x378   :  { %v4699_v50 = vmul.f32 %v4640_v48, %v8942_v17  ;;  %v4700_v9 = vmul.f32 %v4640_v48, %v8962_v21  ;;  %v4701_v62 = vmul.f32 %v4644_v46, %v8942_v17  ;;  %v4702_v55 = vmul.f32 %v4644_v46, %v8962_v21 }
 0x379   :  { %v4703_v14 = vmul.f32 %v4648_v2, %v8942_v17  ;;  %v4704_v41 = vmul.f32 %v4648_v2, %v8962_v21  ;;  %v4705_v40 = vmul.f32 %v4652_v26, %v8942_v17  ;;  %v4706_v6 = vmul.f32 %v4652_v26, %v8962_v21 }
 0x37a   :  { %v4707_v61 = vmul.f32 %v4656_v23, %v8942_v17  ;;  %v4708_v13 = vmul.f32 %v4656_v23, %v8962_v21  ;;  %v4709_v60 = vmul.f32 %v4660_v49, %v8942_v17  ;;  %v4710_v48 = vmul.f32 %v4660_v49, %v8962_v21 }
 0x37b   :  { %v4711_v57 = vmul.f32 %v4664_v0, %v8942_v17  ;;  %v4712_v46 = vmul.f32 %v4664_v0, %v8962_v21  ;;  %v9013_v1 = vmul.f32 %v4668_v43, %v8942_v17  ;;  %v4714_v2 = vmul.f32 %v4668_v43, %v8962_v21 }
 0x37c   :  { %v4715_v24 = vmul.f32 %v4672_v33, %v8942_v17  ;;  %v4716_v26 = vmul.f32 %v4672_v33, %v8962_v21  ;;  %v9019_v59 = vmul.f32 %v4676_v20, %v8942_v17  ;;  %v4718_v23 = vmul.f32 %v4676_v20, %v8962_v21 }
 0x37d   :  { %v4719_v49 = vmul.f32 %v4680_v36, %v8942_v17  ;;  %v4720_v11 = vmul.f32 %v4680_v36, %v8962_v21  ;;  %v9025_v0 = vmul.f32 %v4684_v29, %v8942_v17  ;;  %v4722_v30 = vmul.f32 %v4684_v29, %v8962_v21 }
 0x37e   :  { %9980 = vst [vmem:[#allocation30_spill] sm:$0xff] %v9019_v59  ;;  %v4723_v43 = vmul.f32 %v4688_v63, %v8942_v17  ;;  %v4724_v18 = vmul.f32 %v4688_v63, %v8962_v21  ;;  %v9031_v33 = vmul.f32 %v4692_v16, %v8942_v17  ;;  %v4726_v59 = vmul.f32 %v4692_v16, %v8962_v21 }
 0x37f   :  { %9981 = vst [vmem:[#allocation31_spill] sm:$0xff] %v9025_v0  ;;  %v9983_v20 = vsub.f32 %v8578_v38, %v8776_v15  ;;  %v9040_v36 = vsub.f32 %v8828_v51, %v4698_v3  ;;  %v9984_v29 = vsub.f32 %v8586_v44, %v8780_v4  ;;  %v9048_v63 = vsub.f32 %v8833_v28, %v4700_v9 }
 0x380   :  { %9982 = vst [vmem:[#allocation32_spill] sm:$0xff] %v9031_v33  ;;  %v9985_v17 = vsub.f32 %v8594_v22, %v8784_v8  ;;  %v9056_v38 = vsub.f32 %v8838_v25, %v4702_v55  ;;  %v9986_v51 = vsub.f32 %v8602_v56, %v8788_v52  ;;  %v9064_v44 = vsub.f32 %v8843_v12, %v4704_v41 }
 0x381   :  { %v9037_v58 = vsub.f32 %v9983_v20, %v4697_v19  ;;  %v9045_v0 = vsub.f32 %v9984_v29, %v4699_v50  ;;  %v9987_v4 = vsub.f32 %v8610_v42, %v8792_v53  ;;  %v9072_v22 = vsub.f32 %v8848_v45, %v4706_v6  ;;  %4762 = vst [vmem:[#allocation2 + $0x8] sm:$0xff] %v9040_v36  ;;  %v9991_v45 = vld [vmem:[#allocation26_spill] sm:$0xff]  ;;  %v9998_v19 = vld [vmem:[#allocation24_spill] sm:$0xff]  ;;  %v10007_v6 = vld [vmem:[#allocation23_spill] sm:$0xff] }
 0x382   :  { %v9053_v16 = vsub.f32 %v9985_v17, %v4701_v62  ;;  %v9061_v15 = vsub.f32 %v9986_v51, %v4703_v14  ;;  %v9988_v25 = vsub.f32 %v8618_v7, %v8796_v27  ;;  %v9080_v56 = vsub.f32 %v8853_v10, %v4708_v13  ;;  %4764 = vst [vmem:[#allocation2 + $0x18] sm:$0xff] %v9048_v63  ;;  %v10004_v14 = vld [vmem:[#allocation29_spill] sm:$0xff]  ;;  %v10016_v29 = vld [vmem:[#allocation7_spill] sm:$0xff] }
 0x383   :  { %v9069_v28 = vsub.f32 %v9987_v4, %v4705_v40  ;;  %v9989_v42 = vsub.f32 %v8628_v47, %v8800_v31  ;;  %v9090_v53 = vsub.f32 %v8860_v32, %v4710_v48  ;;  %v9990_v7 = vsub.f32 %v8636_v5, %v8804_v34  ;;  %4766 = vst [vmem:[#allocation2 + $0x28] sm:$0xff] %v9056_v38  ;;  %v9993_v5 = vld [vmem:[#allocation9_spill] sm:$0xff]  ;;  %v10006_v40 = vld [vmem:[#allocation19_spill] sm:$0xff] }
 0x384   :  { %v9077_v8 = vsub.f32 %v9988_v25, %v4707_v61  ;;  %v9098_v12 = vsub.f32 %v8865_v39, %v4712_v46  ;;  %4768 = vst [vmem:[#allocation2 + $0x38] sm:$0xff] %v9064_v44  ;;  %v9105_v31 = vsub.f32 %v8875_v37, %v4714_v2  ;;  %v9992_v10 = vsub.f32 %v8651_v35, %v9991_v45  ;;  %v9995_v39 = vld [vmem:[#allocation25_spill] sm:$0xff]  ;;  %v9996_v61 = vld [vmem:[#allocation28_spill] sm:$0xff]  ;;  %v9997_v37 = vld [vmem:[#allocation14_spill] sm:$0xff] }
 0x385   :  { %v9087_v52 = vsub.f32 %v9989_v42, %v4709_v60  ;;  %v9095_v27 = vsub.f32 %v9990_v7, %v4711_v57  ;;  %v9113_v34 = vsub.f32 %v9993_v5, %v4716_v26  ;;  %4770 = vst [vmem:[#allocation2 + $0x48] sm:$0xff] %v9072_v22  ;;  %4772 = vst [vmem:[#allocation2 + $0x58] sm:$0xff] %v9080_v56  ;;  %v9994_v17 = vld [vmem:[#allocation30_spill] sm:$0xff]  ;;  %v10010_v46 = vld [vmem:[#allocation13_spill] sm:$0xff]  ;;  %v10018_v42 = vmov 0.0  }
 0x386   :  { %v9110_v32 = vsub.f32 %v9992_v10, %v4715_v24  ;;  %v9120_v60 = vsub.f32 %v9996_v61, %v4718_v23  ;;  %v9999_v3 = vsub.f32 %v9997_v37, %v9998_v19  ;;  %v10000_v35 = vld [vmem:[#allocation10_spill] sm:$0xff]  ;;  %4774 = vst [vmem:[#allocation2 + $0x68] sm:$0xff] %v9090_v53  ;;  %4776 = vst [vmem:[#allocation2 + $0x78] sm:$0xff] %v9098_v12  ;;  %v10012_v26 = vld [vmem:[#allocation16_spill] sm:$0xff]  ;;  %v5136_v45 = vsel %vm563_vm0, 1.0, %v10018_v42 }
 0x387   :  { %v9128_v24 = vsub.f32 %v10000_v35, %v4720_v11  ;;  %v9135_v41 = vsub.f32 %v10004_v14, %v4722_v30  ;;  %v10008_v13 = vsub.f32 %v10006_v40, %v10007_v6  ;;  %v9143_v2 = vsub.f32 %v10010_v46, %v4724_v18  ;;  %4778 = vst [vmem:[#allocation2 + $0x88] sm:$0xff] %v9105_v31  ;;  %v4552_v11 = vld [vmem:[#allocation2 + $0xfe] sm:$0x1]  ;;  %v10015_v30 = vld [vmem:[#allocation15_spill] sm:$0xff]  ;;  %v10024_v35 = vld [vmem:[#allocation21_spill] sm:$0xff] }
 0x388   :  { %v9125_v50 = vsub.f32 %v9999_v3, %v4719_v49  ;;  %4780 = vst [vmem:[#allocation2 + $0x98] sm:$0xff] %v9113_v34  ;;  %v10013_v49 = vld [vmem:[#allocation12_spill] sm:$0xff]  ;;  %4782 = vst [vmem:[#allocation2 + $0xa8] sm:$0xff] %v9120_v60  ;;  %v4793_v18 = vmul.f32 %v10015_v30, %v10016_v29  ;;  %v10017_v51 = vld [vmem:[#allocation11_spill] sm:$0xff] }
 0x389   :  { %10001 = vst [vmem:[#allocation26_spill] sm:$0xff] %v9128_v24  ;;  %10005 = vst [vmem:[#allocation9_spill] sm:$0xff] %v9135_v41  ;;  %v9140_v48 = vsub.f32 %v10008_v13, %v4723_v43  ;;  %v9150_v20 = vsub.f32 %v10013_v49, %v4726_v59  ;;  %v4632_v43 = vmul.f32 %v10015_v30, %v4552_v11  ;;  %v10020_v61 = vld [vmem:[#allocation27_spill] sm:$0xff]  ;;  %v10022_v19 = vld [vmem:[#allocation20_spill] sm:$0xff] }
 0x38a   :  { %10011 = vst [vmem:[#allocation25_spill] sm:$0xff] %v9143_v2  ;;  %4784 = vst [vmem:[#allocation2 + $0xb8] sm:$0xff] %v9128_v24  ;;  %v4794_v59 = vmul.f32 %v4793_v18, %v10012_v26  ;;  %v4795_v25 = vmul.f32 %v4793_v18, %v8962_v21  ;;  %v10025_v14 = vld [vmem:[#allocation17_spill] sm:$0xff]  ;;  %v10028_v13 = vld [vmem:[#allocation22_spill] sm:$0xff] }
 0x38b   :  { %10009 = vst [vmem:[#allocation30_spill] sm:$0xff] %v9140_v48  ;;  %10014 = vst [vmem:[#allocation28_spill] sm:$0xff] %v9150_v20  ;;  %v4696_v4 = vrot.slane %v4632_v43, %v10017_v51  ;;  %v10026_v40 = vsub.f32 %v10024_v35, %v10025_v14 }
 0x38c   :  { %4786 = vst [vmem:[#allocation2 + $0xc8] sm:$0xff] %v9135_v41  ;;  %4788 = vst [vmem:[#allocation2 + $0xd8] sm:$0xff] %v9143_v2  ;;  %v9169_v37 = vsub.f32 %v10020_v61, %v4794_v59  ;;  %v9172_v3 = vsub.f32 %v10022_v19, %v4795_v25  ;;  %v10030_v19 = vmov 1e-12  }
 0x38d   :  { %4790 = vst [vmem:[#allocation2 + $0xe8] sm:$0xff] %v9150_v20  ;;  %v4727_v10 = vmul.f32 %v4696_v4, %v10012_v26  ;;  %v4728_v5 = vmul.f32 %v4696_v4, %v8962_v21 }
 0x38e   :  { %10021 = vst [vmem:[#allocation14_spill] sm:$0xff] %v9169_v37  ;;  %10023 = vst [vmem:[#allocation24_spill] sm:$0xff] %v9172_v3  ;;  %v4832_v11 = vmul.f32 0.0, %v9169_v37  ;;  %v4833_v49 = vmul.f32 %v5136_v45, %v9172_v3 }
 0x38f   :  { %v9177_v6 = vsub.f32 %v10026_v40, %v4727_v10  ;;  %v9180_v46 = vsub.f32 %v10028_v13, %v4728_v5 }
 0x390   :  { %v4834_v43 = vadd.f32 %v4833_v49, %v4832_v11  ;;  %v4802_v11 = vld [vmem:[#allocation2 + $0xf] sm:$0x1]  ;;  %v4803_v49 = vld [vmem:[#allocation2 + $0x1f] sm:$0x1] }
 0x391   :  { %10027 = vst [vmem:[#allocation10_spill] sm:$0xff] %v9177_v6  ;;  %10029 = vst [vmem:[#allocation29_spill] sm:$0xff] %v9180_v46  ;;  %v4823_v21 = vmul.f32 0.0, %v9177_v6  ;;  %v4824_v30 = vmul.f32 %v5136_v45, %v9180_v46 }
 0x392   :  { %4792 = vst [vmem:[#allocation2 + $0xf8] sm:$0xff] %v9180_v46  ;;  %v4835_v42 = vrot.slane %v4834_v43, 4 }
 0x393   :  { %v4825_v29 = vadd.f32 %v4824_v30, %v4823_v21  ;;  %v4804_v21 = vld [vmem:[#allocation2 + $0x2f] sm:$0x1]  ;;  %v4805_v30 = vld [vmem:[#allocation2 + $0x3f] sm:$0x1] }
 0x394   :  { %v4836_v5 = vadd.f32 %v4835_v42, %v4834_v43  ;;  %v4809_v42 = vld [vmem:[#allocation2 + $0x7f] sm:$0x1]  ;;  %v4814_v55 = vld [vmem:[#allocation2 + $0xcf] sm:$0x1] }
 0x395   :  { %v4826_v18 = vrot.slane %v4825_v29, 4  ;;  %v4816_v47 = vld [vmem:[#allocation2 + $0xef] sm:$0x1]  ;;  %v4815_v3 = vld [vmem:[#allocation2 + $0xdf] sm:$0x1] }
 0x396   :  { %v4837_v14 = vrot.slane %v4836_v5, 2 }
 0x397   :  { %v4827_v4 = vadd.f32 %v4826_v18, %v4825_v29  ;;  %v4806_v18 = vld [vmem:[#allocation2 + $0x4f] sm:$0x1] }
 0x398   :  { %v4838_v13 = vadd.f32 %v4837_v14, %v4836_v5  ;;  %v4812_v14 = vld [vmem:[#allocation2 + $0xaf] sm:$0x1] }
 0x399   :  { %v4828_v59 = vrot.slane %v4827_v4, 2 }
 0x39a   :  { %v4839_v23 = vrot.slane %v4838_v13, 1 }
 0x39b   :  { %v4829_v25 = vadd.f32 %v4828_v59, %v4827_v4  ;;  %v4807_v4 = vld [vmem:[#allocation2 + $0x5f] sm:$0x1]  ;;  %v4808_v59 = vld [vmem:[#allocation2 + $0x6f] sm:$0x1] }
 0x39c   :  { %v9190_v43 = vadd.f32 %v4839_v23, %v4838_v13 }
 0x39d   :  { %v4830_v7 = vrot.slane %v4829_v25, 1 }
 0x39e   :  { %10032 = vst [vmem:[#allocation23_spill] sm:$0xff] %v9190_v43 }
 0x39f   :  { %v4831_v10 = vadd.f32 %v4830_v7, %v4829_v25  ;;  %v9193_v25 = vsub.f32 %v9180_v46, %v5136_v45  ;;  %v4810_v7 = vld [vmem:[#allocation2 + $0x8f] sm:$0x1] }
 0x3a1   :  { %v4841_v61 = vand.u32 2147483647, %v4831_v10  ;;  %vm4843_vm0 = vcmp.lt.f32.partialorder %v4831_v10, 0.0 }
 0x3a2   :  { %v4844_v35 = vsel %vm4843_vm0, -1e-12, %v10030_v19 }
 0x3a3   :  { %vm4842_vm15 = vcmp.lt.f32.partialorder %v4841_v61, 1e-12 }
 0x3a4   :  { %v4845_v40 = vsel %vm4842_vm15, %v4844_v35, %v4831_v10  ;;  %v4811_v10 = vld [vmem:[#allocation2 + $0x9f] sm:$0x1] }
 0x3a5   :  { %5176 = vrcp.f32 %v4845_v40  ;;  %v4813_v40 = vld [vmem:[#allocation2 + $0xbf] sm:$0x1] }
 0x3af   :  { %v9188_v29 = vpop.eup %5176 }
 0x3b0   :  { %10031 = vst [vmem:[#allocation19_spill] sm:$0xff] %v9188_v29  ;;  %v4882_v5 = vmul.f32 %v9188_v29, %v4802_v11  ;;  %v4883_v61 = vmul.f32 %v9188_v29, %v4803_v49  ;;  %v4884_v19 = vmul.f32 %v9188_v29, %v4804_v21  ;;  %v4885_v35 = vmul.f32 %v9188_v29, %v4805_v30  ;;  %v4817_v11 = vld [vmem:[#allocation2 + $0xff] sm:$0x1] }
 0x3b1   :  { %v4886_v23 = vmul.f32 %v9188_v29, %v4806_v18  ;;  %v4887_v13 = vmul.f32 %v9188_v29, %v4807_v4  ;;  %v4888_v45 = vmul.f32 %v9188_v29, %v4808_v59  ;;  %v4889_v57 = vmul.f32 %v9188_v29, %v4809_v42 }
 0x3b2   :  { %v4890_v49 = vmul.f32 %v9188_v29, %v4810_v7  ;;  %v4891_v21 = vmul.f32 %v9188_v29, %v4811_v10  ;;  %v4892_v30 = vmul.f32 %v9188_v29, %v4812_v14  ;;  %v4893_v37 = vmul.f32 %v9188_v29, %v4813_v40 }
 0x3b3   :  { %v4894_v43 = vmul.f32 %v9188_v29, %v4814_v55  ;;  %v4895_v18 = vmul.f32 %v9188_v29, %v4815_v3  ;;  %v4896_v4 = vmul.f32 %v9188_v29, %v4816_v47  ;;  %v4897_v59 = vmul.f32 %v9188_v29, %v4817_v11 }
 0x3b4   :  { %v4901_v42 = vrot.slane %v4882_v5, %v10017_v51  ;;  %v4905_v46 = vrot.slane %v4883_v61, %v10017_v51  ;;  %v4909_v7 = vrot.slane %v4884_v19, %v10017_v51  ;;  %v4913_v10 = vrot.slane %v4885_v35, %v10017_v51 }
 0x3b5   :  { %v4917_v14 = vrot.slane %v4886_v23, %v10017_v51  ;;  %v4921_v40 = vrot.slane %v4887_v13, %v10017_v51  ;;  %v4925_v55 = vrot.slane %v4888_v45, %v10017_v51  ;;  %v4929_v3 = vrot.slane %v4889_v57, %v10017_v51 }
 0x3b6   :  { %v4933_v47 = vrot.slane %v4890_v49, %v10017_v51  ;;  %v4937_v11 = vrot.slane %v4891_v21, %v10017_v51  ;;  %v4941_v5 = vrot.slane %v4892_v30, %v10017_v51  ;;  %v4945_v61 = vrot.slane %v4893_v37, %v10017_v51 }
 0x3b7   :  { %v4949_v19 = vrot.slane %v4894_v43, %v10017_v51  ;;  %v4953_v35 = vrot.slane %v4895_v18, %v10017_v51  ;;  %v4957_v23 = vrot.slane %v4896_v4, %v10017_v51  ;;  %v4961_v13 = vrot.slane %v4897_v59, %v10017_v51 }
 0x3b8   :  { %v4962_v45 = vmul.f32 %v4901_v42, %v9177_v6  ;;  %v4963_v57 = vmul.f32 %v4901_v42, %v9193_v25  ;;  %v4964_v49 = vmul.f32 %v4905_v46, %v9177_v6  ;;  %v4965_v21 = vmul.f32 %v4905_v46, %v9193_v25 }
 0x3b9   :  { %v4966_v30 = vmul.f32 %v4909_v7, %v9177_v6  ;;  %v4967_v37 = vmul.f32 %v4909_v7, %v9193_v25  ;;  %v4968_v43 = vmul.f32 %v4913_v10, %v9177_v6  ;;  %v4969_v18 = vmul.f32 %v4913_v10, %v9193_v25 }
 0x3ba   :  { %v4970_v4 = vmul.f32 %v4917_v14, %v9177_v6  ;;  %v4971_v51 = vmul.f32 %v4917_v14, %v9193_v25  ;;  %v4972_v59 = vmul.f32 %v4921_v40, %v9177_v6  ;;  %v4973_v42 = vmul.f32 %v4921_v40, %v9193_v25 }
 0x3bb   :  { %v4974_v29 = vmul.f32 %v4925_v55, %v9177_v6  ;;  %v4975_v46 = vmul.f32 %v4925_v55, %v9193_v25  ;;  %v4976_v20 = vmul.f32 %v4929_v3, %v9177_v6  ;;  %v4977_v7 = vmul.f32 %v4929_v3, %v9193_v25 }
 0x3bc   :  { %v4978_v33 = vmul.f32 %v4933_v47, %v9177_v6  ;;  %v4979_v10 = vmul.f32 %v4933_v47, %v9193_v25  ;;  %v4980_v26 = vmul.f32 %v4937_v11, %v9177_v6  ;;  %v4981_v14 = vmul.f32 %v4937_v11, %v9193_v25 }
 0x3bd   :  { %v4982_v2 = vmul.f32 %v4941_v5, %v9177_v6  ;;  %v9249_v40 = vmul.f32 %v4941_v5, %v9193_v25  ;;  %v9252_v48 = vmul.f32 %v4945_v61, %v9177_v6  ;;  %v9255_v55 = vmul.f32 %v4945_v61, %v9193_v25 }
 0x3be   :  { %v4986_v3 = vmul.f32 %v4949_v19, %v9177_v6  ;;  %v9259_v41 = vmul.f32 %v4949_v19, %v9193_v25  ;;  %v9262_v47 = vmul.f32 %v4953_v35, %v9177_v6  ;;  %v9265_v11 = vmul.f32 %v4953_v35, %v9193_v25 }
 0x3bf   :  { %v4990_v5 = vmul.f32 %v4957_v23, %v9177_v6  ;;  %v9269_v9 = vmul.f32 %v4957_v23, %v9193_v25  ;;  %v9272_v62 = vmul.f32 %v4961_v13, %v9177_v6  ;;  %v9275_v61 = vmul.f32 %v4961_v13, %v9193_v25 }
 0x3c0   :  { %10033 = vst [vmem:[#allocation13_spill] sm:$0xff] %v9259_v41  ;;  %10034 = vst [vmem:[#allocation12_spill] sm:$0xff] %v9262_v47  ;;  %v4994_v19 = vsub.f32 %v9037_v58, %v4962_v45  ;;  %v4995_v41 = vsub.f32 %v9040_v36, %v4963_v57  ;;  %v4996_v47 = vsub.f32 %v9045_v0, %v4964_v49  ;;  %v10054_v49 = vld [vmem:[#allocation10_spill] sm:$0xff] }
 0x3c1   :  { %10035 = vst [vmem:[#allocation15_spill] sm:$0xff] %v9265_v11  ;;  %10036 = vst [vmem:[#allocation7_spill] sm:$0xff] %v9272_v62  ;;  %v4997_v35 = vsub.f32 %v9048_v63, %v4965_v21  ;;  %v4998_v11 = vsub.f32 %v9053_v16, %v4966_v30  ;;  %v4999_v24 = vsub.f32 %v9056_v38, %v4967_v37  ;;  %v10055_v30 = vld [vmem:[#allocation29_spill] sm:$0xff] }
 0x3c2   :  { %v5000_v23 = vsub.f32 %v9061_v15, %v4968_v43  ;;  %v5001_v6 = vsub.f32 %v9064_v44, %v4969_v18  ;;  %v5002_v62 = vsub.f32 %v9069_v28, %v4970_v4  ;;  %v5003_v13 = vsub.f32 %v9072_v22, %v4971_v51  ;;  %5026 = vst [vmem:[#allocation2] sm:$0xff] %v4994_v19  ;;  %v10056_v43 = vld [vmem:[#allocation23_spill] sm:$0xff] }
 0x3c3   :  { %v5004_v58 = vsub.f32 %v9077_v8, %v4972_v59  ;;  %v5005_v36 = vsub.f32 %v9080_v56, %v4973_v42  ;;  %5027 = vst [vmem:[#allocation2 + $0x8] sm:$0xff] %v4995_v41  ;;  %5028 = vst [vmem:[#allocation2 + $0x10] sm:$0xff] %v4996_v47  ;;  %v5006_v0 = vsub.f32 %v9087_v52, %v4974_v29  ;;  %v10052_v29 = vld [vmem:[#allocation28_spill] sm:$0xff]  ;;  %v10057_v18 = vld [vmem:[#allocation19_spill] sm:$0xff] }
 0x3c4   :  { %5029 = vst [vmem:[#allocation2 + $0x18] sm:$0xff] %v4997_v35  ;;  %v5007_v63 = vsub.f32 %v9090_v53, %v4975_v46  ;;  %v5008_v16 = vsub.f32 %v9095_v27, %v4976_v20  ;;  %v5009_v38 = vsub.f32 %v9098_v12, %v4977_v7  ;;  %5030 = vst [vmem:[#allocation2 + $0x20] sm:$0xff] %v4998_v11  ;;  %v10040_v27 = vld [vmem:[#allocation18_spill] sm:$0xff]  ;;  %v10041_v12 = vld [vmem:[#allocation31_spill] sm:$0xff] }
 0x3c5   :  { %5031 = vst [vmem:[#allocation2 + $0x28] sm:$0xff] %v4999_v24  ;;  %5032 = vst [vmem:[#allocation2 + $0x30] sm:$0xff] %v5000_v23  ;;  %v10037_v15 = vsub.f32 %v8872_v54, %v9013_v1  ;;  %v5011_v28 = vsub.f32 %v9105_v31, %v4979_v10  ;;  %v5012_v22 = vsub.f32 %v9110_v32, %v4980_v26  ;;  %v10039_v1 = vld [vmem:[#allocation26_spill] sm:$0xff]  ;;  %v10050_v26 = vld [vmem:[#allocation32_spill] sm:$0xff] }
 0x3c6   :  { %5033 = vst [vmem:[#allocation2 + $0x38] sm:$0xff] %v5001_v6  ;;  %v5013_v8 = vsub.f32 %v9113_v34, %v4981_v14  ;;  %5034 = vst [vmem:[#allocation2 + $0x40] sm:$0xff] %v5002_v62  ;;  %v10038_v56 = vsub.f32 %v9995_v39, %v9994_v17  ;;  %v5015_v53 = vsub.f32 %v9120_v60, %v9249_v40  ;;  %v10044_v17 = vld [vmem:[#allocation9_spill] sm:$0xff]  ;;  %v10046_v62 = vld [vmem:[#allocation30_spill] sm:$0xff] }
 0x3c7   :  { %v5010_v44 = vsub.f32 %v10037_v15, %v4978_v33  ;;  %5035 = vst [vmem:[#allocation2 + $0x48] sm:$0xff] %v5003_v13  ;;  %5036 = vst [vmem:[#allocation2 + $0x50] sm:$0xff] %v5004_v58  ;;  %v5016_v54 = vsub.f32 %v9125_v50, %v9252_v48  ;;  %v5017_v33 = vsub.f32 %v10039_v1, %v9255_v55  ;;  %v10043_v34 = vld [vmem:[#allocation13_spill] sm:$0xff]  ;;  %v10045_v24 = vld [vmem:[#allocation12_spill] sm:$0xff] }
 0x3c8   :  { %5037 = vst [vmem:[#allocation2 + $0x58] sm:$0xff] %v5005_v36  ;;  %v5014_v52 = vsub.f32 %v10038_v56, %v4982_v2  ;;  %5038 = vst [vmem:[#allocation2 + $0x60] sm:$0xff] %v5006_v0  ;;  %v10042_v31 = vsub.f32 %v10040_v27, %v10041_v12  ;;  %v5019_v39 = vsub.f32 %v10044_v17, %v10043_v34  ;;  %v10047_v41 = vld [vmem:[#allocation15_spill] sm:$0xff]  ;;  %v10048_v2 = vld [vmem:[#allocation25_spill] sm:$0xff] }
 0x3c9   :  { %5039 = vst [vmem:[#allocation2 + $0x68] sm:$0xff] %v5007_v63  ;;  %5040 = vst [vmem:[#allocation2 + $0x70] sm:$0xff] %v5008_v16  ;;  %v5020_v60 = vsub.f32 %v10046_v62, %v10045_v24  ;;  %v5021_v50 = vsub.f32 %v10048_v2, %v10047_v41  ;;  %v10049_v48 = vld [vmem:[#allocation16_spill] sm:$0xff]  ;;  %v5023_v45 = vsub.f32 %v10052_v29, %v9269_v9  ;;  %v10053_v57 = vld [vmem:[#allocation7_spill] sm:$0xff] }
 0x3ca   :  { %5041 = vst [vmem:[#allocation2 + $0x78] sm:$0xff] %v5009_v38  ;;  %v5018_v32 = vsub.f32 %v10042_v31, %v4986_v3  ;;  %5042 = vst [vmem:[#allocation2 + $0x80] sm:$0xff] %v5010_v44  ;;  %v10051_v20 = vsub.f32 %v10049_v48, %v10050_v26  ;;  %v5024_v21 = vsub.f32 %v10054_v49, %v10053_v57  ;;  %v5065_v59 = vld [vmem:[%s9350_s0] sm:$0xff]  ;;  %v5066_v42 = vld [vmem:[%s9350_s0 + $0x8] sm:$0xff]  ;;  %s5214_s0 = smov [#allocation4]  }
 0x3cb   :  { %5043 = vst [vmem:[#allocation2 + $0x88] sm:$0xff] %v5011_v28  ;;  %5044 = vst [vmem:[#allocation2 + $0x90] sm:$0xff] %v5012_v22  ;;  %v5025_v37 = vsub.f32 %v10055_v30, %v9275_v61  ;;  %v5058_v4 = vmul.f32 %v10057_v18, %v10056_v43  ;;  %v10058_v46 = vld [vmem:[#allocation14_spill] sm:$0xff]  ;;  %v10059_v10 = vld [vmem:[#allocation24_spill] sm:$0xff]  ;;  %s5094_s9 = sshll.u32 %s5214_s0, 4  ;;  %s5095_s9 = int_to_ptr.vmem [resolvable:$true] %s5094_s9 }
 0x3cc   :  { %5045 = vst [vmem:[#allocation2 + $0x98] sm:$0xff] %v5013_v8  ;;  %v5022_v6 = vsub.f32 %v10051_v20, %v4990_v5  ;;  %5046 = vst [vmem:[#allocation2 + $0xa0] sm:$0xff] %v5014_v52  ;;  %s5186_s10 = scalar_lea.vmem %s5095_s9, 256  ;;  %p5191_p1 = scmp.lt.s32.totalorder %s5095_s9, %s5095_s9 }
 0x3cd   :  { %5047 = vst [vmem:[#allocation2 + $0xa8] sm:$0xff] %v5015_v53  ;;  %5048 = vst [vmem:[#allocation2 + $0xb0] sm:$0xff] %v5016_v54  ;;  %v5059_v9 = vmul.f32 %v5058_v4, %v10054_v49  ;;  %v5060_v51 = vmul.f32 %v5058_v4, %v9193_v25  ;;  %p5187_p0 = scmp.ne.s32.totalorder %s5095_s9, %s5186_s10  ;;  %p5192_p2 = scmp.lt.s32.totalorder %s5186_s10, %s5186_s10 }
 0x3ce   :  { %5049 = vst [vmem:[#allocation2 + $0xb8] sm:$0xff] %v5017_v33  ;;  %5050 = vst [vmem:[#allocation2 + $0xc0] sm:$0xff] %v5018_v32 }
 0x3cf   :  { %5051 = vst [vmem:[#allocation2 + $0xc8] sm:$0xff] %v5019_v39  ;;  %5052 = vst [vmem:[#allocation2 + $0xd0] sm:$0xff] %v5020_v60  ;;  %v5061_v7 = vsub.f32 %v10058_v46, %v5059_v9  ;;  %v5062_v14 = vsub.f32 %v10059_v10, %v5060_v51  ;;  %p5193_p3 = por %p5192_p2, %p5191_p1 }
 0x3d0   :  { %5053 = vst [vmem:[#allocation2 + $0xd8] sm:$0xff] %v5021_v50  ;;  %5054 = vst [vmem:[#allocation2 + $0xe0] sm:$0xff] %v5022_v6 }
 0x3d1   :  { %5055 = vst [vmem:[#allocation2 + $0xe8] sm:$0xff] %v5023_v45  ;;  %5056 = vst [vmem:[#allocation2 + $0xf0] sm:$0xff] %v5024_v21  ;;  %v5069_v40 = vmul.f32 %v5065_v59, %v5061_v7  ;;  %v5070_v55 = vmul.f32 %v5066_v42, %v5062_v14  ;;  %p5194_p4 = pnand %p5193_p3, %p5187_p0 }
 0x3d2   :  { %5057 = vst [vmem:[#allocation2 + $0xf8] sm:$0xff] %v5025_v37 }
 0x3d3   :  { %v5071_v3 = vadd.f32 1e-16, %v5069_v40  ;;  %v5072_v47 = vadd.f32 1e-16, %v5070_v55 }
 0x3d5   :  { %v5073_v11 = vadd.f32 %v5072_v47, %v5071_v3 }
 0x3d7   :  { %v5074_v5 = vrot.slane %v5073_v11, 4 }
 0x3d9   :  { %v5075_v61 = vadd.f32 %v5074_v5, %v5073_v11 }
 0x3db   :  { %v5076_v25 = vrot.slane %v5075_v61, 2 }
 0x3dd   :  { %v5077_v19 = vadd.f32 %v5076_v25, %v5075_v61 }
 0x3df   :  { %v5078_v35 = vrot.slane %v5077_v19, 1 }
 0x3e1   :  { %v5079_v23 = vadd.f32 %v5078_v35, %v5077_v19 }
 0x3e3   :  { %5178 = vrcp.f32 %v5079_v23 }
 0x3ed   :  { %v5179_v13 = vpop.eup %5178 }
 0x3ee   :  { %v5081_v58 = vmul.f32 %v5179_v13, %v5071_v3  ;;  %v5082_v36 = vmul.f32 %v5179_v13, %v5072_v47 }
 0x3f0   :  { %5180 = vlog2.f32 %v5081_v58 }
 0x3f1   :  { %5182 = vlog2.f32 %v5082_v36 }
 0x3fa   :  { %v5181_v0 = vpop.eup %5180 }
 0x3fb   :  { %v5183_v63 = vpop.eup %5182  ;;  %v5084_v16 = vmul.f32 0.6931472, %v5181_v0 }
 0x3fc   :  { %v5086_v38 = vmul.f32 0.6931472, %v5183_v63 }
 0x3fd   :  { %5087 = vst [vmem:[#allocation4] sm:$0xff] %v5084_v16 }
 0x3fe   :  { %5088 = vst [vmem:[#allocation4 + $0x8] sm:$0xff] %v5086_v38 }
 0x3ff   :  { %5197 = shalt.err (!%p5194_p4)
}
 0x400   :  { %s5198_s13 = scalar_lea.hbm %s9353_s3, 256 }
 0x401   :  { %p5199_p5 = scmp.ne.s32.totalorder %s9353_s3, %s5198_s13  ;;  %p5202_p6 = scmp.lt.u32.totalorder %s5198_s13, %s9353_s3 }
 0x403   :  { %p5204_p7 = pnand %p5202_p6, %p5199_p5 }
 0x405   :  { %5207 = shalt.err (!%p5204_p7)
}
 0x406   :  { %s5215_s18 = smov 128   ;;  %s5216_s19 = smov 8  }
 0x407   :  { %5100 = dma.vmem_to_hbm [thread:$0]  %s5095_s9, 256, %s9353_s3, [#allocation5], %s5215_s18, %s5215_s18, %s5216_s19  }
 0x408   :  { %5208 = dma.done.wait [#allocation5], 256  }
 0x409   :  { %5209 = vsyncadd [#allocation5], 4294967040 }
 0x40a   :  { %5104 = vsyncpa [#allocation5], 1 }

</bundles_post_ra>
